<compile_context>
chip_gen: v6e
topology: v6e:2x2x1
jax: 0.10.0
libtpu: 0.0.40
codegen_flags: <defaults>
</compile_context>

<pallas_src>
import functools

import jax
import jax.numpy as jnp
from jax.experimental import pallas as pl
from jax.experimental.pallas import tpu as pltpu


# ----------------------------------------------------------------------------
# Host-side weight preparation: 3x3 conv on nearest-2x upsampled image
#   ==  four 2x2 convs (one per output phase) on the original image.
# ----------------------------------------------------------------------------
def _make_phase_weights(weight_oihw):
    """OIHW 3x3 weights -> (8, 2*C_in, C_out) per-phase 2x2 weights.

    Index = p*4 + q*2 + a, where (p, q) is the output phase
    (output pixel (2r+p, 2c+q)) and `a` is the row tap:
      p=0: taps rows (r-1, r)   with weights (W[0], W[1]+W[2])
      p=1: taps rows (r, r+1)   with weights (W[0]+W[1], W[2])
    Width taps are concatenated along C_in in (first tap, second tap) order:
      q=0: cols (c-1, c)        with weights (V[0], V[1]+V[2])
      q=1: cols (c, c+1)        with weights (V[0]+V[1], V[2])
    matching the im2col buffers built in the kernel.
    """
    w = jnp.transpose(weight_oihw, (2, 3, 1, 0))       # (kh, kw, C_in, C_out)
    row_groups = {0: (w[0], w[1] + w[2]),              # p=0
                  1: (w[0] + w[1], w[2])}              # p=1
    mats = []
    for p in (0, 1):
        for q in (0, 1):
            for a in (0, 1):
                v = row_groups[p][a]                   # (kw, C_in, C_out)
                if q == 0:
                    taps = (v[0], v[1] + v[2])         # cols (c-1, c)
                else:
                    taps = (v[0] + v[1], v[2])         # cols (c, c+1)
                mats.append(jnp.concatenate(taps, axis=0))   # (2*C_in, C_out)
    return jnp.stack(mats)                             # (8, 2*C_in, C_out)


# ----------------------------------------------------------------------------
# Kernels
# ----------------------------------------------------------------------------
def _upsample_conv_kernel(x_ref, w_ref, b_ref, o_ref, col0_ref, col1_ref, *, th):
    """Fused nearest-2x upsample + 3x3 conv (padding=1), one (batch, row-tile).

    x_ref   : (1, H, W, C_in)        VMEM, compute dtype (full image, resident)
    w_ref   : (8, 2*C_in, C_out)     VMEM, compute dtype (phase weights)
    b_ref   : (1, C_out)             VMEM, f32
    o_ref   : (1, 2*th*2*W, C_out)   VMEM, flattened output rows of this tile
    col0_ref: (th+2, W, 2*C_in)      VMEM scratch: width taps (c-1, c)   [q=0]
    col1_ref: (th+2, W, 2*C_in)      VMEM scratch: width taps (c, c+1)   [q=1]
    """
    _, H, W, C = x_ref.shape
    C_out = w_ref.shape[-1]
    W2 = 2 * W
    M = th * W
    cdt = x_ref.dtype

    t = pl.program_id(1)
    n_t = pl.num_programs(1)
    r0 = pl.multiple_of(t * th, th)                   # first input row of tile

    # ---- rows r0-1 .. r0+th : branchless halo via clamp + scalar mask -------
    mid = x_ref[0, pl.ds(r0, th), :, :]                                  # (th, W, C)
    top = x_ref[0, pl.ds(jnp.maximum(r0 - 1, 0), 1), :, :]               # (1, W, C)
    bot = x_ref[0, pl.ds(jnp.minimum(r0 + th, H - 1), 1), :, :]          # (1, W, C)
    top = top * (t > 0).astype(cdt)                   # conv zero-padding (top)
    bot = bot * (t < n_t - 1).astype(cdt)             # conv zero-padding (bottom)
    rows = jnp.concatenate([top, mid, bot], axis=0)   # (th+2, W, C)

    # ---- im2col over the two width taps of each phase (lane concat) ---------
    zc = jnp.zeros((th + 2, 1, C), cdt)
    left = jnp.concatenate([zc, rows[:, :W - 1, :]], axis=1)     # X_pad[., c-1]
    right = jnp.concatenate([rows[:, 1:, :], zc], axis=1)        # X_pad[., c+1]
    col0_ref[...] = jnp.concatenate([left, rows], axis=-1)       # (th+2, W, 2C)
    col1_ref[...] = jnp.concatenate([rows, right], axis=-1)      # (th+2, W, 2C)

    # ---- four 2x2 phase convs = 8 MXU matmuls, SSA f32 accumulation ---------
    # phase (p, q): row-tap a uses col rows [p+a : p+a+th].
    def phase(col_ref, p, q):
        a0 = jnp.dot(col_ref[p:p + th, :, :].reshape(M, 2 * C),
                     w_ref[p * 4 + q * 2 + 0],
                     preferred_element_type=jnp.float32)
        a1 = jnp.dot(col_ref[p + 1:p + th + 1, :, :].reshape(M, 2 * C),
                     w_ref[p * 4 + q * 2 + 1],
                     preferred_element_type=jnp.float32)
        return (a0 + a1).reshape(th, W, C_out)

    y00 = phase(col0_ref, 0, 0)
    y01 = phase(col1_ref, 0, 1)
    y10 = phase(col0_ref, 1, 0)
    y11 = phase(col1_ref, 1, 1)

    # ---- interleave phases -> (2*th, 2*W, C_out), fold bias, ONE slab store --
    def wmix(a, b):                                   # width interleave (q axis)
        return jnp.concatenate([a[:, :, None, :], b[:, :, None, :]],
                               axis=2).reshape(th, W2, C_out)

    row0 = wmix(y00, y01)                             # output rows 2r
    row1 = wmix(y10, y11)                             # output rows 2r+1
    out = jnp.concatenate([row0[:, None], row1[:, None]],
                          axis=1).reshape(2 * th, W2, C_out)
    out = out + b_ref[...]                            # bias folded into the store
    o_ref[0] = out.reshape(2 * th * W2, C_out).astype(o_ref.dtype)


def _upsample_only_kernel(x_ref, o_ref):
    """Nearest-neighbour 2x upsample (no conv), one (batch, row-tile).

    x_ref: (1, th, W, C) VMEM    o_ref: (1, 2*th, 2*W, C) VMEM
    """
    _, th, W, C = x_ref.shape
    th2, W2 = 2 * th, 2 * W
    x = x_ref[0]
    xh = jnp.broadcast_to(x[:, None, :, :], (th, 2, W, C)).reshape(th2, W, C)
    xw = jnp.broadcast_to(xh[:, :, None, :], (th2, W, 2, C)).reshape(th2, W2, C)
    o_ref[0] = xw                                     # single slab store


# ----------------------------------------------------------------------------
# pallas_call wrappers (NHWC)
# ----------------------------------------------------------------------------
def _pick_row_tile(H, target):
    """Largest divisor of H that is <= target."""
    th = max(1, min(H, target))
    while H % th:
        th -= 1
    return th


def _pick_row_tile_bytes(H, bytes_per_row, budget):
    """Largest divisor of H whose block stays under `budget` bytes."""
    th = 1
    for cand in range(1, H + 1):
        if H % cand == 0 and cand * bytes_per_row <= budget:
            th = cand
    return th


def _vmem_limit_bytes(frac=0.75, fallback=48 * 1024 * 1024):
    """Generation-aware scoped-VMEM limit (v5e/v6e: ~96 MiB, v7x: ~48 MiB)."""
    try:
        cap = pltpu.get_tpu_info().vmem_capacity_bytes
        return int(cap * frac)
    except Exception:
        return fallback


def _upsample_conv_nhwc(x_nhwc, wph, b2, *, row_tile=16, compute_dtype=jnp.bfloat16):
    B, H, W, C_in = x_nhwc.shape
    C_out = wph.shape[-1]
    th = _pick_row_tile(H, row_tile)
    n_tiles = H // th
    H2, W2 = 2 * H, 2 * W
    m_out = 2 * th * W2

    kernel = functools.partial(_upsample_conv_kernel, th=th)

    out_flat = pl.pallas_call(
        kernel,
        out_shape=jax.ShapeDtypeStruct((B, H2 * W2, C_out), x_nhwc.dtype),
        grid_spec=pltpu.PrefetchScalarGridSpec(
            num_scalar_prefetch=0,
            grid=(B, n_tiles),
            in_specs=[
                # Full image per batch; index ignores t -> stays resident.
                # TODO(synk): for very large H*W*C (v7x 64 MiB VMEM) switch to a
                # row-tiled + halo input (manual make_async_copy) instead.
                pl.BlockSpec((1, H, W, C_in), lambda b, t: (b, 0, 0, 0)),
                # Phase weights / bias: constant block index -> no re-DMA.
                # TODO(synk): pipeline_mode=pl.Buffered(1) here halves resident
                # weight VMEM at large channel counts.
                pl.BlockSpec((8, 2 * C_in, C_out), lambda b, t: (0, 0, 0)),
                pl.BlockSpec((1, C_out), lambda b, t: (0, 0)),
            ],
            # lane/sublane-dense flattened output tile
            out_specs=pl.BlockSpec((1, m_out, C_out), lambda b, t: (b, t, 0)),
            scratch_shapes=[
                pltpu.VMEM((th + 2, W, 2 * C_in), compute_dtype),
                pltpu.VMEM((th + 2, W, 2 * C_in), compute_dtype),
            ],
        ),
        compiler_params=pltpu.CompilerParams(
            dimension_semantics=("parallel", "parallel"),
            vmem_limit_bytes=_vmem_limit_bytes(),
        ),
    )(x_nhwc.astype(compute_dtype),          # bf16 image: half HBM read / VMEM
      wph.astype(compute_dtype),
      b2.astype(jnp.float32))
    return out_flat.reshape(B, H2, W2, C_out)


def _upsample_only_nhwc(x_nhwc, *, target_block_bytes=1 << 20):
    B, H, W, C = x_nhwc.shape
    H2, W2 = 2 * H, 2 * W
    # Pure bandwidth-bound: pick the biggest row tile whose OUTPUT block stays
    # under ~1 MiB (usually th = H, grid effectively over batch only).
    out_bytes_per_in_row = 2 * W2 * C * jnp.dtype(x_nhwc.dtype).itemsize
    th = _pick_row_tile_bytes(H, out_bytes_per_in_row, target_block_bytes)
    n_tiles = H // th
    return pl.pallas_call(
        _upsample_only_kernel,
        out_shape=jax.ShapeDtypeStruct((B, H2, W2, C), x_nhwc.dtype),
        grid_spec=pltpu.PrefetchScalarGridSpec(
            num_scalar_prefetch=0,
            grid=(B, n_tiles),
            in_specs=[pl.BlockSpec((1, th, W, C), lambda b, t: (b, t, 0, 0))],
            out_specs=pl.BlockSpec((1, 2 * th, W2, C), lambda b, t: (b, t, 0, 0)),
        ),
        compiler_params=pltpu.CompilerParams(
            dimension_semantics=("parallel", "parallel"),
            vmem_limit_bytes=_vmem_limit_bytes(),
        ),
    )(x_nhwc)


# ----------------------------------------------------------------------------
# Module wrapper (NCHW in / NCHW out, like the PyTorch module)
# ----------------------------------------------------------------------------
class Upsample2D:
    def __init__(self, channels, use_conv=False, use_conv_transpose=False,
                 out_channels=None, name="conv", key=None,
                 compute_dtype=jnp.bfloat16, row_tile=16):
        if use_conv_transpose:
            # TODO(synk): ConvTranspose2d(4, stride=2, pad=1) path not implemented.
            raise NotImplementedError("use_conv_transpose=True not implemented")
        self.channels = channels
        self.out_channels = out_channels or channels
        self.use_conv = use_conv
        self.name = name
        self.compute_dtype = compute_dtype
        self.row_tile = row_tile
        self.weight = None
        self.bias = None
        if use_conv:
            if key is None:
                key = jax.random.PRNGKey(42)
            kw, kb = jax.random.split(key)
            fan_in = channels * 9
            # Deterministic synthetic parameters (PyTorch layout: OIHW / (O,))
            self.weight = jax.random.normal(
                kw, (self.out_channels, channels, 3, 3), jnp.float32) / jnp.sqrt(fan_in)
            self.bias = jax.random.normal(kb, (self.out_channels,), jnp.float32) * 0.01

    def __call__(self, x):                       # x: (B, C, H, W)
        assert x.shape[1] == self.channels
        # TODO(synk): the NCHW<->NHWC transposes are two extra HBM passes; keep
        # the surrounding model in NHWC to drop them entirely.
        x_nhwc = jnp.transpose(x, (0, 2, 3, 1))  # NCHW -> NHWC
        if self.use_conv:
            wph = _make_phase_weights(self.weight)       # combined in f32
            b2 = self.bias.reshape(1, self.out_channels)
            y_nhwc = _upsample_conv_nhwc(
                x_nhwc, wph, b2,
                row_tile=self.row_tile, compute_dtype=self.compute_dtype)
        else:
            y_nhwc = _upsample_only_nhwc(x_nhwc)
        return jnp.transpose(y_nhwc, (0, 3, 1, 2))  # NHWC -> NCHW


# ----------------------------------------------------------------------------
# Demo / correctness check
# ----------------------------------------------------------------------------
if __name__ == "__main__":
    key = jax.random.PRNGKey(0)
    kx, kp = jax.random.split(key)
    B, C, H, W = 2, 4, 16, 16
    x = jax.random.normal(kx, (B, C, H, W), jnp.float32)

    # --- use_conv=True path (phase-decomposed fused upsample + 3x3 conv) ------
    up_conv = Upsample2D(C, use_conv=True, key=kp)
    y = jax.block_until_ready(up_conv(x))
    assert y.shape == (B, C, 2 * H, 2 * W)

    # Pure f32 reference; tolerance covers the bf16 operand cast in the kernel.
    x_up = jnp.repeat(jnp.repeat(x, 2, axis=2), 2, axis=3)
    ref = jax.lax.conv_general_dilated(
        x_up, up_conv.weight,
        window_strides=(1, 1), padding=((1, 1), (1, 1)),
        dimension_numbers=("NCHW", "OIHW", "NCHW"),
        precision=jax.lax.Precision.HIGHEST,
    ) + up_conv.bias[None, :, None, None]
    assert jnp.allclose(y, ref, atol=2.5e-2, rtol=2.5e-2), "conv path mismatch"

    # --- use_conv=False path (pure nearest 2x upsample kernel, exact) ---------
    up_plain = Upsample2D(C, use_conv=False)
    y2 = jax.block_until_ready(up_plain(x))
    assert y2.shape == (B, C, 2 * H, 2 * W)
    assert jnp.allclose(y2, x_up), "upsample path mismatch"

    print("KERNEL_OK")
</pallas_src>

<mosaic_0001>
module attributes {stable_mosaic.version = 11 : i64} {
  func.func @_upsample_conv_kernel(%arg0: i32, %arg1: i32, %arg2: memref<1x16x16x4xbf16, #tpu.memory_space<vmem>>, %arg3: memref<8x8x4xbf16, #tpu.memory_space<vmem>>, %arg4: memref<1x4xf32, #tpu.memory_space<vmem>>, %arg5: memref<1x1024x4xf32, #tpu.memory_space<vmem>>, %arg6: memref<18x16x8xbf16, #tpu.memory_space<vmem>>, %arg7: memref<18x16x8xbf16, #tpu.memory_space<vmem>>) attributes {dimension_semantics = [#tpu.dimension_semantics<parallel>, #tpu.dimension_semantics<parallel>], iteration_bounds = array<i64: 2, 1>, scalar_prefetch = 0 : i64, scratch_operands = 2 : i64, tpu.core_type = #tpu.core_type<tc>, window_params = [{transform_indices = @transform_0, window_bounds = array<i64: 1, 16, 16, 4>}, {pipeline_mode = #tpu.pipeline_mode<synchronous>, transform_indices = @transform_1, window_bounds = array<i64: 8, 8, 4>}, {pipeline_mode = #tpu.pipeline_mode<synchronous>, transform_indices = @transform_2, window_bounds = array<i64: 1, 4>}, {transform_indices = @transform_3, window_bounds = array<i64: 1, 1024, 4>}]} {
    %c16_i32 = arith.constant 16 : i32
    %0 = arith.muli %arg1, %c16_i32 : i32
    %1 = tpu.assume_multiple %0, 16 : i32
    %c0 = arith.constant 0 : index
    %2 = arith.index_cast %1 : i32 to index
    %c0_0 = arith.constant 0 : index
    %c0_1 = arith.constant 0 : index
    %3 = vector.load %arg2[%c0, %2, %c0_0, %c0_1] : memref<1x16x16x4xbf16, #tpu.memory_space<vmem>>, vector<1x16x16x4xbf16>
    %4 = vector.shape_cast %3 : vector<1x16x16x4xbf16> to vector<16x16x4xbf16>
    %c1_i32 = arith.constant 1 : i32
    %5 = arith.subi %1, %c1_i32 : i32
    %c0_i32 = arith.constant 0 : i32
    %6 = arith.maxsi %5, %c0_i32 : i32
    %c0_2 = arith.constant 0 : index
    %7 = arith.index_cast %6 : i32 to index
    %c0_3 = arith.constant 0 : index
    %c0_4 = arith.constant 0 : index
    %8 = vector.load %arg2[%c0_2, %7, %c0_3, %c0_4] : memref<1x16x16x4xbf16, #tpu.memory_space<vmem>>, vector<1x1x16x4xbf16>
    %9 = vector.shape_cast %8 : vector<1x1x16x4xbf16> to vector<1x16x4xbf16>
    %c16_i32_5 = arith.constant 16 : i32
    %10 = arith.addi %1, %c16_i32_5 : i32
    %c15_i32 = arith.constant 15 : i32
    %11 = arith.minsi %10, %c15_i32 : i32
    %c0_6 = arith.constant 0 : index
    %12 = arith.index_cast %11 : i32 to index
    %c0_7 = arith.constant 0 : index
    %c0_8 = arith.constant 0 : index
    %13 = vector.load %arg2[%c0_6, %12, %c0_7, %c0_8] : memref<1x16x16x4xbf16, #tpu.memory_space<vmem>>, vector<1x1x16x4xbf16>
    %14 = vector.shape_cast %13 : vector<1x1x16x4xbf16> to vector<1x16x4xbf16>
    %c0_i32_9 = arith.constant 0 : i32
    %15 = arith.cmpi sgt, %arg1, %c0_i32_9 : i32
    %16 = arith.extui %15 : i1 to i32
    %17 = arith.sitofp %16 : i32 to f32
    %18 = arith.truncf %17 : f32 to bf16
    %19 = vector.broadcast %18 : bf16 to vector<1x16x4xbf16>
    %20 = arith.mulf %9, %19 : vector<1x16x4xbf16>
    %c0_i32_10 = arith.constant 0 : i32
    %21 = arith.cmpi slt, %arg1, %c0_i32_10 : i32
    %22 = arith.extui %21 : i1 to i32
    %23 = arith.sitofp %22 : i32 to f32
    %24 = arith.truncf %23 : f32 to bf16
    %25 = vector.broadcast %24 : bf16 to vector<1x16x4xbf16>
    %26 = arith.mulf %14, %25 : vector<1x16x4xbf16>
    %27 = tpu.concatenate %20, %4, %26 in 0 : vector<1x16x4xbf16>, vector<16x16x4xbf16>, vector<1x16x4xbf16> -> vector<18x16x4xbf16>
    %cst = arith.constant 0.000000e+00 : bf16
    %28 = vector.broadcast %cst : bf16 to vector<18x1x4xbf16>
    %29 = vector.extract_strided_slice %27 {offsets = [0, 0, 0], sizes = [18, 15, 4], strides = [1, 1, 1]} : vector<18x16x4xbf16> to vector<18x15x4xbf16>
    %30 = tpu.concatenate %28, %29 in 1 : vector<18x1x4xbf16>, vector<18x15x4xbf16> -> vector<18x16x4xbf16>
    %31 = vector.extract_strided_slice %27 {offsets = [0, 1, 0], sizes = [18, 15, 4], strides = [1, 1, 1]} : vector<18x16x4xbf16> to vector<18x15x4xbf16>
    %32 = tpu.concatenate %31, %28 in 1 : vector<18x15x4xbf16>, vector<18x1x4xbf16> -> vector<18x16x4xbf16>
    %33 = tpu.concatenate %30, %27 in 2 : vector<18x16x4xbf16>, vector<18x16x4xbf16> -> vector<18x16x8xbf16>
    %c0_11 = arith.constant 0 : index
    %c0_12 = arith.constant 0 : index
    %c0_13 = arith.constant 0 : index
    %34 = vector.load %arg6[%c0_11, %c0_12, %c0_13] : memref<18x16x8xbf16, #tpu.memory_space<vmem>>, vector<18x16x8xbf16>
    tpu.vector_store %arg6[%c0_11, %c0_12, %c0_13], %33 {strides = array<i32>} : memref<18x16x8xbf16, #tpu.memory_space<vmem>>, vector<18x16x8xbf16>,
    %35 = tpu.concatenate %27, %32 in 2 : vector<18x16x4xbf16>, vector<18x16x4xbf16> -> vector<18x16x8xbf16>
    %c0_14 = arith.constant 0 : index
    %c0_15 = arith.constant 0 : index
    %c0_16 = arith.constant 0 : index
    %36 = vector.load %arg7[%c0_14, %c0_15, %c0_16] : memref<18x16x8xbf16, #tpu.memory_space<vmem>>, vector<18x16x8xbf16>
    tpu.vector_store %arg7[%c0_14, %c0_15, %c0_16], %35 {strides = array<i32>} : memref<18x16x8xbf16, #tpu.memory_space<vmem>>, vector<18x16x8xbf16>,
    %c0_17 = arith.constant 0 : index
    %c0_18 = arith.constant 0 : index
    %c0_19 = arith.constant 0 : index
    %37 = vector.load %arg6[%c0_17, %c0_18, %c0_19] : memref<18x16x8xbf16, #tpu.memory_space<vmem>>, vector<16x16x8xbf16>
    %38 = vector.shape_cast %37 : vector<16x16x8xbf16> to vector<256x8xbf16>
    %c0_20 = arith.constant 0 : index
    %c0_21 = arith.constant 0 : index
    %c0_22 = arith.constant 0 : index
    %39 = vector.load %arg3[%c0_20, %c0_21, %c0_22] : memref<8x8x4xbf16, #tpu.memory_space<vmem>>, vector<1x8x4xbf16>
    %40 = vector.shape_cast %39 : vector<1x8x4xbf16> to vector<8x4xbf16>
    %cst_23 = arith.constant dense<0.000000e+00> : vector<256x4xf32>
    %41 = tpu.matmul %38, %40, %cst_23 {dimension_numbers = #tpu.dot_dimension_numbers<[1], [0], [0], [1], [0, 0, 1, 1], [], []>} : vector<256x8xbf16>, vector<8x4xbf16>, vector<256x4xf32> -> vector<256x4xf32>
    %c1 = arith.constant 1 : index
    %c0_24 = arith.constant 0 : index
    %c0_25 = arith.constant 0 : index
    %42 = vector.load %arg6[%c1, %c0_24, %c0_25] : memref<18x16x8xbf16, #tpu.memory_space<vmem>>, vector<16x16x8xbf16>
    %43 = vector.shape_cast %42 : vector<16x16x8xbf16> to vector<256x8xbf16>
    %c1_26 = arith.constant 1 : index
    %c0_27 = arith.constant 0 : index
    %c0_28 = arith.constant 0 : index
    %44 = vector.load %arg3[%c1_26, %c0_27, %c0_28] : memref<8x8x4xbf16, #tpu.memory_space<vmem>>, vector<1x8x4xbf16>
    %45 = vector.shape_cast %44 : vector<1x8x4xbf16> to vector<8x4xbf16>
    %cst_29 = arith.constant dense<0.000000e+00> : vector<256x4xf32>
    %46 = tpu.matmul %43, %45, %cst_29 {dimension_numbers = #tpu.dot_dimension_numbers<[1], [0], [0], [1], [0, 0, 1, 1], [], []>} : vector<256x8xbf16>, vector<8x4xbf16>, vector<256x4xf32> -> vector<256x4xf32>
    %47 = arith.addf %41, %46 : vector<256x4xf32>
    %48 = vector.shape_cast %47 : vector<256x4xf32> to vector<16x16x4xf32>
    %c0_30 = arith.constant 0 : index
    %c0_31 = arith.constant 0 : index
    %c0_32 = arith.constant 0 : index
    %49 = vector.load %arg7[%c0_30, %c0_31, %c0_32] : memref<18x16x8xbf16, #tpu.memory_space<vmem>>, vector<16x16x8xbf16>
    %50 = vector.shape_cast %49 : vector<16x16x8xbf16> to vector<256x8xbf16>
    %c2 = arith.constant 2 : index
    %c0_33 = arith.constant 0 : index
    %c0_34 = arith.constant 0 : index
    %51 = vector.load %arg3[%c2, %c0_33, %c0_34] : memref<8x8x4xbf16, #tpu.memory_space<vmem>>, vector<1x8x4xbf16>
    %52 = vector.shape_cast %51 : vector<1x8x4xbf16> to vector<8x4xbf16>
    %cst_35 = arith.constant dense<0.000000e+00> : vector<256x4xf32>
    %53 = tpu.matmul %50, %52, %cst_35 {dimension_numbers = #tpu.dot_dimension_numbers<[1], [0], [0], [1], [0, 0, 1, 1], [], []>} : vector<256x8xbf16>, vector<8x4xbf16>, vector<256x4xf32> -> vector<256x4xf32>
    %c1_36 = arith.constant 1 : index
    %c0_37 = arith.constant 0 : index
    %c0_38 = arith.constant 0 : index
    %54 = vector.load %arg7[%c1_36, %c0_37, %c0_38] : memref<18x16x8xbf16, #tpu.memory_space<vmem>>, vector<16x16x8xbf16>
    %55 = vector.shape_cast %54 : vector<16x16x8xbf16> to vector<256x8xbf16>
    %c3 = arith.constant 3 : index
    %c0_39 = arith.constant 0 : index
    %c0_40 = arith.constant 0 : index
    %56 = vector.load %arg3[%c3, %c0_39, %c0_40] : memref<8x8x4xbf16, #tpu.memory_space<vmem>>, vector<1x8x4xbf16>
    %57 = vector.shape_cast %56 : vector<1x8x4xbf16> to vector<8x4xbf16>
    %cst_41 = arith.constant dense<0.000000e+00> : vector<256x4xf32>
    %58 = tpu.matmul %55, %57, %cst_41 {dimension_numbers = #tpu.dot_dimension_numbers<[1], [0], [0], [1], [0, 0, 1, 1], [], []>} : vector<256x8xbf16>, vector<8x4xbf16>, vector<256x4xf32> -> vector<256x4xf32>
    %59 = arith.addf %53, %58 : vector<256x4xf32>
    %60 = vector.shape_cast %59 : vector<256x4xf32> to vector<16x16x4xf32>
    %c1_42 = arith.constant 1 : index
    %c0_43 = arith.constant 0 : index
    %c0_44 = arith.constant 0 : index
    %61 = vector.load %arg6[%c1_42, %c0_43, %c0_44] : memref<18x16x8xbf16, #tpu.memory_space<vmem>>, vector<16x16x8xbf16>
    %62 = vector.shape_cast %61 : vector<16x16x8xbf16> to vector<256x8xbf16>
    %c4 = arith.constant 4 : index
    %c0_45 = arith.constant 0 : index
    %c0_46 = arith.constant 0 : index
    %63 = vector.load %arg3[%c4, %c0_45, %c0_46] : memref<8x8x4xbf16, #tpu.memory_space<vmem>>, vector<1x8x4xbf16>
    %64 = vector.shape_cast %63 : vector<1x8x4xbf16> to vector<8x4xbf16>
    %cst_47 = arith.constant dense<0.000000e+00> : vector<256x4xf32>
    %65 = tpu.matmul %62, %64, %cst_47 {dimension_numbers = #tpu.dot_dimension_numbers<[1], [0], [0], [1], [0, 0, 1, 1], [], []>} : vector<256x8xbf16>, vector<8x4xbf16>, vector<256x4xf32> -> vector<256x4xf32>
    %c2_48 = arith.constant 2 : index
    %c0_49 = arith.constant 0 : index
    %c0_50 = arith.constant 0 : index
    %66 = vector.load %arg6[%c2_48, %c0_49, %c0_50] : memref<18x16x8xbf16, #tpu.memory_space<vmem>>, vector<16x16x8xbf16>
    %67 = vector.shape_cast %66 : vector<16x16x8xbf16> to vector<256x8xbf16>
    %c5 = arith.constant 5 : index
    %c0_51 = arith.constant 0 : index
    %c0_52 = arith.constant 0 : index
    %68 = vector.load %arg3[%c5, %c0_51, %c0_52] : memref<8x8x4xbf16, #tpu.memory_space<vmem>>, vector<1x8x4xbf16>
    %69 = vector.shape_cast %68 : vector<1x8x4xbf16> to vector<8x4xbf16>
    %cst_53 = arith.constant dense<0.000000e+00> : vector<256x4xf32>
    %70 = tpu.matmul %67, %69, %cst_53 {dimension_numbers = #tpu.dot_dimension_numbers<[1], [0], [0], [1], [0, 0, 1, 1], [], []>} : vector<256x8xbf16>, vector<8x4xbf16>, vector<256x4xf32> -> vector<256x4xf32>
    %71 = arith.addf %65, %70 : vector<256x4xf32>
    %72 = vector.shape_cast %71 : vector<256x4xf32> to vector<16x16x4xf32>
    %c1_54 = arith.constant 1 : index
    %c0_55 = arith.constant 0 : index
    %c0_56 = arith.constant 0 : index
    %73 = vector.load %arg7[%c1_54, %c0_55, %c0_56] : memref<18x16x8xbf16, #tpu.memory_space<vmem>>, vector<16x16x8xbf16>
    %74 = vector.shape_cast %73 : vector<16x16x8xbf16> to vector<256x8xbf16>
    %c6 = arith.constant 6 : index
    %c0_57 = arith.constant 0 : index
    %c0_58 = arith.constant 0 : index
    %75 = vector.load %arg3[%c6, %c0_57, %c0_58] : memref<8x8x4xbf16, #tpu.memory_space<vmem>>, vector<1x8x4xbf16>
    %76 = vector.shape_cast %75 : vector<1x8x4xbf16> to vector<8x4xbf16>
    %cst_59 = arith.constant dense<0.000000e+00> : vector<256x4xf32>
    %77 = tpu.matmul %74, %76, %cst_59 {dimension_numbers = #tpu.dot_dimension_numbers<[1], [0], [0], [1], [0, 0, 1, 1], [], []>} : vector<256x8xbf16>, vector<8x4xbf16>, vector<256x4xf32> -> vector<256x4xf32>
    %c2_60 = arith.constant 2 : index
    %c0_61 = arith.constant 0 : index
    %c0_62 = arith.constant 0 : index
    %78 = vector.load %arg7[%c2_60, %c0_61, %c0_62] : memref<18x16x8xbf16, #tpu.memory_space<vmem>>, vector<16x16x8xbf16>
    %79 = vector.shape_cast %78 : vector<16x16x8xbf16> to vector<256x8xbf16>
    %c7 = arith.constant 7 : index
    %c0_63 = arith.constant 0 : index
    %c0_64 = arith.constant 0 : index
    %80 = vector.load %arg3[%c7, %c0_63, %c0_64] : memref<8x8x4xbf16, #tpu.memory_space<vmem>>, vector<1x8x4xbf16>
    %81 = vector.shape_cast %80 : vector<1x8x4xbf16> to vector<8x4xbf16>
    %cst_65 = arith.constant dense<0.000000e+00> : vector<256x4xf32>
    %82 = tpu.matmul %79, %81, %cst_65 {dimension_numbers = #tpu.dot_dimension_numbers<[1], [0], [0], [1], [0, 0, 1, 1], [], []>} : vector<256x8xbf16>, vector<8x4xbf16>, vector<256x4xf32> -> vector<256x4xf32>
    %83 = arith.addf %77, %82 : vector<256x4xf32>
    %84 = vector.shape_cast %83 : vector<256x4xf32> to vector<16x16x4xf32>
    %85 = vector.shape_cast %48 : vector<16x16x4xf32> to vector<16x16x1x4xf32>
    %86 = vector.shape_cast %60 : vector<16x16x4xf32> to vector<16x16x1x4xf32>
    %87 = tpu.concatenate %85, %86 in 2 : vector<16x16x1x4xf32>, vector<16x16x1x4xf32> -> vector<16x16x2x4xf32>
    %88 = vector.shape_cast %87 : vector<16x16x2x4xf32> to vector<16x32x4xf32>
    %89 = vector.shape_cast %72 : vector<16x16x4xf32> to vector<16x16x1x4xf32>
    %90 = vector.shape_cast %84 : vector<16x16x4xf32> to vector<16x16x1x4xf32>
    %91 = tpu.concatenate %89, %90 in 2 : vector<16x16x1x4xf32>, vector<16x16x1x4xf32> -> vector<16x16x2x4xf32>
    %92 = vector.shape_cast %91 : vector<16x16x2x4xf32> to vector<16x32x4xf32>
    %93 = vector.shape_cast %88 : vector<16x32x4xf32> to vector<16x1x32x4xf32>
    %94 = vector.shape_cast %92 : vector<16x32x4xf32> to vector<16x1x32x4xf32>
    %95 = tpu.concatenate %93, %94 in 1 : vector<16x1x32x4xf32>, vector<16x1x32x4xf32> -> vector<16x2x32x4xf32>
    %96 = vector.shape_cast %95 : vector<16x2x32x4xf32> to vector<32x32x4xf32>
    %c0_66 = arith.constant 0 : index
    %c0_67 = arith.constant 0 : index
    %97 = vector.load %arg4[%c0_66, %c0_67] : memref<1x4xf32, #tpu.memory_space<vmem>>, vector<1x4xf32>
    %98 = vector.shape_cast %97 : vector<1x4xf32> to vector<1x1x4xf32>
    %99 = vector.broadcast %98 : vector<1x1x4xf32> to vector<32x32x4xf32>
    %100 = arith.addf %96, %99 : vector<32x32x4xf32>
    %101 = vector.shape_cast %100 : vector<32x32x4xf32> to vector<1024x4xf32>
    %c0_68 = arith.constant 0 : index
    %c0_69 = arith.constant 0 : index
    %c0_70 = arith.constant 0 : index
    %102 = vector.load %arg5[%c0_68, %c0_69, %c0_70] : memref<1x1024x4xf32, #tpu.memory_space<vmem>>, vector<1x1024x4xf32>
    %103 = vector.shape_cast %102 : vector<1x1024x4xf32> to vector<1024x4xf32>
    %104 = vector.shape_cast %101 : vector<1024x4xf32> to vector<1x1024x4xf32>
    tpu.vector_store %arg5[%c0_68, %c0_69, %c0_70], %104 {strides = array<i32>} : memref<1x1024x4xf32, #tpu.memory_space<vmem>>, vector<1x1024x4xf32>,
    return
  }
  func.func @transform_0(%arg0: i32, %arg1: i32) -> (i32, i32, i32, i32) {
    %c0_i32 = arith.constant 0 : i32
    %c0_i32_0 = arith.constant 0 : i32
    %c0_i32_1 = arith.constant 0 : i32
    %c0_i32_2 = arith.constant 0 : i32
    return %arg0, %c0_i32, %c0_i32_0, %c0_i32_1 : i32, i32, i32, i32
  }
  func.func @transform_1(%arg0: i32, %arg1: i32) -> (i32, i32, i32) {
    %c0_i32 = arith.constant 0 : i32
    %c0_i32_0 = arith.constant 0 : i32
    %c0_i32_1 = arith.constant 0 : i32
    %c0_i32_2 = arith.constant 0 : i32
    return %c0_i32, %c0_i32_0, %c0_i32_1 : i32, i32, i32
  }
  func.func @transform_2(%arg0: i32, %arg1: i32) -> (i32, i32) {
    %c0_i32 = arith.constant 0 : i32
    %c0_i32_0 = arith.constant 0 : i32
    %c0_i32_1 = arith.constant 0 : i32
    return %c0_i32, %c0_i32_0 : i32, i32
  }
  func.func @transform_3(%arg0: i32, %arg1: i32) -> (i32, i32, i32) {
    %c0_i32 = arith.constant 0 : i32
    %c0_i32_0 = arith.constant 0 : i32
    return %arg0, %arg1, %c0_i32 : i32, i32, i32
  }
}

</mosaic_0001>

<bundles_post_ra>
// kernel: tpu_custom_call.1
= control target key start
LH: loop header
LB: loop body
LE: loop exit
PB: predicated region body
PF: predicated region fallthrough
CT: control target
= control target key end

     0   :  { %s17913_s12 = smov 0   ;;  %s17915_s13 = smov 0   ;;  %s24029_s0 = inlined_call_operand.vmem [shape: bf16[2,16,16,4], index: 0, kind: input, shape index: {}]   ;;  %s24030_s1 = inlined_call_operand.vmem [shape: bf16[8,8,4], index: 1, kind: input, shape index: {}]   ;;  %s24031_s2 = inlined_call_operand.vmem [shape: f32[1,4], index: 2, kind: input, shape index: {}]   ;;  %s24032_s3 = inlined_call_operand.vmem [shape: f32[2,1024,4], index: 3, kind: output, shape index: {}]  }
   0x1   :  { %s17917_s14 = smov 0  }
   0x2 LB: > { %s25_s15 = sadd.s32 1, %s17884_s13  ;;  %p16973_p0 = scmp.ge.s32.totalorder %s17888_s14, 1  ;;  %s17888_s14 = sphi %s17917_s14, %s13_s14   ;;  %s17884_s13 = sphi %s17915_s13, %s25042_s13   ;;  %s17880_s12 = sphi %s17913_s12, %s25041_s12  }
   0x3   : > { %p27_p1 = scmp.ge.s32.totalorder %s25_s15, 2  ;;  %p151_p2 = scmp.lt.s32.totalorder %s17888_s14, 3 }
   0x5   : > { %s25044_s15 = smov (%p27_p1, %s25_s15), 0  ;;  %p152_p3 = pnand %p16973_p0, %p151_p2 }
   0x7   : > { %155 = sbr.rel (%p152_p3) target bundleno = 1376 (0x560), region = 32 }
   0xc   : > { %p179_p4 = scmp.lt.s32.totalorder %s17880_s12, 1  ;;  %s17890_s20 = smov 4   ;;  %vm594_vm0 = vcmask 1047552   ;;  %vm595_vm1 = vsmask.f32 7424  ;;  %vm1318_vm3 = vcmask 1043456  }
   0xd   : > { %vm18021_vm2 = vmand %vm594_vm0, %vm595_vm1  ;;  %vm519_vm4 = vcmask 1040384   ;;  %vm520_vm5 = vsmask.f32 256  ;;  %vm651_vm7 = vcmask 31744   ;;  %vm832_vm8 = vcmask 60416  }
   0xe   : > { %s25046_s12 = smov (!%p179_p4, %s17880_s12), 1  ;;  %vm18223_vm6 = vmand %vm519_vm4, %vm520_vm5  ;;  %vm1269_vm9 = vcmask 64512  }
   0xf   : > { %s17304_s16 = sshll.u32 %s25046_s12, 7 }
  0x10   : > { %s17937_s19 = scalar_lea.vmem %s24029_s0, %s17304_s16  ;;  %s17305_s16 = sshll.u32 %s25046_s12, 10 }
  0x11   : > { %v237_v0 = vld [vmem:[%s17937_s19] sm:$0xf]  ;;  %v238_v1 = vld [vmem:[%s17937_s19 + $0x4] sm:$0xf]  ;;  %v17942_v4 = vld [vmem:[%s17937_s19 + $0x8] sm:$0xff]   ;;  %s19560_s18 = scalar_lea.vmem %s24032_s3, %s17305_s16 }
  0x12   : > { %v264_v2 = vmul.bf16 0.0, %v237_v0  ;;  %v265_v3 = vmul.bf16 0.0, %v238_v1  ;;  %619 = vrot.lane.b32.xlu1 %v17942_v4, %s17890_s20  ;;  %v17949_v6 = vld [vmem:[%s17937_s19 + $0x10] sm:$0xff]   ;;  %v17954_v7 = vld [vmem:[%s17937_s19] sm:$0xff]   ;;  %v17967_v13 = vld [vmem:[%s17937_s19 + $0x18] sm:$0xff]   ;;  %v393_v26 = vshll.u32 %v17942_v4, 16 }
  0x13   : > { %v17958_v9 = vld [vmem:[%s17937_s19 + $0x20] sm:$0xff]   ;;  %v383_v12 = vshrl.u32 %v17954_v7, 16  ;;  %v386_v15 = vshll.u32 %v17954_v7, 16  ;;  %v17975_v17 = vld [vmem:[%s17937_s19 + $0x30] sm:$0xff]   ;;  %v17982_v19 = vld [vmem:[%s17937_s19 + $0x28] sm:$0xff]   ;;  %v400_v27 = vshll.u32 %v17949_v6, 16 }
  0x14   : > { %v17944_v5 = vcombine.low %v264_v2, %v265_v3  ;;  %v17987_v20 = vld [vmem:[%s17937_s19 + $0x40] sm:$0xff]   ;;  %v17992_v21 = vld [vmem:[%s17937_s19 + $0x38] sm:$0xff]   ;;  %v17997_v22 = vld [vmem:[%s17937_s19 + $0x50] sm:$0xff]   ;;  %v407_v28 = vshll.u32 %v17967_v13, 16  ;;  %v390_v33 = vshrl.u32 %v17942_v4, 16  ;;  %v544_v34 = vrot.slane %v393_v26, 1 }
  0x15   : > { %v385_v16 = vrot.slane %v383_v12, 7  ;;  %v18002_v24 = vld [vmem:[%s17937_s19 + $0x48] sm:$0xff]   ;;  %v542_v25 = vrot.slane %v386_v15, 1  ;;  %v18010_v29 = vld [vmem:[%s17937_s19 + $0x60] sm:$0xff]   ;;  %v18015_v31 = vld [vmem:[%s17937_s19 + $0x58] sm:$0xff]   ;;  %v397_v35 = vshrl.u32 %v17949_v6, 16 }
  0x16   : > { %615 = vrot.lane.b32.xlu0 %v17944_v5, %s17890_s20  ;;  %v376_v8 = vshrl.u32 %v17944_v5, 16  ;;  %621 = vrot.lane.b32.xlu1 %v17949_v6, %s17890_s20  ;;  %v379_v11 = vshll.u32 %v17944_v5, 16  ;;  %v546_v37 = vrot.slane %v400_v27, 1  ;;  %v404_v38 = vshrl.u32 %v17967_v13, 16  ;;  %v18034_v41 = vld [vmem:[%s17937_s19 + $0x70] sm:$0xff]   ;;  %v18040_v43 = vld [vmem:[%s17937_s19 + $0x68] sm:$0xff]  }
  0x17   : > { %v17977_v18 = vor.u32 %v386_v15, %v385_v16  ;;  %v18017_v32 = vor.u32 %v542_v25, %v383_v12  ;;  %v548_v39 = vrot.slane %v407_v28, 1  ;;  %v414_v40 = vshll.u32 %v17958_v9, 16  ;;  %v18065_v60 = vld [vmem:[%s17937_s19 + $0x78] sm:$0xff]  }
  0x18   : > { %v378_v10 = vrot.slane %v376_v8, 7  ;;  %v540_v23 = vrot.slane %v379_v11, 1  ;;  %v421_v42 = vshll.u32 %v17982_v19, 16  ;;  %v545_v46 = vor.u32 %v544_v34, %v390_v33 }
  0x19   : > { %v598_v45 = vsel %vm18021_vm2, %v18017_v32, 0  ;;  %v392_v47 = vrot.slane %v390_v33, 7  ;;  %v18047_v48 = vor.u32 %v546_v37, %v397_v35  ;;  %v18049_v49 = vor.u32 %v548_v39, %v404_v38  ;;  %v1153_v37 = vld [vmem:[%s24030_s1] sm:$0xf] }
  0x1a   : > { %617 = vrot.lane.b32.xlu0 %v17954_v7, %s17890_s20  ;;  %v17969_v14 = vor.u32 %v379_v11, %v378_v10  ;;  %625 = vrot.lane.b32.xlu1 %v17958_v9, %s17890_s20  ;;  %v541_v30 = vor.u32 %v540_v23, %v376_v8  ;;  %v411_v50 = vshrl.u32 %v17958_v9, 16  ;;  %v550_v51 = vrot.slane %v414_v40, 1 }
  0x1b   : > { %v399_v52 = vrot.slane %v397_v35, 7  ;;  %v418_v53 = vshrl.u32 %v17982_v19, 16  ;;  %v552_v54 = vrot.slane %v421_v42, 1  ;;  %v428_v55 = vshll.u32 %v17975_v17, 16  ;;  %17715 = vmatprep.subr.msk.bf16.mxu1 %vm1318_vm3, %v1153_v37 }
  0x1c   : > { %v597_v44 = vsel %vm18021_vm2, %v541_v30, 0  ;;  %v406_v56 = vrot.slane %v404_v38, 7  ;;  %v413_v57 = vrot.slane %v411_v50, 7  ;;  %v425_v58 = vshrl.u32 %v17975_v17, 16  ;;  %v17070_v30 = vld [vmem:[%s24030_s1 + $0x4] sm:$0xf] }
  0x1d   : > { %v435_v59 = vshll.u32 %v17992_v21, 16  ;;  %v599_v61 = vsel %vm18021_vm2, %v545_v46, 0  ;;  %v420_v62 = vrot.slane %v418_v53, 7  ;;  %v432_v63 = vshrl.u32 %v17992_v21, 16  ;;  %v18111_v46 = vld [vmem:[%s24030_s1 + $0xc] sm:$0xf]  ;;  %17714 = vmatprep.subr.msk.bf16.mxu0 %vm1318_vm3, %v17070_v30 }
  0x1e   : > { %623 = vrot.lane.b32.xlu0 %v17967_v13, %s17890_s20  ;;  %629 = vrot.lane.b32.xlu1 %v17975_v17, %s17890_s20  ;;  %v18070_v0 = vor.u32 %v393_v26, %v392_v47  ;;  %v600_v1 = vsel %vm18021_vm2, %v18047_v48, 0  ;;  %v601_v2 = vsel %vm18021_vm2, %v18049_v49, 0  ;;  %v18078_v3 = vor.u32 %v550_v51, %v411_v50  ;;  %v18124_v49 = vld [vmem:[%s24030_s1 + $0x8] sm:$0xf] }
  0x1f   : > { %v427_v8 = vrot.slane %v425_v58, 7  ;;  %v553_v10 = vor.u32 %v552_v54, %v418_v53  ;;  %v554_v11 = vrot.slane %v428_v55, 1  ;;  %v434_v12 = vrot.slane %v432_v63, 7 }
  0x20   : > { %v439_v15 = vshrl.u32 %v17987_v20, 16  ;;  %v556_v16 = vrot.slane %v435_v59, 1  ;;  %v442_v23 = vshll.u32 %v17987_v20, 16  ;;  %v446_v25 = vshrl.u32 %v18002_v24, 16 }
  0x21   : > { %v449_v26 = vshll.u32 %v18002_v24, 16  ;;  %v453_v33 = vshrl.u32 %v17997_v22, 16  ;;  %v18097_v34 = vor.u32 %v400_v27, %v399_v52  ;;  %v18101_v35 = vor.u32 %v407_v28, %v406_v56 }
  0x22   : > { %627 = vrot.lane.b32.xlu0 %v17982_v19, %s17890_s20  ;;  %633 = vrot.lane.b32.xlu1 %v17987_v20, %s17890_s20  ;;  %v441_v32 = vrot.slane %v439_v15, 7  ;;  %v448_v38 = vrot.slane %v446_v25, 7  ;;  %v460_v39 = vshrl.u32 %v18015_v31, 16  ;;  %v603_v27 = vsel %vm18021_vm2, %v553_v10, 0 }
  0x23   : > { %v455_v28 = vrot.slane %v453_v33, 7  ;;  %v474_v47 = vshrl.u32 %v18040_v43, 16  ;;  %v1320_v48 = vsel %vm1318_vm3, %v17070_v30, 0  ;;  %v456_v50 = vshll.u32 %v17997_v22, 16 }
  0x24   : > { %v462_v51 = vrot.slane %v460_v39, 7  ;;  %17443 = vmatpush3.bf16.msra.mxu0 %v1320_v48  ;;  %v1612_v53 = vsel %vm1318_vm3, %v1153_v37, 0  ;;  %v18134_v56 = vor.u32 %v414_v40, %v413_v57  ;;  %v18140_v10 = vor.u32 %v428_v55, %v427_v8 }
  0x25   : > { %v476_v54 = vrot.slane %v474_v47, 7  ;;  %17477 = vmatpush3.bf16.msra.mxu1 %v1612_v53  ;;  %v463_v30 = vshll.u32 %v18015_v31, 16  ;;  %17716 = vmatprep.subr.msk.bf16.mxu0 %vm1318_vm3, %v18111_v46  ;;  %v18149_v37 = vor.u32 %v442_v23, %v441_v32  ;;  %v18151_v40 = vor.u32 %v449_v26, %v448_v38 }
  0x26   : > { %631 = vrot.lane.b32.xlu0 %v17992_v21, %s17890_s20  ;;  %637 = vrot.lane.b32.xlu1 %v17997_v22, %s17890_s20  ;;  %v470_v55 = vshll.u32 %v18010_v29, 16  ;;  %v477_v57 = vshll.u32 %v18040_v43, 16  ;;  %v560_v8 = vrot.slane %v449_v26, 1  ;;  %v481_v48 = vshrl.u32 %v18034_v41, 16 }
  0x27   : > { %17717 = vmatprep.subr.msk.bf16.mxu1 %vm1318_vm3, %v18124_v49  ;;  %v488_v53 = vshrl.u32 %v18065_v60, 16  ;;  %v558_v26 = vrot.slane %v442_v23, 1  ;;  %v562_v23 = vrot.slane %v456_v50, 1  ;;  %v2265_v36 = vsel %vm1318_vm3, %v18124_v49, 0 }
  0x28   : > { %v483_v32 = vrot.slane %v481_v48, 7  ;;  %v532_v49 = vsel %vm18223_vm6, 0, %v18151_v40  ;;  %v18312_v40 = vld [vmem:[%s24030_s1 + $0x14] sm:$0xf] }
  0x29   : > { %v490_v38 = vrot.slane %v488_v53, 7 }
  0x2a   : > { %635 = vrot.lane.b32.xlu0 %v18002_v24, %s17890_s20  ;;  %641 = vrot.lane.b32.xlu1 %v18010_v29, %s17890_s20 }
  0x2e   : > { %639 = vrot.lane.b32.xlu0 %v18015_v31, %s17890_s20  ;;  %645 = vrot.lane.b32.xlu1 %v18034_v41, %s17890_s20 }
  0x32   : > { %643 = vrot.lane.b32.xlu0 %v18040_v43, %s17890_s20  ;;  %887 = vrot.lane.b32.xlu1 %v597_v44, %s17890_s20  ;;  %v467_v44 = vshrl.u32 %v18010_v29, 16 }
  0x34   : > { %v469_v52 = vrot.slane %v467_v44, 7 }
  0x36   : > { %647 = vrot.lane.b32.xlu0 %v18065_v60, %s17890_s20  ;;  %891 = vrot.lane.b32.xlu1 %v599_v61, %s17890_s20  ;;  %v18138_v61 = vor.u32 %v421_v42, %v420_v62  ;;  %v557_v42 = vor.u32 %v556_v16, %v432_v63  ;;  %v18156_v62 = vor.u32 %v456_v50, %v455_v28  ;;  %v602_v16 = vsel %vm18021_vm2, %v18078_v3, 0 }
  0x37   : > { %v18167_v63 = vor.u32 %v477_v57, %v476_v54  ;;  %v559_v3 = vor.u32 %v558_v26, %v439_v15  ;;  %v563_v15 = vor.u32 %v562_v23, %v453_v33  ;;  %v566_v50 = vrot.slane %v470_v55, 1  ;;  %v16978_v26 = vld [vmem:[%s17937_s19 + $0x78] sm:$0xf] }
  0x38   : > { %v605_v28 = vsel %vm18021_vm2, %v557_v42, 0 }
  0x3a   : > { %889 = vrot.lane.b32.xlu0 %v598_v45, %s17890_s20  ;;  %v18147_v45 = vor.u32 %v435_v59, %v434_v12  ;;  %895 = vrot.lane.b32.xlu1 %v601_v2, %s17890_s20  ;;  %v18160_v59 = vor.u32 %v463_v30, %v462_v51  ;;  %v555_v12 = vor.u32 %v554_v11, %v425_v58  ;;  %v564_v51 = vrot.slane %v463_v30, 1 }
  0x3b   : > { %v18165_v2 = vor.u32 %v470_v55, %v469_v52  ;;  %v484_v58 = vshll.u32 %v18034_v41, 16  ;;  %v491_v11 = vshll.u32 %v18065_v60, 16  ;;  %v568_v60 = vrot.slane %v477_v57, 1 }
  0x3c   : > { %v604_v52 = vsel %vm18021_vm2, %v555_v12, 0  ;;  %v606_v30 = vsel %vm18021_vm2, %v559_v3, 0  ;;  %v567_v57 = vor.u32 %v566_v50, %v467_v44  ;;  %v283_v44 = vmul.bf16 0.0, %v16978_v26 }
  0x3d   : > { %v18182_v54 = vor.u32 %v484_v58, %v483_v32  ;;  %v572_v12 = vrot.slane %v491_v11, 1  ;;  %v570_v22 = vrot.slane %v484_v58, 1  ;;  %v16979_v32 = vld [vmem:[%s17937_s19 + $0x7c] sm:$0xf] }
  0x3e   : > { %893 = vrot.lane.b32.xlu0 %v600_v1, %s17890_s20  ;;  %899 = vrot.lane.b32.xlu1 %v603_v27, %s17890_s20  ;;  %v561_v1 = vor.u32 %v560_v8, %v446_v25  ;;  %v18184_v27 = vor.u32 %v491_v11, %v490_v38  ;;  %v565_v25 = vor.u32 %v564_v51, %v460_v39  ;;  %v608_v39 = vsel %vm18021_vm2, %v563_v15, 0 }
  0x3f   : > { %v569_v8 = vor.u32 %v568_v60, %v474_v47  ;;  %v573_v55 = vor.u32 %v572_v12, %v488_v53  ;;  %v610_v47 = vsel %vm18021_vm2, %v567_v57, 0  ;;  %v284_v38 = vmul.bf16 0.0, %v16979_v32 }
  0x40   : > { %v607_v41 = vsel %vm18021_vm2, %v561_v1, 0  ;;  %v609_v42 = vsel %vm18021_vm2, %v565_v25, 0  ;;  %v524_v1 = vsel %vm18223_vm6, 0, %v18070_v0  ;;  %v522_v51 = vsel %vm18223_vm6, 0, %v17969_v14 }
  0x41   : > { %v611_v33 = vsel %vm18021_vm2, %v569_v8, 0  ;;  %v613_v29 = vsel %vm18021_vm2, %v573_v55, 0  ;;  %v527_v8 = vsel %vm18223_vm6, 0, %v18134_v56 }
  0x42   : > { %897 = vrot.lane.b32.xlu0 %v602_v16, %s17890_s20  ;;  %903 = vrot.lane.b32.xlu1 %v605_v28, %s17890_s20  ;;  %v571_v16 = vor.u32 %v570_v22, %v481_v48  ;;  %v18218_v28 = vcombine.low %v283_v44, %v284_v38  ;;  %v526_v22 = vsel %vm18223_vm6, 0, %v18101_v35 }
  0x44   : > { %v612_v53 = vsel %vm18021_vm2, %v571_v16, 0  ;;  %v498_v12 = vshll.u32 %v18218_v28, 16 }
  0x46   : > { %901 = vrot.lane.b32.xlu0 %v604_v52, %s17890_s20  ;;  %907 = vrot.lane.b32.xlu1 %v607_v41, %s17890_s20  ;;  %v525_v41 = vsel %vm18223_vm6, 0, %v18097_v34  ;;  %v574_v56 = vrot.slane %v498_v12, 1 }
  0x4a   : > { %905 = vrot.lane.b32.xlu0 %v606_v30, %s17890_s20  ;;  %911 = vrot.lane.b32.xlu1 %v609_v42, %s17890_s20  ;;  %v523_v30 = vsel %vm18223_vm6, 0, %v17977_v18 }
  0x4e   : > { %909 = vrot.lane.b32.xlu0 %v608_v39, %s17890_s20  ;;  %915 = vrot.lane.b32.xlu1 %v611_v33, %s17890_s20 }
  0x52   : > { %913 = vrot.lane.b32.xlu0 %v610_v47, %s17890_s20  ;;  %919 = vrot.lane.b32.xlu1 %v613_v29, %s17890_s20  ;;  %v495_v47 = vshrl.u32 %v18218_v28, 16  ;;  %v529_v29 = vsel %vm18223_vm6, 0, %v18140_v10 }
  0x54   : > { %v575_v44 = vor.u32 %v574_v56, %v495_v47 }
  0x56   : > { %917 = vrot.lane.b32.xlu0 %v612_v53, %s17890_s20 }
  0x5a   : > { %649 = vrot.lane.b32.xlu0 %v18218_v28, %s17890_s20 }
  0x84   : > { %v620_v58 = vpop.permute.xlu1 %619 }
  0x85   : > { %v660_v11 = vsel %vm651_vm7, %v524_v1, %v620_v58  ;;  %v1973_v1 = vsel %vm1318_vm3, %v18111_v46, 0 }
  0x86   : > { %v17002_v3 = vcombine.low %v660_v11, %v660_v11  ;;  %v17003_v23 = vcombine.high %v660_v11, %v660_v11 }
  0x88   : > { %v616_v52 = vpop.permute.xlu0 %615  ;;  %837 = vst.msk [vmem:[#allocation2 + $0x10] sm:$0xf] %vm832_vm8, %v17002_v3  ;;  %838 = vst.msk [vmem:[#allocation2 + $0x14] sm:$0xf] %vm832_vm8, %v17003_v23  ;;  %v622_v14 = vpop.permute.xlu1 %621 }
  0x89   : > { %v654_v25 = vsel %vm651_vm7, %v522_v51, %v616_v52  ;;  %v663_v15 = vsel %vm651_vm7, %v525_v41, %v622_v14  ;;  %v528_v51 = vsel %vm18223_vm6, 0, %v18138_v61  ;;  %v614_v52 = vsel %vm18021_vm2, %v575_v44, 0 }
  0x8a   : > { %v16998_v60 = vcombine.low %v654_v25, %v654_v25  ;;  %v16999_v0 = vcombine.high %v654_v25, %v654_v25  ;;  %v17004_v50 = vcombine.low %v663_v15, %v663_v15  ;;  %v17005_v42 = vcombine.high %v663_v15, %v663_v15  ;;  %921 = vrot.lane.b32.xlu1 %v614_v52, %s17890_s20 }
  0x8b   : > { %v531_v25 = vsel %vm18223_vm6, 0, %v18149_v37  ;;  %v530_v37 = vsel %vm18223_vm6, 0, %v18147_v45  ;;  %v533_v45 = vsel %vm18223_vm6, 0, %v18156_v62 }
  0x8c   : > { %833 = vst.msk [vmem:[#allocation2] sm:$0xf] %vm832_vm8, %v16998_v60  ;;  %834 = vst.msk [vmem:[#allocation2 + $0x4] sm:$0xf] %vm832_vm8, %v16999_v0  ;;  %v618_v34 = vpop.permute.xlu0 %617  ;;  %v626_v33 = vpop.permute.xlu1 %625 }
  0x8d   : > { %v657_v18 = vsel %vm651_vm7, %v523_v30, %v618_v34  ;;  %839 = vst.msk [vmem:[#allocation2 + $0x18] sm:$0xf] %vm832_vm8, %v17004_v50  ;;  %840 = vst.msk [vmem:[#allocation2 + $0x1c] sm:$0xf] %vm832_vm8, %v17005_v42  ;;  %v669_v55 = vsel %vm651_vm7, %v527_v8, %v626_v33 }
  0x8e   : > { %v17000_v39 = vcombine.low %v657_v18, %v657_v18  ;;  %v17001_v57 = vcombine.high %v657_v18, %v657_v18  ;;  %v17008_v26 = vcombine.low %v669_v55, %v669_v55  ;;  %v17009_v32 = vcombine.high %v669_v55, %v669_v55  ;;  %v18321_v55 = vld [vmem:[%s24030_s1 + $0x10] sm:$0xf] }
  0x8f   : > { %v17768_v46 = vld [vmem:[#allocation2 + $0x10] sm:$0xff]  }
  0x90   : > { %835 = vst.msk [vmem:[#allocation2 + $0x8] sm:$0xf] %vm832_vm8, %v17000_v39  ;;  %836 = vst.msk [vmem:[#allocation2 + $0xc] sm:$0xf] %vm832_vm8, %v17001_v57  ;;  %v624_v16 = vpop.permute.xlu0 %623  ;;  %v630_v10 = vpop.permute.xlu1 %629  ;;  %v17769_v61 = vld [vmem:[#allocation2 + $0x10] sm:$0xff]  }
  0x91   : > { %v666_v35 = vsel %vm651_vm7, %v526_v22, %v624_v16  ;;  %843 = vst.msk [vmem:[#allocation2 + $0x28] sm:$0xf] %vm832_vm8, %v17008_v26  ;;  %844 = vst.msk [vmem:[#allocation2 + $0x2c] sm:$0xf] %vm832_vm8, %v17009_v32  ;;  %v675_v11 = vsel %vm651_vm7, %v529_v29, %v630_v10 }
  0x92   : > { %v17006_v38 = vcombine.low %v666_v35, %v666_v35  ;;  %v17007_v53 = vcombine.high %v666_v35, %v666_v35  ;;  %v17012_v23 = vcombine.low %v675_v11, %v675_v11  ;;  %v17013_v41 = vcombine.high %v675_v11, %v675_v11 }
  0x93   : > { %v17765_v58 = vld [vmem:[#allocation2] sm:$0xff]   ;;  %v535_v35 = vsel %vm18223_vm6, 0, %v18165_v2  ;;  %v534_v2 = vsel %vm18223_vm6, 0, %v18160_v59 }
  0x94   : > { %841 = vst.msk [vmem:[#allocation2 + $0x20] sm:$0xf] %vm832_vm8, %v17006_v38  ;;  %842 = vst.msk [vmem:[#allocation2 + $0x24] sm:$0xf] %vm832_vm8, %v17007_v53  ;;  %v628_v3 = vpop.permute.xlu0 %627  ;;  %17478 = vmatprep.mubr.msk.bf16.mxu1 %vm1269_vm9, %v17765_v58  ;;  %v18288_v14 = vld [vmem:[#allocation2 + $0x18] sm:$0xff]   ;;  %v634_v15 = vpop.permute.xlu1 %633 }
  0x95   : > { %v672_v60 = vsel %vm651_vm7, %v528_v51, %v628_v3  ;;  %847 = vst.msk [vmem:[#allocation2 + $0x38] sm:$0xf] %vm832_vm8, %v17012_v23  ;;  %848 = vst.msk [vmem:[#allocation2 + $0x3c] sm:$0xf] %vm832_vm8, %v17013_v41  ;;  %v681_v50 = vsel %vm651_vm7, %v531_v25, %v634_v15  ;;  %v17771_v16 = vld [vmem:[#allocation2 + $0x18] sm:$0xff]   ;;  %v537_v23 = vsel %vm18223_vm6, 0, %v18182_v54 }
  0x96   : > { %v17010_v0 = vcombine.low %v672_v60, %v672_v60  ;;  %v17011_v30 = vcombine.high %v672_v60, %v672_v60  ;;  %v17016_v18 = vcombine.low %v681_v50, %v681_v50  ;;  %v17017_v39 = vcombine.high %v681_v50, %v681_v50 }
  0x97   : > { %v18295_v34 = vld [vmem:[#allocation2 + $0x8] sm:$0xff]  }
  0x98   : > { %v17767_v42 = vld [vmem:[#allocation2 + $0x8] sm:$0xff]   ;;  %845 = vst.msk [vmem:[#allocation2 + $0x30] sm:$0xf] %vm832_vm8, %v17010_v0  ;;  %846 = vst.msk [vmem:[#allocation2 + $0x34] sm:$0xf] %vm832_vm8, %v17011_v30  ;;  %v632_v8 = vpop.permute.xlu0 %631  ;;  %17444 = vmatprep.mubr.msk.bf16.mxu0 %vm1269_vm9, %v18295_v34  ;;  %v638_v62 = vpop.permute.xlu1 %637 }
  0x99   : > { %v678_v57 = vsel %vm651_vm7, %v530_v37, %v632_v8  ;;  %17479 = vmatmul.mubr.msk.bf16.vlgmr.msra.gmra.mxu1 %vm1269_vm9, %v17767_v42  ;;  %17445 = vmatmul.mubr.msk.bf16.vlgmr.msra.gmra.mxu0 %vm1269_vm9, %v17768_v46  ;;  %851 = vst.msk [vmem:[#allocation2 + $0x48] sm:$0xf] %vm832_vm8, %v17016_v18  ;;  %852 = vst.msk [vmem:[#allocation2 + $0x4c] sm:$0xf] %vm832_vm8, %v17017_v39  ;;  %v687_v56 = vsel %vm651_vm7, %v533_v45, %v638_v62  ;;  %v18332_v44 = vld [vmem:[#allocation2 + $0x28] sm:$0xff]   ;;  %v538_v8 = vsel %vm18223_vm6, 0, %v18184_v27 }
  0x9a   : > { %v17014_v22 = vcombine.low %v678_v57, %v678_v57  ;;  %v17015_v33 = vcombine.high %v678_v57, %v678_v57  ;;  %17482 = vmatprep.mubr.msk.bf16.mxu1 %vm1269_vm9, %v17769_v61  ;;  %17511 = vmatpush3.bf16.msra.mxu0 %v1973_v1  ;;  %v17020_v32 = vcombine.low %v687_v56, %v687_v56  ;;  %v536_v61 = vsel %vm18223_vm6, 0, %v18167_v63  ;;  %v17775_v60 = vld [vmem:[#allocation2 + $0x28] sm:$0xff]  }
  0x9b   : > { %17545 = vmatpush3.bf16.msra.mxu1 %v2265_v36  ;;  %17448 = vmatprep.mubr.msk.bf16.mxu0 %vm1269_vm9, %v18288_v14  ;;  %v17021_v29 = vcombine.high %v687_v56, %v687_v56  ;;  %v18339_v53 = vld [vmem:[#allocation2 + $0x20] sm:$0xff]  }
  0x9c   : > { %849 = vst.msk [vmem:[#allocation2 + $0x40] sm:$0xf] %vm832_vm8, %v17014_v22  ;;  %850 = vst.msk [vmem:[#allocation2 + $0x44] sm:$0xf] %vm832_vm8, %v17015_v33  ;;  %v636_v26 = vpop.permute.xlu0 %635  ;;  %17718 = vmatprep.subr.msk.bf16.mxu0 %vm1318_vm3, %v18312_v40  ;;  %17719 = vmatprep.subr.msk.bf16.mxu1 %vm1318_vm3, %v18321_v55  ;;  %v642_v10 = vpop.permute.xlu1 %641  ;;  %v17773_v58 = vld [vmem:[#allocation2 + $0x20] sm:$0xff]   ;;  %v18367_v15 = vld [vmem:[#allocation2 + $0x38] sm:$0xff]  }
  0x9d   : > { %v684_v38 = vsel %vm651_vm7, %v532_v49, %v636_v26  ;;  %855 = vst.msk [vmem:[#allocation2 + $0x58] sm:$0xf] %vm832_vm8, %v17020_v32  ;;  %856 = vst.msk [vmem:[#allocation2 + $0x5c] sm:$0xf] %vm832_vm8, %v17021_v29  ;;  %v693_v11 = vsel %vm651_vm7, %v535_v35, %v642_v10  ;;  %v17779_v26 = vld [vmem:[#allocation2 + $0x38] sm:$0xff]  }
  0x9e   : > { %v17018_v1 = vcombine.low %v684_v38, %v684_v38  ;;  %v17019_v51 = vcombine.high %v684_v38, %v684_v38  ;;  %v17024_v46 = vcombine.low %v693_v11, %v693_v11  ;;  %v17025_v3 = vcombine.high %v693_v11, %v693_v11 }
  0x9f   : > { %v18370_v50 = vld [vmem:[#allocation2 + $0x30] sm:$0xff]  }
  0xa0   : > { %853 = vst.msk [vmem:[#allocation2 + $0x50] sm:$0xf] %vm832_vm8, %v17018_v1  ;;  %854 = vst.msk [vmem:[#allocation2 + $0x54] sm:$0xf] %vm832_vm8, %v17019_v51  ;;  %v640_v52 = vpop.permute.xlu0 %639  ;;  %v646_v36 = vpop.permute.xlu1 %645  ;;  %v17777_v39 = vld [vmem:[#allocation2 + $0x30] sm:$0xff]   ;;  %v18394_v38 = vld [vmem:[#allocation2 + $0x48] sm:$0xff]  }
  0xa1   : > { %v690_v41 = vsel %vm651_vm7, %v534_v2, %v640_v52  ;;  %17483 = vmatmul.mubr.msk.bf16.gmra.mxu1 %vm1269_vm9, %v17771_v16  ;;  %17449 = vmatmul.mubr.msk.bf16.gmra.mxu0 %vm1269_vm9, %v18339_v53  ;;  %859 = vst.msk [vmem:[#allocation2 + $0x68] sm:$0xf] %vm832_vm8, %v17024_v46  ;;  %860 = vst.msk [vmem:[#allocation2 + $0x6c] sm:$0xf] %vm832_vm8, %v17025_v3  ;;  %v699_v54 = vsel %vm651_vm7, %v537_v23, %v646_v36 }
  0xa2   : > { %v17022_v59 = vcombine.low %v690_v41, %v690_v41  ;;  %v17023_v25 = vcombine.high %v690_v41, %v690_v41  ;;  %17486 = vmatprep.mubr.msk.bf16.mxu1 %vm1269_vm9, %v17773_v58  ;;  %17452 = vmatprep.mubr.msk.bf16.mxu0 %vm1269_vm9, %v18332_v44  ;;  %v17028_v30 = vcombine.low %v699_v54, %v699_v54 }
  0xa3   : > { %v17029_v37 = vcombine.high %v699_v54, %v699_v54  ;;  %v18398_v51 = vld [vmem:[#allocation2 + $0x40] sm:$0xff]  }
  0xa4   : > { %857 = vst.msk [vmem:[#allocation2 + $0x60] sm:$0xf] %vm832_vm8, %v17022_v59  ;;  %858 = vst.msk [vmem:[#allocation2 + $0x64] sm:$0xf] %vm832_vm8, %v17023_v25  ;;  %v644_v0 = vpop.permute.xlu0 %643  ;;  %v888_v18 = vpop.permute.xlu1 %887  ;;  %v17781_v58 = vld [vmem:[#allocation2 + $0x40] sm:$0xff]   ;;  %v17783_v59 = vld [vmem:[#allocation2 + $0x48] sm:$0xff]  }
  0xa5   : > { %v696_v63 = vsel %vm651_vm7, %v536_v61, %v644_v0  ;;  %863 = vst.msk [vmem:[#allocation2 + $0x78] sm:$0xf] %vm832_vm8, %v17028_v30  ;;  %864 = vst.msk [vmem:[#allocation2 + $0x7c] sm:$0xf] %vm832_vm8, %v17029_v37  ;;  %v924_v45 = vsel %vm651_vm7, %v17944_v5, %v888_v18  ;;  %v18420_v54 = vld [vmem:[#allocation2 + $0x58] sm:$0xff]  }
  0xa6   : > { %v17026_v49 = vcombine.low %v696_v63, %v696_v63  ;;  %v17027_v42 = vcombine.high %v696_v63, %v696_v63  ;;  %v17034_v22 = vcombine.low %v924_v45, %v924_v45  ;;  %v17035_v33 = vcombine.high %v924_v45, %v924_v45 }
  0xa7   : > { %v18424_v0 = vld [vmem:[#allocation2 + $0x50] sm:$0xff]  }
  0xa8   : > { %861 = vst.msk [vmem:[#allocation2 + $0x70] sm:$0xf] %vm832_vm8, %v17026_v49  ;;  %862 = vst.msk [vmem:[#allocation2 + $0x74] sm:$0xf] %vm832_vm8, %v17027_v42  ;;  %v648_v57 = vpop.permute.xlu0 %647  ;;  %v892_v5 = vpop.permute.xlu1 %891  ;;  %v17785_v63 = vld [vmem:[#allocation2 + $0x50] sm:$0xff]  }
  0xa9   : > { %v702_v62 = vsel %vm651_vm7, %v538_v8, %v648_v57  ;;  %17487 = vmatmul.mubr.msk.bf16.gmra.mxu1 %vm1269_vm9, %v17775_v60  ;;  %17453 = vmatmul.mubr.msk.bf16.gmra.mxu0 %vm1269_vm9, %v18370_v50  ;;  %1085 = vst.msk [vmem:[#allocation3] sm:$0xf] %vm832_vm8, %v17034_v22  ;;  %1086 = vst.msk [vmem:[#allocation3 + $0x4] sm:$0xf] %vm832_vm8, %v17035_v33  ;;  %v928_v16 = vsel %vm651_vm7, %v17942_v4, %v892_v5  ;;  %v17787_v57 = vld [vmem:[#allocation2 + $0x58] sm:$0xff]  }
  0xaa   : > { %v17030_v27 = vcombine.low %v702_v62, %v702_v62  ;;  %v17031_v56 = vcombine.high %v702_v62, %v702_v62  ;;  %17490 = vmatprep.mubr.msk.bf16.mxu1 %vm1269_vm9, %v17777_v39  ;;  %17456 = vmatprep.mubr.msk.bf16.mxu0 %vm1269_vm9, %v18367_v15  ;;  %v17038_v29 = vcombine.low %v928_v16, %v928_v16 }
  0xab   : > { %v17039_v35 = vcombine.high %v928_v16, %v928_v16  ;;  %v18450_v5 = vld [vmem:[#allocation2 + $0x60] sm:$0xff]  }
  0xac   : > { %865 = vst.msk [vmem:[#allocation2 + $0x80] sm:$0xf] %vm832_vm8, %v17030_v27  ;;  %866 = vst.msk [vmem:[#allocation2 + $0x84] sm:$0xf] %vm832_vm8, %v17031_v56  ;;  %v890_v32 = vpop.permute.xlu0 %889  ;;  %v896_v4 = vpop.permute.xlu1 %895  ;;  %v18446_v27 = vld [vmem:[#allocation2 + $0x68] sm:$0xff]  }
  0xad   : > { %v926_v1 = vsel %vm651_vm7, %v17954_v7, %v890_v32  ;;  %1089 = vst.msk [vmem:[#allocation3 + $0x10] sm:$0xf] %vm832_vm8, %v17038_v29  ;;  %1090 = vst.msk [vmem:[#allocation3 + $0x14] sm:$0xf] %vm832_vm8, %v17039_v35  ;;  %v932_v11 = vsel %vm651_vm7, %v17967_v13, %v896_v4  ;;  %v17789_v32 = vld [vmem:[#allocation2 + $0x60] sm:$0xff]  }
  0xae   : > { %v17036_v2 = vcombine.low %v926_v1, %v926_v1  ;;  %v17037_v10 = vcombine.high %v926_v1, %v926_v1  ;;  %v17042_v46 = vcombine.low %v932_v11, %v932_v11  ;;  %v17043_v7 = vcombine.high %v932_v11, %v932_v11 }
  0xaf   : > { %v497_v11 = vrot.slane %v495_v47, 7  ;;  %v17862_v47 = vld [vmem:[%s17937_s19 + $0x60] sm:$0xff]  }
  0xb0   : > { %1087 = vst.msk [vmem:[#allocation3 + $0x8] sm:$0xf] %vm832_vm8, %v17036_v2  ;;  %1088 = vst.msk [vmem:[#allocation3 + $0xc] sm:$0xf] %vm832_vm8, %v17037_v10  ;;  %v894_v52 = vpop.permute.xlu0 %893  ;;  %v900_v13 = vpop.permute.xlu1 %899  ;;  %v17861_v2 = vld [vmem:[%s17937_s19 + $0x50] sm:$0xff]  }
  0xb1   : > { %v930_v3 = vsel %vm651_vm7, %v17949_v6, %v894_v52  ;;  %17491 = vmatmul.mubr.msk.bf16.gmra.mxu1 %vm1269_vm9, %v17779_v26  ;;  %17457 = vmatmul.mubr.msk.bf16.gmra.mxu0 %vm1269_vm9, %v18398_v51  ;;  %1093 = vst.msk [vmem:[#allocation3 + $0x20] sm:$0xf] %vm832_vm8, %v17042_v46  ;;  %1094 = vst.msk [vmem:[#allocation3 + $0x24] sm:$0xf] %vm832_vm8, %v17043_v7  ;;  %v936_v6 = vsel %vm651_vm7, %v17982_v19, %v900_v13  ;;  %v17791_v46 = vld [vmem:[#allocation2 + $0x68] sm:$0xff]  }
  0xb2   : > { %v17040_v23 = vcombine.low %v930_v3, %v930_v3  ;;  %v17041_v41 = vcombine.high %v930_v3, %v930_v3  ;;  %17494 = vmatprep.mubr.msk.bf16.mxu1 %vm1269_vm9, %v17781_v58  ;;  %17460 = vmatprep.mubr.msk.bf16.mxu0 %vm1269_vm9, %v18394_v38  ;;  %v17046_v61 = vcombine.low %v936_v6, %v936_v6 }
  0xb3   : > { %v17047_v36 = vcombine.high %v936_v6, %v936_v6  ;;  %v18478_v6 = vld [vmem:[#allocation2 + $0x70] sm:$0xff]  }
  0xb4   : > { %1091 = vst.msk [vmem:[#allocation3 + $0x18] sm:$0xf] %vm832_vm8, %v17040_v23  ;;  %1092 = vst.msk [vmem:[#allocation3 + $0x1c] sm:$0xf] %vm832_vm8, %v17041_v41  ;;  %v898_v25 = vpop.permute.xlu0 %897  ;;  %v904_v19 = vpop.permute.xlu1 %903  ;;  %v18474_v41 = vld [vmem:[#allocation2 + $0x78] sm:$0xff]  }
  0xb5   : > { %v934_v60 = vsel %vm651_vm7, %v17958_v9, %v898_v25  ;;  %1097 = vst.msk [vmem:[#allocation3 + $0x30] sm:$0xf] %vm832_vm8, %v17046_v61  ;;  %1098 = vst.msk [vmem:[#allocation3 + $0x34] sm:$0xf] %vm832_vm8, %v17047_v36  ;;  %v940_v49 = vsel %vm651_vm7, %v17992_v21, %v904_v19  ;;  %v500_v61 = vor.u32 %v498_v12, %v497_v11  ;;  %v17793_v36 = vld [vmem:[#allocation2 + $0x70] sm:$0xff]  }
  0xb6   : > { %v17044_v30 = vcombine.low %v934_v60, %v934_v60  ;;  %v17045_v37 = vcombine.high %v934_v60, %v934_v60  ;;  %v17050_v8 = vcombine.low %v940_v49, %v940_v49  ;;  %v17051_v9 = vcombine.high %v940_v49, %v940_v49  ;;  %v17863_v60 = vld [vmem:[%s17937_s19 + $0x78] sm:$0xff]   ;;  %v17864_v49 = vld [vmem:[%s17937_s19 + $0x70] sm:$0xff]  }
  0xb7   : > { %v18505_v48 = vld [vmem:[#allocation3 + $0x8] sm:$0xff]  }
  0xb8   : > { %1095 = vst.msk [vmem:[#allocation3 + $0x28] sm:$0xf] %vm832_vm8, %v17044_v30  ;;  %1096 = vst.msk [vmem:[#allocation3 + $0x2c] sm:$0xf] %vm832_vm8, %v17045_v37  ;;  %v902_v42 = vpop.permute.xlu0 %901  ;;  %v908_v21 = vpop.permute.xlu1 %907 }
  0xb9   : > { %v938_v18 = vsel %vm651_vm7, %v17975_v17, %v902_v42  ;;  %17495 = vmatmul.mubr.msk.bf16.gmra.mxu1 %vm1269_vm9, %v17783_v59  ;;  %17461 = vmatmul.mubr.msk.bf16.gmra.mxu0 %vm1269_vm9, %v18424_v0  ;;  %1101 = vst.msk [vmem:[#allocation3 + $0x40] sm:$0xf] %vm832_vm8, %v17050_v8  ;;  %1102 = vst.msk [vmem:[#allocation3 + $0x44] sm:$0xf] %vm832_vm8, %v17051_v9  ;;  %v944_v17 = vsel %vm651_vm7, %v18002_v24, %v908_v21  ;;  %v539_v9 = vsel %vm18223_vm6, 0, %v500_v61 }
  0xba   : > { %v17048_v39 = vcombine.low %v938_v18, %v938_v18  ;;  %v17049_v45 = vcombine.high %v938_v18, %v938_v18  ;;  %17498 = vmatprep.mubr.msk.bf16.mxu1 %vm1269_vm9, %v17785_v63  ;;  %17464 = vmatprep.mubr.msk.bf16.mxu0 %vm1269_vm9, %v18420_v54  ;;  %v17054_v33 = vcombine.low %v944_v17, %v944_v17  ;;  %v17795_v18 = vld [vmem:[#allocation2 + $0x78] sm:$0xff]  }
  0xbb   : > { %v17055_v62 = vcombine.high %v944_v17, %v944_v17  ;;  %v18503_v17 = vld [vmem:[#allocation2 + $0x80] sm:$0xff]  }
  0xbc   : > { %1099 = vst.msk [vmem:[#allocation3 + $0x38] sm:$0xf] %vm832_vm8, %v17048_v39  ;;  %1100 = vst.msk [vmem:[#allocation3 + $0x3c] sm:$0xf] %vm832_vm8, %v17049_v45  ;;  %v906_v22 = vpop.permute.xlu0 %905  ;;  %v912_v24 = vpop.permute.xlu1 %911  ;;  %v17797_v45 = vld [vmem:[#allocation3] sm:$0xff]  }
  0xbd   : > { %v942_v56 = vsel %vm651_vm7, %v17987_v20, %v906_v22  ;;  %1105 = vst.msk [vmem:[#allocation3 + $0x50] sm:$0xf] %vm832_vm8, %v17054_v33  ;;  %1106 = vst.msk [vmem:[#allocation3 + $0x54] sm:$0xf] %vm832_vm8, %v17055_v62  ;;  %v948_v29 = vsel %vm651_vm7, %v18015_v31, %v912_v24  ;;  %v18515_v33 = vld [vmem:[#allocation3 + $0x10] sm:$0xff]   ;;  %v17799_v62 = vld [vmem:[#allocation3 + $0x8] sm:$0xff]  }
  0xbe   : > { %v17052_v16 = vcombine.low %v942_v56, %v942_v56  ;;  %v17053_v26 = vcombine.high %v942_v56, %v942_v56  ;;  %v17058_v1 = vcombine.low %v948_v29, %v948_v29  ;;  %v17059_v20 = vcombine.high %v948_v29, %v948_v29  ;;  %v17801_v56 = vld [vmem:[#allocation3 + $0x10] sm:$0xff]   ;;  %v18521_v24 = vld [vmem:[#allocation3 + $0x18] sm:$0xff]   ;;  %v18534_v29 = vld [vmem:[%s24030_s1 + $0x18] sm:$0xf] }
  0xc0   : > { %1103 = vst.msk [vmem:[#allocation3 + $0x48] sm:$0xf] %vm832_vm8, %v17052_v16  ;;  %1104 = vst.msk [vmem:[#allocation3 + $0x4c] sm:$0xf] %vm832_vm8, %v17053_v26  ;;  %v910_v35 = vpop.permute.xlu0 %909  ;;  %v916_v31 = vpop.permute.xlu1 %915  ;;  %v2594_v16 = vsel %vm1318_vm3, %v18312_v40, 0  ;;  %v2758_v26 = vsel %vm1318_vm3, %v18321_v55, 0 }
  0xc1   : > { %v946_v10 = vsel %vm651_vm7, %v17861_v2, %v910_v35  ;;  %17499 = vmatmul.mubr.msk.bf16.gmra.mxu1 %vm1269_vm9, %v17787_v57  ;;  %17465 = vmatmul.mubr.msk.bf16.gmra.mxu0 %vm1269_vm9, %v18450_v5  ;;  %1109 = vst.msk [vmem:[#allocation3 + $0x60] sm:$0xf] %vm832_vm8, %v17058_v1  ;;  %1110 = vst.msk [vmem:[#allocation3 + $0x64] sm:$0xf] %vm832_vm8, %v17059_v20  ;;  %v952_v52 = vsel %vm651_vm7, %v18040_v43, %v916_v31  ;;  %v18539_v40 = vld [vmem:[#allocation3 + $0x20] sm:$0xff]   ;;  %v17803_v35 = vld [vmem:[#allocation3 + $0x18] sm:$0xff]  }
  0xc2   : > { %v17056_v4 = vcombine.low %v946_v10, %v946_v10  ;;  %v17057_v58 = vcombine.high %v946_v10, %v946_v10  ;;  %17502 = vmatprep.mubr.msk.bf16.mxu1 %vm1269_vm9, %v17789_v32  ;;  %17468 = vmatprep.mubr.msk.bf16.mxu0 %vm1269_vm9, %v18446_v27  ;;  %v17062_v3 = vcombine.low %v952_v52, %v952_v52  ;;  %v18526_v32 = vld [vmem:[%s24030_s1 + $0x1c] sm:$0xf]  ;;  %v17805_v55 = vld [vmem:[#allocation3 + $0x20] sm:$0xff]   ;;  %v18553_v20 = vld [vmem:[#allocation3 + $0x30] sm:$0xff]  }
  0xc3   : > { %v17063_v23 = vcombine.high %v952_v52, %v952_v52  ;;  %v18545_v1 = vld [vmem:[#allocation3 + $0x28] sm:$0xff]   ;;  %v17809_v2 = vld [vmem:[#allocation3 + $0x30] sm:$0xff]   ;;  %v17813_v31 = vld [vmem:[#allocation3 + $0x40] sm:$0xff]  }
  0xc4   : > { %1107 = vst.msk [vmem:[#allocation3 + $0x58] sm:$0xf] %vm832_vm8, %v17056_v4  ;;  %1108 = vst.msk [vmem:[#allocation3 + $0x5c] sm:$0xf] %vm832_vm8, %v17057_v58  ;;  %v914_v7 = vpop.permute.xlu0 %913  ;;  %v920_v43 = vpop.permute.xlu1 %919  ;;  %v17807_v10 = vld [vmem:[#allocation3 + $0x28] sm:$0xff]   ;;  %v18555_v4 = vld [vmem:[#allocation3 + $0x38] sm:$0xff]  }
  0xc5   : > { %v950_v13 = vsel %vm651_vm7, %v17862_v47, %v914_v7  ;;  %1113 = vst.msk [vmem:[#allocation3 + $0x70] sm:$0xf] %vm832_vm8, %v17062_v3  ;;  %1114 = vst.msk [vmem:[#allocation3 + $0x74] sm:$0xf] %vm832_vm8, %v17063_v23  ;;  %v956_v30 = vsel %vm651_vm7, %v17863_v60, %v920_v43  ;;  %v18563_v58 = vld [vmem:[#allocation3 + $0x40] sm:$0xff]   ;;  %v17811_v11 = vld [vmem:[#allocation3 + $0x38] sm:$0xff]  }
  0xc6   : > { %v17060_v59 = vcombine.low %v950_v13, %v950_v13  ;;  %v17061_v25 = vcombine.high %v950_v13, %v950_v13  ;;  %v17066_v19 = vcombine.low %v956_v30, %v956_v30  ;;  %v17067_v63 = vcombine.high %v956_v30, %v956_v30  ;;  %v18573_v7 = vld [vmem:[#allocation3 + $0x50] sm:$0xff]  }
  0xc7   : > { %v18565_v52 = vld [vmem:[#allocation3 + $0x48] sm:$0xff]   ;;  %v17817_v3 = vld [vmem:[#allocation3 + $0x50] sm:$0xff]  }
  0xc8   : > { %1111 = vst.msk [vmem:[#allocation3 + $0x68] sm:$0xf] %vm832_vm8, %v17060_v59  ;;  %1112 = vst.msk [vmem:[#allocation3 + $0x6c] sm:$0xf] %vm832_vm8, %v17061_v25  ;;  %v918_v37 = vpop.permute.xlu0 %917  ;;  %v18583_v13 = vld [vmem:[#allocation3 + $0x60] sm:$0xff]  }
  0xc9   : > { %v954_v42 = vsel %vm651_vm7, %v17864_v49, %v918_v37  ;;  %17503 = vmatmul.mubr.msk.bf16.gmra.mxu1 %vm1269_vm9, %v17791_v46  ;;  %17469 = vmatmul.mubr.msk.bf16.gmra.mxu0 %vm1269_vm9, %v18478_v6  ;;  %1117 = vst.msk [vmem:[#allocation3 + $0x80] sm:$0xf] %vm832_vm8, %v17066_v19  ;;  %1118 = vst.msk [vmem:[#allocation3 + $0x84] sm:$0xf] %vm832_vm8, %v17067_v63  ;;  %v17815_v46 = vld [vmem:[#allocation3 + $0x48] sm:$0xff]   ;;  %v17821_v59 = vld [vmem:[#allocation3 + $0x60] sm:$0xff]  }
  0xca   : > { %v17064_v12 = vcombine.low %v954_v42, %v954_v42  ;;  %v17065_v8 = vcombine.high %v954_v42, %v954_v42  ;;  %17506 = vmatprep.mubr.msk.bf16.mxu1 %vm1269_vm9, %v17793_v36  ;;  %17472 = vmatprep.mubr.msk.bf16.mxu0 %vm1269_vm9, %v18474_v41  ;;  %v17829_v19 = vld [vmem:[#allocation2 + $0x10] sm:$0xff]   ;;  %v17830_v63 = vld [vmem:[#allocation2 + $0x18] sm:$0xff]   ;;  %v3087_v49 = vsel %vm1318_vm3, %v18526_v32, 0  ;;  %v3251_v42 = vsel %vm1318_vm3, %v18534_v29, 0 }
  0xcb   : > { %v18575_v23 = vld [vmem:[#allocation3 + $0x58] sm:$0xff]  }
  0xcc   : > { %1115 = vst.msk [vmem:[#allocation3 + $0x78] sm:$0xf] %vm832_vm8, %v17064_v12  ;;  %1116 = vst.msk [vmem:[#allocation3 + $0x7c] sm:$0xf] %vm832_vm8, %v17065_v8  ;;  %v650_v39 = vpop.permute.xlu0 %649  ;;  %v17819_v47 = vld [vmem:[#allocation3 + $0x58] sm:$0xff]   ;;  %v18593_v61 = vld [vmem:[#allocation3 + $0x70] sm:$0xff]  }
  0xcd   : > { %v705_v21 = vsel %vm651_vm7, %v539_v9, %v650_v39  ;;  %v17825_v36 = vld [vmem:[#allocation3 + $0x70] sm:$0xff]   ;;  %v17865_v12 = vld [vmem:[#allocation2 + $0x10] sm:$0xff]  }
  0xce   : > { %v17032_v57 = vcombine.low %v705_v21, %v705_v21  ;;  %v17033_v22 = vcombine.high %v705_v21, %v705_v21  ;;  %v17831_v8 = vld [vmem:[#allocation2 + $0x20] sm:$0xff]   ;;  %v17833_v9 = vld [vmem:[#allocation2 + $0x30] sm:$0xff]   ;;  %v17836_v21 = vld [vmem:[#allocation2 + $0x48] sm:$0xff]  }
  0xcf   : > { %v18585_v25 = vld [vmem:[#allocation3 + $0x68] sm:$0xff]   ;;  %v17835_v39 = vld [vmem:[#allocation2 + $0x40] sm:$0xff]  }
  0xd0   : > { %867 = vst.msk [vmem:[#allocation2 + $0x88] sm:$0xf] %vm832_vm8, %v17032_v57  ;;  %868 = vst.msk [vmem:[#allocation2 + $0x8c] sm:$0xf] %vm832_vm8, %v17033_v22  ;;  %v17823_v43 = vld [vmem:[#allocation3 + $0x68] sm:$0xff]   ;;  %v18603_v37 = vld [vmem:[#allocation3 + $0x80] sm:$0xff]  }
  0xd1   : > { %17507 = vmatmul.mubr.msk.bf16.gmra.mxu1 %vm1269_vm9, %v17795_v18  ;;  %17473 = vmatmul.mubr.msk.bf16.gmra.mxu0 %vm1269_vm9, %v18503_v17  ;;  %v17834_v18 = vld [vmem:[#allocation2 + $0x38] sm:$0xff]   ;;  %v17837_v57 = vld [vmem:[#allocation2 + $0x50] sm:$0xff]  }
  0xd2   : > { %17546 = vmatprep.mubr.msk.bf16.mxu1 %vm1269_vm9, %v17797_v45  ;;  %17512 = vmatprep.mubr.msk.bf16.mxu0 %vm1269_vm9, %v18505_v48 }
  0xd3   : > { %v18595_v60 = vld [vmem:[#allocation3 + $0x78] sm:$0xff]  }
  0xd4   : > { %v17827_v30 = vld [vmem:[#allocation3 + $0x78] sm:$0xff]  }
  0xd9   : > { %17547 = vmatmul.mubr.msk.bf16.vlgmr.msra.gmra.mxu1 %vm1269_vm9, %v17799_v62  ;;  %17513 = vmatmul.mubr.msk.bf16.vlgmr.msra.gmra.mxu0 %vm1269_vm9, %v18515_v33  ;;  %v17845_v62 = vld [vmem:[#allocation3 + $0x10] sm:$0xff]  }
  0xda   : > { %17550 = vmatprep.mubr.msk.bf16.mxu1 %vm1269_vm9, %v17801_v56  ;;  %17579 = vmatpush3.bf16.msra.mxu0 %v2594_v16  ;;  %v17892_v56 = vmov 1966171168   ;;  %v3450_v16 = vlaneseq }
  0xdb   : > { %17613 = vmatpush3.bf16.msra.mxu1 %v2758_v26  ;;  %17516 = vmatprep.mubr.msk.bf16.mxu0 %vm1269_vm9, %v18521_v24 }
  0xdc   : > { %17720 = vmatprep.subr.msk.bf16.mxu0 %vm1318_vm3, %v18526_v32  ;;  %17721 = vmatprep.subr.msk.bf16.mxu1 %vm1318_vm3, %v18534_v29  ;;  %v3451_v26 = vshrl.u32 %v3450_v16, 7  ;;  %v17301_v32 = vld [vmem:[%s24031_s2] ss:$0 sm:$0xff]  ;;  %v17846_v29 = vld [vmem:[#allocation3 + $0x18] sm:$0xff]  }
  0xe1   : > { %17551 = vmatmul.mubr.msk.bf16.gmra.mxu1 %vm1269_vm9, %v17803_v35  ;;  %17517 = vmatmul.mubr.msk.bf16.gmra.mxu0 %vm1269_vm9, %v18539_v40 }
  0xe2   : > { %17554 = vmatprep.mubr.msk.bf16.mxu1 %vm1269_vm9, %v17805_v55  ;;  %17520 = vmatprep.mubr.msk.bf16.mxu0 %vm1269_vm9, %v18545_v1  ;;  %v13405_v55 = vcombine.high %v17301_v32, %v17301_v32 }
  0xe9   : > { %17555 = vmatmul.mubr.msk.bf16.gmra.mxu1 %vm1269_vm9, %v17807_v10  ;;  %17521 = vmatmul.mubr.msk.bf16.gmra.mxu0 %vm1269_vm9, %v18553_v20 }
  0xea   : > { %17558 = vmatprep.mubr.msk.bf16.mxu1 %vm1269_vm9, %v17809_v2  ;;  %17524 = vmatprep.mubr.msk.bf16.mxu0 %vm1269_vm9, %v18555_v4 }
  0xf1   : > { %17559 = vmatmul.mubr.msk.bf16.gmra.mxu1 %vm1269_vm9, %v17811_v11  ;;  %17525 = vmatmul.mubr.msk.bf16.gmra.mxu0 %vm1269_vm9, %v18563_v58 }
  0xf2   : > { %17562 = vmatprep.mubr.msk.bf16.mxu1 %vm1269_vm9, %v17813_v31  ;;  %17528 = vmatprep.mubr.msk.bf16.mxu0 %vm1269_vm9, %v18565_v52 }
  0xf9   : > { %17563 = vmatmul.mubr.msk.bf16.gmra.mxu1 %vm1269_vm9, %v17815_v46  ;;  %17529 = vmatmul.mubr.msk.bf16.gmra.mxu0 %vm1269_vm9, %v18573_v7 }
  0xfa   : > { %17566 = vmatprep.mubr.msk.bf16.mxu1 %vm1269_vm9, %v17817_v3  ;;  %17532 = vmatprep.mubr.msk.bf16.mxu0 %vm1269_vm9, %v18575_v23 }
 0x101   : > { %17567 = vmatmul.mubr.msk.bf16.gmra.mxu1 %vm1269_vm9, %v17819_v47  ;;  %17533 = vmatmul.mubr.msk.bf16.gmra.mxu0 %vm1269_vm9, %v18583_v13 }
 0x102   : > { %17570 = vmatprep.mubr.msk.bf16.mxu1 %vm1269_vm9, %v17821_v59  ;;  %17536 = vmatprep.mubr.msk.bf16.mxu0 %vm1269_vm9, %v18585_v25 }
 0x109   : > { %17571 = vmatmul.mubr.msk.bf16.gmra.mxu1 %vm1269_vm9, %v17823_v43  ;;  %17537 = vmatmul.mubr.msk.bf16.gmra.mxu0 %vm1269_vm9, %v18593_v61 }
 0x10a   : > { %17574 = vmatprep.mubr.msk.bf16.mxu1 %vm1269_vm9, %v17825_v36  ;;  %17540 = vmatprep.mubr.msk.bf16.mxu0 %vm1269_vm9, %v18595_v60 }
 0x111   : > { %17575 = vmatmul.mubr.msk.bf16.gmra.mxu1 %vm1269_vm9, %v17827_v30  ;;  %17541 = vmatmul.mubr.msk.bf16.gmra.mxu0 %vm1269_vm9, %v18603_v37 }
 0x112   : > { %17614 = vmatprep.mubr.msk.bf16.mxu1 %vm1269_vm9, %v18295_v34  ;;  %17580 = vmatprep.mubr.msk.bf16.mxu0 %vm1269_vm9, %v17829_v19  ;;  %v17832_v34 = vld [vmem:[#allocation2 + $0x28] sm:$0xff]   ;;  %v18686_v19 = vsub.s32 0, %v3451_v26 }
 0x119   : > { %17615 = vmatmul.mubr.msk.bf16.vlgmr.msra.gmra.mxu1 %vm1269_vm9, %v17865_v12  ;;  %17581 = vmatmul.mubr.msk.bf16.vlgmr.msra.gmra.mxu0 %vm1269_vm9, %v17830_v63 }
 0x11a   : > { %17618 = vmatprep.mubr.msk.bf16.mxu1 %vm1269_vm9, %v18288_v14  ;;  %17647 = vmatpush3.bf16.msra.mxu0 %v3087_v49  ;;  %v922_v14 = vpop.permute.xlu1 %921 }
 0x11b   : > { %17681 = vmatpush3.bf16.msra.mxu1 %v3251_v42  ;;  %17584 = vmatprep.mubr.msk.bf16.mxu0 %vm1269_vm9, %v17831_v8 }
 0x121   : > { %17619 = vmatmul.mubr.msk.bf16.gmra.mxu1 %vm1269_vm9, %v18339_v53  ;;  %17585 = vmatmul.mubr.msk.bf16.gmra.mxu0 %vm1269_vm9, %v17832_v34  ;;  %v958_v53 = vsel %vm651_vm7, %v18218_v28, %v922_v14  ;;  %v17839_v28 = vld [vmem:[#allocation2 + $0x60] sm:$0xff]  }
 0x122   : > { %17622 = vmatprep.mubr.msk.bf16.mxu1 %vm1269_vm9, %v18332_v44  ;;  %17588 = vmatprep.mubr.msk.bf16.mxu0 %vm1269_vm9, %v17833_v9  ;;  %v17068_v45 = vcombine.low %v958_v53, %v958_v53  ;;  %v17069_v44 = vcombine.high %v958_v53, %v958_v53 }
 0x124   : > { %1119 = vst.msk [vmem:[#allocation3 + $0x88] sm:$0xf] %vm832_vm8, %v17068_v45  ;;  %1120 = vst.msk [vmem:[#allocation3 + $0x8c] sm:$0xf] %vm832_vm8, %v17069_v44 }
 0x129   : > { %17623 = vmatmul.mubr.msk.bf16.gmra.mxu1 %vm1269_vm9, %v18370_v50  ;;  %17589 = vmatmul.mubr.msk.bf16.gmra.mxu0 %vm1269_vm9, %v17834_v18  ;;  %v17840_v50 = vld [vmem:[#allocation2 + $0x68] sm:$0xff]  }
 0x12a   : > { %17626 = vmatprep.mubr.msk.bf16.mxu1 %vm1269_vm9, %v18367_v15  ;;  %17592 = vmatprep.mubr.msk.bf16.mxu0 %vm1269_vm9, %v17835_v39  ;;  %v17838_v15 = vld [vmem:[#allocation2 + $0x58] sm:$0xff]  }
 0x131   : > { %17627 = vmatmul.mubr.msk.bf16.gmra.mxu1 %vm1269_vm9, %v18398_v51  ;;  %17593 = vmatmul.mubr.msk.bf16.gmra.mxu0 %vm1269_vm9, %v17836_v21  ;;  %v17841_v51 = vld [vmem:[#allocation2 + $0x70] sm:$0xff]   ;;  %v17848_v21 = vld [vmem:[#allocation3 + $0x28] sm:$0xff]  }
 0x132   : > { %17630 = vmatprep.mubr.msk.bf16.mxu1 %vm1269_vm9, %v18394_v38  ;;  %17596 = vmatprep.mubr.msk.bf16.mxu0 %vm1269_vm9, %v17837_v57  ;;  %v17842_v38 = vld [vmem:[#allocation2 + $0x78] sm:$0xff]  }
 0x139   : > { %17631 = vmatmul.mubr.msk.bf16.gmra.mxu1 %vm1269_vm9, %v18424_v0  ;;  %17597 = vmatmul.mubr.msk.bf16.gmra.mxu0 %vm1269_vm9, %v17838_v15  ;;  %v17843_v0 = vld [vmem:[#allocation2 + $0x80] sm:$0xff]  }
 0x13a   : > { %17634 = vmatprep.mubr.msk.bf16.mxu1 %vm1269_vm9, %v18420_v54  ;;  %17600 = vmatprep.mubr.msk.bf16.mxu0 %vm1269_vm9, %v17839_v28  ;;  %v17844_v54 = vld [vmem:[#allocation2 + $0x88] sm:$0xff]  }
 0x141   : > { %17635 = vmatmul.mubr.msk.bf16.gmra.mxu1 %vm1269_vm9, %v18450_v5  ;;  %17601 = vmatmul.mubr.msk.bf16.gmra.mxu0 %vm1269_vm9, %v17840_v50  ;;  %v17891_v5 = vmov 1983009808  }
 0x142   : > { %17638 = vmatprep.mubr.msk.bf16.mxu1 %vm1269_vm9, %v18446_v27  ;;  %17604 = vmatprep.mubr.msk.bf16.mxu0 %vm1269_vm9, %v17841_v51  ;;  %v13407_v22 = vunpack.c.l.s4 %v17891_v5  ;;  %v3448_v27 = vunpack.c.l.s4 %v17892_v56 }
 0x149   : > { %17639 = vmatmul.mubr.msk.bf16.gmra.mxu1 %vm1269_vm9, %v18478_v6  ;;  %17605 = vmatmul.mubr.msk.bf16.gmra.mxu0 %vm1269_vm9, %v17842_v38  ;;  %v3449_v6 = vunpack.c.0.s8 %v3448_v27 }
 0x14a   : > { %17642 = vmatprep.mubr.msk.bf16.mxu1 %vm1269_vm9, %v18474_v41  ;;  %17608 = vmatprep.mubr.msk.bf16.mxu0 %vm1269_vm9, %v17843_v0  ;;  %v13408_v41 = vunpack.c.0.s8 %v13407_v22 }
 0x14b   : > { %v18671_v2 = vsub.s32 %v3449_v6, %v3451_v26 }
 0x14c   : > { %v18669_v35 = vsub.s32 %v13408_v41, %v3451_v26 }
 0x14e   : > { %v18680_v3 = vrot.slane %v17301_v32, %v18669_v35  ;;  %v18683_v47 = vrot.slane %v13405_v55, %v18669_v35 }
 0x150   : > { %v18695_v18 = vcombine.high %v18680_v3, %v18680_v3  ;;  %v18699_v39 = vcombine.high %v18683_v47, %v18683_v47 }
 0x151   : > { %17643 = vmatmul.mubr.msk.bf16.gmra.mxu1 %vm1269_vm9, %v18503_v17  ;;  %17609 = vmatmul.mubr.msk.bf16.gmra.mxu0 %vm1269_vm9, %v17844_v54  ;;  %v17847_v17 = vld [vmem:[#allocation3 + $0x20] sm:$0xff]  }
 0x152   : > { %17682 = vmatprep.mubr.msk.bf16.mxu1 %vm1269_vm9, %v18505_v48  ;;  %17648 = vmatprep.mubr.msk.bf16.mxu0 %vm1269_vm9, %v17845_v62  ;;  %v17849_v62 = vld [vmem:[#allocation3 + $0x30] sm:$0xff]  }
 0x159   : > { %v17480_v10 = vpop.f32.mrf.mxu1  ;;  %17683 = vmatmul.mubr.msk.bf16.vlgmr.msra.gmra.mxu1 %vm1269_vm9, %v18515_v33  ;;  %v17446_v48 = vpop.f32.mrf.mxu0  ;;  %17649 = vmatmul.mubr.msk.bf16.vlgmr.msra.gmra.mxu0 %vm1269_vm9, %v17846_v29 }
 0x15a   : > { %v1657_v31 = vadd.f32 %v17480_v10, %v17446_v48  ;;  %17686 = vmatprep.mubr.msk.bf16.mxu1 %vm1269_vm9, %v18521_v24  ;;  %17652 = vmatprep.mubr.msk.bf16.mxu0 %vm1269_vm9, %v17847_v17 }
 0x15b   : > { %v1648_v11 = vpop.f32.mrf.mxu1  ;;  %v1356_v46 = vpop.f32.mrf.mxu0 }
 0x15c   : > { %v3544_v59 = vcombine.high %v1657_v31, %v1657_v31  ;;  %v3551_v33 = vrot.slane %v1657_v31, %v18671_v2  ;;  %v1649_v43 = vadd.f32 %v1648_v11, %v1356_v46 }
 0x15d   : > { %v17481_v36 = vpop.f32.mrf.mxu1  ;;  %v17447_v30 = vpop.f32.mrf.mxu0 }
 0x15e   : > { %v3558_v24 = vrot.slane %v3544_v59, %v18671_v2  ;;  %v3559_v63 = vcombine.high %v3551_v33, %v3551_v33  ;;  %v18690_v49 = vrot.slane %v3551_v33, %v18671_v2  ;;  %v3446_v42 = vcombine.high %v1649_v43, %v1649_v43 }
 0x15f   : > { %v3453_v12 = vrot.slane %v1649_v43, %v18671_v2  ;;  %v1660_v8 = vadd.f32 %v17481_v36, %v17447_v30  ;;  %v1651_v34 = vpop.f32.mrf.mxu1  ;;  %v1359_v9 = vpop.f32.mrf.mxu0 }
 0x160   : > { %v3560_v14 = vcombine.high %v3558_v24, %v3558_v24  ;;  %v18702_v53 = vrot.slane %v3558_v24, %v18671_v2  ;;  %v18705_v45 = vrot.slane %v3559_v63, %v18671_v2  ;;  %v3460_v57 = vrot.slane %v3446_v42, %v18671_v2 }
 0x161   : > { %v3461_v15 = vcombine.high %v3453_v12, %v3453_v12  ;;  %v18711_v28 = vrot.slane %v3453_v12, %v18671_v2  ;;  %v3593_v50 = vcombine.high %v1660_v8, %v1660_v8  ;;  %v17484_v51 = vpop.f32.mrf.mxu1  ;;  %17687 = vmatmul.mubr.msk.bf16.gmra.mxu1 %vm1269_vm9, %v18539_v40  ;;  %v17450_v38 = vpop.f32.mrf.mxu0  ;;  %v3600_v22 = vrot.slane %v1660_v8, %v18671_v2 }
 0x162   : > { %v18716_v0 = vrot.slane %v3560_v14, %v18671_v2  ;;  %17653 = vmatmul.mubr.msk.bf16.gmra.mxu0 %vm1269_vm9, %v17848_v21  ;;  %v3462_v56 = vcombine.high %v3460_v57, %v3460_v57  ;;  %v18725_v27 = vrot.slane %v3460_v57, %v18671_v2  ;;  %17690 = vmatprep.mubr.msk.bf16.mxu1 %vm1269_vm9, %v18545_v1  ;;  %v17850_v21 = vld [vmem:[#allocation3 + $0x38] sm:$0xff]  }
 0x163   : > { %v18728_v40 = vrot.slane %v3461_v15, %v18671_v2  ;;  %v1664_v41 = vpop.f32.mrf.mxu1  ;;  %v1372_v6 = vpop.f32.mrf.mxu0  ;;  %v3607_v32 = vrot.slane %v3593_v50, %v18671_v2  ;;  %v3608_v29 = vcombine.high %v3600_v22, %v3600_v22  ;;  %v18738_v55 = vrot.slane %v3600_v22, %v18671_v2  ;;  %17656 = vmatprep.mubr.msk.bf16.mxu0 %vm1269_vm9, %v17849_v62 }
 0x164   : > { %v18742_v17 = vrot.slane %v3462_v56, %v18671_v2  ;;  %v1652_v48 = vadd.f32 %v1651_v34, %v1359_v9  ;;  %v1673_v63 = vadd.f32 %v17484_v51, %v17450_v38  ;;  %v1665_v14 = vadd.f32 %v1664_v41, %v1372_v6  ;;  %v17851_v6 = vld [vmem:[#allocation3 + $0x40] sm:$0xff]  }
 0x165   : > { %v18748_v31 = vpop.f32.mrf.mxu1  ;;  %v18750_v11 = vpop.f32.mrf.mxu0  ;;  %v3609_v46 = vcombine.high %v3607_v32, %v3607_v32  ;;  %v18753_v59 = vrot.slane %v3607_v32, %v18671_v2  ;;  %v18756_v33 = vrot.slane %v3608_v29, %v18671_v2 }
 0x166   : > { %v3495_v30 = vcombine.high %v1652_v48, %v1652_v48  ;;  %v3502_v24 = vrot.slane %v1652_v48, %v18671_v2  ;;  %v3740_v51 = vcombine.high %v1673_v63, %v1673_v63  ;;  %v3747_v56 = vrot.slane %v1673_v63, %v18671_v2 }
 0x167   : > { %v1667_v42 = vpop.f32.mrf.mxu1  ;;  %v1375_v12 = vpop.f32.mrf.mxu0  ;;  %v18764_v8 = vrot.slane %v3609_v46, %v18671_v2  ;;  %v3642_v32 = vcombine.high %v1665_v14, %v1665_v14  ;;  %v3649_v41 = vrot.slane %v1665_v14, %v18671_v2  ;;  %v1676_v16 = vadd.f32 %v18748_v31, %v18750_v11 }
 0x168   : > { %v3509_v57 = vrot.slane %v3495_v30, %v18671_v2  ;;  %v3510_v15 = vcombine.high %v3502_v24, %v3502_v24  ;;  %v18772_v50 = vrot.slane %v3502_v24, %v18671_v2  ;;  %v3754_v63 = vrot.slane %v3740_v51, %v18671_v2 }
 0x169   : > { %v17488_v38 = vpop.f32.mrf.mxu1  ;;  %17691 = vmatmul.mubr.msk.bf16.gmra.mxu1 %vm1269_vm9, %v18553_v20  ;;  %v17454_v22 = vpop.f32.mrf.mxu0  ;;  %v3755_v14 = vcombine.high %v3747_v56, %v3747_v56  ;;  %v3657_v62 = vcombine.high %v3649_v41, %v3649_v41  ;;  %v3789_v11 = vcombine.high %v1676_v16, %v1676_v16 }
 0x16a   : > { %17657 = vmatmul.mubr.msk.bf16.gmra.mxu0 %vm1269_vm9, %v17850_v21  ;;  %v3511_v29 = vcombine.high %v3509_v57, %v3509_v57  ;;  %v18782_v48 = vrot.slane %v3509_v57, %v18671_v2  ;;  %v18785_v46 = vrot.slane %v3510_v15, %v18671_v2  ;;  %17694 = vmatprep.mubr.msk.bf16.mxu1 %vm1269_vm9, %v18555_v4 }
 0x16b   : > { %v1680_v30 = vpop.f32.mrf.mxu1  ;;  %v1388_v24 = vpop.f32.mrf.mxu0  ;;  %v18793_v21 = vrot.slane %v3747_v56, %v18671_v2  ;;  %v3656_v57 = vrot.slane %v3642_v32, %v18671_v2  ;;  %17660 = vmatprep.mubr.msk.bf16.mxu0 %vm1269_vm9, %v17851_v6  ;;  %v3756_v56 = vcombine.high %v3754_v63, %v3754_v63  ;;  %v18809_v9 = vrot.slane %v3754_v63, %v18671_v2 }
 0x16c   : > { %v18798_v15 = vrot.slane %v3511_v29, %v18671_v2  ;;  %v18812_v32 = vrot.slane %v3755_v14, %v18671_v2  ;;  %v18819_v4 = vrot.slane %v3649_v41, %v18671_v2  ;;  %v18836_v10 = vrot.slane %v3657_v62, %v18671_v2  ;;  %v17852_v41 = vld [vmem:[#allocation3 + $0x48] sm:$0xff]  }
 0x16d   : > { %v18804_v34 = vpop.f32.mrf.mxu1  ;;  %v18806_v51 = vpop.f32.mrf.mxu0  ;;  %v3658_v20 = vcombine.high %v3656_v57, %v3656_v57  ;;  %v18822_v43 = vrot.slane %v3656_v57, %v18671_v2  ;;  %v18829_v14 = vrot.slane %v3756_v56, %v18671_v2  ;;  %v1689_v6 = vadd.f32 %v17488_v38, %v17454_v22  ;;  %v17853_v56 = vld [vmem:[#allocation3 + $0x50] sm:$0xff]  }
 0x16e   : > { %v1681_v54 = vadd.f32 %v1680_v30, %v1388_v24  ;;  %v3803_v22 = vrot.slane %v3789_v11, %v18671_v2 }
 0x16f   : > { %v18824_v36 = vpop.f32.mrf.mxu1  ;;  %v18826_v63 = vpop.f32.mrf.mxu0  ;;  %v18839_v57 = vrot.slane %v3658_v20, %v18671_v2  ;;  %v1668_v20 = vadd.f32 %v1667_v42, %v1375_v12  ;;  %v3936_v12 = vcombine.high %v1689_v6, %v1689_v6  ;;  %v3943_v38 = vrot.slane %v1689_v6, %v18671_v2 }
 0x170   : > { %v3838_v62 = vcombine.high %v1681_v54, %v1681_v54  ;;  %v18880_v11 = vrot.slane %v3803_v22, %v18671_v2 }
 0x171   : > { %24411 = vst [vmem:[#allocation4_spill] sm:$0xff] %v18839_v57  ;;  %17695 = vmatmul.mubr.msk.bf16.gmra.mxu1 %vm1269_vm9, %v18563_v58  ;;  %v18853_v26 = vpop.f32.mrf.mxu1  ;;  %v18855_v1 = vpop.f32.mrf.mxu0  ;;  %v3796_v58 = vrot.slane %v1676_v16, %v18671_v2  ;;  %v3691_v29 = vcombine.high %v1668_v20, %v1668_v20  ;;  %v3698_v42 = vrot.slane %v1668_v20, %v18671_v2  ;;  %v17854_v57 = vld [vmem:[#allocation3 + $0x58] sm:$0xff]  }
 0x172   : > { %17661 = vmatmul.mubr.msk.bf16.gmra.mxu0 %vm1269_vm9, %v17852_v41  ;;  %17698 = vmatprep.mubr.msk.bf16.mxu1 %vm1269_vm9, %v18565_v52  ;;  %v3950_v24 = vrot.slane %v3936_v12, %v18671_v2  ;;  %24414 = vst [vmem:[#allocation7_spill] sm:$0xff] %v18880_v11 }
 0x173   : > { %17664 = vmatprep.mubr.msk.bf16.mxu0 %vm1269_vm9, %v17853_v56  ;;  %v3804_v41 = vcombine.high %v3796_v58, %v3796_v58  ;;  %v18868_v31 = vrot.slane %v3796_v58, %v18671_v2  ;;  %v3705_v16 = vrot.slane %v3691_v29, %v18671_v2  ;;  %v3706_v30 = vcombine.high %v3698_v42, %v3698_v42  ;;  %v18875_v20 = vpop.f32.mrf.mxu1  ;;  %v18877_v6 = vpop.f32.mrf.mxu0  ;;  %v17855_v29 = vld [vmem:[#allocation3 + $0x60] sm:$0xff]  }
 0x174   : > { %v18872_v52 = vrot.slane %v3698_v42, %v18671_v2  ;;  %v3805_v56 = vcombine.high %v3803_v22, %v3803_v22  ;;  %v3952_v44 = vcombine.high %v3950_v24, %v3950_v24  ;;  %v18922_v11 = vrot.slane %v3950_v24, %v18671_v2 }
 0x175   : > { %24412 = vst [vmem:[#allocation5_spill] sm:$0xff] %v18868_v31  ;;  %v18883_v58 = vrot.slane %v3804_v41, %v18671_v2  ;;  %v3707_v5 = vcombine.high %v3705_v16, %v3705_v16  ;;  %v18888_v42 = vrot.slane %v3705_v16, %v18671_v2  ;;  %v18891_v12 = vrot.slane %v3706_v30, %v18671_v2  ;;  %v18913_v41 = vpop.f32.mrf.mxu0 }
 0x176   : > { %24413 = vst [vmem:[#allocation6_spill] sm:$0xff] %v18872_v52  ;;  %v18896_v22 = vrot.slane %v3805_v56, %v18671_v2  ;;  %v3951_v31 = vcombine.high %v3943_v38, %v3943_v38  ;;  %v18911_v52 = vpop.f32.mrf.mxu1  ;;  %24417 = vst [vmem:[#allocation10_spill] sm:$0xff] %v18922_v11  ;;  %v1692_v56 = vadd.f32 %v18804_v34, %v18806_v51 }
 0x177   : > { %v18905_v16 = vrot.slane %v3707_v5, %v18671_v2  ;;  %v18919_v5 = vrot.slane %v3943_v38, %v18671_v2  ;;  %v3852_v38 = vrot.slane %v3838_v62, %v18671_v2  ;;  %v18952_v24 = vpop.f32.mrf.mxu0  ;;  %v1684_v34 = vadd.f32 %v18824_v36, %v18826_v63 }
 0x178   : > { %v18925_v30 = vrot.slane %v3951_v31, %v18671_v2  ;;  %v3985_v11 = vcombine.high %v1692_v56, %v1692_v56 }
 0x179   : > { %17699 = vmatmul.mubr.msk.bf16.gmra.mxu1 %vm1269_vm9, %v18573_v7  ;;  %24415 = vst [vmem:[#allocation8_spill] sm:$0xff] %v18905_v16  ;;  %24416 = vst [vmem:[#allocation9_spill] sm:$0xff] %v18919_v5  ;;  %v3845_v7 = vrot.slane %v1681_v54, %v18671_v2  ;;  %v3854_v16 = vcombine.high %v3852_v38, %v3852_v38  ;;  %v18955_v31 = vrot.slane %v3852_v38, %v18671_v2  ;;  %v17856_v38 = vld [vmem:[#allocation3 + $0x68] sm:$0xff]  }
 0x17a   : > { %17665 = vmatmul.mubr.msk.bf16.gmra.mxu0 %vm1269_vm9, %v17854_v57  ;;  %24418 = vst [vmem:[#allocation11_spill] sm:$0xff] %v18925_v30  ;;  %17702 = vmatprep.mubr.msk.bf16.mxu1 %vm1269_vm9, %v18575_v23  ;;  %v18932_v57 = vrot.slane %v3952_v44, %v18671_v2  ;;  %v3992_v23 = vrot.slane %v1692_v56, %v18671_v2  ;;  %v18985_v30 = vpop.f32.mrf.mxu0 }
 0x17b   : > { %17668 = vmatprep.mubr.msk.bf16.mxu0 %vm1269_vm9, %v17855_v29  ;;  %v3853_v54 = vcombine.high %v3845_v7, %v3845_v7  ;;  %v18948_v62 = vrot.slane %v3845_v7, %v18671_v2  ;;  %v18950_v29 = vpop.f32.mrf.mxu1  ;;  %24420 = vst [vmem:[#allocation13_spill] sm:$0xff] %v18955_v31  ;;  %v18964_v44 = vrot.slane %v3854_v16, %v18671_v2 }
 0x17c   : > { %24419 = vst [vmem:[#allocation12_spill] sm:$0xff] %v18932_v57  ;;  %v1705_v57 = vadd.f32 %v18853_v26, %v18855_v1  ;;  %v3999_v56 = vrot.slane %v3985_v11, %v18671_v2  ;;  %v4000_v5 = vcombine.high %v3992_v23, %v3992_v23  ;;  %v18974_v36 = vrot.slane %v3992_v23, %v18671_v2  ;;  %v17857_v11 = vld [vmem:[#allocation3 + $0x70] sm:$0xff]   ;;  %v19021_v31 = vpop.f32.mrf.mxu0 }
 0x17d   : > { %v18961_v51 = vrot.slane %v3853_v54, %v18671_v2  ;;  %24421 = vst [vmem:[#allocation14_spill] sm:$0xff] %v18964_v44  ;;  %v3887_v26 = vcombine.high %v1684_v34, %v1684_v34  ;;  %v3894_v1 = vrot.slane %v1684_v34, %v18671_v2  ;;  %v18983_v54 = vpop.f32.mrf.mxu1 }
 0x17e   : > { %24422 = vst [vmem:[#allocation15_spill] sm:$0xff] %v18974_v36  ;;  %v4001_v23 = vcombine.high %v3999_v56, %v3999_v56  ;;  %v18989_v7 = vrot.slane %v3999_v56, %v18671_v2 }
 0x17f   : > { %v3901_v34 = vrot.slane %v3887_v26, %v18671_v2  ;;  %v3902_v63 = vcombine.high %v3894_v1, %v3894_v1  ;;  %v19000_v44 = vrot.slane %v3894_v1, %v18671_v2 }
 0x180   : > { %24423 = vst [vmem:[#allocation16_spill] sm:$0xff] %v18989_v7  ;;  %v19004_v56 = vrot.slane %v4001_v23, %v18671_v2  ;;  %v19019_v23 = vpop.f32.mrf.mxu1 }
 0x181   : > { %17703 = vmatmul.mubr.msk.bf16.gmra.mxu1 %vm1269_vm9, %v18583_v13  ;;  %v18992_v13 = vrot.slane %v4000_v5, %v18671_v2  ;;  %24425 = vst [vmem:[#allocation18_spill] sm:$0xff] %v19000_v44  ;;  %v3903_v36 = vcombine.high %v3901_v34, %v3901_v34  ;;  %v19012_v26 = vrot.slane %v3901_v34, %v18671_v2 }
 0x182   : > { %17669 = vmatmul.mubr.msk.bf16.gmra.mxu0 %vm1269_vm9, %v17856_v38  ;;  %17706 = vmatprep.mubr.msk.bf16.mxu1 %vm1269_vm9, %v18585_v25  ;;  %v4132_v38 = vcombine.high %v1705_v57, %v1705_v57  ;;  %v4139_v25 = vrot.slane %v1705_v57, %v18671_v2  ;;  %v19015_v1 = vrot.slane %v3902_v63, %v18671_v2 }
 0x183   : > { %24424 = vst [vmem:[#allocation17_spill] sm:$0xff] %v18992_v13  ;;  %17672 = vmatprep.mubr.msk.bf16.mxu0 %vm1269_vm9, %v17857_v11  ;;  %24426 = vst [vmem:[#allocation19_spill] sm:$0xff] %v19012_v26  ;;  %v19030_v34 = vrot.slane %v3903_v36, %v18671_v2  ;;  %v1697_v44 = vadd.f32 %v18875_v20, %v18877_v6  ;;  %v17858_v13 = vld [vmem:[#allocation3 + $0x78] sm:$0xff]   ;;  %v1708_v6 = vadd.f32 %v18911_v52, %v18913_v41  ;;  %v17463_v26 = vpop.f32.mrf.mxu0 }
 0x184   : > { %24427 = vst [vmem:[#allocation20_spill] sm:$0xff] %v19015_v1  ;;  %v4146_v16 = vrot.slane %v4132_v38, %v18671_v2  ;;  %v4147_v57 = vcombine.high %v4139_v25, %v4139_v25  ;;  %v19027_v7 = vrot.slane %v4139_v25, %v18671_v2 }
 0x185   : > { %24429 = vst [vmem:[#allocation22_spill] sm:$0xff] %v19030_v34  ;;  %v4034_v11 = vcombine.high %v1697_v44, %v1697_v44  ;;  %v4041_v20 = vrot.slane %v1697_v44, %v18671_v2  ;;  %v1700_v44 = vadd.f32 %v18950_v29, %v18952_v24  ;;  %v4188_v36 = vrot.slane %v1708_v6, %v18671_v2 }
 0x186   : > { %24428 = vst [vmem:[#allocation21_spill] sm:$0xff] %v19027_v7  ;;  %v4148_v5 = vcombine.high %v4146_v16, %v4146_v16  ;;  %v19039_v38 = vrot.slane %v4146_v16, %v18671_v2  ;;  %v19042_v25 = vrot.slane %v4147_v57, %v18671_v2  ;;  %v17497_v16 = vpop.f32.mrf.mxu1  ;;  %v17859_v57 = vld [vmem:[#allocation3 + $0x80] sm:$0xff]  }
 0x187   : > { %v4048_v52 = vrot.slane %v4034_v11, %v18671_v2  ;;  %v4049_v41 = vcombine.high %v4041_v20, %v4041_v20  ;;  %v4083_v63 = vcombine.high %v1700_v44, %v1700_v44  ;;  %v4090_v24 = vrot.slane %v1700_v44, %v18671_v2 }
 0x188   : > { %24430 = vst [vmem:[#allocation23_spill] sm:$0xff] %v19039_v38  ;;  %24431 = vst [vmem:[#allocation24_spill] sm:$0xff] %v19042_v25  ;;  %v19055_v1 = vrot.slane %v4148_v5, %v18671_v2  ;;  %v4181_v5 = vcombine.high %v1708_v6, %v1708_v6  ;;  %v1715_v25 = vpop.f32.mrf.mxu1  ;;  %v17860_v38 = vld [vmem:[#allocation3 + $0x88] sm:$0xff]   ;;  %v19084_v6 = vrot.slane %v4188_v36, %v18671_v2 }
 0x189   : > { %17707 = vmatmul.mubr.msk.bf16.gmra.mxu1 %vm1269_vm9, %v18593_v61  ;;  %v4050_v29 = vcombine.high %v4048_v52, %v4048_v52  ;;  %v19078_v11 = vrot.slane %v4049_v41, %v18671_v2  ;;  %v4097_v44 = vrot.slane %v4083_v63, %v18671_v2  ;;  %v19107_v41 = vrot.slane %v4090_v24, %v18671_v2 }
 0x18a   : > { %17673 = vmatmul.mubr.msk.bf16.gmra.mxu0 %vm1269_vm9, %v17858_v13  ;;  %24432 = vst [vmem:[#allocation25_spill] sm:$0xff] %v19055_v1  ;;  %17710 = vmatprep.mubr.msk.bf16.mxu1 %vm1269_vm9, %v18595_v60  ;;  %v19067_v13 = vrot.slane %v4041_v20, %v18671_v2  ;;  %v19075_v60 = vrot.slane %v4048_v52, %v18671_v2  ;;  %24434 = vst [vmem:[#allocation27_spill] sm:$0xff] %v19084_v6 }
 0x18b   : > { %17676 = vmatprep.mubr.msk.bf16.mxu0 %vm1269_vm9, %v17859_v57  ;;  %v1423_v57 = vpop.f32.mrf.mxu0  ;;  %v4195_v61 = vrot.slane %v4181_v5, %v18671_v2  ;;  %v4196_v1 = vcombine.high %v4188_v36, %v4188_v36  ;;  %v19088_v52 = vrot.slane %v4050_v29, %v18671_v2  ;;  %v4099_v29 = vcombine.high %v4097_v44, %v4097_v44 }
 0x18c   : > { %24433 = vst [vmem:[#allocation26_spill] sm:$0xff] %v19067_v13  ;;  %v4098_v13 = vcombine.high %v4090_v24, %v4090_v24  ;;  %24438 = vst [vmem:[#allocation31_spill] sm:$0xff] %v19107_v41  ;;  %v19110_v20 = vrot.slane %v4097_v44, %v18671_v2 }
 0x18d   : > { %24435 = vst [vmem:[#allocation28_spill] sm:$0xff] %v19088_v52  ;;  %v4197_v7 = vcombine.high %v4195_v61, %v4195_v61  ;;  %v19095_v34 = vrot.slane %v4195_v61, %v18671_v2  ;;  %v19098_v5 = vrot.slane %v4196_v1, %v18671_v2  ;;  %v19112_v61 = vpop.f32.mrf.mxu1  ;;  %v19114_v1 = vpop.f32.mrf.mxu0  ;;  %v19128_v44 = vrot.slane %v4099_v29, %v18671_v2 }
 0x18e   : > { %24439 = vst [vmem:[#allocation32_spill] sm:$0xff] %v19110_v20  ;;  %v19125_v24 = vrot.slane %v4098_v13, %v18671_v2  ;;  %v1713_v13 = vadd.f32 %v19019_v23, %v19021_v31  ;;  %v1724_v29 = vadd.f32 %v17497_v16, %v17463_v26 }
 0x18f   : > { %24436 = vst [vmem:[#allocation29_spill] sm:$0xff] %v19095_v34  ;;  %24437 = vst [vmem:[#allocation30_spill] sm:$0xff] %v19098_v5  ;;  %v19118_v63 = vrot.slane %v4197_v7, %v18671_v2  ;;  %v1721_v7 = vadd.f32 %v18983_v54, %v18985_v30  ;;  %v1728_v20 = vpop.f32.mrf.mxu1  ;;  %v1436_v5 = vpop.f32.mrf.mxu0 }
 0x190   : > { %24441 = vst [vmem:[#allocation34_spill] sm:$0xff] %v19125_v24  ;;  %24442 = vst [vmem:[#allocation35_spill] sm:$0xff] %v19128_v44  ;;  %v4230_v30 = vcombine.high %v1713_v13, %v1713_v13  ;;  %v4237_v54 = vrot.slane %v1713_v13, %v18671_v2 }
 0x191   : > { %17711 = vmatmul.mubr.msk.bf16.gmra.mxu1 %vm1269_vm9, %v18603_v37  ;;  %24440 = vst [vmem:[#allocation33_spill] sm:$0xff] %v19118_v63  ;;  %v4328_v6 = vcombine.high %v1721_v7, %v1721_v7  ;;  %v4335_v41 = vrot.slane %v1721_v7, %v18671_v2  ;;  %v4377_v37 = vcombine.high %v1724_v29, %v1724_v29  ;;  %v17467_v34 = vpop.f32.mrf.mxu0 }
 0x192   : > { %17677 = vmatmul.mubr.msk.bf16.gmra.mxu0 %vm1269_vm9, %v17860_v38  ;;  %v1716_v38 = vadd.f32 %v1715_v25, %v1423_v57  ;;  %v4384_v63 = vrot.slane %v1724_v29, %v18671_v2  ;;  %v4244_v23 = vrot.slane %v4230_v30, %v18671_v2  ;;  %v4245_v16 = vcombine.high %v4237_v54, %v4237_v54 }
 0x193   : > { %v4342_v36 = vrot.slane %v4328_v6, %v18671_v2  ;;  %v4343_v24 = vcombine.high %v4335_v41, %v4335_v41  ;;  %v19149_v31 = vrot.slane %v4335_v41, %v18671_v2  ;;  %v19153_v25 = vrot.slane %v4237_v54, %v18671_v2  ;;  %v17501_v41 = vpop.f32.mrf.mxu1 }
 0x194   : > { %v4279_v26 = vcombine.high %v1716_v38, %v1716_v38  ;;  %v4391_v57 = vrot.slane %v4377_v37, %v18671_v2  ;;  %v4246_v44 = vcombine.high %v4244_v23, %v4244_v23  ;;  %v19165_v30 = vrot.slane %v4244_v23, %v18671_v2 }
 0x195   : > { %24443 = vst [vmem:[#allocation36_spill] sm:$0xff] %v19149_v31  ;;  %24444 = vst [vmem:[#allocation37_spill] sm:$0xff] %v19153_v25  ;;  %v4344_v7 = vcombine.high %v4342_v36, %v4342_v36  ;;  %v19157_v13 = vrot.slane %v4342_v36, %v18671_v2  ;;  %v19160_v29 = vrot.slane %v4343_v24, %v18671_v2 }
 0x196   : > { %24446 = vst [vmem:[#allocation39_spill] sm:$0xff] %v19165_v30  ;;  %v19168_v54 = vrot.slane %v4245_v16, %v18671_v2  ;;  %v4392_v31 = vcombine.high %v4384_v63, %v4384_v63  ;;  %v19180_v52 = vrot.slane %v4246_v44, %v18671_v2  ;;  %v4393_v37 = vcombine.high %v4391_v57, %v4391_v57  ;;  %v1731_v44 = vpop.f32.mrf.mxu1 }
 0x197   : > { %24445 = vst [vmem:[#allocation38_spill] sm:$0xff] %v19160_v29  ;;  %v19173_v36 = vrot.slane %v4344_v7, %v18671_v2  ;;  %v19189_v25 = vrot.slane %v4384_v63, %v18671_v2  ;;  %v19192_v24 = vrot.slane %v4391_v57, %v18671_v2  ;;  %v1439_v29 = vpop.f32.mrf.mxu0  ;;  %v4286_v30 = vrot.slane %v1716_v38, %v18671_v2 }
 0x198   : > { %24447 = vst [vmem:[#allocation40_spill] sm:$0xff] %v19168_v54  ;;  %24449 = vst [vmem:[#allocation42_spill] sm:$0xff] %v19180_v52  ;;  %v19195_v6 = vrot.slane %v4392_v31, %v18671_v2  ;;  %v19200_v16 = vrot.slane %v4393_v37, %v18671_v2  ;;  %v4293_v7 = vrot.slane %v4279_v26, %v18671_v2 }
 0x199   : > { %24448 = vst [vmem:[#allocation41_spill] sm:$0xff] %v19173_v36  ;;  %24450 = vst [vmem:[#allocation43_spill] sm:$0xff] %v19189_v25  ;;  %v1737_v54 = vadd.f32 %v19112_v61, %v19114_v1  ;;  %v4294_v23 = vcombine.high %v4286_v30, %v4286_v30  ;;  %v19215_v38 = vrot.slane %v4286_v30, %v18671_v2  ;;  %v17504_v25 = vpop.f32.mrf.mxu1  ;;  %v17470_v31 = vpop.f32.mrf.mxu0 }
 0x19a   : > { %24451 = vst [vmem:[#allocation44_spill] sm:$0xff] %v19192_v24  ;;  %24452 = vst [vmem:[#allocation45_spill] sm:$0xff] %v19195_v6  ;;  %v4295_v52 = vcombine.high %v4293_v7, %v4293_v7  ;;  %v19218_v26 = vrot.slane %v4293_v7, %v18671_v2  ;;  %v1729_v24 = vadd.f32 %v1728_v20, %v1436_v5 }
 0x19b   : > { %24453 = vst [vmem:[#allocation46_spill] sm:$0xff] %v19200_v16  ;;  %24454 = vst [vmem:[#allocation47_spill] sm:$0xff] %v19215_v38  ;;  %v4524_v63 = vcombine.high %v1737_v54, %v1737_v54  ;;  %v4531_v57 = vrot.slane %v1737_v54, %v18671_v2  ;;  %v19222_v6 = vrot.slane %v4294_v23, %v18671_v2  ;;  %v1452_v7 = vpop.f32.mrf.mxu0 }
 0x19c   : > { %24455 = vst [vmem:[#allocation48_spill] sm:$0xff] %v19218_v26  ;;  %v19225_v61 = vrot.slane %v4295_v52, %v18671_v2  ;;  %v1740_v30 = vadd.f32 %v17501_v41, %v17467_v34  ;;  %v4426_v54 = vcombine.high %v1729_v24, %v1729_v24  ;;  %v4433_v23 = vrot.slane %v1729_v24, %v18671_v2 }
 0x19d   : > { %24456 = vst [vmem:[#allocation49_spill] sm:$0xff] %v19222_v6  ;;  %v4538_v37 = vrot.slane %v4524_v63, %v18671_v2  ;;  %v4539_v16 = vcombine.high %v4531_v57, %v4531_v57  ;;  %v19233_v20 = vrot.slane %v4531_v57, %v18671_v2  ;;  %v1744_v57 = vpop.f32.mrf.mxu1 }
 0x19e   : > { %24457 = vst [vmem:[#allocation50_spill] sm:$0xff] %v19225_v61  ;;  %v4440_v5 = vrot.slane %v4426_v54, %v18671_v2  ;;  %v4441_v26 = vcombine.high %v4433_v23, %v4433_v23  ;;  %v19250_v52 = vrot.slane %v4433_v23, %v18671_v2  ;;  %v4573_v61 = vcombine.high %v1740_v30, %v1740_v30 }
 0x19f   : > { %24458 = vst [vmem:[#allocation51_spill] sm:$0xff] %v19233_v20  ;;  %v4540_v1 = vcombine.high %v4538_v37, %v4538_v37  ;;  %v19241_v34 = vrot.slane %v4538_v37, %v18671_v2  ;;  %v19244_v41 = vrot.slane %v4539_v16, %v18671_v2  ;;  %v4580_v63 = vrot.slane %v1740_v30, %v18671_v2  ;;  %v17505_v30 = vpop.f32.mrf.mxu1 }
 0x1a0   : > { %24461 = vst [vmem:[#allocation54_spill] sm:$0xff] %v19250_v52  ;;  %v4442_v20 = vcombine.high %v4440_v5, %v4440_v5  ;;  %v19261_v6 = vrot.slane %v4440_v5, %v18671_v2  ;;  %v19264_v54 = vrot.slane %v4441_v26, %v18671_v2  ;;  %v4587_v37 = vrot.slane %v4573_v61, %v18671_v2 }
 0x1a1   : > { %24459 = vst [vmem:[#allocation52_spill] sm:$0xff] %v19241_v34  ;;  %24460 = vst [vmem:[#allocation53_spill] sm:$0xff] %v19244_v41  ;;  %v19253_v24 = vrot.slane %v4540_v1, %v18671_v2  ;;  %v4588_v34 = vcombine.high %v4580_v63, %v4580_v63  ;;  %v19272_v16 = vrot.slane %v4580_v63, %v18671_v2  ;;  %v17471_v41 = vpop.f32.mrf.mxu0 }
 0x1a2   : > { %24463 = vst [vmem:[#allocation56_spill] sm:$0xff] %v19261_v6  ;;  %24464 = vst [vmem:[#allocation57_spill] sm:$0xff] %v19264_v54  ;;  %v19275_v5 = vrot.slane %v4442_v20, %v18671_v2  ;;  %v1732_v52 = vadd.f32 %v1731_v44, %v1439_v29  ;;  %v4589_v38 = vcombine.high %v4587_v37, %v4587_v37 }
 0x1a3   : > { %24462 = vst [vmem:[#allocation55_spill] sm:$0xff] %v19253_v24  ;;  %24465 = vst [vmem:[#allocation58_spill] sm:$0xff] %v19272_v16  ;;  %v19282_v1 = vrot.slane %v4587_v37, %v18671_v2  ;;  %v19285_v61 = vrot.slane %v4588_v34, %v18671_v2  ;;  %v1753_v6 = vadd.f32 %v17504_v25, %v17470_v31  ;;  %v1747_v37 = vpop.f32.mrf.mxu1  ;;  %v1455_v54 = vpop.f32.mrf.mxu0 }
 0x1a4   : > { %24466 = vst [vmem:[#allocation59_spill] sm:$0xff] %v19275_v5  ;;  %v4475_v24 = vcombine.high %v1732_v52, %v1732_v52  ;;  %v4482_v26 = vrot.slane %v1732_v52, %v18671_v2  ;;  %v19293_v23 = vrot.slane %v4589_v38, %v18671_v2  ;;  %v1745_v34 = vadd.f32 %v1744_v57, %v1452_v7 }
 0x1a5   : > { %24467 = vst [vmem:[#allocation60_spill] sm:$0xff] %v19282_v1  ;;  %24468 = vst [vmem:[#allocation61_spill] sm:$0xff] %v19285_v61  ;;  %v4720_v52 = vcombine.high %v1753_v6, %v1753_v6  ;;  %v4727_v31 = vrot.slane %v1753_v6, %v18671_v2 }
 0x1a6   : > { %24469 = vst [vmem:[#allocation62_spill] sm:$0xff] %v19293_v23  ;;  %v4489_v63 = vrot.slane %v4475_v24, %v18671_v2  ;;  %v4490_v16 = vcombine.high %v4482_v26, %v4482_v26  ;;  %v19301_v20 = vrot.slane %v4482_v26, %v18671_v2  ;;  %v4622_v38 = vcombine.high %v1745_v34, %v1745_v34  ;;  %v17508_v23 = vpop.f32.mrf.mxu1 }
 0x1a7   : > { %v4629_v29 = vrot.slane %v1745_v34, %v18671_v2  ;;  %v4734_v26 = vrot.slane %v4720_v52, %v18671_v2  ;;  %v4735_v44 = vcombine.high %v4727_v31, %v4727_v31  ;;  %v19317_v25 = vrot.slane %v4727_v31, %v18671_v2  ;;  %v17474_v34 = vpop.f32.mrf.mxu0 }
 0x1a8   : > { %24470 = vst [vmem:[#allocation63_spill] sm:$0xff] %v19301_v20  ;;  %v4491_v1 = vcombine.high %v4489_v63, %v4489_v63  ;;  %v19308_v7 = vrot.slane %v4489_v63, %v18671_v2  ;;  %v19311_v57 = vrot.slane %v4490_v16, %v18671_v2  ;;  %v4636_v6 = vrot.slane %v4622_v38, %v18671_v2 }
 0x1a9   : > { %24473 = vst [vmem:[#allocation66_spill] sm:$0xff] %v19317_v25  ;;  %v4637_v24 = vcombine.high %v4629_v29, %v4629_v29  ;;  %v4736_v20 = vcombine.high %v4734_v26, %v4734_v26  ;;  %v19328_v52 = vrot.slane %v4734_v26, %v18671_v2  ;;  %v19331_v31 = vrot.slane %v4735_v44, %v18671_v2  ;;  %v1468_v25 = vpop.f32.mrf.mxu0 }
 0x1aa   : > { %24471 = vst [vmem:[#allocation64_spill] sm:$0xff] %v19308_v7  ;;  %24472 = vst [vmem:[#allocation65_spill] sm:$0xff] %v19311_v57  ;;  %v19321_v61 = vrot.slane %v4491_v1, %v18671_v2  ;;  %v4638_v5 = vcombine.high %v4636_v6, %v4636_v6  ;;  %v19338_v16 = vrot.slane %v4629_v29, %v18671_v2  ;;  %v1760_v1 = vpop.f32.mrf.mxu1 }
 0x1ab   : > { %24475 = vst [vmem:[#allocation68_spill] sm:$0xff] %v19328_v52  ;;  %24476 = vst [vmem:[#allocation69_spill] sm:$0xff] %v19331_v31  ;;  %v19341_v63 = vrot.slane %v4636_v6, %v18671_v2  ;;  %v19344_v7 = vrot.slane %v4736_v20, %v18671_v2  ;;  %v19351_v38 = vrot.slane %v4637_v24, %v18671_v2 }
 0x1ac   : > { %24474 = vst [vmem:[#allocation67_spill] sm:$0xff] %v19321_v61  ;;  %24477 = vst [vmem:[#allocation70_spill] sm:$0xff] %v19338_v16  ;;  %v19354_v29 = vrot.slane %v4638_v5, %v18671_v2  ;;  %v1756_v61 = vadd.f32 %v17505_v30, %v17471_v41  ;;  %v1748_v24 = vadd.f32 %v1747_v37, %v1455_v54  ;;  %v17475_v37 = vpop.f32.mrf.mxu0 }
 0x1ad   : > { %24478 = vst [vmem:[#allocation71_spill] sm:$0xff] %v19341_v63  ;;  %24479 = vst [vmem:[#allocation72_spill] sm:$0xff] %v19351_v38  ;;  %v1769_v31 = vadd.f32 %v17508_v23, %v17474_v34  ;;  %v1761_v36 = vadd.f32 %v1760_v1, %v1468_v25  ;;  %v17509_v23 = vpop.f32.mrf.mxu1 }
 0x1ae   : > { %24480 = vst [vmem:[#allocation73_spill] sm:$0xff] %v19354_v29  ;;  %v4769_v5 = vcombine.high %v1756_v61, %v1756_v61  ;;  %v4776_v57 = vrot.slane %v1756_v61, %v18671_v2  ;;  %v4671_v6 = vcombine.high %v1748_v24, %v1748_v24  ;;  %v4678_v16 = vrot.slane %v1748_v24, %v18671_v2  ;;  %v1471_v63 = vpop.f32.mrf.mxu0 }
 0x1af   : > { %v4916_v20 = vcombine.high %v1769_v31, %v1769_v31  ;;  %v4923_v41 = vrot.slane %v1769_v31, %v18671_v2  ;;  %v4818_v54 = vcombine.high %v1761_v36, %v1761_v36 }
 0x1b0   : > { %v4783_v30 = vrot.slane %v4769_v5, %v18671_v2  ;;  %v4784_v44 = vcombine.high %v4776_v57, %v4776_v57  ;;  %v19371_v26 = vrot.slane %v4776_v57, %v18671_v2  ;;  %v4685_v34 = vrot.slane %v4671_v6, %v18671_v2 }
 0x1b1   : > { %v4686_v52 = vcombine.high %v4678_v16, %v4678_v16  ;;  %v19375_v61 = vrot.slane %v4678_v16, %v18671_v2  ;;  %v4930_v25 = vrot.slane %v4916_v20, %v18671_v2  ;;  %v4931_v57 = vcombine.high %v4923_v41, %v4923_v41 }
 0x1b2   : > { %24481 = vst [vmem:[#allocation74_spill] sm:$0xff] %v19371_v26  ;;  %v4785_v1 = vcombine.high %v4783_v30, %v4783_v30  ;;  %v19379_v31 = vrot.slane %v4783_v30, %v18671_v2  ;;  %v19382_v24 = vrot.slane %v4784_v44, %v18671_v2  ;;  %v4687_v5 = vcombine.high %v4685_v34, %v4685_v34  ;;  %v1763_v26 = vpop.f32.mrf.mxu1 }
 0x1b3   : > { %24482 = vst [vmem:[#allocation75_spill] sm:$0xff] %v19375_v61  ;;  %v19387_v29 = vrot.slane %v4685_v34, %v18671_v2  ;;  %v19390_v6 = vrot.slane %v4686_v52, %v18671_v2  ;;  %v19411_v44 = vrot.slane %v4923_v41, %v18671_v2  ;;  %v19414_v30 = vrot.slane %v4930_v25, %v18671_v2 }
 0x1b4   : > { %24483 = vst [vmem:[#allocation76_spill] sm:$0xff] %v19379_v31  ;;  %24484 = vst [vmem:[#allocation77_spill] sm:$0xff] %v19382_v24  ;;  %v19395_v20 = vrot.slane %v4785_v1, %v18671_v2  ;;  %v19402_v34 = vrot.slane %v4687_v5, %v18671_v2  ;;  %v4932_v1 = vcombine.high %v4930_v25, %v4930_v25 }
 0x1b5   : > { %24485 = vst [vmem:[#allocation78_spill] sm:$0xff] %v19387_v29  ;;  %24486 = vst [vmem:[#allocation79_spill] sm:$0xff] %v19390_v6  ;;  %v19417_v31 = vrot.slane %v4931_v57, %v18671_v2  ;;  %v4825_v16 = vrot.slane %v1761_v36, %v18671_v2  ;;  %v4832_v29 = vrot.slane %v4818_v54, %v18671_v2  ;;  %v17548_v6 = vpop.f32.mrf.mxu1 }
 0x1b6   : > { %24487 = vst [vmem:[#allocation80_spill] sm:$0xff] %v19395_v20  ;;  %24488 = vst [vmem:[#allocation81_spill] sm:$0xff] %v19402_v34  ;;  %v19422_v52 = vrot.slane %v4932_v1, %v18671_v2  ;;  %v1772_v61 = vadd.f32 %v17509_v23, %v17475_v37  ;;  %v17514_v20 = vpop.f32.mrf.mxu0 }
 0x1b7   : > { %24489 = vst [vmem:[#allocation82_spill] sm:$0xff] %v19411_v44  ;;  %24490 = vst [vmem:[#allocation83_spill] sm:$0xff] %v19414_v30  ;;  %v4833_v5 = vcombine.high %v4825_v16, %v4825_v16  ;;  %v4834_v34 = vcombine.high %v4832_v29, %v4832_v29  ;;  %v19435_v36 = vrot.slane %v4825_v16, %v18671_v2 }
 0x1b8   : > { %24491 = vst [vmem:[#allocation84_spill] sm:$0xff] %v19417_v31  ;;  %24492 = vst [vmem:[#allocation85_spill] sm:$0xff] %v19422_v52  ;;  %v19438_v54 = vrot.slane %v4832_v29, %v18671_v2  ;;  %v4965_v41 = vcombine.high %v1772_v61, %v1772_v61  ;;  %v4972_v25 = vrot.slane %v1772_v61, %v18671_v2 }
 0x1b9   : > { %24493 = vst [vmem:[#allocation86_spill] sm:$0xff] %v19435_v36  ;;  %v1764_v30 = vadd.f32 %v1763_v26, %v1471_v63  ;;  %v19442_v57 = vrot.slane %v4833_v5, %v18671_v2  ;;  %v19445_v23 = vrot.slane %v4834_v34, %v18671_v2  ;;  %v2310_v1 = vadd.f32 %v17548_v6, %v17514_v20 }
 0x1ba   : > { %24494 = vst [vmem:[#allocation87_spill] sm:$0xff] %v19438_v54  ;;  %v4979_v29 = vrot.slane %v4965_v41, %v18671_v2  ;;  %v4980_v52 = vcombine.high %v4972_v25, %v4972_v25  ;;  %v19453_v31 = vrot.slane %v4972_v25, %v18671_v2  ;;  %v2009_v41 = vpop.f32.mrf.mxu0 }
 0x1bb   : > { %24495 = vst [vmem:[#allocation88_spill] sm:$0xff] %v19442_v57  ;;  %24496 = vst [vmem:[#allocation89_spill] sm:$0xff] %v19445_v23  ;;  %v4867_v61 = vcombine.high %v1764_v30, %v1764_v30  ;;  %v4874_v34 = vrot.slane %v1764_v30, %v18671_v2  ;;  %v5400_v26 = vcombine.high %v2310_v1, %v2310_v1  ;;  %v2301_v23 = vpop.f32.mrf.mxu1 }
 0x1bc   : > { %24497 = vst [vmem:[#allocation90_spill] sm:$0xff] %v19453_v31  ;;  %v4981_v5 = vcombine.high %v4979_v29, %v4979_v29  ;;  %v19461_v6 = vrot.slane %v4979_v29, %v18671_v2  ;;  %v19464_v20 = vrot.slane %v4980_v52, %v18671_v2  ;;  %v5407_v29 = vrot.slane %v2310_v1, %v18671_v2 }
 0x1bd   : > { %v4881_v25 = vrot.slane %v4867_v61, %v18671_v2  ;;  %v4882_v16 = vcombine.high %v4874_v34, %v4874_v34  ;;  %v19470_v63 = vrot.slane %v4874_v34, %v18671_v2  ;;  %v2302_v54 = vadd.f32 %v2301_v23, %v2009_v41 }
 0x1be   : > { %24498 = vst [vmem:[#allocation91_spill] sm:$0xff] %v19461_v6  ;;  %24499 = vst [vmem:[#allocation92_spill] sm:$0xff] %v19464_v20  ;;  %v19473_v37 = vrot.slane %v4981_v5, %v18671_v2  ;;  %v5414_v6 = vrot.slane %v5400_v26, %v18671_v2  ;;  %v5415_v52 = vcombine.high %v5407_v29, %v5407_v29 }
 0x1bf   : > { %24500 = vst [vmem:[#allocation93_spill] sm:$0xff] %v19470_v63  ;;  %v4883_v31 = vcombine.high %v4881_v25, %v4881_v25  ;;  %v19481_v61 = vrot.slane %v4881_v25, %v18671_v2  ;;  %v19484_v34 = vrot.slane %v4882_v16, %v18671_v2  ;;  %v5423_v1 = vrot.slane %v5407_v29, %v18671_v2 }
 0x1c0   : > { %24501 = vst [vmem:[#allocation94_spill] sm:$0xff] %v19473_v37  ;;  %v5416_v57 = vcombine.high %v5414_v6, %v5414_v6  ;;  %v5430_v5 = vrot.slane %v5414_v6, %v18671_v2  ;;  %v5437_v30 = vrot.slane %v5415_v52, %v18671_v2  ;;  %v5309_v37 = vrot.slane %v2302_v54, %v18671_v2 }
 0x1c1   : > { %24502 = vst [vmem:[#allocation95_spill] sm:$0xff] %v19481_v61  ;;  %24503 = vst [vmem:[#allocation96_spill] sm:$0xff] %v19484_v34  ;;  %v19493_v20 = vrot.slane %v4883_v31, %v18671_v2  ;;  %v5445_v63 = vcombine.high %v5423_v1, %v5423_v1  ;;  %v6937_v29 = vrot.slane %v5423_v1, %v18686_v19 }
 0x1c2   : > { %v5302_v31 = vcombine.high %v2302_v54, %v2302_v54  ;;  %v5444_v25 = vrot.slane %v5416_v57, %v18671_v2  ;;  %v5446_v61 = vcombine.high %v5430_v5, %v5430_v5  ;;  %v5447_v36 = vcombine.high %v5437_v30, %v5437_v30 }
 0x1c3   : > { %24504 = vst [vmem:[#allocation97_spill] sm:$0xff] %v19493_v20  ;;  %v6941_v23 = vrot.slane %v5437_v30, %v18686_v19  ;;  %v6945_v41 = vrot.slane %v5445_v63, %v18686_v19  ;;  %v6953_v6 = vrot.slane %v5430_v5, %v18686_v19  ;;  %v8167_v52 = vsel %vm519_vm4, %v18690_v49, %v6937_v29 }
 0x1c4   : > { %v5316_v26 = vrot.slane %v5302_v31, %v18671_v2  ;;  %v5448_v16 = vcombine.high %v5444_v25, %v5444_v25  ;;  %v6949_v1 = vrot.slane %v5447_v36, %v18686_v19  ;;  %v6957_v54 = vrot.slane %v5444_v25, %v18686_v19 }
 0x1c5   : > { %v6961_v57 = vrot.slane %v5446_v61, %v18686_v19  ;;  %v8168_v20 = vsel %vm519_vm4, %v18705_v45, %v6941_v23  ;;  %v24505_v63 = vcombine.high %v18690_v49, %v18690_v49  ;;  %v8171_v5 = vsel %vm519_vm4, %v18702_v53, %v6953_v6  ;;  %v19537_v6 = vpop.f32.mrf.mxu0 }
 0x1c6   : > { %v13458_v29 = vadd.f32 %v18680_v3, %v8167_v52  ;;  %v6965_v36 = vrot.slane %v5448_v16, %v18686_v19  ;;  %v24506_v25 = vcombine.high %v18705_v45, %v18705_v45  ;;  %v8172_v31 = vsel %vm519_vm4, %v18716_v0, %v6957_v54 }
 0x1c7   : > { %v8169_v30 = vsel %vm519_vm4, %v24505_v63, %v6945_v41  ;;  %v24507_v49 = vcombine.high %v18702_v53, %v18702_v53  ;;  %v19535_v41 = vpop.f32.mrf.mxu1  ;;  %v13459_v52 = vadd.f32 %v18695_v18, %v8168_v20  ;;  %v24508_v54 = vcombine.high %v18716_v0, %v18716_v0 }
 0x1c8   : > { %v8170_v61 = vsel %vm519_vm4, %v24506_v25, %v6949_v1  ;;  %v13460_v16 = vadd.f32 %v18683_v47, %v8169_v30  ;;  %v13462_v1 = vadd.f32 %v18680_v3, %v8171_v5  ;;  %v13463_v53 = vadd.f32 %v18695_v18, %v8172_v31 }
 0x1c9   : > { %v8173_v23 = vsel %vm519_vm4, %v24507_v49, %v6961_v57  ;;  %v13461_v45 = vadd.f32 %v18699_v39, %v8170_v61  ;;  %v8174_v63 = vsel %vm519_vm4, %v24508_v54, %v6965_v36  ;;  %v5317_v25 = vcombine.high %v5309_v37, %v5309_v37  ;;  %v2304_v24 = vpop.f32.mrf.mxu1  ;;  %v2012_v36 = vpop.f32.mrf.mxu0 }
 0x1ca   : > { %v13464_v57 = vadd.f32 %v18683_v47, %v8173_v23  ;;  %v13465_v49 = vadd.f32 %v18699_v39, %v8174_v63  ;;  %v14586_v20 = vcombine.low %v13458_v29, %v13459_v52  ;;  %v5318_v30 = vcombine.high %v5316_v26, %v5316_v26 }
 0x1cb   : > { %v14587_v34 = vcombine.low %v13460_v16, %v13461_v45  ;;  %v14603_v44 = vcombine.low %v13462_v1, %v13463_v53  ;;  %v5325_v61 = vrot.slane %v5309_v37, %v18671_v2  ;;  %v5332_v5 = vrot.slane %v5316_v26, %v18671_v2 }
 0x1cc   : > { %v5339_v0 = vrot.slane %v5317_v25, %v18671_v2  ;;  %v14594_v31 = vrot.slane %v14586_v20, %v18669_v35  ;;  %v14604_v54 = vcombine.low %v13464_v57, %v13465_v49  ;;  %v5346_v38 = vrot.slane %v5318_v30, %v18671_v2  ;;  %v17552_v49 = vpop.f32.mrf.mxu1 }
 0x1cd   : > { %v14601_v23 = vrot.slane %v14587_v34, %v18669_v35  ;;  %v14611_v37 = vrot.slane %v14603_v44, %v18669_v35  ;;  %v5347_v26 = vcombine.high %v5325_v61, %v5325_v61  ;;  %v5348_v29 = vcombine.high %v5332_v5, %v5332_v5  ;;  %v17518_v44 = vpop.f32.mrf.mxu0 }
 0x1ce   : > { %v5349_v52 = vcombine.high %v5339_v0, %v5339_v0  ;;  %v14618_v45 = vrot.slane %v14604_v54, %v18669_v35  ;;  %v5350_v1 = vcombine.high %v5346_v38, %v5346_v38  ;;  %v6873_v34 = vrot.slane %v5325_v61, %v18686_v19 }
 0x1cf   : > { %v14602_v16 = vcombine.low %v14594_v31, %v14601_v23  ;;  %v6877_v63 = vrot.slane %v5339_v0, %v18686_v19  ;;  %v6881_v53 = vrot.slane %v5347_v26, %v18686_v19  ;;  %v6889_v25 = vrot.slane %v5332_v5, %v18686_v19 }
 0x1d0   : > { %v6885_v57 = vrot.slane %v5349_v52, %v18686_v19  ;;  %v14619_v20 = vcombine.low %v14611_v37, %v14618_v45  ;;  %v6893_v30 = vrot.slane %v5346_v38, %v18686_v19  ;;  %v6897_v31 = vrot.slane %v5348_v29, %v18686_v19 }
 0x1d1   : > { %16762 = vst.msk [vmem:[%s19560_s18 + $0x40] sm:$0xff] %vm651_vm7, %v14602_v16  ;;  %v6901_v61 = vrot.slane %v5350_v1, %v18686_v19  ;;  %v8151_v0 = vsel %vm519_vm4, %v18711_v28, %v6873_v34  ;;  %v8152_v23 = vsel %vm519_vm4, %v18728_v40, %v6877_v63  ;;  %v24509_v5 = vcombine.high %v18711_v28, %v18711_v28 }
 0x1d2   : > { %v24510_v37 = vcombine.high %v18728_v40, %v18728_v40  ;;  %16763 = vst.msk [vmem:[%s19560_s18 + $0x48] sm:$0xff] %vm651_vm7, %v14619_v20  ;;  %v8155_v26 = vsel %vm519_vm4, %v18725_v27, %v6889_v25  ;;  %v8156_v29 = vsel %vm519_vm4, %v18742_v17, %v6893_v30  ;;  %v24511_v52 = vcombine.high %v18725_v27, %v18725_v27 }
 0x1d3   : > { %v8153_v54 = vsel %vm519_vm4, %v24509_v5, %v6881_v53  ;;  %v24512_v16 = vcombine.high %v18742_v17, %v18742_v17  ;;  %v13426_v45 = vadd.f32 %v18680_v3, %v8151_v0  ;;  %v13427_v1 = vadd.f32 %v18695_v18, %v8152_v23  ;;  %v2317_v53 = vpop.f32.mrf.mxu1 }
 0x1d4   : > { %v8154_v38 = vsel %vm519_vm4, %v24510_v37, %v6885_v57  ;;  %v8157_v28 = vsel %vm519_vm4, %v24511_v52, %v6897_v31  ;;  %v13428_v34 = vadd.f32 %v18683_v47, %v8153_v54  ;;  %v2025_v57 = vpop.f32.mrf.mxu0  ;;  %v13430_v25 = vadd.f32 %v18680_v3, %v8155_v26 }
 0x1d5   : > { %v8158_v40 = vsel %vm519_vm4, %v24512_v16, %v6901_v61  ;;  %v13429_v63 = vadd.f32 %v18699_v39, %v8154_v38  ;;  %v13431_v27 = vadd.f32 %v18695_v18, %v8156_v29  ;;  %v13432_v20 = vadd.f32 %v18683_v47, %v8157_v28 }
 0x1d6   : > { %v13433_v17 = vadd.f32 %v18699_v39, %v8158_v40  ;;  %v14450_v30 = vcombine.low %v13426_v45, %v13427_v1  ;;  %v2313_v61 = vadd.f32 %v19535_v41, %v19537_v6  ;;  %v2305_v0 = vadd.f32 %v2304_v24, %v2012_v36 }
 0x1d7   : > { %v14451_v31 = vcombine.low %v13428_v34, %v13429_v63  ;;  %v14467_v23 = vcombine.low %v13430_v25, %v13431_v27  ;;  %v19610_v54 = vadd.f32 %v17552_v49, %v17518_v44  ;;  %v19612_v37 = vadd.f32 %v2317_v53, %v2025_v57 }
 0x1d8   : > { %v14468_v5 = vcombine.low %v13432_v20, %v13433_v17  ;;  %v14458_v38 = vrot.slane %v14450_v30, %v18669_v35  ;;  %v5449_v29 = vcombine.high %v2313_v61, %v2313_v61  ;;  %v5456_v52 = vrot.slane %v2313_v61, %v18671_v2 }
 0x1d9   : > { %v14465_v26 = vrot.slane %v14451_v31, %v18669_v35  ;;  %v14475_v28 = vrot.slane %v14467_v23, %v18669_v35  ;;  %v5351_v24 = vcombine.high %v2305_v0, %v2305_v0  ;;  %v5358_v41 = vrot.slane %v2305_v0, %v18671_v2 }
 0x1da   : > { %v14482_v16 = vrot.slane %v14468_v5, %v18669_v35  ;;  %v5463_v36 = vrot.slane %v5449_v29, %v18671_v2  ;;  %v5464_v49 = vcombine.high %v5456_v52, %v5456_v52  ;;  %v5472_v44 = vrot.slane %v5456_v52, %v18671_v2 }
 0x1db   : > { %v14466_v6 = vcombine.low %v14458_v38, %v14465_v26  ;;  %v5365_v45 = vrot.slane %v5351_v24, %v18671_v2  ;;  %v5366_v1 = vcombine.high %v5358_v41, %v5358_v41  ;;  %v5374_v34 = vrot.slane %v5358_v41, %v18671_v2 }
 0x1dc   : > { %v14483_v40 = vcombine.low %v14475_v28, %v14482_v16  ;;  %v5465_v63 = vcombine.high %v5463_v36, %v5463_v36  ;;  %v5479_v53 = vrot.slane %v5463_v36, %v18671_v2  ;;  %v5486_v57 = vrot.slane %v5464_v49, %v18671_v2 }
 0x1dd   : > { %16754 = vst.msk [vmem:[%s19560_s18] sm:$0xff] %vm651_vm7, %v14466_v6  ;;  %v5494_v25 = vcombine.high %v5472_v44, %v5472_v44  ;;  %v6969_v27 = vrot.slane %v5472_v44, %v18686_v19  ;;  %v5367_v20 = vcombine.high %v5365_v45, %v5365_v45  ;;  %v5381_v17 = vrot.slane %v5365_v45, %v18671_v2 }
 0x1de   : > { %16755 = vst.msk [vmem:[%s19560_s18 + $0x8] sm:$0xff] %vm651_vm7, %v14483_v40  ;;  %v5388_v30 = vrot.slane %v5366_v1, %v18671_v2  ;;  %v5493_v31 = vrot.slane %v5465_v63, %v18671_v2  ;;  %v5495_v61 = vcombine.high %v5479_v53, %v5479_v53  ;;  %v5496_v0 = vcombine.high %v5486_v57, %v5486_v57 }
 0x1df   : > { %v6973_v23 = vrot.slane %v5486_v57, %v18686_v19  ;;  %v6977_v5 = vrot.slane %v5494_v25, %v18686_v19  ;;  %v6985_v38 = vrot.slane %v5479_v53, %v18686_v19  ;;  %v8175_v26 = vsel %vm519_vm4, %v18738_v55, %v6969_v27 }
 0x1e0   : > { %v5395_v29 = vrot.slane %v5367_v20, %v18671_v2  ;;  %v5497_v52 = vcombine.high %v5493_v31, %v5493_v31  ;;  %v6981_v28 = vrot.slane %v5496_v0, %v18686_v19  ;;  %v6989_v16 = vrot.slane %v5493_v31, %v18686_v19 }
 0x1e1   : > { %v6993_v24 = vrot.slane %v5495_v61, %v18686_v19  ;;  %v8176_v41 = vsel %vm519_vm4, %v18756_v33, %v6973_v23  ;;  %v24513_v6 = vcombine.high %v18738_v55, %v18738_v55  ;;  %v8179_v49 = vsel %vm519_vm4, %v18753_v59, %v6985_v38 }
 0x1e2   : > { %v13466_v44 = vadd.f32 %v18680_v3, %v8175_v26  ;;  %v6997_v40 = vrot.slane %v5497_v52, %v18686_v19  ;;  %v24514_v45 = vcombine.high %v18756_v33, %v18756_v33  ;;  %v8180_v63 = vsel %vm519_vm4, %v18764_v8, %v6989_v16 }
 0x1e3   : > { %v8177_v36 = vsel %vm519_vm4, %v24513_v6, %v6977_v5  ;;  %v24515_v55 = vcombine.high %v18753_v59, %v18753_v59  ;;  %v13467_v57 = vadd.f32 %v18695_v18, %v8176_v41  ;;  %v13470_v20 = vadd.f32 %v18680_v3, %v8179_v49 }
 0x1e4   : > { %v8178_v1 = vsel %vm519_vm4, %v24514_v45, %v6981_v28  ;;  %v13468_v25 = vadd.f32 %v18683_v47, %v8177_v36  ;;  %v24516_v33 = vcombine.high %v18764_v8, %v18764_v8  ;;  %v13471_v61 = vadd.f32 %v18695_v18, %v8180_v63 }
 0x1e5   : > { %v8181_v53 = vsel %vm519_vm4, %v24515_v55, %v6993_v24  ;;  %v13469_v27 = vadd.f32 %v18699_v39, %v8178_v1  ;;  %v5396_v59 = vcombine.high %v5374_v34, %v5374_v34  ;;  %v14620_v5 = vcombine.low %v13466_v44, %v13467_v57 }
 0x1e6   : > { %v8182_v31 = vsel %vm519_vm4, %v24516_v33, %v6997_v40  ;;  %v13472_v0 = vadd.f32 %v18683_v47, %v8181_v53  ;;  %v5397_v26 = vcombine.high %v5381_v17, %v5381_v17  ;;  %v14637_v52 = vcombine.low %v13470_v20, %v13471_v61 }
 0x1e7   : > { %v13473_v23 = vadd.f32 %v18699_v39, %v8182_v31  ;;  %v14621_v38 = vcombine.low %v13468_v25, %v13469_v27  ;;  %v5398_v28 = vcombine.high %v5388_v30, %v5388_v30  ;;  %v5399_v16 = vcombine.high %v5395_v29, %v5395_v29 }
 0x1e8   : > { %v6905_v24 = vrot.slane %v5374_v34, %v18686_v19  ;;  %v14628_v41 = vrot.slane %v14620_v5, %v18669_v35  ;;  %v6909_v36 = vrot.slane %v5388_v30, %v18686_v19  ;;  %v14645_v49 = vrot.slane %v14637_v52, %v18669_v35 }
 0x1e9   : > { %v14635_v8 = vrot.slane %v14621_v38, %v18669_v35  ;;  %v14638_v6 = vcombine.low %v13472_v0, %v13473_v23  ;;  %v6913_v40 = vrot.slane %v5396_v59, %v18686_v19  ;;  %v6917_v44 = vrot.slane %v5398_v28, %v18686_v19 }
 0x1ea   : > { %v6921_v45 = vrot.slane %v5381_v17, %v18686_v19  ;;  %v6925_v34 = vrot.slane %v5395_v29, %v18686_v19  ;;  %v6929_v55 = vrot.slane %v5397_v26, %v18686_v19  ;;  %v6933_v53 = vrot.slane %v5399_v16, %v18686_v19 }
 0x1eb   : > { %v14636_v1 = vcombine.low %v14628_v41, %v14635_v8  ;;  %v14652_v63 = vrot.slane %v14638_v6, %v18669_v35  ;;  %v8159_v30 = vsel %vm519_vm4, %v18772_v50, %v6905_v24  ;;  %v8160_v57 = vsel %vm519_vm4, %v18785_v46, %v6909_v36 }
 0x1ec   : > { %v24517_v25 = vcombine.high %v18772_v50, %v18772_v50  ;;  %v24518_v29 = vcombine.high %v18785_v46, %v18785_v46  ;;  %v8163_v33 = vsel %vm519_vm4, %v18782_v48, %v6921_v45  ;;  %v8164_v31 = vsel %vm519_vm4, %v18798_v15, %v6925_v34 }
 0x1ed   : > { %v14653_v27 = vcombine.low %v14645_v49, %v14652_v63  ;;  %16764 = vst.msk [vmem:[%s19560_s18 + $0x50] sm:$0xff] %vm651_vm7, %v14636_v1  ;;  %v24519_v61 = vcombine.high %v18782_v48, %v18782_v48  ;;  %v24520_v0 = vcombine.high %v18798_v15, %v18798_v15  ;;  %v13434_v46 = vadd.f32 %v18680_v3, %v8159_v30 }
 0x1ee   : > { %v8161_v17 = vsel %vm519_vm4, %v24517_v25, %v6913_v40  ;;  %v8162_v20 = vsel %vm519_vm4, %v24518_v29, %v6917_v44  ;;  %v13435_v23 = vadd.f32 %v18695_v18, %v8160_v57  ;;  %v13438_v26 = vadd.f32 %v18680_v3, %v8163_v33 }
 0x1ef   : > { %v8165_v50 = vsel %vm519_vm4, %v24519_v61, %v6929_v55  ;;  %v8166_v59 = vsel %vm519_vm4, %v24520_v0, %v6933_v53  ;;  %16765 = vst.msk [vmem:[%s19560_s18 + $0x58] sm:$0xff] %vm651_vm7, %v14653_v27  ;;  %v13436_v5 = vadd.f32 %v18683_v47, %v8161_v17  ;;  %v13437_v38 = vadd.f32 %v18699_v39, %v8162_v20 }
 0x1f0   : > { %v13439_v48 = vadd.f32 %v18695_v18, %v8164_v31  ;;  %v13440_v52 = vadd.f32 %v18683_v47, %v8165_v50  ;;  %v13441_v15 = vadd.f32 %v18699_v39, %v8166_v59  ;;  %v14484_v28 = vcombine.low %v13434_v46, %v13435_v23 }
 0x1f1   : > { %v5596_v16 = vcombine.high %v19610_v54, %v19610_v54  ;;  %v14485_v24 = vcombine.low %v13436_v5, %v13437_v38  ;;  %v5603_v8 = vrot.slane %v19610_v54, %v18671_v2  ;;  %v5498_v6 = vcombine.high %v19612_v37, %v19612_v37 }
 0x1f2   : > { %v14501_v41 = vcombine.low %v13438_v26, %v13439_v48  ;;  %v14492_v36 = vrot.slane %v14484_v28, %v18669_v35  ;;  %v14502_v49 = vcombine.low %v13440_v52, %v13441_v15  ;;  %v5505_v44 = vrot.slane %v19612_v37, %v18671_v2 }
 0x1f3   : > { %v5610_v40 = vrot.slane %v5596_v16, %v18671_v2  ;;  %v14499_v45 = vrot.slane %v14485_v24, %v18669_v35  ;;  %v5611_v63 = vcombine.high %v5603_v8, %v5603_v8  ;;  %v5619_v34 = vrot.slane %v5603_v8, %v18671_v2 }
 0x1f4   : > { %v14509_v1 = vrot.slane %v14501_v41, %v18669_v35  ;;  %v14516_v54 = vrot.slane %v14502_v49, %v18669_v35  ;;  %v5512_v30 = vrot.slane %v5498_v6, %v18671_v2  ;;  %v24521_v48 = vcombine.high %v18793_v21, %v18793_v21  ;;  %v19770_v6 = vpop.f32.mrf.mxu1 }
 0x1f5   : > { %v5612_v55 = vcombine.high %v5610_v40, %v5610_v40  ;;  %v5626_v53 = vrot.slane %v5610_v40, %v18671_v2  ;;  %v14500_v57 = vcombine.low %v14492_v36, %v14499_v45  ;;  %v5633_v25 = vrot.slane %v5611_v63, %v18671_v2  ;;  %v19772_v36 = vpop.f32.mrf.mxu0 }
 0x1f6   : > { %v5641_v37 = vcombine.high %v5619_v34, %v5619_v34  ;;  %v7065_v17 = vrot.slane %v5619_v34, %v18686_v19  ;;  %v14517_v27 = vcombine.low %v14509_v1, %v14516_v54  ;;  %v24522_v24 = vcombine.high %v18809_v9, %v18809_v9 }
 0x1f7   : > { %v5640_v29 = vrot.slane %v5612_v55, %v18671_v2  ;;  %v5642_v20 = vcombine.high %v5626_v53, %v5626_v53  ;;  %v7081_v33 = vrot.slane %v5626_v53, %v18686_v19  ;;  %16756 = vst.msk [vmem:[%s19560_s18 + $0x10] sm:$0xff] %vm651_vm7, %v14500_v57  ;;  %v5643_v31 = vcombine.high %v5633_v25, %v5633_v25 }
 0x1f8   : > { %v7069_v61 = vrot.slane %v5633_v25, %v18686_v19  ;;  %v7073_v50 = vrot.slane %v5641_v37, %v18686_v19  ;;  %v8199_v0 = vsel %vm519_vm4, %v18793_v21, %v7065_v17  ;;  %16757 = vst.msk [vmem:[%s19560_s18 + $0x18] sm:$0xff] %vm651_vm7, %v14517_v27  ;;  %v24523_v21 = vcombine.high %v18812_v32, %v18812_v32 }
 0x1f9   : > { %v5644_v59 = vcombine.high %v5640_v29, %v5640_v29  ;;  %v7085_v46 = vrot.slane %v5640_v29, %v18686_v19  ;;  %v7089_v23 = vrot.slane %v5642_v20, %v18686_v19  ;;  %v8203_v5 = vsel %vm519_vm4, %v18809_v9, %v7081_v33  ;;  %v2028_v20 = vpop.f32.mrf.mxu0 }
 0x1fa   : > { %v7077_v38 = vrot.slane %v5643_v31, %v18686_v19  ;;  %v8200_v26 = vsel %vm519_vm4, %v18812_v32, %v7069_v61  ;;  %v8201_v52 = vsel %vm519_vm4, %v24521_v48, %v7073_v50  ;;  %v13522_v15 = vadd.f32 %v18680_v3, %v8199_v0 }
 0x1fb   : > { %v7093_v28 = vrot.slane %v5644_v59, %v18686_v19  ;;  %v8204_v16 = vsel %vm519_vm4, %v18829_v14, %v7085_v46  ;;  %v8205_v41 = vsel %vm519_vm4, %v24522_v24, %v7089_v23  ;;  %v13523_v8 = vadd.f32 %v18695_v18, %v8200_v26 }
 0x1fc   : > { %v8202_v49 = vsel %vm519_vm4, %v24523_v21, %v7077_v38  ;;  %v13524_v40 = vadd.f32 %v18683_v47, %v8201_v52  ;;  %v13526_v45 = vadd.f32 %v18680_v3, %v8203_v5  ;;  %v13527_v1 = vadd.f32 %v18695_v18, %v8204_v16  ;;  %v17522_v16 = vpop.f32.mrf.mxu0 }
 0x1fd   : > { %v24524_v9 = vcombine.high %v18829_v14, %v18829_v14  ;;  %v13525_v34 = vadd.f32 %v18699_v39, %v8202_v49  ;;  %v13528_v54 = vadd.f32 %v18683_v47, %v8205_v41  ;;  %v14858_v55 = vcombine.low %v13522_v15, %v13523_v8  ;;  %v2320_v14 = vpop.f32.mrf.mxu1 }
 0x1fe   : > { %v14875_v53 = vcombine.low %v13526_v45, %v13527_v1  ;;  %v5513_v57 = vcombine.high %v5505_v44, %v5505_v44  ;;  %v5514_v25 = vcombine.high %v5512_v30, %v5512_v30  ;;  %v5521_v27 = vrot.slane %v5505_v44, %v18671_v2 }
 0x1ff   : > { %v8206_v63 = vsel %vm519_vm4, %v24524_v9, %v7093_v28  ;;  %v14859_v37 = vcombine.low %v13524_v40, %v13525_v34  ;;  %v14866_v17 = vrot.slane %v14858_v55, %v18669_v35  ;;  %v5528_v29 = vrot.slane %v5512_v30, %v18671_v2  ;;  %v17556_v28 = vpop.f32.mrf.mxu1 }
 0x200   : > { %v13529_v32 = vadd.f32 %v18699_v39, %v8206_v63  ;;  %v14883_v31 = vrot.slane %v14875_v53, %v18669_v35  ;;  %v5535_v61 = vrot.slane %v5513_v57, %v18671_v2  ;;  %v5542_v50 = vrot.slane %v5514_v25, %v18671_v2 }
 0x201   : > { %v14873_v0 = vrot.slane %v14859_v37, %v18669_v35  ;;  %v5543_v59 = vcombine.high %v5521_v27, %v5521_v27  ;;  %v5544_v46 = vcombine.high %v5528_v29, %v5528_v29  ;;  %v7001_v23 = vrot.slane %v5521_v27, %v18686_v19  ;;  %v2333_v27 = vpop.f32.mrf.mxu1 }
 0x202   : > { %v14876_v33 = vcombine.low %v13528_v54, %v13529_v32  ;;  %v5545_v5 = vcombine.high %v5535_v61, %v5535_v61  ;;  %v5546_v30 = vcombine.high %v5542_v50, %v5542_v50  ;;  %v7005_v38 = vrot.slane %v5535_v61, %v18686_v19  ;;  %v24527_v54 = vld [vmem:[#allocation4_spill] sm:$0xff] }
 0x203   : > { %v14874_v26 = vcombine.low %v14866_v17, %v14873_v0  ;;  %v7009_v48 = vrot.slane %v5543_v59, %v18686_v19  ;;  %v7017_v52 = vrot.slane %v5528_v29, %v18686_v19  ;;  %v7021_v15 = vrot.slane %v5542_v50, %v18686_v19  ;;  %v2041_v29 = vpop.f32.mrf.mxu0 }
 0x204   : > { %v14890_v44 = vrot.slane %v14876_v33, %v18669_v35  ;;  %v7013_v41 = vrot.slane %v5545_v5, %v18686_v19  ;;  %v7025_v8 = vrot.slane %v5544_v46, %v18686_v19  ;;  %v7029_v21 = vrot.slane %v5546_v30, %v18686_v19 }
 0x205   : > { %16778 = vst.msk [vmem:[%s19560_s18 + $0xc0] sm:$0xff] %vm651_vm7, %v14874_v26  ;;  %v8183_v49 = vsel %vm519_vm4, %v18819_v4, %v7001_v23  ;;  %v8184_v40 = vsel %vm519_vm4, %v18836_v10, %v7005_v38  ;;  %v24525_v45 = vcombine.high %v18819_v4, %v18819_v4  ;;  %v8187_v9 = vsel %vm519_vm4, %v18822_v43, %v7017_v52 }
 0x206   : > { %v14891_v24 = vcombine.low %v14883_v31, %v14890_v44  ;;  %v24526_v63 = vcombine.high %v18836_v10, %v18836_v10  ;;  %v8188_v55 = vsel %vm519_vm4, %v24527_v54, %v7021_v15  ;;  %v24528_v32 = vcombine.high %v18822_v43, %v18822_v43 }
 0x207   : > { %v8185_v1 = vsel %vm519_vm4, %v24525_v45, %v7009_v48  ;;  %v24529_v53 = vcombine.high %v24527_v54, %v24527_v54  ;;  %v13490_v25 = vadd.f32 %v18680_v3, %v8183_v49  ;;  %v13491_v37 = vadd.f32 %v18695_v18, %v8184_v40 }
 0x208   : > { %16779 = vst.msk [vmem:[%s19560_s18 + $0xc8] sm:$0xff] %vm651_vm7, %v14891_v24  ;;  %v8186_v34 = vsel %vm519_vm4, %v24526_v63, %v7013_v41  ;;  %v8189_v4 = vsel %vm519_vm4, %v24528_v32, %v7025_v8  ;;  %v13492_v10 = vadd.f32 %v18683_v47, %v8185_v1  ;;  %v13494_v33 = vadd.f32 %v18680_v3, %v8187_v9 }
 0x209   : > { %v8190_v57 = vsel %vm519_vm4, %v24529_v53, %v7029_v21  ;;  %v13493_v17 = vadd.f32 %v18699_v39, %v8186_v34  ;;  %v13495_v43 = vadd.f32 %v18695_v18, %v8188_v55  ;;  %v13496_v31 = vadd.f32 %v18683_v47, %v8189_v4 }
 0x20a   : > { %v13497_v61 = vadd.f32 %v18699_v39, %v8190_v57  ;;  %v14722_v50 = vcombine.low %v13490_v25, %v13491_v37  ;;  %v2329_v59 = vadd.f32 %v19770_v6, %v19772_v36  ;;  %v2321_v46 = vadd.f32 %v2320_v14, %v2028_v20 }
 0x20b   : > { %v14723_v0 = vcombine.low %v13492_v10, %v13493_v17  ;;  %v14739_v23 = vcombine.low %v13494_v33, %v13495_v43  ;;  %v19842_v5 = vadd.f32 %v17556_v28, %v17522_v16  ;;  %v19844_v30 = vadd.f32 %v2333_v27, %v2041_v29  ;;  %v24530_v10 = vld [vmem:[#allocation5_spill] sm:$0xff] }
 0x20c   : > { %v14740_v44 = vcombine.low %v13496_v31, %v13497_v61  ;;  %v14730_v38 = vrot.slane %v14722_v50, %v18669_v35  ;;  %v5645_v48 = vcombine.high %v2329_v59, %v2329_v59  ;;  %v5652_v52 = vrot.slane %v2329_v59, %v18671_v2  ;;  %v24532_v59 = vld [vmem:[#allocation7_spill] sm:$0xff] }
 0x20d   : > { %v14737_v26 = vrot.slane %v14723_v0, %v18669_v35  ;;  %v14747_v15 = vrot.slane %v14739_v23, %v18669_v35  ;;  %v5547_v6 = vcombine.high %v2321_v46, %v2321_v46  ;;  %v5554_v36 = vrot.slane %v2321_v46, %v18671_v2 }
 0x20e   : > { %v14754_v24 = vrot.slane %v14740_v44, %v18669_v35  ;;  %v5659_v20 = vrot.slane %v5645_v48, %v18671_v2  ;;  %v5660_v28 = vcombine.high %v5652_v52, %v5652_v52  ;;  %v5668_v16 = vrot.slane %v5652_v52, %v18671_v2 }
 0x20f   : > { %v14738_v14 = vcombine.low %v14730_v38, %v14737_v26  ;;  %v5561_v8 = vrot.slane %v5547_v6, %v18671_v2  ;;  %v5562_v21 = vcombine.high %v5554_v36, %v5554_v36  ;;  %v5570_v49 = vrot.slane %v5554_v36, %v18671_v2 }
 0x210   : > { %v14755_v41 = vcombine.low %v14747_v15, %v14754_v24  ;;  %v5661_v40 = vcombine.high %v5659_v20, %v5659_v20  ;;  %v5675_v45 = vrot.slane %v5659_v20, %v18671_v2  ;;  %v5682_v1 = vrot.slane %v5660_v28, %v18671_v2 }
 0x211   : > { %16770 = vst.msk [vmem:[%s19560_s18 + $0x80] sm:$0xff] %vm651_vm7, %v14738_v14  ;;  %v5690_v9 = vcombine.high %v5668_v16, %v5668_v16  ;;  %v7097_v63 = vrot.slane %v5668_v16, %v18686_v19  ;;  %v5563_v34 = vcombine.high %v5561_v8, %v5561_v8  ;;  %v5577_v54 = vrot.slane %v5561_v8, %v18671_v2 }
 0x212   : > { %16771 = vst.msk [vmem:[%s19560_s18 + $0x88] sm:$0xff] %vm651_vm7, %v14755_v41  ;;  %v5584_v55 = vrot.slane %v5562_v21, %v18671_v2  ;;  %v5689_v32 = vrot.slane %v5661_v40, %v18671_v2  ;;  %v5691_v4 = vcombine.high %v5675_v45, %v5675_v45  ;;  %v5692_v53 = vcombine.high %v5682_v1, %v5682_v1 }
 0x213   : > { %v7101_v57 = vrot.slane %v5682_v1, %v18686_v19  ;;  %v7105_v25 = vrot.slane %v5690_v9, %v18686_v19  ;;  %v7113_v37 = vrot.slane %v5675_v45, %v18686_v19  ;;  %v8207_v17 = vsel %vm519_vm4, %v24530_v10, %v7097_v63 }
 0x214   : > { %v5591_v27 = vrot.slane %v5563_v34, %v18671_v2  ;;  %v5693_v29 = vcombine.high %v5689_v32, %v5689_v32  ;;  %v7109_v33 = vrot.slane %v5692_v53, %v18686_v19  ;;  %v7117_v43 = vrot.slane %v5689_v32, %v18686_v19 }
 0x215   : > { %v7121_v31 = vrot.slane %v5691_v4, %v18686_v19  ;;  %v8208_v61 = vsel %vm519_vm4, %v18883_v58, %v7101_v57  ;;  %v24531_v50 = vcombine.high %v24530_v10, %v24530_v10  ;;  %v8211_v46 = vsel %vm519_vm4, %v24532_v59, %v7113_v37 }
 0x216   : > { %v13530_v23 = vadd.f32 %v18680_v3, %v8207_v17  ;;  %v7125_v44 = vrot.slane %v5693_v29, %v18686_v19  ;;  %v24533_v38 = vcombine.high %v18883_v58, %v18883_v58  ;;  %v8212_v48 = vsel %vm519_vm4, %v18896_v22, %v7117_v43 }
 0x217   : > { %v8209_v0 = vsel %vm519_vm4, %v24531_v50, %v7105_v25  ;;  %v24534_v52 = vcombine.high %v24532_v59, %v24532_v59  ;;  %v13531_v24 = vadd.f32 %v18695_v18, %v8208_v61  ;;  %v13534_v14 = vadd.f32 %v18680_v3, %v8211_v46 }
 0x218   : > { %v8210_v26 = vsel %vm519_vm4, %v24533_v38, %v7109_v33  ;;  %v13532_v6 = vadd.f32 %v18683_v47, %v8209_v0  ;;  %v24535_v58 = vcombine.high %v18896_v22, %v18896_v22  ;;  %v13535_v28 = vadd.f32 %v18695_v18, %v8212_v48 }
 0x219   : > { %v8213_v15 = vsel %vm519_vm4, %v24534_v52, %v7121_v31  ;;  %v13533_v36 = vadd.f32 %v18699_v39, %v8210_v26  ;;  %v5592_v41 = vcombine.high %v5570_v49, %v5570_v49  ;;  %v14892_v21 = vcombine.low %v13530_v23, %v13531_v24  ;;  %v24536_v31 = vld [vmem:[#allocation6_spill] sm:$0xff]  ;;  %v24539_v23 = vld [vmem:[#allocation8_spill] sm:$0xff] }
 0x21a   : > { %v8214_v20 = vsel %vm519_vm4, %v24535_v58, %v7125_v44  ;;  %v13536_v16 = vadd.f32 %v18683_v47, %v8213_v15  ;;  %v5593_v45 = vcombine.high %v5577_v54, %v5577_v54  ;;  %v14909_v1 = vcombine.low %v13534_v14, %v13535_v28 }
 0x21b   : > { %v13537_v8 = vadd.f32 %v18699_v39, %v8214_v20  ;;  %v14893_v40 = vcombine.low %v13532_v6, %v13533_v36  ;;  %v5594_v9 = vcombine.high %v5584_v55, %v5584_v55  ;;  %v5595_v63 = vcombine.high %v5591_v27, %v5591_v27 }
 0x21c   : > { %v7033_v34 = vrot.slane %v5570_v49, %v18686_v19  ;;  %v14900_v32 = vrot.slane %v14892_v21, %v18669_v35  ;;  %v7037_v53 = vrot.slane %v5584_v55, %v18686_v19  ;;  %v14917_v57 = vrot.slane %v14909_v1, %v18669_v35 }
 0x21d   : > { %v14907_v22 = vrot.slane %v14893_v40, %v18669_v35  ;;  %v14910_v4 = vcombine.low %v13536_v16, %v13537_v8  ;;  %v7041_v25 = vrot.slane %v5592_v41, %v18686_v19  ;;  %v7045_v37 = vrot.slane %v5594_v9, %v18686_v19 }
 0x21e   : > { %v7049_v10 = vrot.slane %v5577_v54, %v18686_v19  ;;  %v7053_v49 = vrot.slane %v5591_v27, %v18686_v19  ;;  %v7057_v33 = vrot.slane %v5593_v45, %v18686_v19  ;;  %v7061_v43 = vrot.slane %v5595_v63, %v18686_v19 }
 0x21f   : > { %v14908_v17 = vcombine.low %v14900_v32, %v14907_v22  ;;  %v14924_v29 = vrot.slane %v14910_v4, %v18669_v35  ;;  %v8191_v55 = vsel %vm519_vm4, %v24536_v31, %v7033_v34  ;;  %v8192_v61 = vsel %vm519_vm4, %v18891_v12, %v7037_v53 }
 0x220   : > { %v24537_v50 = vcombine.high %v24536_v31, %v24536_v31  ;;  %v24538_v27 = vcombine.high %v18891_v12, %v18891_v12  ;;  %v8195_v46 = vsel %vm519_vm4, %v18888_v42, %v7049_v10  ;;  %v8196_v44 = vsel %vm519_vm4, %v24539_v23, %v7053_v49 }
 0x221   : > { %v14925_v0 = vcombine.low %v14917_v57, %v14924_v29  ;;  %16780 = vst.msk [vmem:[%s19560_s18 + $0xd0] sm:$0xff] %vm651_vm7, %v14908_v17  ;;  %v24540_v38 = vcombine.high %v18888_v42, %v18888_v42  ;;  %v24541_v48 = vcombine.high %v24539_v23, %v24539_v23  ;;  %v13498_v12 = vadd.f32 %v18680_v3, %v8191_v55 }
 0x222   : > { %v8193_v54 = vsel %vm519_vm4, %v24537_v50, %v7041_v25  ;;  %v8194_v59 = vsel %vm519_vm4, %v24538_v27, %v7045_v37  ;;  %v13499_v15 = vadd.f32 %v18695_v18, %v8192_v61  ;;  %v13502_v36 = vadd.f32 %v18680_v3, %v8195_v46  ;;  %v24542_v61 = vld [vmem:[#allocation9_spill] sm:$0xff] }
 0x223   : > { %v8197_v26 = vsel %vm519_vm4, %v24540_v38, %v7057_v33  ;;  %v8198_v52 = vsel %vm519_vm4, %v24541_v48, %v7061_v43  ;;  %16781 = vst.msk [vmem:[%s19560_s18 + $0xd8] sm:$0xff] %vm651_vm7, %v14925_v0  ;;  %v13500_v24 = vadd.f32 %v18683_v47, %v8193_v54  ;;  %v13501_v6 = vadd.f32 %v18699_v39, %v8194_v59  ;;  %v24543_v59 = vld [vmem:[#allocation10_spill] sm:$0xff] }
 0x224   : > { %v13503_v42 = vadd.f32 %v18695_v18, %v8196_v44  ;;  %v13504_v14 = vadd.f32 %v18683_v47, %v8197_v26  ;;  %v13505_v58 = vadd.f32 %v18699_v39, %v8198_v52  ;;  %v14756_v20 = vcombine.low %v13498_v12, %v13499_v15  ;;  %v24544_v44 = vld [vmem:[#allocation11_spill] sm:$0xff]  ;;  %v24546_v15 = vld [vmem:[#allocation12_spill] sm:$0xff] }
 0x225   : > { %v5792_v28 = vcombine.high %v19842_v5, %v19842_v5  ;;  %v14757_v16 = vcombine.low %v13500_v24, %v13501_v6  ;;  %v5799_v8 = vrot.slane %v19842_v5, %v18671_v2  ;;  %v5694_v21 = vcombine.high %v19844_v30, %v19844_v30 }
 0x226   : > { %v14773_v41 = vcombine.low %v13502_v36, %v13503_v42  ;;  %v14764_v40 = vrot.slane %v14756_v20, %v18669_v35  ;;  %v14774_v45 = vcombine.low %v13504_v14, %v13505_v58  ;;  %v5701_v9 = vrot.slane %v19844_v30, %v18671_v2  ;;  %v20002_v14 = vpop.f32.mrf.mxu1  ;;  %v20004_v58 = vpop.f32.mrf.mxu0 }
 0x227   : > { %v5806_v1 = vrot.slane %v5792_v28, %v18671_v2  ;;  %v14771_v63 = vrot.slane %v14757_v16, %v18669_v35  ;;  %v5807_v32 = vcombine.high %v5799_v8, %v5799_v8  ;;  %v5815_v22 = vrot.slane %v5799_v8, %v18671_v2 }
 0x228   : > { %v14781_v34 = vrot.slane %v14773_v41, %v18669_v35  ;;  %v14788_v5 = vrot.slane %v14774_v45, %v18669_v35  ;;  %v5708_v57 = vrot.slane %v5694_v21, %v18671_v2  ;;  %v24545_v26 = vcombine.high %v24542_v61, %v24542_v61 }
 0x229   : > { %v5808_v4 = vcombine.high %v5806_v1, %v5806_v1  ;;  %v5822_v53 = vrot.slane %v5806_v1, %v18671_v2  ;;  %v14772_v25 = vcombine.low %v14764_v40, %v14771_v63  ;;  %v5829_v37 = vrot.slane %v5807_v32, %v18671_v2 }
 0x22a   : > { %v5837_v30 = vcombine.high %v5815_v22, %v5815_v22  ;;  %v7193_v10 = vrot.slane %v5815_v22, %v18686_v19  ;;  %v14789_v17 = vcombine.low %v14781_v34, %v14788_v5  ;;  %v24547_v6 = vcombine.high %v24543_v59, %v24543_v59 }
 0x22b   : > { %v5836_v29 = vrot.slane %v5808_v4, %v18671_v2  ;;  %v5838_v49 = vcombine.high %v5822_v53, %v5822_v53  ;;  %v7209_v33 = vrot.slane %v5822_v53, %v18686_v19  ;;  %16772 = vst.msk [vmem:[%s19560_s18 + $0x90] sm:$0xff] %vm651_vm7, %v14772_v25  ;;  %v5839_v43 = vcombine.high %v5829_v37, %v5829_v37 }
 0x22c   : > { %v7197_v31 = vrot.slane %v5829_v37, %v18686_v19  ;;  %v7201_v55 = vrot.slane %v5837_v30, %v18686_v19  ;;  %v8231_v50 = vsel %vm519_vm4, %v24542_v61, %v7193_v10  ;;  %16773 = vst.msk [vmem:[%s19560_s18 + $0x98] sm:$0xff] %vm651_vm7, %v14789_v17  ;;  %v24548_v20 = vcombine.high %v24544_v44, %v24544_v44  ;;  %v2336_v30 = vpop.f32.mrf.mxu1  ;;  %v2044_v10 = vpop.f32.mrf.mxu0 }
 0x22d   : > { %v5840_v54 = vcombine.high %v5836_v29, %v5836_v29  ;;  %v7213_v0 = vrot.slane %v5836_v29, %v18686_v19  ;;  %v7217_v27 = vrot.slane %v5838_v49, %v18686_v19  ;;  %v8235_v46 = vsel %vm519_vm4, %v24543_v59, %v7209_v33 }
 0x22e   : > { %v7205_v23 = vrot.slane %v5839_v43, %v18686_v19  ;;  %v8232_v38 = vsel %vm519_vm4, %v24544_v44, %v7197_v31  ;;  %v8233_v48 = vsel %vm519_vm4, %v24545_v26, %v7201_v55  ;;  %v13586_v52 = vadd.f32 %v18680_v3, %v8231_v50  ;;  %v17526_v44 = vpop.f32.mrf.mxu0 }
 0x22f   : > { %v7221_v12 = vrot.slane %v5840_v54, %v18686_v19  ;;  %v8236_v24 = vsel %vm519_vm4, %v24546_v15, %v7213_v0  ;;  %v8237_v36 = vsel %vm519_vm4, %v24547_v6, %v7217_v27  ;;  %v13587_v42 = vadd.f32 %v18695_v18, %v8232_v38 }
 0x230   : > { %v8234_v28 = vsel %vm519_vm4, %v24548_v20, %v7205_v23  ;;  %v13588_v16 = vadd.f32 %v18683_v47, %v8233_v48  ;;  %v13590_v41 = vadd.f32 %v18680_v3, %v8235_v46  ;;  %v13591_v8 = vadd.f32 %v18695_v18, %v8236_v24  ;;  %v17560_v23 = vpop.f32.mrf.mxu1 }
 0x231   : > { %v24549_v21 = vcombine.high %v24546_v15, %v24546_v15  ;;  %v13589_v45 = vadd.f32 %v18699_v39, %v8234_v28  ;;  %v13592_v1 = vadd.f32 %v18683_v47, %v8237_v36  ;;  %v15130_v63 = vcombine.low %v13586_v52, %v13587_v42  ;;  %v24551_v36 = vld [vmem:[#allocation13_spill] sm:$0xff] }
 0x232   : > { %v15147_v32 = vcombine.low %v13590_v41, %v13591_v8  ;;  %v5709_v22 = vcombine.high %v5701_v9, %v5701_v9  ;;  %v5710_v5 = vcombine.high %v5708_v57, %v5708_v57  ;;  %v5717_v25 = vrot.slane %v5701_v9, %v18671_v2 }
 0x233   : > { %v8238_v40 = vsel %vm519_vm4, %v24549_v21, %v7221_v12  ;;  %v15131_v4 = vcombine.low %v13588_v16, %v13589_v45  ;;  %v15138_v53 = vrot.slane %v15130_v63, %v18669_v35  ;;  %v5724_v37 = vrot.slane %v5708_v57, %v18671_v2  ;;  %v24553_v16 = vld [vmem:[#allocation14_spill] sm:$0xff] }
 0x234   : > { %v13593_v34 = vadd.f32 %v18699_v39, %v8238_v40  ;;  %v15155_v29 = vrot.slane %v15147_v32, %v18669_v35  ;;  %v5731_v49 = vrot.slane %v5709_v22, %v18671_v2  ;;  %v5738_v33 = vrot.slane %v5710_v5, %v18671_v2  ;;  %v2057_v32 = vpop.f32.mrf.mxu0 }
 0x235   : > { %v15145_v43 = vrot.slane %v15131_v4, %v18669_v35  ;;  %v5739_v31 = vcombine.high %v5717_v25, %v5717_v25  ;;  %v5740_v55 = vcombine.high %v5724_v37, %v5724_v37  ;;  %v7129_v61 = vrot.slane %v5717_v25, %v18686_v19 }
 0x236   : > { %v15148_v17 = vcombine.low %v13592_v1, %v13593_v34  ;;  %v5741_v50 = vcombine.high %v5731_v49, %v5731_v49  ;;  %v5742_v57 = vcombine.high %v5738_v33, %v5738_v33  ;;  %v7133_v54 = vrot.slane %v5731_v49, %v18686_v19  ;;  %v2349_v34 = vpop.f32.mrf.mxu1 }
 0x237   : > { %v15146_v0 = vcombine.low %v15138_v53, %v15145_v43  ;;  %v7137_v27 = vrot.slane %v5739_v31, %v18686_v19  ;;  %v7145_v59 = vrot.slane %v5724_v37, %v18686_v19  ;;  %v7149_v46 = vrot.slane %v5738_v33, %v18686_v19 }
 0x238   : > { %v15162_v9 = vrot.slane %v15148_v17, %v18669_v35  ;;  %v7141_v26 = vrot.slane %v5741_v50, %v18686_v19  ;;  %v7153_v48 = vrot.slane %v5740_v55, %v18686_v19  ;;  %v7157_v52 = vrot.slane %v5742_v57, %v18686_v19 }
 0x239   : > { %16794 = vst.msk [vmem:[%s19560_s18 + $0x140] sm:$0xff] %vm651_vm7, %v15146_v0  ;;  %v8215_v12 = vsel %vm519_vm4, %v18948_v62, %v7129_v61  ;;  %v8216_v15 = vsel %vm519_vm4, %v18961_v51, %v7133_v54  ;;  %v24550_v24 = vcombine.high %v18948_v62, %v18948_v62  ;;  %v8219_v42 = vsel %vm519_vm4, %v24551_v36, %v7145_v59 }
 0x23a   : > { %v15163_v38 = vcombine.low %v15155_v29, %v15162_v9  ;;  %v24552_v20 = vcombine.high %v18961_v51, %v18961_v51  ;;  %v8220_v41 = vsel %vm519_vm4, %v24553_v16, %v7149_v46  ;;  %v24554_v8 = vcombine.high %v24551_v36, %v24551_v36 }
 0x23b   : > { %v8217_v6 = vsel %vm519_vm4, %v24550_v24, %v7137_v27  ;;  %v24555_v21 = vcombine.high %v24553_v16, %v24553_v16  ;;  %v13554_v45 = vadd.f32 %v18680_v3, %v8215_v12  ;;  %v13555_v1 = vadd.f32 %v18695_v18, %v8216_v15 }
 0x23c   : > { %16795 = vst.msk [vmem:[%s19560_s18 + $0x148] sm:$0xff] %vm651_vm7, %v15163_v38  ;;  %v8218_v28 = vsel %vm519_vm4, %v24552_v20, %v7141_v26  ;;  %v8221_v62 = vsel %vm519_vm4, %v24554_v8, %v7153_v48  ;;  %v13556_v51 = vadd.f32 %v18683_v47, %v8217_v6  ;;  %v13558_v22 = vadd.f32 %v18680_v3, %v8219_v42  ;;  %v24556_v8 = vld [vmem:[#allocation15_spill] sm:$0xff] }
 0x23d   : > { %v8222_v40 = vsel %vm519_vm4, %v24555_v21, %v7157_v52  ;;  %v13557_v63 = vadd.f32 %v18699_v39, %v8218_v28  ;;  %v13559_v5 = vadd.f32 %v18695_v18, %v8220_v41  ;;  %v13560_v4 = vadd.f32 %v18683_v47, %v8221_v62 }
 0x23e   : > { %v13561_v53 = vadd.f32 %v18699_v39, %v8222_v40  ;;  %v14994_v25 = vcombine.low %v13554_v45, %v13555_v1  ;;  %v2345_v17 = vadd.f32 %v20002_v14, %v20004_v58  ;;  %v2337_v29 = vadd.f32 %v2336_v30, %v2044_v10 }
 0x23f   : > { %v14995_v37 = vcombine.low %v13556_v51, %v13557_v63  ;;  %v15011_v49 = vcombine.low %v13558_v22, %v13559_v5  ;;  %v20074_v43 = vadd.f32 %v17560_v23, %v17526_v44  ;;  %v20076_v31 = vadd.f32 %v2349_v34, %v2057_v32  ;;  %v24557_v63 = vld [vmem:[#allocation17_spill] sm:$0xff]  ;;  %v24559_v5 = vld [vmem:[#allocation16_spill] sm:$0xff] }
 0x240   : > { %v15012_v33 = vcombine.low %v13560_v4, %v13561_v53  ;;  %v15002_v55 = vrot.slane %v14994_v25, %v18669_v35  ;;  %v5841_v9 = vcombine.high %v2345_v17, %v2345_v17  ;;  %v5848_v50 = vrot.slane %v2345_v17, %v18671_v2 }
 0x241   : > { %v15009_v61 = vrot.slane %v14995_v37, %v18669_v35  ;;  %v15019_v57 = vrot.slane %v15011_v49, %v18669_v35  ;;  %v5743_v14 = vcombine.high %v2337_v29, %v2337_v29  ;;  %v5750_v58 = vrot.slane %v2337_v29, %v18671_v2 }
 0x242   : > { %v15026_v54 = vrot.slane %v15012_v33, %v18669_v35  ;;  %v5855_v10 = vrot.slane %v5841_v9, %v18671_v2  ;;  %v5856_v0 = vcombine.high %v5848_v50, %v5848_v50  ;;  %v5864_v27 = vrot.slane %v5848_v50, %v18671_v2 }
 0x243   : > { %v15010_v30 = vcombine.low %v15002_v55, %v15009_v61  ;;  %v5757_v46 = vrot.slane %v5743_v14, %v18671_v2  ;;  %v5758_v23 = vcombine.high %v5750_v58, %v5750_v58  ;;  %v5766_v44 = vrot.slane %v5750_v58, %v18671_v2 }
 0x244   : > { %v15027_v59 = vcombine.low %v15019_v57, %v15026_v54  ;;  %v5857_v38 = vcombine.high %v5855_v10, %v5855_v10  ;;  %v5871_v26 = vrot.slane %v5855_v10, %v18671_v2  ;;  %v5878_v48 = vrot.slane %v5856_v0, %v18671_v2 }
 0x245   : > { %16786 = vst.msk [vmem:[%s19560_s18 + $0x100] sm:$0xff] %vm651_vm7, %v15010_v30  ;;  %v5886_v52 = vcombine.high %v5864_v27, %v5864_v27  ;;  %v7225_v12 = vrot.slane %v5864_v27, %v18686_v19  ;;  %v5759_v15 = vcombine.high %v5757_v46, %v5757_v46  ;;  %v5773_v24 = vrot.slane %v5757_v46, %v18671_v2 }
 0x246   : > { %16787 = vst.msk [vmem:[%s19560_s18 + $0x108] sm:$0xff] %vm651_vm7, %v15027_v59  ;;  %v5780_v6 = vrot.slane %v5758_v23, %v18671_v2  ;;  %v5885_v36 = vrot.slane %v5857_v38, %v18671_v2  ;;  %v5887_v42 = vcombine.high %v5871_v26, %v5871_v26  ;;  %v5888_v20 = vcombine.high %v5878_v48, %v5878_v48 }
 0x247   : > { %v7229_v28 = vrot.slane %v5878_v48, %v18686_v19  ;;  %v7233_v16 = vrot.slane %v5886_v52, %v18686_v19  ;;  %v7241_v41 = vrot.slane %v5871_v26, %v18686_v19  ;;  %v8239_v62 = vsel %vm519_vm4, %v24556_v8, %v7225_v12 }
 0x248   : > { %v5787_v21 = vrot.slane %v5759_v15, %v18671_v2  ;;  %v5889_v40 = vcombine.high %v5885_v36, %v5885_v36  ;;  %v7237_v45 = vrot.slane %v5888_v20, %v18686_v19  ;;  %v7245_v1 = vrot.slane %v5885_v36, %v18686_v19 }
 0x249   : > { %v7249_v51 = vrot.slane %v5887_v42, %v18686_v19  ;;  %v8240_v34 = vsel %vm519_vm4, %v24557_v63, %v7229_v28  ;;  %v24558_v32 = vcombine.high %v24556_v8, %v24556_v8  ;;  %v8243_v4 = vsel %vm519_vm4, %v24559_v5, %v7241_v41 }
 0x24a   : > { %v13594_v53 = vadd.f32 %v18680_v3, %v8239_v62  ;;  %v7253_v25 = vrot.slane %v5889_v40, %v18686_v19  ;;  %v24560_v37 = vcombine.high %v24557_v63, %v24557_v63  ;;  %v8244_v29 = vsel %vm519_vm4, %v19004_v56, %v7245_v1  ;;  %v24563_v62 = vld [vmem:[#allocation18_spill] sm:$0xff]  ;;  %v24564_v40 = vld [vmem:[#allocation20_spill] sm:$0xff] }
 0x24b   : > { %v8241_v22 = vsel %vm519_vm4, %v24558_v32, %v7233_v16  ;;  %v24561_v49 = vcombine.high %v24559_v5, %v24559_v5  ;;  %v13595_v55 = vadd.f32 %v18695_v18, %v8240_v34  ;;  %v13598_v50 = vadd.f32 %v18680_v3, %v8243_v4  ;;  %v24567_v34 = vld [vmem:[#allocation19_spill] sm:$0xff] }
 0x24c   : > { %v8242_v17 = vsel %vm519_vm4, %v24560_v37, %v7237_v45  ;;  %v13596_v61 = vadd.f32 %v18683_v47, %v8241_v22  ;;  %v24562_v57 = vcombine.high %v19004_v56, %v19004_v56  ;;  %v13599_v14 = vadd.f32 %v18695_v18, %v8244_v29  ;;  %v24568_v22 = vld [vmem:[#allocation22_spill] sm:$0xff] }
 0x24d   : > { %v8245_v33 = vsel %vm519_vm4, %v24561_v49, %v7249_v51  ;;  %v13597_v9 = vadd.f32 %v18699_v39, %v8242_v17  ;;  %v5788_v30 = vcombine.high %v5766_v44, %v5766_v44  ;;  %v15164_v0 = vcombine.low %v13594_v53, %v13595_v55 }
 0x24e   : > { %v8246_v54 = vsel %vm519_vm4, %v24562_v57, %v7253_v25  ;;  %v13600_v58 = vadd.f32 %v18683_v47, %v8245_v33  ;;  %v5789_v59 = vcombine.high %v5773_v24, %v5773_v24  ;;  %v15181_v46 = vcombine.low %v13598_v50, %v13599_v14 }
 0x24f   : > { %v13601_v10 = vadd.f32 %v18699_v39, %v8246_v54  ;;  %v15165_v27 = vcombine.low %v13596_v61, %v13597_v9  ;;  %v5790_v23 = vcombine.high %v5780_v6, %v5780_v6  ;;  %v5791_v38 = vcombine.high %v5787_v21, %v5787_v21 }
 0x250   : > { %v7161_v26 = vrot.slane %v5766_v44, %v18686_v19  ;;  %v15172_v48 = vrot.slane %v15164_v0, %v18669_v35  ;;  %v7165_v12 = vrot.slane %v5780_v6, %v18686_v19  ;;  %v15189_v15 = vrot.slane %v15181_v46, %v18669_v35 }
 0x251   : > { %v15179_v56 = vrot.slane %v15165_v27, %v18669_v35  ;;  %v15182_v52 = vcombine.low %v13600_v58, %v13601_v10  ;;  %v7169_v36 = vrot.slane %v5788_v30, %v18686_v19  ;;  %v7173_v42 = vrot.slane %v5790_v23, %v18686_v19 }
 0x252   : > { %v7177_v20 = vrot.slane %v5773_v24, %v18686_v19  ;;  %v7181_v44 = vrot.slane %v5787_v21, %v18686_v19  ;;  %v7185_v41 = vrot.slane %v5789_v59, %v18686_v19  ;;  %v7189_v8 = vrot.slane %v5791_v38, %v18686_v19 }
 0x253   : > { %v15180_v28 = vcombine.low %v15172_v48, %v15179_v56  ;;  %v15196_v16 = vrot.slane %v15182_v52, %v18669_v35  ;;  %v8223_v6 = vsel %vm519_vm4, %v24563_v62, %v7161_v26  ;;  %v8224_v45 = vsel %vm519_vm4, %v24564_v40, %v7165_v12 }
 0x254   : > { %v24565_v1 = vcombine.high %v24563_v62, %v24563_v62  ;;  %v24566_v21 = vcombine.high %v24564_v40, %v24564_v40  ;;  %v8227_v32 = vsel %vm519_vm4, %v24567_v34, %v7177_v20  ;;  %v8228_v5 = vsel %vm519_vm4, %v24568_v22, %v7181_v44 }
 0x255   : > { %v15197_v51 = vcombine.low %v15189_v15, %v15196_v16  ;;  %16796 = vst.msk [vmem:[%s19560_s18 + $0x150] sm:$0xff] %vm651_vm7, %v15180_v28  ;;  %v24569_v4 = vcombine.high %v24567_v34, %v24567_v34  ;;  %v24570_v25 = vcombine.high %v24568_v22, %v24568_v22  ;;  %v13562_v17 = vadd.f32 %v18680_v3, %v8223_v6  ;;  %v24571_v6 = vld [vmem:[#allocation21_spill] sm:$0xff]  ;;  %v24573_v34 = vld [vmem:[#allocation24_spill] sm:$0xff] }
 0x256   : > { %v8225_v24 = vsel %vm519_vm4, %v24565_v1, %v7169_v36  ;;  %v8226_v63 = vsel %vm519_vm4, %v24566_v21, %v7173_v42  ;;  %v13563_v29 = vadd.f32 %v18695_v18, %v8224_v45  ;;  %v13566_v55 = vadd.f32 %v18680_v3, %v8227_v32 }
 0x257   : > { %v8229_v53 = vsel %vm519_vm4, %v24569_v4, %v7185_v41  ;;  %v8230_v37 = vsel %vm519_vm4, %v24570_v25, %v7189_v8  ;;  %16797 = vst.msk [vmem:[%s19560_s18 + $0x158] sm:$0xff] %vm651_vm7, %v15197_v51  ;;  %v13564_v49 = vadd.f32 %v18683_v47, %v8225_v24  ;;  %v13565_v33 = vadd.f32 %v18699_v39, %v8226_v63  ;;  %v24572_v51 = vld [vmem:[#allocation23_spill] sm:$0xff]  ;;  %v24575_v25 = vld [vmem:[#allocation25_spill] sm:$0xff] }
 0x258   : > { %v13567_v61 = vadd.f32 %v18695_v18, %v8228_v5  ;;  %v13568_v9 = vadd.f32 %v18683_v47, %v8229_v53  ;;  %v13569_v50 = vadd.f32 %v18699_v39, %v8230_v37  ;;  %v15028_v57 = vcombine.low %v13562_v17, %v13563_v29 }
 0x259   : > { %v5988_v54 = vcombine.high %v20074_v43, %v20074_v43  ;;  %v15029_v14 = vcombine.low %v13564_v49, %v13565_v33  ;;  %v5995_v30 = vrot.slane %v20074_v43, %v18671_v2  ;;  %v5890_v10 = vcombine.high %v20076_v31, %v20076_v31  ;;  %v20234_v33 = vpop.f32.mrf.mxu1 }
 0x25a   : > { %v15045_v58 = vcombine.low %v13566_v55, %v13567_v61  ;;  %v15036_v0 = vrot.slane %v15028_v57, %v18669_v35  ;;  %v15046_v27 = vcombine.low %v13568_v9, %v13569_v50  ;;  %v5897_v46 = vrot.slane %v20076_v31, %v18671_v2  ;;  %v20236_v55 = vpop.f32.mrf.mxu0 }
 0x25b   : > { %v6002_v59 = vrot.slane %v5988_v54, %v18671_v2  ;;  %v15043_v23 = vrot.slane %v15029_v14, %v18669_v35  ;;  %v6003_v26 = vcombine.high %v5995_v30, %v5995_v30  ;;  %v6011_v48 = vrot.slane %v5995_v30, %v18671_v2 }
 0x25c   : > { %v15053_v38 = vrot.slane %v15045_v58, %v18669_v35  ;;  %v15060_v43 = vrot.slane %v15046_v27, %v18669_v35  ;;  %v5904_v12 = vrot.slane %v5890_v10, %v18671_v2  ;;  %v24574_v22 = vcombine.high %v24571_v6, %v24571_v6 }
 0x25d   : > { %v6004_v56 = vcombine.high %v6002_v59, %v6002_v59  ;;  %v6018_v52 = vrot.slane %v6002_v59, %v18671_v2  ;;  %v15044_v15 = vcombine.low %v15036_v0, %v15043_v23  ;;  %v6025_v36 = vrot.slane %v6003_v26, %v18671_v2 }
 0x25e   : > { %v6033_v31 = vcombine.high %v6011_v48, %v6011_v48  ;;  %v7321_v42 = vrot.slane %v6011_v48, %v18686_v19  ;;  %v15061_v20 = vcombine.low %v15053_v38, %v15060_v43  ;;  %v24576_v17 = vcombine.high %v24572_v51, %v24572_v51 }
 0x25f   : > { %v6032_v28 = vrot.slane %v6004_v56, %v18671_v2  ;;  %v6034_v16 = vcombine.high %v6018_v52, %v6018_v52  ;;  %v7337_v44 = vrot.slane %v6018_v52, %v18686_v19  ;;  %16788 = vst.msk [vmem:[%s19560_s18 + $0x110] sm:$0xff] %vm651_vm7, %v15044_v15  ;;  %v6035_v41 = vcombine.high %v6025_v36, %v6025_v36  ;;  %v2352_v52 = vpop.f32.mrf.mxu1  ;;  %v2060_v15 = vpop.f32.mrf.mxu0 }
 0x260   : > { %v7325_v8 = vrot.slane %v6025_v36, %v18686_v19  ;;  %v7329_v62 = vrot.slane %v6033_v31, %v18686_v19  ;;  %v8263_v40 = vsel %vm519_vm4, %v24571_v6, %v7321_v42  ;;  %16789 = vst.msk [vmem:[%s19560_s18 + $0x118] sm:$0xff] %vm651_vm7, %v15061_v20  ;;  %v24577_v61 = vcombine.high %v24573_v34, %v24573_v34 }
 0x261   : > { %v6036_v45 = vcombine.high %v6032_v28, %v6032_v28  ;;  %v7341_v1 = vrot.slane %v6032_v28, %v18686_v19  ;;  %v7345_v24 = vrot.slane %v6034_v16, %v18686_v19  ;;  %v8267_v21 = vsel %vm519_vm4, %v24572_v51, %v7337_v44  ;;  %v17530_v51 = vpop.f32.mrf.mxu0 }
 0x262   : > { %v7333_v63 = vrot.slane %v6035_v41, %v18686_v19  ;;  %v8264_v32 = vsel %vm519_vm4, %v24573_v34, %v7325_v8  ;;  %v8265_v5 = vsel %vm519_vm4, %v24574_v22, %v7329_v62  ;;  %v13650_v4 = vadd.f32 %v18680_v3, %v8263_v40  ;;  %v24579_v22 = vld [vmem:[#allocation26_spill] sm:$0xff] }
 0x263   : > { %v7349_v53 = vrot.slane %v6036_v45, %v18686_v19  ;;  %v8268_v37 = vsel %vm519_vm4, %v24575_v25, %v7341_v1  ;;  %v8269_v29 = vsel %vm519_vm4, %v24576_v17, %v7345_v24  ;;  %v13651_v49 = vadd.f32 %v18695_v18, %v8264_v32  ;;  %v17564_v24 = vpop.f32.mrf.mxu1 }
 0x264   : > { %v8266_v9 = vsel %vm519_vm4, %v24577_v61, %v7333_v63  ;;  %v13652_v50 = vadd.f32 %v18683_v47, %v8265_v5  ;;  %v13654_v57 = vadd.f32 %v18680_v3, %v8267_v21  ;;  %v13655_v54 = vadd.f32 %v18695_v18, %v8268_v37 }
 0x265   : > { %v24578_v14 = vcombine.high %v24575_v25, %v24575_v25  ;;  %v13653_v30 = vadd.f32 %v18699_v39, %v8266_v9  ;;  %v13656_v10 = vadd.f32 %v18683_v47, %v8269_v29  ;;  %v15402_v0 = vcombine.low %v13650_v4, %v13651_v49  ;;  %v24582_v49 = vld [vmem:[#allocation28_spill] sm:$0xff] }
 0x266   : > { %v15419_v59 = vcombine.low %v13654_v57, %v13655_v54  ;;  %v5905_v23 = vcombine.high %v5897_v46, %v5897_v46  ;;  %v5906_v38 = vcombine.high %v5904_v12, %v5904_v12  ;;  %v5913_v43 = vrot.slane %v5897_v46, %v18671_v2 }
 0x267   : > { %v8270_v58 = vsel %vm519_vm4, %v24578_v14, %v7349_v53  ;;  %v15403_v26 = vcombine.low %v13652_v50, %v13653_v30  ;;  %v15410_v48 = vrot.slane %v15402_v0, %v18669_v35  ;;  %v5920_v56 = vrot.slane %v5904_v12, %v18671_v2  ;;  %v2073_v0 = vpop.f32.mrf.mxu0 }
 0x268   : > { %v13657_v27 = vadd.f32 %v18699_v39, %v8270_v58  ;;  %v15427_v31 = vrot.slane %v15419_v59, %v18669_v35  ;;  %v5927_v42 = vrot.slane %v5905_v23, %v18671_v2  ;;  %v5934_v20 = vrot.slane %v5906_v38, %v18671_v2 }
 0x269   : > { %v15417_v28 = vrot.slane %v15403_v26, %v18669_v35  ;;  %v5935_v16 = vcombine.high %v5913_v43, %v5913_v43  ;;  %v5936_v44 = vcombine.high %v5920_v56, %v5920_v56  ;;  %v7257_v41 = vrot.slane %v5913_v43, %v18686_v19 }
 0x26a   : > { %v15420_v36 = vcombine.low %v13656_v10, %v13657_v27  ;;  %v5937_v8 = vcombine.high %v5927_v42, %v5927_v42  ;;  %v5938_v12 = vcombine.high %v5934_v20, %v5934_v20  ;;  %v7261_v62 = vrot.slane %v5927_v42, %v18686_v19  ;;  %v2365_v10 = vpop.f32.mrf.mxu1 }
 0x26b   : > { %v15418_v6 = vcombine.low %v15410_v48, %v15417_v28  ;;  %v7265_v40 = vrot.slane %v5935_v16, %v18686_v19  ;;  %v7273_v45 = vrot.slane %v5920_v56, %v18686_v19  ;;  %v7277_v1 = vrot.slane %v5934_v20, %v18686_v19 }
 0x26c   : > { %v15434_v46 = vrot.slane %v15420_v36, %v18669_v35  ;;  %v7269_v63 = vrot.slane %v5937_v8, %v18686_v19  ;;  %v7281_v34 = vrot.slane %v5936_v44, %v18686_v19  ;;  %v7285_v32 = vrot.slane %v5938_v12, %v18686_v19 }
 0x26d   : > { %16810 = vst.msk [vmem:[%s19560_s18 + $0x1c0] sm:$0xff] %vm651_vm7, %v15418_v6  ;;  %v8247_v5 = vsel %vm519_vm4, %v24579_v22, %v7257_v41  ;;  %v8248_v4 = vsel %vm519_vm4, %v19078_v11, %v7261_v62  ;;  %v24580_v53 = vcombine.high %v24579_v22, %v24579_v22  ;;  %v8251_v37 = vsel %vm519_vm4, %v19075_v60, %v7273_v45 }
 0x26e   : > { %v15435_v21 = vcombine.low %v15427_v31, %v15434_v46  ;;  %v24581_v17 = vcombine.high %v19078_v11, %v19078_v11  ;;  %v8252_v61 = vsel %vm519_vm4, %v24582_v49, %v7277_v1  ;;  %v24583_v9 = vcombine.high %v19075_v60, %v19075_v60 }
 0x26f   : > { %v8249_v25 = vsel %vm519_vm4, %v24580_v53, %v7265_v40  ;;  %v24584_v57 = vcombine.high %v24582_v49, %v24582_v49  ;;  %v13618_v14 = vadd.f32 %v18680_v3, %v8247_v5  ;;  %v13619_v58 = vadd.f32 %v18695_v18, %v8248_v4 }
 0x270   : > { %16811 = vst.msk [vmem:[%s19560_s18 + $0x1c8] sm:$0xff] %vm651_vm7, %v15435_v21  ;;  %v8250_v29 = vsel %vm519_vm4, %v24581_v17, %v7269_v63  ;;  %v8253_v50 = vsel %vm519_vm4, %v24583_v9, %v7281_v34  ;;  %v13620_v11 = vadd.f32 %v18683_v47, %v8249_v25  ;;  %v13622_v27 = vadd.f32 %v18680_v3, %v8251_v37 }
 0x271   : > { %v8254_v54 = vsel %vm519_vm4, %v24584_v57, %v7285_v32  ;;  %v13621_v30 = vadd.f32 %v18699_v39, %v8250_v29  ;;  %v13623_v60 = vadd.f32 %v18695_v18, %v8252_v61  ;;  %v13624_v59 = vadd.f32 %v18683_v47, %v8253_v50  ;;  %v24585_v29 = vld [vmem:[#allocation27_spill] sm:$0xff] }
 0x272   : > { %v13625_v23 = vadd.f32 %v18699_v39, %v8254_v54  ;;  %v15266_v38 = vcombine.low %v13618_v14, %v13619_v58  ;;  %v2361_v48 = vadd.f32 %v20234_v33, %v20236_v55  ;;  %v2353_v43 = vadd.f32 %v2352_v52, %v2060_v15  ;;  %v24586_v14 = vld [vmem:[#allocation30_spill] sm:$0xff] }
 0x273   : > { %v15267_v26 = vcombine.low %v13620_v11, %v13621_v30  ;;  %v15283_v56 = vcombine.low %v13622_v27, %v13623_v60  ;;  %v20306_v31 = vadd.f32 %v17564_v24, %v17530_v51  ;;  %v20308_v42 = vadd.f32 %v2365_v10, %v2073_v0  ;;  %v24588_v10 = vld [vmem:[#allocation29_spill] sm:$0xff] }
 0x274   : > { %v15284_v36 = vcombine.low %v13624_v59, %v13625_v23  ;;  %v15274_v20 = vrot.slane %v15266_v38, %v18669_v35  ;;  %v6037_v16 = vcombine.high %v2361_v48, %v2361_v48  ;;  %v6044_v44 = vrot.slane %v2361_v48, %v18671_v2  ;;  %v24590_v38 = vld [vmem:[#allocation33_spill] sm:$0xff] }
 0x275   : > { %v15281_v28 = vrot.slane %v15267_v26, %v18669_v35  ;;  %v15291_v41 = vrot.slane %v15283_v56, %v18669_v35  ;;  %v5939_v33 = vcombine.high %v2353_v43, %v2353_v43  ;;  %v5946_v55 = vrot.slane %v2353_v43, %v18671_v2 }
 0x276   : > { %v15298_v46 = vrot.slane %v15284_v36, %v18669_v35  ;;  %v6051_v15 = vrot.slane %v6037_v16, %v18671_v2  ;;  %v6052_v8 = vcombine.high %v6044_v44, %v6044_v44  ;;  %v6060_v12 = vrot.slane %v6044_v44, %v18671_v2 }
 0x277   : > { %v15282_v52 = vcombine.low %v15274_v20, %v15281_v28  ;;  %v5953_v6 = vrot.slane %v5939_v33, %v18671_v2  ;;  %v5954_v40 = vcombine.high %v5946_v55, %v5946_v55  ;;  %v5962_v45 = vrot.slane %v5946_v55, %v18671_v2 }
 0x278   : > { %v15299_v62 = vcombine.low %v15291_v41, %v15298_v46  ;;  %v6053_v1 = vcombine.high %v6051_v15, %v6051_v15  ;;  %v6067_v24 = vrot.slane %v6051_v15, %v18671_v2  ;;  %v6074_v51 = vrot.slane %v6052_v8, %v18671_v2 }
 0x279   : > { %16802 = vst.msk [vmem:[%s19560_s18 + $0x180] sm:$0xff] %vm651_vm7, %v15282_v52  ;;  %v6082_v21 = vcombine.high %v6060_v12, %v6060_v12  ;;  %v7353_v63 = vrot.slane %v6060_v12, %v18686_v19  ;;  %v5955_v34 = vcombine.high %v5953_v6, %v5953_v6  ;;  %v5969_v32 = vrot.slane %v5953_v6, %v18671_v2 }
 0x27a   : > { %16803 = vst.msk [vmem:[%s19560_s18 + $0x188] sm:$0xff] %vm651_vm7, %v15299_v62  ;;  %v5976_v22 = vrot.slane %v5954_v40, %v18671_v2  ;;  %v6081_v5 = vrot.slane %v6053_v1, %v18671_v2  ;;  %v6083_v4 = vcombine.high %v6067_v24, %v6067_v24  ;;  %v6084_v53 = vcombine.high %v6074_v51, %v6074_v51 }
 0x27b   : > { %v7357_v25 = vrot.slane %v6074_v51, %v18686_v19  ;;  %v7361_v37 = vrot.slane %v6082_v21, %v18686_v19  ;;  %v7369_v17 = vrot.slane %v6067_v24, %v18686_v19  ;;  %v8271_v49 = vsel %vm519_vm4, %v24585_v29, %v7353_v63 }
 0x27c   : > { %v5983_v61 = vrot.slane %v5955_v34, %v18671_v2  ;;  %v6085_v9 = vcombine.high %v6081_v5, %v6081_v5  ;;  %v7365_v50 = vrot.slane %v6084_v53, %v18686_v19  ;;  %v7373_v57 = vrot.slane %v6081_v5, %v18686_v19 }
 0x27d   : > { %v7377_v54 = vrot.slane %v6083_v4, %v18686_v19  ;;  %v8272_v58 = vsel %vm519_vm4, %v24586_v14, %v7357_v25  ;;  %v24587_v11 = vcombine.high %v24585_v29, %v24585_v29  ;;  %v8275_v0 = vsel %vm519_vm4, %v24588_v10, %v7369_v17  ;;  %v24593_v29 = vld [vmem:[#allocation31_spill] sm:$0xff] }
 0x27e   : > { %v13658_v27 = vadd.f32 %v18680_v3, %v8271_v49  ;;  %v7381_v60 = vrot.slane %v6085_v9, %v18686_v19  ;;  %v24589_v59 = vcombine.high %v24586_v14, %v24586_v14  ;;  %v8276_v26 = vsel %vm519_vm4, %v24590_v38, %v7373_v57  ;;  %v24594_v49 = vld [vmem:[#allocation34_spill] sm:$0xff]  ;;  %v24597_v14 = vld [vmem:[#allocation32_spill] sm:$0xff] }
 0x27f   : > { %v8273_v30 = vsel %vm519_vm4, %v24587_v11, %v7361_v37  ;;  %v24591_v48 = vcombine.high %v24588_v10, %v24588_v10  ;;  %v13659_v56 = vadd.f32 %v18695_v18, %v8272_v58  ;;  %v13662_v28 = vadd.f32 %v18680_v3, %v8275_v0  ;;  %v24598_v11 = vld [vmem:[#allocation35_spill] sm:$0xff] }
 0x280   : > { %v8274_v23 = vsel %vm519_vm4, %v24589_v59, %v7365_v50  ;;  %v13660_v36 = vadd.f32 %v18683_v47, %v8273_v30  ;;  %v24592_v16 = vcombine.high %v24590_v38, %v24590_v38  ;;  %v13663_v41 = vadd.f32 %v18695_v18, %v8276_v26 }
 0x281   : > { %v8277_v43 = vsel %vm519_vm4, %v24591_v48, %v7377_v54  ;;  %v13661_v20 = vadd.f32 %v18699_v39, %v8274_v23  ;;  %v5984_v33 = vcombine.high %v5962_v45, %v5962_v45  ;;  %v15436_v52 = vcombine.low %v13658_v27, %v13659_v56 }
 0x282   : > { %v8278_v44 = vsel %vm519_vm4, %v24592_v16, %v7381_v60  ;;  %v13664_v46 = vadd.f32 %v18683_v47, %v8277_v43  ;;  %v5985_v8 = vcombine.high %v5969_v32, %v5969_v32  ;;  %v15453_v12 = vcombine.low %v13662_v28, %v13663_v41 }
 0x283   : > { %v13665_v55 = vadd.f32 %v18699_v39, %v8278_v44  ;;  %v15437_v15 = vcombine.low %v13660_v36, %v13661_v20  ;;  %v5986_v62 = vcombine.high %v5976_v22, %v5976_v22  ;;  %v5987_v6 = vcombine.high %v5983_v61, %v5983_v61 }
 0x284   : > { %v7289_v40 = vrot.slane %v5962_v45, %v18686_v19  ;;  %v15444_v1 = vrot.slane %v15436_v52, %v18669_v35  ;;  %v7293_v21 = vrot.slane %v5976_v22, %v18686_v19  ;;  %v15461_v63 = vrot.slane %v15453_v12, %v18669_v35 }
 0x285   : > { %v15451_v24 = vrot.slane %v15437_v15, %v18669_v35  ;;  %v15454_v51 = vcombine.low %v13664_v46, %v13665_v55  ;;  %v7297_v34 = vrot.slane %v5984_v33, %v18686_v19  ;;  %v7301_v5 = vrot.slane %v5986_v62, %v18686_v19 }
 0x286   : > { %v7305_v4 = vrot.slane %v5969_v32, %v18686_v19  ;;  %v7309_v45 = vrot.slane %v5983_v61, %v18686_v19  ;;  %v7313_v37 = vrot.slane %v5985_v8, %v18686_v19  ;;  %v7317_v17 = vrot.slane %v5987_v6, %v18686_v19 }
 0x287   : > { %v15452_v53 = vcombine.low %v15444_v1, %v15451_v24  ;;  %v15468_v25 = vrot.slane %v15454_v51, %v18669_v35  ;;  %v8255_v22 = vsel %vm519_vm4, %v24593_v29, %v7289_v40  ;;  %v8256_v9 = vsel %vm519_vm4, %v24594_v49, %v7293_v21 }
 0x288   : > { %v24595_v50 = vcombine.high %v24593_v29, %v24593_v29  ;;  %v24596_v61 = vcombine.high %v24594_v49, %v24594_v49  ;;  %v8259_v58 = vsel %vm519_vm4, %v24597_v14, %v7305_v4  ;;  %v8260_v30 = vsel %vm519_vm4, %v24598_v11, %v7309_v45 }
 0x289   : > { %v15469_v57 = vcombine.low %v15461_v63, %v15468_v25  ;;  %16812 = vst.msk [vmem:[%s19560_s18 + $0x1d0] sm:$0xff] %vm651_vm7, %v15452_v53  ;;  %v24599_v10 = vcombine.high %v24597_v14, %v24597_v14  ;;  %v24600_v27 = vcombine.high %v24598_v11, %v24598_v11  ;;  %v13626_v59 = vadd.f32 %v18680_v3, %v8255_v22 }
 0x28a   : > { %v8257_v32 = vsel %vm519_vm4, %v24595_v50, %v7297_v34  ;;  %v8258_v54 = vsel %vm519_vm4, %v24596_v61, %v7301_v5  ;;  %v13627_v23 = vadd.f32 %v18695_v18, %v8256_v9  ;;  %v13630_v48 = vadd.f32 %v18680_v3, %v8259_v58 }
 0x28b   : > { %v8261_v0 = vsel %vm519_vm4, %v24599_v10, %v7313_v37  ;;  %v8262_v60 = vsel %vm519_vm4, %v24600_v27, %v7317_v17  ;;  %16813 = vst.msk [vmem:[%s19560_s18 + $0x1d8] sm:$0xff] %vm651_vm7, %v15469_v57  ;;  %v13628_v38 = vadd.f32 %v18683_v47, %v8257_v32  ;;  %v13629_v26 = vadd.f32 %v18699_v39, %v8258_v54  ;;  %v24601_v17 = vld [vmem:[#allocation36_spill] sm:$0xff]  ;;  %v24602_v57 = vld [vmem:[#allocation38_spill] sm:$0xff] }
 0x28c   : > { %v13631_v43 = vadd.f32 %v18695_v18, %v8260_v30  ;;  %v13632_v56 = vadd.f32 %v18683_v47, %v8261_v0  ;;  %v13633_v36 = vadd.f32 %v18699_v39, %v8262_v60  ;;  %v15300_v20 = vcombine.low %v13626_v59, %v13627_v23  ;;  %v24604_v30 = vld [vmem:[#allocation41_spill] sm:$0xff]  ;;  %v20466_v59 = vpop.f32.mrf.mxu1  ;;  %v20468_v23 = vpop.f32.mrf.mxu0 }
 0x28d   : > { %v6184_v28 = vcombine.high %v20306_v31, %v20306_v31  ;;  %v15301_v16 = vcombine.low %v13628_v38, %v13629_v26  ;;  %v6191_v41 = vrot.slane %v20306_v31, %v18671_v2  ;;  %v6086_v46 = vcombine.high %v20308_v42, %v20308_v42 }
 0x28e   : > { %v15317_v44 = vcombine.low %v13630_v48, %v13631_v43  ;;  %v15308_v33 = vrot.slane %v15300_v20, %v18669_v35  ;;  %v15318_v55 = vcombine.low %v13632_v56, %v13633_v36  ;;  %v6093_v15 = vrot.slane %v20308_v42, %v18671_v2 }
 0x28f   : > { %v6198_v52 = vrot.slane %v6184_v28, %v18671_v2  ;;  %v15315_v8 = vrot.slane %v15301_v16, %v18669_v35  ;;  %v6199_v62 = vcombine.high %v6191_v41, %v6191_v41  ;;  %v6207_v6 = vrot.slane %v6191_v41, %v18671_v2 }
 0x290   : > { %v15325_v12 = vrot.slane %v15317_v44, %v18669_v35  ;;  %v15332_v31 = vrot.slane %v15318_v55, %v18669_v35  ;;  %v6100_v24 = vrot.slane %v6086_v46, %v18671_v2  ;;  %v24603_v54 = vcombine.high %v24601_v17, %v24601_v17 }
 0x291   : > { %v6200_v40 = vcombine.high %v6198_v52, %v6198_v52  ;;  %v6214_v1 = vrot.slane %v6198_v52, %v18671_v2  ;;  %v15316_v51 = vcombine.low %v15308_v33, %v15315_v8  ;;  %v6221_v21 = vrot.slane %v6199_v62, %v18671_v2  ;;  %v2368_v62 = vpop.f32.mrf.mxu1 }
 0x292   : > { %v6229_v42 = vcombine.high %v6207_v6, %v6207_v6  ;;  %v7449_v63 = vrot.slane %v6207_v6, %v18686_v19  ;;  %v15333_v34 = vcombine.low %v15325_v12, %v15332_v31  ;;  %v24605_v0 = vcombine.high %v19157_v13, %v19157_v13  ;;  %v2076_v6 = vpop.f32.mrf.mxu0 }
 0x293   : > { %v6228_v5 = vrot.slane %v6200_v40, %v18671_v2  ;;  %v6230_v4 = vcombine.high %v6214_v1, %v6214_v1  ;;  %v7465_v53 = vrot.slane %v6214_v1, %v18686_v19  ;;  %16804 = vst.msk [vmem:[%s19560_s18 + $0x190] sm:$0xff] %vm651_vm7, %v15316_v51  ;;  %v6231_v25 = vcombine.high %v6221_v21, %v6221_v21 }
 0x294   : > { %v7453_v45 = vrot.slane %v6221_v21, %v18686_v19  ;;  %v7457_v37 = vrot.slane %v6229_v42, %v18686_v19  ;;  %v8295_v29 = vsel %vm519_vm4, %v24601_v17, %v7449_v63  ;;  %16805 = vst.msk [vmem:[%s19560_s18 + $0x198] sm:$0xff] %vm651_vm7, %v15333_v34  ;;  %v24606_v38 = vcombine.high %v24602_v57, %v24602_v57  ;;  %v17568_v17 = vpop.f32.mrf.mxu1 }
 0x295   : > { %v6232_v22 = vcombine.high %v6228_v5, %v6228_v5  ;;  %v7469_v49 = vrot.slane %v6228_v5, %v18686_v19  ;;  %v7473_v9 = vrot.slane %v6230_v4, %v18686_v19  ;;  %v8299_v50 = vsel %vm519_vm4, %v19157_v13, %v7465_v53 }
 0x296   : > { %v7461_v32 = vrot.slane %v6231_v25, %v18686_v19  ;;  %v8296_v61 = vsel %vm519_vm4, %v24602_v57, %v7453_v45  ;;  %v8297_v14 = vsel %vm519_vm4, %v24603_v54, %v7457_v37  ;;  %v13714_v58 = vadd.f32 %v18680_v3, %v8295_v29  ;;  %v17534_v29 = vpop.f32.mrf.mxu0 }
 0x297   : > { %v7477_v11 = vrot.slane %v6232_v22, %v18686_v19  ;;  %v8300_v10 = vsel %vm519_vm4, %v24604_v30, %v7469_v49  ;;  %v8301_v27 = vsel %vm519_vm4, %v24605_v0, %v7473_v9  ;;  %v13715_v60 = vadd.f32 %v18695_v18, %v8296_v61  ;;  %v24609_v61 = vld [vmem:[#allocation40_spill] sm:$0xff] }
 0x298   : > { %v8298_v26 = vsel %vm519_vm4, %v24606_v38, %v7461_v32  ;;  %v13716_v48 = vadd.f32 %v18683_v47, %v8297_v14  ;;  %v13718_v43 = vadd.f32 %v18680_v3, %v8299_v50  ;;  %v13719_v56 = vadd.f32 %v18695_v18, %v8300_v10  ;;  %v24608_v32 = vld [vmem:[#allocation37_spill] sm:$0xff] }
 0x299   : > { %v24607_v13 = vcombine.high %v24604_v30, %v24604_v30  ;;  %v13717_v20 = vadd.f32 %v18699_v39, %v8298_v26  ;;  %v13720_v28 = vadd.f32 %v18683_v47, %v8301_v27  ;;  %v15674_v16 = vcombine.low %v13714_v58, %v13715_v60  ;;  %v24613_v27 = vld [vmem:[#allocation42_spill] sm:$0xff] }
 0x29a   : > { %v15691_v41 = vcombine.low %v13718_v43, %v13719_v56  ;;  %v6101_v46 = vcombine.high %v6093_v15, %v6093_v15  ;;  %v6102_v33 = vcombine.high %v6100_v24, %v6100_v24  ;;  %v6109_v8 = vrot.slane %v6093_v15, %v18671_v2 }
 0x29b   : > { %v8302_v36 = vsel %vm519_vm4, %v24607_v13, %v7477_v11  ;;  %v15675_v55 = vcombine.low %v13716_v48, %v13717_v20  ;;  %v15682_v52 = vrot.slane %v15674_v16, %v18669_v35  ;;  %v6116_v12 = vrot.slane %v6100_v24, %v18671_v2  ;;  %v24611_v11 = vld [vmem:[#allocation39_spill] sm:$0xff]  ;;  %v2089_v16 = vpop.f32.mrf.mxu0 }
 0x29c   : > { %v13721_v44 = vadd.f32 %v18699_v39, %v8302_v36  ;;  %v15699_v40 = vrot.slane %v15691_v41, %v18669_v35  ;;  %v6123_v1 = vrot.slane %v6101_v46, %v18671_v2  ;;  %v6130_v51 = vrot.slane %v6102_v33, %v18671_v2 }
 0x29d   : > { %v15689_v21 = vrot.slane %v15675_v55, %v18669_v35  ;;  %v6131_v42 = vcombine.high %v6109_v8, %v6109_v8  ;;  %v6132_v63 = vcombine.high %v6116_v12, %v6116_v12  ;;  %v7385_v34 = vrot.slane %v6109_v8, %v18686_v19 }
 0x29e   : > { %v15692_v31 = vcombine.low %v13720_v28, %v13721_v44  ;;  %v6133_v5 = vcombine.high %v6123_v1, %v6123_v1  ;;  %v6134_v24 = vcombine.high %v6130_v51, %v6130_v51  ;;  %v7389_v4 = vrot.slane %v6123_v1, %v18686_v19  ;;  %v2381_v28 = vpop.f32.mrf.mxu1 }
 0x29f   : > { %v15690_v53 = vcombine.low %v15682_v52, %v15689_v21  ;;  %v7393_v25 = vrot.slane %v6131_v42, %v18686_v19  ;;  %v7401_v45 = vrot.slane %v6116_v12, %v18686_v19  ;;  %v7405_v37 = vrot.slane %v6130_v51, %v18686_v19 }
 0x2a0   : > { %v15706_v15 = vrot.slane %v15692_v31, %v18669_v35  ;;  %v7397_v49 = vrot.slane %v6133_v5, %v18686_v19  ;;  %v7409_v9 = vrot.slane %v6132_v63, %v18686_v19  ;;  %v7413_v50 = vrot.slane %v6134_v24, %v18686_v19 }
 0x2a1   : > { %16826 = vst.msk [vmem:[%s19560_s18 + $0x240] sm:$0xff] %vm651_vm7, %v15690_v53  ;;  %v8279_v57 = vsel %vm519_vm4, %v24608_v32, %v7385_v34  ;;  %v8280_v54 = vsel %vm519_vm4, %v24609_v61, %v7389_v4  ;;  %v24610_v14 = vcombine.high %v24608_v32, %v24608_v32  ;;  %v8283_v30 = vsel %vm519_vm4, %v24611_v11, %v7401_v45 }
 0x2a2   : > { %v15707_v22 = vcombine.low %v15699_v40, %v15706_v15  ;;  %v24612_v10 = vcombine.high %v24609_v61, %v24609_v61  ;;  %v8284_v60 = vsel %vm519_vm4, %v24613_v27, %v7405_v37  ;;  %v24614_v38 = vcombine.high %v24611_v11, %v24611_v11 }
 0x2a3   : > { %v8281_v58 = vsel %vm519_vm4, %v24610_v14, %v7393_v25  ;;  %v24615_v48 = vcombine.high %v24613_v27, %v24613_v27  ;;  %v13682_v56 = vadd.f32 %v18680_v3, %v8279_v57  ;;  %v13683_v13 = vadd.f32 %v18695_v18, %v8280_v54 }
 0x2a4   : > { %16827 = vst.msk [vmem:[%s19560_s18 + $0x248] sm:$0xff] %vm651_vm7, %v15707_v22  ;;  %v8282_v0 = vsel %vm519_vm4, %v24612_v10, %v7397_v49  ;;  %v8285_v26 = vsel %vm519_vm4, %v24614_v38, %v7409_v9  ;;  %v13684_v36 = vadd.f32 %v18683_v47, %v8281_v58  ;;  %v13686_v44 = vadd.f32 %v18680_v3, %v8283_v30  ;;  %v24616_v10 = vld [vmem:[#allocation43_spill] sm:$0xff] }
 0x2a5   : > { %v8286_v43 = vsel %vm519_vm4, %v24615_v48, %v7413_v50  ;;  %v13685_v20 = vadd.f32 %v18699_v39, %v8282_v0  ;;  %v13687_v41 = vadd.f32 %v18695_v18, %v8284_v60  ;;  %v13688_v46 = vadd.f32 %v18683_v47, %v8285_v26 }
 0x2a6   : > { %v13689_v33 = vadd.f32 %v18699_v39, %v8286_v43  ;;  %v15538_v55 = vcombine.low %v13682_v56, %v13683_v13  ;;  %v2377_v8 = vadd.f32 %v20466_v59, %v20468_v23  ;;  %v2369_v12 = vadd.f32 %v2368_v62, %v2076_v6  ;;  %v24617_v43 = vld [vmem:[#allocation45_spill] sm:$0xff] }
 0x2a7   : > { %v15539_v52 = vcombine.low %v13684_v36, %v13685_v20  ;;  %v15555_v31 = vcombine.low %v13686_v44, %v13687_v41  ;;  %v20538_v1 = vadd.f32 %v17568_v17, %v17534_v29  ;;  %v20540_v51 = vadd.f32 %v2381_v28, %v2089_v16  ;;  %v24619_v20 = vld [vmem:[#allocation44_spill] sm:$0xff] }
 0x2a8   : > { %v15556_v40 = vcombine.low %v13688_v46, %v13689_v33  ;;  %v15546_v21 = vrot.slane %v15538_v55, %v18669_v35  ;;  %v6233_v63 = vcombine.high %v2377_v8, %v2377_v8  ;;  %v6240_v34 = vrot.slane %v2377_v8, %v18671_v2  ;;  %v24621_v33 = vld [vmem:[#allocation46_spill] sm:$0xff] }
 0x2a9   : > { %v15553_v42 = vrot.slane %v15539_v52, %v18669_v35  ;;  %v15563_v15 = vrot.slane %v15555_v31, %v18669_v35  ;;  %v6135_v59 = vcombine.high %v2369_v12, %v2369_v12  ;;  %v6142_v23 = vrot.slane %v2369_v12, %v18671_v2 }
 0x2aa   : > { %v15570_v5 = vrot.slane %v15556_v40, %v18669_v35  ;;  %v6247_v6 = vrot.slane %v6233_v63, %v18671_v2  ;;  %v6248_v24 = vcombine.high %v6240_v34, %v6240_v34  ;;  %v6256_v4 = vrot.slane %v6240_v34, %v18671_v2 }
 0x2ab   : > { %v15554_v62 = vcombine.low %v15546_v21, %v15553_v42  ;;  %v6149_v25 = vrot.slane %v6135_v59, %v18671_v2  ;;  %v6150_v45 = vcombine.high %v6142_v23, %v6142_v23  ;;  %v6158_v37 = vrot.slane %v6142_v23, %v18671_v2 }
 0x2ac   : > { %v15571_v53 = vcombine.low %v15563_v15, %v15570_v5  ;;  %v6249_v17 = vcombine.high %v6247_v6, %v6247_v6  ;;  %v6263_v29 = vrot.slane %v6247_v6, %v18671_v2  ;;  %v6270_v22 = vrot.slane %v6248_v24, %v18671_v2 }
 0x2ad   : > { %16818 = vst.msk [vmem:[%s19560_s18 + $0x200] sm:$0xff] %vm651_vm7, %v15554_v62  ;;  %v6278_v49 = vcombine.high %v6256_v4, %v6256_v4  ;;  %v7481_v9 = vrot.slane %v6256_v4, %v18686_v19  ;;  %v6151_v50 = vcombine.high %v6149_v25, %v6149_v25  ;;  %v6165_v32 = vrot.slane %v6149_v25, %v18671_v2 }
 0x2ae   : > { %16819 = vst.msk [vmem:[%s19560_s18 + $0x208] sm:$0xff] %vm651_vm7, %v15571_v53  ;;  %v6172_v57 = vrot.slane %v6150_v45, %v18671_v2  ;;  %v6277_v61 = vrot.slane %v6249_v17, %v18671_v2  ;;  %v6279_v54 = vcombine.high %v6263_v29, %v6263_v29  ;;  %v6280_v14 = vcombine.high %v6270_v22, %v6270_v22 }
 0x2af   : > { %v7485_v58 = vrot.slane %v6270_v22, %v18686_v19  ;;  %v7489_v11 = vrot.slane %v6278_v49, %v18686_v19  ;;  %v7497_v30 = vrot.slane %v6263_v29, %v18686_v19  ;;  %v8303_v0 = vsel %vm519_vm4, %v24616_v10, %v7481_v9 }
 0x2b0   : > { %v6179_v27 = vrot.slane %v6151_v50, %v18671_v2  ;;  %v6281_v60 = vcombine.high %v6277_v61, %v6277_v61  ;;  %v7493_v38 = vrot.slane %v6280_v14, %v18686_v19  ;;  %v7501_v26 = vrot.slane %v6277_v61, %v18686_v19 }
 0x2b1   : > { %v7505_v48 = vrot.slane %v6279_v54, %v18686_v19  ;;  %v8304_v56 = vsel %vm519_vm4, %v24617_v43, %v7485_v58  ;;  %v24618_v13 = vcombine.high %v24616_v10, %v24616_v10  ;;  %v8307_v28 = vsel %vm519_vm4, %v24619_v20, %v7497_v30  ;;  %v24624_v30 = vld [vmem:[#allocation47_spill] sm:$0xff]  ;;  %v24625_v10 = vld [vmem:[#allocation49_spill] sm:$0xff] }
 0x2b2   : > { %v13722_v16 = vadd.f32 %v18680_v3, %v8303_v0  ;;  %v7509_v44 = vrot.slane %v6281_v60, %v18686_v19  ;;  %v24620_v41 = vcombine.high %v24617_v43, %v24617_v43  ;;  %v8308_v55 = vsel %vm519_vm4, %v24621_v33, %v7501_v26 }
 0x2b3   : > { %v8305_v36 = vsel %vm519_vm4, %v24618_v13, %v7489_v11  ;;  %v24622_v52 = vcombine.high %v24619_v20, %v24619_v20  ;;  %v13723_v12 = vadd.f32 %v18695_v18, %v8304_v56  ;;  %v13726_v21 = vadd.f32 %v18680_v3, %v8307_v28  ;;  %v24629_v56 = vld [vmem:[#allocation50_spill] sm:$0xff] }
 0x2b4   : > { %v8306_v46 = vsel %vm519_vm4, %v24620_v41, %v7493_v38  ;;  %v13724_v31 = vadd.f32 %v18683_v47, %v8305_v36  ;;  %v24623_v42 = vcombine.high %v24621_v33, %v24621_v33  ;;  %v13727_v34 = vadd.f32 %v18695_v18, %v8308_v55 }
 0x2b5   : > { %v8309_v8 = vsel %vm519_vm4, %v24622_v52, %v7505_v48  ;;  %v13725_v40 = vadd.f32 %v18699_v39, %v8306_v46  ;;  %v6180_v5 = vcombine.high %v6158_v37, %v6158_v37  ;;  %v15708_v23 = vcombine.low %v13722_v16, %v13723_v12  ;;  %v24628_v48 = vld [vmem:[#allocation48_spill] sm:$0xff] }
 0x2b6   : > { %v8310_v63 = vsel %vm519_vm4, %v24623_v42, %v7509_v44  ;;  %v13728_v15 = vadd.f32 %v18683_v47, %v8309_v8  ;;  %v6181_v6 = vcombine.high %v6165_v32, %v6165_v32  ;;  %v15725_v24 = vcombine.low %v13726_v21, %v13727_v34 }
 0x2b7   : > { %v13729_v59 = vadd.f32 %v18699_v39, %v8310_v63  ;;  %v15709_v62 = vcombine.low %v13724_v31, %v13725_v40  ;;  %v6182_v4 = vcombine.high %v6172_v57, %v6172_v57  ;;  %v6183_v53 = vcombine.high %v6179_v27, %v6179_v27 }
 0x2b8   : > { %v7417_v25 = vrot.slane %v6158_v37, %v18686_v19  ;;  %v15716_v45 = vrot.slane %v15708_v23, %v18669_v35  ;;  %v7421_v22 = vrot.slane %v6172_v57, %v18686_v19  ;;  %v15733_v49 = vrot.slane %v15725_v24, %v18669_v35 }
 0x2b9   : > { %v15723_v17 = vrot.slane %v15709_v62, %v18669_v35  ;;  %v15726_v29 = vcombine.low %v13728_v15, %v13729_v59  ;;  %v7425_v9 = vrot.slane %v6180_v5, %v18686_v19  ;;  %v7429_v50 = vrot.slane %v6182_v4, %v18686_v19 }
 0x2ba   : > { %v7433_v61 = vrot.slane %v6165_v32, %v18686_v19  ;;  %v7437_v37 = vrot.slane %v6179_v27, %v18686_v19  ;;  %v7441_v58 = vrot.slane %v6181_v6, %v18686_v19  ;;  %v7445_v11 = vrot.slane %v6183_v53, %v18686_v19 }
 0x2bb   : > { %v15724_v54 = vcombine.low %v15716_v45, %v15723_v17  ;;  %v15740_v14 = vrot.slane %v15726_v29, %v18669_v35  ;;  %v8287_v57 = vsel %vm519_vm4, %v24624_v30, %v7417_v25  ;;  %v8288_v0 = vsel %vm519_vm4, %v24625_v10, %v7421_v22 }
 0x2bc   : > { %v24626_v60 = vcombine.high %v24624_v30, %v24624_v30  ;;  %v24627_v27 = vcombine.high %v24625_v10, %v24625_v10  ;;  %v8291_v43 = vsel %vm519_vm4, %v24628_v48, %v7433_v61  ;;  %v8292_v13 = vsel %vm519_vm4, %v24629_v56, %v7437_v37 }
 0x2bd   : > { %v15741_v38 = vcombine.low %v15733_v49, %v15740_v14  ;;  %16828 = vst.msk [vmem:[%s19560_s18 + $0x250] sm:$0xff] %vm651_vm7, %v15724_v54  ;;  %v24630_v36 = vcombine.high %v24628_v48, %v24628_v48  ;;  %v24631_v28 = vcombine.high %v24629_v56, %v24629_v56  ;;  %v13690_v44 = vadd.f32 %v18680_v3, %v8287_v57 }
 0x2be   : > { %v8289_v32 = vsel %vm519_vm4, %v24626_v60, %v7425_v9  ;;  %v8290_v26 = vsel %vm519_vm4, %v24627_v27, %v7429_v50  ;;  %v13691_v41 = vadd.f32 %v18695_v18, %v8288_v0  ;;  %v13694_v55 = vadd.f32 %v18680_v3, %v8291_v43  ;;  %v24633_v0 = vld [vmem:[#allocation52_spill] sm:$0xff] }
 0x2bf   : > { %v8293_v20 = vsel %vm519_vm4, %v24630_v36, %v7441_v58  ;;  %v8294_v16 = vsel %vm519_vm4, %v24631_v28, %v7445_v11  ;;  %16829 = vst.msk [vmem:[%s19560_s18 + $0x258] sm:$0xff] %vm651_vm7, %v15741_v38  ;;  %v13692_v46 = vadd.f32 %v18683_v47, %v8289_v32  ;;  %v13693_v33 = vadd.f32 %v18699_v39, %v8290_v26  ;;  %v24632_v58 = vld [vmem:[#allocation51_spill] sm:$0xff]  ;;  %v24634_v38 = vld [vmem:[#allocation53_spill] sm:$0xff] }
 0x2c0   : > { %v13695_v52 = vadd.f32 %v18695_v18, %v8292_v13  ;;  %v13696_v8 = vadd.f32 %v18683_v47, %v8293_v20  ;;  %v13697_v12 = vadd.f32 %v18699_v39, %v8294_v16  ;;  %v15572_v31 = vcombine.low %v13690_v44, %v13691_v41  ;;  %v24636_v13 = vld [vmem:[#allocation55_spill] sm:$0xff]  ;;  %v20698_v44 = vpop.f32.mrf.mxu1  ;;  %v20700_v41 = vpop.f32.mrf.mxu0 }
 0x2c1   : > { %v6380_v40 = vcombine.high %v20538_v1, %v20538_v1  ;;  %v15573_v21 = vcombine.low %v13692_v46, %v13693_v33  ;;  %v6387_v63 = vrot.slane %v20538_v1, %v18671_v2  ;;  %v6282_v34 = vcombine.high %v20540_v51, %v20540_v51 }
 0x2c2   : > { %v15589_v42 = vcombine.low %v13694_v55, %v13695_v52  ;;  %v15580_v15 = vrot.slane %v15572_v31, %v18669_v35  ;;  %v15590_v5 = vcombine.low %v13696_v8, %v13697_v12  ;;  %v6289_v23 = vrot.slane %v20540_v51, %v18671_v2 }
 0x2c3   : > { %v6394_v59 = vrot.slane %v6380_v40, %v18671_v2  ;;  %v15587_v62 = vrot.slane %v15573_v21, %v18669_v35  ;;  %v6395_v24 = vcombine.high %v6387_v63, %v6387_v63  ;;  %v6403_v4 = vrot.slane %v6387_v63, %v18671_v2 }
 0x2c4   : > { %v15597_v6 = vrot.slane %v15589_v42, %v18669_v35  ;;  %v15604_v1 = vrot.slane %v15590_v5, %v18669_v35  ;;  %v6296_v45 = vrot.slane %v6282_v34, %v18671_v2  ;;  %v24635_v26 = vcombine.high %v24632_v58, %v24632_v58 }
 0x2c5   : > { %v6396_v53 = vcombine.high %v6394_v59, %v6394_v59  ;;  %v6410_v25 = vrot.slane %v6394_v59, %v18671_v2  ;;  %v15588_v17 = vcombine.low %v15580_v15, %v15587_v62  ;;  %v6417_v29 = vrot.slane %v6395_v24, %v18671_v2 }
 0x2c6   : > { %v6425_v51 = vcombine.high %v6403_v4, %v6403_v4  ;;  %v7577_v22 = vrot.slane %v6403_v4, %v18686_v19  ;;  %v15605_v49 = vcombine.low %v15597_v6, %v15604_v1  ;;  %v24637_v20 = vcombine.high %v24633_v0, %v24633_v0  ;;  %v2384_v4 = vpop.f32.mrf.mxu1  ;;  %v2092_v1 = vpop.f32.mrf.mxu0 }
 0x2c7   : > { %v6424_v9 = vrot.slane %v6396_v53, %v18671_v2  ;;  %v6426_v50 = vcombine.high %v6410_v25, %v6410_v25  ;;  %v7593_v61 = vrot.slane %v6410_v25, %v18686_v19  ;;  %16820 = vst.msk [vmem:[%s19560_s18 + $0x210] sm:$0xff] %vm651_vm7, %v15588_v17  ;;  %v6427_v54 = vcombine.high %v6417_v29, %v6417_v29 }
 0x2c8   : > { %v7581_v14 = vrot.slane %v6417_v29, %v18686_v19  ;;  %v7585_v37 = vrot.slane %v6425_v51, %v18686_v19  ;;  %v8327_v11 = vsel %vm519_vm4, %v24632_v58, %v7577_v22  ;;  %16821 = vst.msk [vmem:[%s19560_s18 + $0x218] sm:$0xff] %vm651_vm7, %v15605_v49  ;;  %v24638_v46 = vcombine.high %v24634_v38, %v24634_v38 }
 0x2c9   : > { %v6428_v30 = vcombine.high %v6424_v9, %v6424_v9  ;;  %v7597_v57 = vrot.slane %v6424_v9, %v18686_v19  ;;  %v7601_v10 = vrot.slane %v6426_v50, %v18686_v19  ;;  %v8331_v60 = vsel %vm519_vm4, %v24633_v0, %v7593_v61 }
 0x2ca   : > { %v7589_v32 = vrot.slane %v6427_v54, %v18686_v19  ;;  %v8328_v27 = vsel %vm519_vm4, %v24634_v38, %v7581_v14  ;;  %v8329_v48 = vsel %vm519_vm4, %v24635_v26, %v7585_v37  ;;  %v13778_v43 = vadd.f32 %v18680_v3, %v8327_v11  ;;  %v17572_v11 = vpop.f32.mrf.mxu1 }
 0x2cb   : > { %v7605_v56 = vrot.slane %v6428_v30, %v18686_v19  ;;  %v8332_v36 = vsel %vm519_vm4, %v24636_v13, %v7597_v57  ;;  %v8333_v28 = vsel %vm519_vm4, %v24637_v20, %v7601_v10  ;;  %v13779_v16 = vadd.f32 %v18695_v18, %v8328_v27  ;;  %v17538_v30 = vpop.f32.mrf.mxu0  ;;  %v24641_v27 = vld [vmem:[#allocation57_spill] sm:$0xff] }
 0x2cc   : > { %v8330_v33 = vsel %vm519_vm4, %v24638_v46, %v7589_v32  ;;  %v13780_v55 = vadd.f32 %v18683_v47, %v8329_v48  ;;  %v13782_v52 = vadd.f32 %v18680_v3, %v8331_v60  ;;  %v13783_v8 = vadd.f32 %v18695_v18, %v8332_v36  ;;  %v24640_v32 = vld [vmem:[#allocation54_spill] sm:$0xff] }
 0x2cd   : > { %v24639_v12 = vcombine.high %v24636_v13, %v24636_v13  ;;  %v13781_v40 = vadd.f32 %v18699_v39, %v8330_v33  ;;  %v13784_v21 = vadd.f32 %v18683_v47, %v8333_v28  ;;  %v15946_v42 = vcombine.low %v13778_v43, %v13779_v16  ;;  %v24645_v28 = vld [vmem:[#allocation59_spill] sm:$0xff] }
 0x2ce   : > { %v15963_v34 = vcombine.low %v13782_v52, %v13783_v8  ;;  %v6297_v15 = vcombine.high %v6289_v23, %v6289_v23  ;;  %v6298_v5 = vcombine.high %v6296_v45, %v6296_v45  ;;  %v6305_v6 = vrot.slane %v6289_v23, %v18671_v2 }
 0x2cf   : > { %v8334_v31 = vsel %vm519_vm4, %v24639_v12, %v7605_v56  ;;  %v15947_v59 = vcombine.low %v13780_v55, %v13781_v40  ;;  %v15954_v62 = vrot.slane %v15946_v42, %v18669_v35  ;;  %v6312_v24 = vrot.slane %v6296_v45, %v18671_v2  ;;  %v24643_v56 = vld [vmem:[#allocation56_spill] sm:$0xff]  ;;  %v2105_v42 = vpop.f32.mrf.mxu0 }
 0x2d0   : > { %v13785_v63 = vadd.f32 %v18699_v39, %v8334_v31  ;;  %v15971_v25 = vrot.slane %v15963_v34, %v18669_v35  ;;  %v6319_v17 = vrot.slane %v6297_v15, %v18671_v2  ;;  %v6326_v29 = vrot.slane %v6298_v5, %v18671_v2 }
 0x2d1   : > { %v15961_v51 = vrot.slane %v15947_v59, %v18669_v35  ;;  %v6327_v22 = vcombine.high %v6305_v6, %v6305_v6  ;;  %v6328_v49 = vcombine.high %v6312_v24, %v6312_v24  ;;  %v7513_v9 = vrot.slane %v6305_v6, %v18686_v19 }
 0x2d2   : > { %v15964_v53 = vcombine.low %v13784_v21, %v13785_v63  ;;  %v6329_v50 = vcombine.high %v6319_v17, %v6319_v17  ;;  %v6330_v45 = vcombine.high %v6326_v29, %v6326_v29  ;;  %v7517_v61 = vrot.slane %v6319_v17, %v18686_v19  ;;  %v2397_v21 = vpop.f32.mrf.mxu1 }
 0x2d3   : > { %v15962_v54 = vcombine.low %v15954_v62, %v15961_v51  ;;  %v7521_v14 = vrot.slane %v6327_v22, %v18686_v19  ;;  %v7529_v37 = vrot.slane %v6312_v24, %v18686_v19  ;;  %v7533_v58 = vrot.slane %v6326_v29, %v18686_v19 }
 0x2d4   : > { %v15978_v23 = vrot.slane %v15964_v53, %v18669_v35  ;;  %v7525_v10 = vrot.slane %v6329_v50, %v18686_v19  ;;  %v7537_v0 = vrot.slane %v6328_v49, %v18686_v19  ;;  %v7541_v60 = vrot.slane %v6330_v45, %v18686_v19 }
 0x2d5   : > { %16842 = vst.msk [vmem:[%s19560_s18 + $0x2c0] sm:$0xff] %vm651_vm7, %v15962_v54  ;;  %v8311_v38 = vsel %vm519_vm4, %v24640_v32, %v7513_v9  ;;  %v8312_v26 = vsel %vm519_vm4, %v24641_v27, %v7517_v61  ;;  %v24642_v48 = vcombine.high %v24640_v32, %v24640_v32  ;;  %v8315_v13 = vsel %vm519_vm4, %v24643_v56, %v7529_v37 }
 0x2d6   : > { %v15979_v57 = vcombine.low %v15971_v25, %v15978_v23  ;;  %v24644_v36 = vcombine.high %v24641_v27, %v24641_v27  ;;  %v8316_v16 = vsel %vm519_vm4, %v24645_v28, %v7533_v58  ;;  %v24646_v46 = vcombine.high %v24643_v56, %v24643_v56 }
 0x2d7   : > { %v8313_v43 = vsel %vm519_vm4, %v24642_v48, %v7521_v14  ;;  %v24647_v55 = vcombine.high %v24645_v28, %v24645_v28  ;;  %v13746_v8 = vadd.f32 %v18680_v3, %v8311_v38  ;;  %v13747_v12 = vadd.f32 %v18695_v18, %v8312_v26 }
 0x2d8   : > { %16843 = vst.msk [vmem:[%s19560_s18 + $0x2c8] sm:$0xff] %vm651_vm7, %v15979_v57  ;;  %v8314_v20 = vsel %vm519_vm4, %v24644_v36, %v7525_v10  ;;  %v8317_v33 = vsel %vm519_vm4, %v24646_v46, %v7537_v0  ;;  %v13748_v31 = vadd.f32 %v18683_v47, %v8313_v43  ;;  %v13750_v63 = vadd.f32 %v18680_v3, %v8315_v13  ;;  %v24648_v36 = vld [vmem:[#allocation58_spill] sm:$0xff] }
 0x2d9   : > { %v8318_v52 = vsel %vm519_vm4, %v24647_v55, %v7541_v60  ;;  %v13749_v40 = vadd.f32 %v18699_v39, %v8314_v20  ;;  %v13751_v34 = vadd.f32 %v18695_v18, %v8316_v16  ;;  %v13752_v15 = vadd.f32 %v18683_v47, %v8317_v33 }
 0x2da   : > { %v13753_v5 = vadd.f32 %v18699_v39, %v8318_v52  ;;  %v15810_v59 = vcombine.low %v13746_v8, %v13747_v12  ;;  %v2393_v6 = vadd.f32 %v20698_v44, %v20700_v41  ;;  %v2385_v24 = vadd.f32 %v2384_v4, %v2092_v1  ;;  %v24649_v52 = vld [vmem:[#allocation61_spill] sm:$0xff] }
 0x2db   : > { %v15811_v62 = vcombine.low %v13748_v31, %v13749_v40  ;;  %v15827_v53 = vcombine.low %v13750_v63, %v13751_v34  ;;  %v20770_v17 = vadd.f32 %v17572_v11, %v17538_v30  ;;  %v20772_v29 = vadd.f32 %v2397_v21, %v2105_v42  ;;  %v24651_v40 = vld [vmem:[#allocation60_spill] sm:$0xff] }
 0x2dc   : > { %v15828_v25 = vcombine.low %v13752_v15, %v13753_v5  ;;  %v15818_v51 = vrot.slane %v15810_v59, %v18669_v35  ;;  %v6429_v49 = vcombine.high %v2393_v6, %v2393_v6  ;;  %v6436_v9 = vrot.slane %v2393_v6, %v18671_v2  ;;  %v24653_v5 = vld [vmem:[#allocation62_spill] sm:$0xff] }
 0x2dd   : > { %v15825_v22 = vrot.slane %v15811_v62, %v18669_v35  ;;  %v15835_v23 = vrot.slane %v15827_v53, %v18669_v35  ;;  %v6331_v44 = vcombine.high %v2385_v24, %v2385_v24  ;;  %v6338_v41 = vrot.slane %v2385_v24, %v18671_v2 }
 0x2de   : > { %v15842_v50 = vrot.slane %v15828_v25, %v18669_v35  ;;  %v6443_v1 = vrot.slane %v6429_v49, %v18671_v2  ;;  %v6444_v45 = vcombine.high %v6436_v9, %v6436_v9  ;;  %v6452_v61 = vrot.slane %v6436_v9, %v18671_v2 }
 0x2df   : > { %v15826_v4 = vcombine.low %v15818_v51, %v15825_v22  ;;  %v6345_v14 = vrot.slane %v6331_v44, %v18671_v2  ;;  %v6346_v37 = vcombine.high %v6338_v41, %v6338_v41  ;;  %v6354_v58 = vrot.slane %v6338_v41, %v18671_v2 }
 0x2e0   : > { %v15843_v54 = vcombine.low %v15835_v23, %v15842_v50  ;;  %v6445_v11 = vcombine.high %v6443_v1, %v6443_v1  ;;  %v6459_v30 = vrot.slane %v6443_v1, %v18671_v2  ;;  %v6466_v57 = vrot.slane %v6444_v45, %v18671_v2 }
 0x2e1   : > { %16834 = vst.msk [vmem:[%s19560_s18 + $0x280] sm:$0xff] %vm651_vm7, %v15826_v4  ;;  %v6474_v10 = vcombine.high %v6452_v61, %v6452_v61  ;;  %v7609_v0 = vrot.slane %v6452_v61, %v18686_v19  ;;  %v6347_v60 = vcombine.high %v6345_v14, %v6345_v14  ;;  %v6361_v32 = vrot.slane %v6345_v14, %v18671_v2 }
 0x2e2   : > { %16835 = vst.msk [vmem:[%s19560_s18 + $0x288] sm:$0xff] %vm651_vm7, %v15843_v54  ;;  %v6368_v38 = vrot.slane %v6346_v37, %v18671_v2  ;;  %v6473_v27 = vrot.slane %v6445_v11, %v18671_v2  ;;  %v6475_v26 = vcombine.high %v6459_v30, %v6459_v30  ;;  %v6476_v48 = vcombine.high %v6466_v57, %v6466_v57 }
 0x2e3   : > { %v7613_v43 = vrot.slane %v6466_v57, %v18686_v19  ;;  %v7617_v56 = vrot.slane %v6474_v10, %v18686_v19  ;;  %v7625_v13 = vrot.slane %v6459_v30, %v18686_v19  ;;  %v8335_v20 = vsel %vm519_vm4, %v24648_v36, %v7609_v0 }
 0x2e4   : > { %v6375_v28 = vrot.slane %v6347_v60, %v18671_v2  ;;  %v6477_v16 = vcombine.high %v6473_v27, %v6473_v27  ;;  %v7621_v46 = vrot.slane %v6476_v48, %v18686_v19  ;;  %v7629_v33 = vrot.slane %v6473_v27, %v18686_v19 }
 0x2e5   : > { %v7633_v55 = vrot.slane %v6475_v26, %v18686_v19  ;;  %v8336_v8 = vsel %vm519_vm4, %v24649_v52, %v7613_v43  ;;  %v24650_v12 = vcombine.high %v24648_v36, %v24648_v36  ;;  %v8339_v21 = vsel %vm519_vm4, %v24651_v40, %v7625_v13  ;;  %v24656_v13 = vld [vmem:[#allocation63_spill] sm:$0xff]  ;;  %v24657_v36 = vld [vmem:[#allocation65_spill] sm:$0xff] }
 0x2e6   : > { %v13786_v42 = vadd.f32 %v18680_v3, %v8335_v20  ;;  %v7637_v63 = vrot.slane %v6477_v16, %v18686_v19  ;;  %v24652_v34 = vcombine.high %v24649_v52, %v24649_v52  ;;  %v8340_v59 = vsel %vm519_vm4, %v24653_v5, %v7629_v33 }
 0x2e7   : > { %v8337_v31 = vsel %vm519_vm4, %v24650_v12, %v7617_v56  ;;  %v24654_v62 = vcombine.high %v24651_v40, %v24651_v40  ;;  %v13787_v24 = vadd.f32 %v18695_v18, %v8336_v8  ;;  %v13790_v51 = vadd.f32 %v18680_v3, %v8339_v21  ;;  %v24661_v8 = vld [vmem:[#allocation67_spill] sm:$0xff] }
 0x2e8   : > { %v8338_v15 = vsel %vm519_vm4, %v24652_v34, %v7621_v46  ;;  %v13788_v53 = vadd.f32 %v18683_v47, %v8337_v31  ;;  %v24655_v22 = vcombine.high %v24653_v5, %v24653_v5  ;;  %v13791_v9 = vadd.f32 %v18695_v18, %v8340_v59 }
 0x2e9   : > { %v8341_v6 = vsel %vm519_vm4, %v24654_v62, %v7633_v55  ;;  %v13789_v25 = vadd.f32 %v18699_v39, %v8338_v15  ;;  %v6376_v50 = vcombine.high %v6354_v58, %v6354_v58  ;;  %v15980_v41 = vcombine.low %v13786_v42, %v13787_v24  ;;  %v24660_v55 = vld [vmem:[#allocation64_spill] sm:$0xff] }
 0x2ea   : > { %v8342_v49 = vsel %vm519_vm4, %v24655_v22, %v7637_v63  ;;  %v13792_v23 = vadd.f32 %v18683_v47, %v8341_v6  ;;  %v6377_v1 = vcombine.high %v6361_v32, %v6361_v32  ;;  %v15997_v45 = vcombine.low %v13790_v51, %v13791_v9 }
 0x2eb   : > { %v13793_v44 = vadd.f32 %v18699_v39, %v8342_v49  ;;  %v15981_v4 = vcombine.low %v13788_v53, %v13789_v25  ;;  %v6378_v61 = vcombine.high %v6368_v38, %v6368_v38  ;;  %v6379_v54 = vcombine.high %v6375_v28, %v6375_v28 }
 0x2ec   : > { %v7545_v14 = vrot.slane %v6354_v58, %v18686_v19  ;;  %v15988_v37 = vrot.slane %v15980_v41, %v18669_v35  ;;  %v7549_v57 = vrot.slane %v6368_v38, %v18686_v19  ;;  %v16005_v10 = vrot.slane %v15997_v45, %v18669_v35 }
 0x2ed   : > { %v15995_v11 = vrot.slane %v15981_v4, %v18669_v35  ;;  %v15998_v30 = vcombine.low %v13792_v23, %v13793_v44  ;;  %v7553_v0 = vrot.slane %v6376_v50, %v18686_v19  ;;  %v7557_v60 = vrot.slane %v6378_v61, %v18686_v19 }
 0x2ee   : > { %v7561_v27 = vrot.slane %v6361_v32, %v18686_v19  ;;  %v7565_v58 = vrot.slane %v6375_v28, %v18686_v19  ;;  %v7569_v43 = vrot.slane %v6377_v1, %v18686_v19  ;;  %v7573_v56 = vrot.slane %v6379_v54, %v18686_v19 }
 0x2ef   : > { %v15996_v26 = vcombine.low %v15988_v37, %v15995_v11  ;;  %v16012_v48 = vrot.slane %v15998_v30, %v18669_v35  ;;  %v8319_v38 = vsel %vm519_vm4, %v24656_v13, %v7545_v14  ;;  %v8320_v20 = vsel %vm519_vm4, %v24657_v36, %v7549_v57 }
 0x2f0   : > { %v24658_v16 = vcombine.high %v24656_v13, %v24656_v13  ;;  %v24659_v28 = vcombine.high %v24657_v36, %v24657_v36  ;;  %v8323_v52 = vsel %vm519_vm4, %v24660_v55, %v7561_v27  ;;  %v8324_v12 = vsel %vm519_vm4, %v24661_v8, %v7565_v58 }
 0x2f1   : > { %v16013_v46 = vcombine.low %v16005_v10, %v16012_v48  ;;  %16844 = vst.msk [vmem:[%s19560_s18 + $0x2d0] sm:$0xff] %vm651_vm7, %v15996_v26  ;;  %v24662_v31 = vcombine.high %v24660_v55, %v24660_v55  ;;  %v24663_v21 = vcombine.high %v24661_v8, %v24661_v8  ;;  %v13754_v63 = vadd.f32 %v18680_v3, %v8319_v38 }
 0x2f2   : > { %v8321_v32 = vsel %vm519_vm4, %v24658_v16, %v7553_v0  ;;  %v8322_v33 = vsel %vm519_vm4, %v24659_v28, %v7557_v60  ;;  %v13755_v34 = vadd.f32 %v18695_v18, %v8320_v20  ;;  %v13758_v59 = vadd.f32 %v18680_v3, %v8323_v52  ;;  %v24665_v20 = vld [vmem:[#allocation68_spill] sm:$0xff] }
 0x2f3   : > { %v8325_v40 = vsel %vm519_vm4, %v24662_v31, %v7569_v43  ;;  %v8326_v42 = vsel %vm519_vm4, %v24663_v21, %v7573_v56  ;;  %16845 = vst.msk [vmem:[%s19560_s18 + $0x2d8] sm:$0xff] %vm651_vm7, %v16013_v46  ;;  %v13756_v15 = vadd.f32 %v18683_v47, %v8321_v32  ;;  %v13757_v5 = vadd.f32 %v18699_v39, %v8322_v33  ;;  %v24664_v43 = vld [vmem:[#allocation66_spill] sm:$0xff]  ;;  %v24666_v46 = vld [vmem:[#allocation69_spill] sm:$0xff] }
 0x2f4   : > { %v13759_v62 = vadd.f32 %v18695_v18, %v8324_v12  ;;  %v13760_v6 = vadd.f32 %v18683_v47, %v8325_v40  ;;  %v13761_v24 = vadd.f32 %v18699_v39, %v8326_v42  ;;  %v15844_v53 = vcombine.low %v13754_v63, %v13755_v34  ;;  %v20930_v42 = vpop.f32.mrf.mxu1  ;;  %v20932_v63 = vpop.f32.mrf.mxu0 }
 0x2f5   : > { %v6576_v25 = vcombine.high %v20770_v17, %v20770_v17  ;;  %v15845_v51 = vcombine.low %v13756_v15, %v13757_v5  ;;  %v6583_v49 = vrot.slane %v20770_v17, %v18671_v2  ;;  %v6478_v9 = vcombine.high %v20772_v29, %v20772_v29 }
 0x2f6   : > { %v15861_v22 = vcombine.low %v13758_v59, %v13759_v62  ;;  %v15852_v23 = vrot.slane %v15844_v53, %v18669_v35  ;;  %v15862_v50 = vcombine.low %v13760_v6, %v13761_v24  ;;  %v6485_v41 = vrot.slane %v20772_v29, %v18671_v2 }
 0x2f7   : > { %v6590_v44 = vrot.slane %v6576_v25, %v18671_v2  ;;  %v15859_v4 = vrot.slane %v15845_v51, %v18669_v35  ;;  %v6591_v45 = vcombine.high %v6583_v49, %v6583_v49  ;;  %v6599_v61 = vrot.slane %v6583_v49, %v18671_v2 }
 0x2f8   : > { %v15869_v1 = vrot.slane %v15861_v22, %v18669_v35  ;;  %v15876_v17 = vrot.slane %v15862_v50, %v18669_v35  ;;  %v6492_v37 = vrot.slane %v6478_v9, %v18671_v2  ;;  %v24667_v33 = vcombine.high %v24664_v43, %v24664_v43 }
 0x2f9   : > { %v6592_v54 = vcombine.high %v6590_v44, %v6590_v44  ;;  %v6606_v14 = vrot.slane %v6590_v44, %v18671_v2  ;;  %v15860_v11 = vcombine.low %v15852_v23, %v15859_v4  ;;  %v6613_v30 = vrot.slane %v6591_v45, %v18671_v2  ;;  %v2108_v45 = vpop.f32.mrf.mxu0 }
 0x2fa   : > { %v6621_v29 = vcombine.high %v6599_v61, %v6599_v61  ;;  %v7705_v57 = vrot.slane %v6599_v61, %v18686_v19  ;;  %v15877_v10 = vcombine.low %v15869_v1, %v15876_v17  ;;  %v24668_v31 = vcombine.high %v24665_v20, %v24665_v20 }
 0x2fb   : > { %v6620_v0 = vrot.slane %v6592_v54, %v18671_v2  ;;  %v6622_v60 = vcombine.high %v6606_v14, %v6606_v14  ;;  %v7721_v27 = vrot.slane %v6606_v14, %v18686_v19  ;;  %16836 = vst.msk [vmem:[%s19560_s18 + $0x290] sm:$0xff] %vm651_vm7, %v15860_v11  ;;  %v6623_v26 = vcombine.high %v6613_v30, %v6613_v30 }
 0x2fc   : > { %v7709_v48 = vrot.slane %v6613_v30, %v18686_v19  ;;  %v7713_v58 = vrot.slane %v6621_v29, %v18686_v19  ;;  %v8359_v56 = vsel %vm519_vm4, %v24664_v43, %v7705_v57  ;;  %16837 = vst.msk [vmem:[%s19560_s18 + $0x298] sm:$0xff] %vm651_vm7, %v15877_v10  ;;  %v24669_v34 = vcombine.high %v24666_v46, %v24666_v46  ;;  %v17542_v43 = vpop.f32.mrf.mxu0 }
 0x2fd   : > { %v6624_v13 = vcombine.high %v6620_v0, %v6620_v0  ;;  %v7725_v38 = vrot.slane %v6620_v0, %v18686_v19  ;;  %v7729_v36 = vrot.slane %v6622_v60, %v18686_v19  ;;  %v8363_v16 = vsel %vm519_vm4, %v24665_v20, %v7721_v27  ;;  %v24671_v20 = vld [vmem:[#allocation70_spill] sm:$0xff] }
 0x2fe   : > { %v7717_v32 = vrot.slane %v6623_v26, %v18686_v19  ;;  %v8360_v28 = vsel %vm519_vm4, %v24666_v46, %v7709_v48  ;;  %v8361_v55 = vsel %vm519_vm4, %v24667_v33, %v7713_v58  ;;  %v13842_v52 = vadd.f32 %v18680_v3, %v8359_v56 }
 0x2ff   : > { %v7733_v8 = vrot.slane %v6624_v13, %v18686_v19  ;;  %v8364_v12 = vsel %vm519_vm4, %v19344_v7, %v7725_v38  ;;  %v8365_v40 = vsel %vm519_vm4, %v24668_v31, %v7729_v36  ;;  %v13843_v21 = vadd.f32 %v18695_v18, %v8360_v28  ;;  %v24676_v31 = vld [vmem:[#allocation73_spill] sm:$0xff] }
 0x300   : > { %v8362_v15 = vsel %vm519_vm4, %v24669_v34, %v7717_v32  ;;  %v13844_v5 = vadd.f32 %v18683_v47, %v8361_v55  ;;  %v13846_v59 = vadd.f32 %v18680_v3, %v8363_v16  ;;  %v13847_v62 = vadd.f32 %v18695_v18, %v8364_v12  ;;  %v24672_v32 = vld [vmem:[#allocation72_spill] sm:$0xff]  ;;  %v24674_v55 = vld [vmem:[#allocation71_spill] sm:$0xff] }
 0x301   : > { %v24670_v6 = vcombine.high %v19344_v7, %v19344_v7  ;;  %v13845_v53 = vadd.f32 %v18699_v39, %v8362_v15  ;;  %v13848_v25 = vadd.f32 %v18683_v47, %v8365_v40  ;;  %v16218_v51 = vcombine.low %v13842_v52, %v13843_v21  ;;  %v2400_v7 = vpop.f32.mrf.mxu1 }
 0x302   : > { %v16235_v49 = vcombine.low %v13846_v59, %v13847_v62  ;;  %v6493_v9 = vcombine.high %v6485_v41, %v6485_v41  ;;  %v6494_v23 = vcombine.high %v6492_v37, %v6492_v37  ;;  %v6501_v4 = vrot.slane %v6485_v41, %v18671_v2 }
 0x303   : > { %v8366_v24 = vsel %vm519_vm4, %v24670_v6, %v7733_v8  ;;  %v16219_v50 = vcombine.low %v13844_v5, %v13845_v53  ;;  %v16226_v44 = vrot.slane %v16218_v51, %v18669_v35  ;;  %v6508_v1 = vrot.slane %v6492_v37, %v18671_v2  ;;  %v17576_v58 = vpop.f32.mrf.mxu1 }
 0x304   : > { %v13849_v22 = vadd.f32 %v18699_v39, %v8366_v24  ;;  %v16243_v17 = vrot.slane %v16235_v49, %v18669_v35  ;;  %v6515_v54 = vrot.slane %v6493_v9, %v18671_v2  ;;  %v6522_v14 = vrot.slane %v6494_v23, %v18671_v2 }
 0x305   : > { %v16233_v11 = vrot.slane %v16219_v50, %v18669_v35  ;;  %v6523_v30 = vcombine.high %v6501_v4, %v6501_v4  ;;  %v6524_v29 = vcombine.high %v6508_v1, %v6508_v1  ;;  %v7641_v57 = vrot.slane %v6501_v4, %v18686_v19  ;;  %v2413_v53 = vpop.f32.mrf.mxu1 }
 0x306   : > { %v16236_v61 = vcombine.low %v13848_v25, %v13849_v22  ;;  %v6525_v10 = vcombine.high %v6515_v54, %v6515_v54  ;;  %v6526_v37 = vcombine.high %v6522_v14, %v6522_v14  ;;  %v7645_v0 = vrot.slane %v6515_v54, %v18686_v19  ;;  %v2121_v25 = vpop.f32.mrf.mxu0 }
 0x307   : > { %v16234_v60 = vcombine.low %v16226_v44, %v16233_v11  ;;  %v7649_v27 = vrot.slane %v6523_v30, %v18686_v19  ;;  %v7657_v26 = vrot.slane %v6508_v1, %v18686_v19  ;;  %v7661_v48 = vrot.slane %v6522_v14, %v18686_v19 }
 0x308   : > { %v16250_v41 = vrot.slane %v16236_v61, %v18669_v35  ;;  %v7653_v13 = vrot.slane %v6525_v10, %v18686_v19  ;;  %v7665_v38 = vrot.slane %v6524_v29, %v18686_v19  ;;  %v7669_v36 = vrot.slane %v6526_v37, %v18686_v19 }
 0x309   : > { %16858 = vst.msk [vmem:[%s19560_s18 + $0x340] sm:$0xff] %vm651_vm7, %v16234_v60  ;;  %v8343_v16 = vsel %vm519_vm4, %v24671_v20, %v7641_v57  ;;  %v8344_v46 = vsel %vm519_vm4, %v24672_v32, %v7645_v0  ;;  %v24673_v28 = vcombine.high %v24671_v20, %v24671_v20  ;;  %v8347_v52 = vsel %vm519_vm4, %v24674_v55, %v7657_v26 }
 0x30a   : > { %v16251_v56 = vcombine.low %v16243_v17, %v16250_v41  ;;  %v24675_v8 = vcombine.high %v24672_v32, %v24672_v32  ;;  %v8348_v40 = vsel %vm519_vm4, %v24676_v31, %v7661_v48  ;;  %v24677_v21 = vcombine.high %v24674_v55, %v24674_v55 }
 0x30b   : > { %v8345_v33 = vsel %vm519_vm4, %v24673_v28, %v7649_v27  ;;  %v24678_v15 = vcombine.high %v24676_v31, %v24676_v31  ;;  %v13810_v59 = vadd.f32 %v18680_v3, %v8343_v16  ;;  %v13811_v62 = vadd.f32 %v18695_v18, %v8344_v46 }
 0x30c   : > { %16859 = vst.msk [vmem:[%s19560_s18 + $0x348] sm:$0xff] %vm651_vm7, %v16251_v56  ;;  %v8346_v12 = vsel %vm519_vm4, %v24675_v8, %v7653_v13  ;;  %v8349_v34 = vsel %vm519_vm4, %v24677_v21, %v7665_v38  ;;  %v13812_v6 = vadd.f32 %v18683_v47, %v8345_v33  ;;  %v13814_v51 = vadd.f32 %v18680_v3, %v8347_v52  ;;  %v24679_v52 = vld [vmem:[#allocation74_spill] sm:$0xff] }
 0x30d   : > { %v8350_v5 = vsel %vm519_vm4, %v24678_v15, %v7669_v36  ;;  %v13813_v24 = vadd.f32 %v18699_v39, %v8346_v12  ;;  %v13815_v22 = vadd.f32 %v18695_v18, %v8348_v40  ;;  %v13816_v49 = vadd.f32 %v18683_v47, %v8349_v34  ;;  %v24680_v15 = vld [vmem:[#allocation77_spill] sm:$0xff] }
 0x30e   : > { %v13817_v9 = vadd.f32 %v18699_v39, %v8350_v5  ;;  %v16082_v23 = vcombine.low %v13810_v59, %v13811_v62  ;;  %v2409_v44 = vadd.f32 %v20930_v42, %v20932_v63  ;;  %v2401_v4 = vadd.f32 %v2400_v7, %v2108_v45 }
 0x30f   : > { %v16083_v50 = vcombine.low %v13812_v6, %v13813_v24  ;;  %v16099_v1 = vcombine.low %v13814_v51, %v13815_v22  ;;  %v21002_v17 = vadd.f32 %v17576_v58, %v17542_v43  ;;  %v21004_v54 = vadd.f32 %v2413_v53, %v2121_v25  ;;  %v24682_v6 = vld [vmem:[#allocation76_spill] sm:$0xff] }
 0x310   : > { %v16100_v61 = vcombine.low %v13816_v49, %v13817_v9  ;;  %v16090_v14 = vrot.slane %v16082_v23, %v18669_v35  ;;  %v6625_v30 = vcombine.high %v2409_v44, %v2409_v44  ;;  %v6632_v29 = vrot.slane %v2409_v44, %v18671_v2  ;;  %v24684_v49 = vld [vmem:[#allocation80_spill] sm:$0xff] }
 0x311   : > { %v16097_v11 = vrot.slane %v16083_v50, %v18669_v35  ;;  %v16107_v57 = vrot.slane %v16099_v1, %v18669_v35  ;;  %v6527_v42 = vcombine.high %v2401_v4, %v2401_v4  ;;  %v6534_v63 = vrot.slane %v2401_v4, %v18671_v2 }
 0x312   : > { %v16114_v41 = vrot.slane %v16100_v61, %v18669_v35  ;;  %v6639_v45 = vrot.slane %v6625_v30, %v18671_v2  ;;  %v6640_v10 = vcombine.high %v6632_v29, %v6632_v29  ;;  %v6648_v37 = vrot.slane %v6632_v29, %v18671_v2 }
 0x313   : > { %v16098_v7 = vcombine.low %v16090_v14, %v16097_v11  ;;  %v6541_v60 = vrot.slane %v6527_v42, %v18671_v2  ;;  %v6542_v27 = vcombine.high %v6534_v63, %v6534_v63  ;;  %v6550_v26 = vrot.slane %v6534_v63, %v18671_v2 }
 0x314   : > { %v16115_v0 = vcombine.low %v16107_v57, %v16114_v41  ;;  %v6641_v48 = vcombine.high %v6639_v45, %v6639_v45  ;;  %v6655_v58 = vrot.slane %v6639_v45, %v18671_v2  ;;  %v6662_v43 = vrot.slane %v6640_v10, %v18671_v2 }
 0x315   : > { %16850 = vst.msk [vmem:[%s19560_s18 + $0x300] sm:$0xff] %vm651_vm7, %v16098_v7  ;;  %v6670_v56 = vcombine.high %v6648_v37, %v6648_v37  ;;  %v7737_v13 = vrot.slane %v6648_v37, %v18686_v19  ;;  %v6543_v38 = vcombine.high %v6541_v60, %v6541_v60  ;;  %v6557_v36 = vrot.slane %v6541_v60, %v18671_v2 }
 0x316   : > { %16851 = vst.msk [vmem:[%s19560_s18 + $0x308] sm:$0xff] %vm651_vm7, %v16115_v0  ;;  %v6564_v20 = vrot.slane %v6542_v27, %v18671_v2  ;;  %v6669_v16 = vrot.slane %v6641_v48, %v18671_v2  ;;  %v6671_v32 = vcombine.high %v6655_v58, %v6655_v58  ;;  %v6672_v46 = vcombine.high %v6662_v43, %v6662_v43 }
 0x317   : > { %v7741_v28 = vrot.slane %v6662_v43, %v18686_v19  ;;  %v7745_v33 = vrot.slane %v6670_v56, %v18686_v19  ;;  %v7753_v55 = vrot.slane %v6655_v58, %v18686_v19  ;;  %v8367_v8 = vsel %vm519_vm4, %v24679_v52, %v7737_v13 }
 0x318   : > { %v6571_v12 = vrot.slane %v6543_v38, %v18671_v2  ;;  %v6673_v31 = vcombine.high %v6669_v16, %v6669_v16  ;;  %v7749_v40 = vrot.slane %v6672_v46, %v18686_v19  ;;  %v7757_v21 = vrot.slane %v6669_v16, %v18686_v19 }
 0x319   : > { %v7761_v34 = vrot.slane %v6671_v32, %v18686_v19  ;;  %v8368_v5 = vsel %vm519_vm4, %v24680_v15, %v7741_v28  ;;  %v24681_v59 = vcombine.high %v24679_v52, %v24679_v52  ;;  %v8371_v24 = vsel %vm519_vm4, %v24682_v6, %v7753_v55  ;;  %v24688_v55 = vld [vmem:[#allocation79_spill] sm:$0xff] }
 0x31a   : > { %v13850_v53 = vadd.f32 %v18680_v3, %v8367_v8  ;;  %v7765_v25 = vrot.slane %v6673_v31, %v18686_v19  ;;  %v24683_v51 = vcombine.high %v24680_v15, %v24680_v15  ;;  %v8372_v9 = vsel %vm519_vm4, %v24684_v49, %v7757_v21  ;;  %v24691_v21 = vld [vmem:[#allocation78_spill] sm:$0xff]  ;;  %v24692_v15 = vld [vmem:[#allocation81_spill] sm:$0xff] }
 0x31b   : > { %v8369_v62 = vsel %vm519_vm4, %v24681_v59, %v7745_v33  ;;  %v24685_v23 = vcombine.high %v24682_v6, %v24682_v6  ;;  %v13851_v44 = vadd.f32 %v18695_v18, %v8368_v5  ;;  %v13854_v61 = vadd.f32 %v18680_v3, %v8371_v24  ;;  %v24687_v33 = vld [vmem:[#allocation75_spill] sm:$0xff] }
 0x31c   : > { %v8370_v22 = vsel %vm519_vm4, %v24683_v51, %v7749_v40  ;;  %v13852_v4 = vadd.f32 %v18683_v47, %v8369_v62  ;;  %v24686_v14 = vcombine.high %v24684_v49, %v24684_v49  ;;  %v13855_v30 = vadd.f32 %v18695_v18, %v8372_v9 }
 0x31d   : > { %v8373_v50 = vsel %vm519_vm4, %v24685_v23, %v7761_v34  ;;  %v13853_v1 = vadd.f32 %v18699_v39, %v8370_v22  ;;  %v6572_v57 = vcombine.high %v6550_v26, %v6550_v26  ;;  %v16252_v42 = vcombine.low %v13850_v53, %v13851_v44 }
 0x31e   : > { %v8374_v11 = vsel %vm519_vm4, %v24686_v14, %v7765_v25  ;;  %v13856_v29 = vadd.f32 %v18683_v47, %v8373_v50  ;;  %v6573_v7 = vcombine.high %v6557_v36, %v6557_v36  ;;  %v16269_v45 = vcombine.low %v13854_v61, %v13855_v30 }
 0x31f   : > { %v13857_v41 = vadd.f32 %v18699_v39, %v8374_v11  ;;  %v16253_v63 = vcombine.low %v13852_v4, %v13853_v1  ;;  %v6574_v10 = vcombine.high %v6564_v20, %v6564_v20  ;;  %v6575_v37 = vcombine.high %v6571_v12, %v6571_v12 }
 0x320   : > { %v7673_v0 = vrot.slane %v6550_v26, %v18686_v19  ;;  %v16260_v60 = vrot.slane %v16252_v42, %v18669_v35  ;;  %v7677_v58 = vrot.slane %v6564_v20, %v18686_v19  ;;  %v16277_v43 = vrot.slane %v16269_v45, %v18669_v35 }
 0x321   : > { %v16267_v27 = vrot.slane %v16253_v63, %v18669_v35  ;;  %v16270_v48 = vcombine.low %v13856_v29, %v13857_v41  ;;  %v7681_v56 = vrot.slane %v6572_v57, %v18686_v19  ;;  %v7685_v13 = vrot.slane %v6574_v10, %v18686_v19 }
 0x322   : > { %v7689_v38 = vrot.slane %v6557_v36, %v18686_v19  ;;  %v7693_v26 = vrot.slane %v6571_v12, %v18686_v19  ;;  %v7697_v46 = vrot.slane %v6573_v7, %v18686_v19  ;;  %v7701_v28 = vrot.slane %v6575_v37, %v18686_v19 }
 0x323   : > { %v16268_v16 = vcombine.low %v16260_v60, %v16267_v27  ;;  %v16284_v32 = vrot.slane %v16270_v48, %v18669_v35  ;;  %v8351_v20 = vsel %vm519_vm4, %v24687_v33, %v7673_v0  ;;  %v8352_v52 = vsel %vm519_vm4, %v24688_v55, %v7677_v58 }
 0x324   : > { %v24689_v8 = vcombine.high %v24687_v33, %v24687_v33  ;;  %v24690_v12 = vcombine.high %v24688_v55, %v24688_v55  ;;  %v8355_v34 = vsel %vm519_vm4, %v24691_v21, %v7689_v38  ;;  %v8356_v5 = vsel %vm519_vm4, %v24692_v15, %v7693_v26  ;;  %v24695_v26 = vld [vmem:[#allocation82_spill] sm:$0xff]  ;;  %v24696_v55 = vld [vmem:[#allocation83_spill] sm:$0xff] }
 0x325   : > { %v16285_v31 = vcombine.low %v16277_v43, %v16284_v32  ;;  %16860 = vst.msk [vmem:[%s19560_s18 + $0x350] sm:$0xff] %vm651_vm7, %v16268_v16  ;;  %v24693_v59 = vcombine.high %v24691_v21, %v24691_v21  ;;  %v24694_v6 = vcombine.high %v24692_v15, %v24692_v15  ;;  %v13818_v53 = vadd.f32 %v18680_v3, %v8351_v20  ;;  %v24699_v15 = vld [vmem:[#allocation85_spill] sm:$0xff] }
 0x326   : > { %v8353_v36 = vsel %vm519_vm4, %v24689_v8, %v7681_v56  ;;  %v8354_v40 = vsel %vm519_vm4, %v24690_v12, %v7685_v13  ;;  %v13819_v25 = vadd.f32 %v18695_v18, %v8352_v52  ;;  %v13822_v49 = vadd.f32 %v18680_v3, %v8355_v34 }
 0x327   : > { %v8357_v62 = vsel %vm519_vm4, %v24693_v59, %v7697_v46  ;;  %v8358_v24 = vsel %vm519_vm4, %v24694_v6, %v7701_v28  ;;  %16861 = vst.msk [vmem:[%s19560_s18 + $0x358] sm:$0xff] %vm651_vm7, %v16285_v31  ;;  %v13820_v51 = vadd.f32 %v18683_v47, %v8353_v36  ;;  %v13821_v22 = vadd.f32 %v18699_v39, %v8354_v40  ;;  %v24697_v36 = vld [vmem:[#allocation84_spill] sm:$0xff] }
 0x328   : > { %v13823_v9 = vadd.f32 %v18695_v18, %v8356_v5  ;;  %v13824_v23 = vadd.f32 %v18683_v47, %v8357_v62  ;;  %v13825_v50 = vadd.f32 %v18699_v39, %v8358_v24  ;;  %v16116_v44 = vcombine.low %v13818_v53, %v13819_v25  ;;  %v21162_v24 = vpop.f32.mrf.mxu1  ;;  %v21164_v53 = vpop.f32.mrf.mxu0 }
 0x329   : > { %v6772_v4 = vcombine.high %v21002_v17, %v21002_v17  ;;  %v16117_v1 = vcombine.low %v13820_v51, %v13821_v22  ;;  %v6779_v14 = vrot.slane %v21002_v17, %v18671_v2  ;;  %v6674_v11 = vcombine.high %v21004_v54, %v21004_v54 }
 0x32a   : > { %v16133_v61 = vcombine.low %v13822_v49, %v13823_v9  ;;  %v16124_v30 = vrot.slane %v16116_v44, %v18669_v35  ;;  %v16134_v29 = vcombine.low %v13824_v23, %v13825_v50  ;;  %v6681_v41 = vrot.slane %v21004_v54, %v18671_v2 }
 0x32b   : > { %v6786_v57 = vrot.slane %v6772_v4, %v18671_v2  ;;  %v16131_v42 = vrot.slane %v16117_v1, %v18669_v35  ;;  %v6787_v7 = vcombine.high %v6779_v14, %v6779_v14  ;;  %v6795_v45 = vrot.slane %v6779_v14, %v18671_v2 }
 0x32c   : > { %v16141_v63 = vrot.slane %v16133_v61, %v18669_v35  ;;  %v16148_v17 = vrot.slane %v16134_v29, %v18669_v35  ;;  %v6688_v0 = vrot.slane %v6674_v11, %v18671_v2  ;;  %v24698_v12 = vcombine.high %v24695_v26, %v24695_v26 }
 0x32d   : > { %v6788_v10 = vcombine.high %v6786_v57, %v6786_v57  ;;  %v6802_v37 = vrot.slane %v6786_v57, %v18671_v2  ;;  %v16132_v60 = vcombine.low %v16124_v30, %v16131_v42  ;;  %v6809_v27 = vrot.slane %v6787_v7, %v18671_v2  ;;  %v2416_v7 = vpop.f32.mrf.mxu1 }
 0x32e   : > { %v6817_v54 = vcombine.high %v6795_v45, %v6795_v45  ;;  %v7833_v48 = vrot.slane %v6795_v45, %v18686_v19  ;;  %v16149_v58 = vcombine.low %v16141_v63, %v16148_v17  ;;  %v24700_v59 = vcombine.high %v24696_v55, %v24696_v55  ;;  %v2124_v45 = vpop.f32.mrf.mxu0 }
 0x32f   : > { %v6816_v43 = vrot.slane %v6788_v10, %v18671_v2  ;;  %v6818_v56 = vcombine.high %v6802_v37, %v6802_v37  ;;  %v7849_v13 = vrot.slane %v6802_v37, %v18686_v19  ;;  %16852 = vst.msk [vmem:[%s19560_s18 + $0x310] sm:$0xff] %vm651_vm7, %v16132_v60  ;;  %v6819_v38 = vcombine.high %v6809_v27, %v6809_v27 }
 0x330   : > { %v7837_v16 = vrot.slane %v6809_v27, %v18686_v19  ;;  %v7841_v32 = vrot.slane %v6817_v54, %v18686_v19  ;;  %v8391_v46 = vsel %vm519_vm4, %v24695_v26, %v7833_v48  ;;  %16853 = vst.msk [vmem:[%s19560_s18 + $0x318] sm:$0xff] %vm651_vm7, %v16149_v58  ;;  %v24701_v25 = vcombine.high %v24697_v36, %v24697_v36  ;;  %v17616_v26 = vpop.f32.mrf.mxu1 }
 0x331   : > { %v6820_v28 = vcombine.high %v6816_v43, %v6816_v43  ;;  %v7853_v33 = vrot.slane %v6816_v43, %v18686_v19  ;;  %v7857_v20 = vrot.slane %v6818_v56, %v18686_v19  ;;  %v8395_v52 = vsel %vm519_vm4, %v24696_v55, %v7849_v13 }
 0x332   : > { %v7845_v8 = vrot.slane %v6819_v38, %v18686_v19  ;;  %v8392_v31 = vsel %vm519_vm4, %v24697_v36, %v7837_v16  ;;  %v8393_v40 = vsel %vm519_vm4, %v24698_v12, %v7841_v32  ;;  %v13906_v21 = vadd.f32 %v18680_v3, %v8391_v46  ;;  %v17582_v46 = vpop.f32.mrf.mxu0  ;;  %v24704_v36 = vld [vmem:[#allocation88_spill] sm:$0xff] }
 0x333   : > { %v7861_v34 = vrot.slane %v6820_v28, %v18686_v19  ;;  %v8396_v5 = vsel %vm519_vm4, %v24699_v15, %v7853_v33  ;;  %v8397_v62 = vsel %vm519_vm4, %v24700_v59, %v7857_v20  ;;  %v13907_v6 = vadd.f32 %v18695_v18, %v8392_v31  ;;  %v24708_v59 = vld [vmem:[#allocation89_spill] sm:$0xff] }
 0x334   : > { %v8394_v51 = vsel %vm519_vm4, %v24701_v25, %v7845_v8  ;;  %v13908_v22 = vadd.f32 %v18683_v47, %v8393_v40  ;;  %v13910_v49 = vadd.f32 %v18680_v3, %v8395_v52  ;;  %v13911_v9 = vadd.f32 %v18695_v18, %v8396_v5  ;;  %v24703_v52 = vld [vmem:[#allocation86_spill] sm:$0xff] }
 0x335   : > { %v24702_v23 = vcombine.high %v24699_v15, %v24699_v15  ;;  %v13909_v44 = vadd.f32 %v18699_v39, %v8394_v51  ;;  %v13912_v4 = vadd.f32 %v18683_v47, %v8397_v62  ;;  %v16490_v1 = vcombine.low %v13906_v21, %v13907_v6  ;;  %v24706_v21 = vld [vmem:[#allocation87_spill] sm:$0xff] }
 0x336   : > { %v16507_v14 = vcombine.low %v13910_v49, %v13911_v9  ;;  %v6689_v11 = vcombine.high %v6681_v41, %v6681_v41  ;;  %v6690_v30 = vcombine.high %v6688_v0, %v6688_v0  ;;  %v6697_v42 = vrot.slane %v6681_v41, %v18671_v2 }
 0x337   : > { %v8398_v50 = vsel %vm519_vm4, %v24702_v23, %v7861_v34  ;;  %v16491_v29 = vcombine.low %v13908_v22, %v13909_v44  ;;  %v16498_v57 = vrot.slane %v16490_v1, %v18669_v35  ;;  %v6704_v63 = vrot.slane %v6688_v0, %v18671_v2  ;;  %v2794_v44 = vpop.f32.mrf.mxu1 }
 0x338   : > { %v13913_v61 = vadd.f32 %v18699_v39, %v8398_v50  ;;  %v16515_v10 = vrot.slane %v16507_v14, %v18669_v35  ;;  %v6711_v37 = vrot.slane %v6689_v11, %v18671_v2  ;;  %v6718_v60 = vrot.slane %v6690_v30, %v18671_v2 }
 0x339   : > { %v16505_v27 = vrot.slane %v16491_v29, %v18669_v35  ;;  %v6719_v54 = vcombine.high %v6697_v42, %v6697_v42  ;;  %v6720_v48 = vcombine.high %v6704_v63, %v6704_v63  ;;  %v7769_v58 = vrot.slane %v6697_v42, %v18686_v19 }
 0x33a   : > { %v16508_v17 = vcombine.low %v13912_v4, %v13913_v61  ;;  %v6721_v43 = vcombine.high %v6711_v37, %v6711_v37  ;;  %v6722_v0 = vcombine.high %v6718_v60, %v6718_v60  ;;  %v7773_v56 = vrot.slane %v6711_v37, %v18686_v19  ;;  %v2630_v4 = vpop.f32.mrf.mxu0 }
 0x33b   : > { %v16506_v13 = vcombine.low %v16498_v57, %v16505_v27  ;;  %v7777_v38 = vrot.slane %v6719_v54, %v18686_v19  ;;  %v7785_v16 = vrot.slane %v6704_v63, %v18686_v19  ;;  %v7789_v32 = vrot.slane %v6718_v60, %v18686_v19 }
 0x33c   : > { %v16522_v41 = vrot.slane %v16508_v17, %v18669_v35  ;;  %v7781_v33 = vrot.slane %v6721_v43, %v18686_v19  ;;  %v7793_v20 = vrot.slane %v6720_v48, %v18686_v19  ;;  %v7797_v55 = vrot.slane %v6722_v0, %v18686_v19 }
 0x33d   : > { %16874 = vst.msk [vmem:[%s19560_s18 + $0x3c0] sm:$0xff] %vm651_vm7, %v16506_v13  ;;  %v8375_v8 = vsel %vm519_vm4, %v24703_v52, %v7769_v58  ;;  %v8376_v31 = vsel %vm519_vm4, %v24704_v36, %v7773_v56  ;;  %v24705_v12 = vcombine.high %v24703_v52, %v24703_v52  ;;  %v8379_v34 = vsel %vm519_vm4, %v24706_v21, %v7785_v16 }
 0x33e   : > { %v16523_v28 = vcombine.low %v16515_v10, %v16522_v41  ;;  %v24707_v15 = vcombine.high %v24704_v36, %v24704_v36  ;;  %v8380_v62 = vsel %vm519_vm4, %v24708_v59, %v7789_v32  ;;  %v24709_v6 = vcombine.high %v24706_v21, %v24706_v21 }
 0x33f   : > { %v8377_v40 = vsel %vm519_vm4, %v24705_v12, %v7777_v38  ;;  %v24710_v51 = vcombine.high %v24708_v59, %v24708_v59  ;;  %v13874_v49 = vadd.f32 %v18680_v3, %v8375_v8  ;;  %v13875_v9 = vadd.f32 %v18695_v18, %v8376_v31 }
 0x340   : > { %16875 = vst.msk [vmem:[%s19560_s18 + $0x3c8] sm:$0xff] %vm651_vm7, %v16523_v28  ;;  %v8378_v5 = vsel %vm519_vm4, %v24707_v15, %v7781_v33  ;;  %v8381_v25 = vsel %vm519_vm4, %v24709_v6, %v7793_v20  ;;  %v13876_v23 = vadd.f32 %v18683_v47, %v8377_v40  ;;  %v13878_v1 = vadd.f32 %v18680_v3, %v8379_v34  ;;  %v21254_v33 = vpop.f32.mrf.mxu1  ;;  %v21256_v20 = vpop.f32.mrf.mxu0 }
 0x341   : > { %v8382_v22 = vsel %vm519_vm4, %v24710_v51, %v7797_v55  ;;  %v13877_v50 = vadd.f32 %v18699_v39, %v8378_v5  ;;  %v13879_v61 = vadd.f32 %v18695_v18, %v8380_v62  ;;  %v13880_v14 = vadd.f32 %v18683_v47, %v8381_v25  ;;  %v24711_v5 = vld [vmem:[#allocation90_spill] sm:$0xff] }
 0x342   : > { %v13881_v11 = vadd.f32 %v18699_v39, %v8382_v22  ;;  %v16354_v30 = vcombine.low %v13874_v49, %v13875_v9  ;;  %v2425_v57 = vadd.f32 %v21162_v24, %v21164_v53  ;;  %v2417_v42 = vadd.f32 %v2416_v7, %v2124_v45  ;;  %v21275_v49 = vpop.f32.mrf.mxu1  ;;  %v21277_v9 = vpop.f32.mrf.mxu0 }
 0x343   : > { %v16355_v29 = vcombine.low %v13876_v23, %v13877_v50  ;;  %v16371_v63 = vcombine.low %v13878_v1, %v13879_v61  ;;  %v21234_v10 = vadd.f32 %v17616_v26, %v17582_v46  ;;  %v21236_v37 = vadd.f32 %v2794_v44, %v2630_v4  ;;  %v24712_v23 = vld [vmem:[#allocation92_spill] sm:$0xff]  ;;  %v24714_v1 = vld [vmem:[#allocation91_spill] sm:$0xff] }
 0x344   : > { %v16372_v17 = vcombine.low %v13880_v14, %v13881_v11  ;;  %v16362_v60 = vrot.slane %v16354_v30, %v18669_v35  ;;  %v6821_v54 = vcombine.high %v2425_v57, %v2425_v57  ;;  %v6828_v48 = vrot.slane %v2425_v57, %v18671_v2  ;;  %v24716_v57 = vld [vmem:[#allocation94_spill] sm:$0xff] }
 0x345   : > { %v16369_v27 = vrot.slane %v16355_v29, %v18669_v35  ;;  %v16379_v58 = vrot.slane %v16371_v63, %v18669_v35  ;;  %v6723_v24 = vcombine.high %v2417_v42, %v2417_v42  ;;  %v6730_v53 = vrot.slane %v2417_v42, %v18671_v2 }
 0x346   : > { %v16386_v41 = vrot.slane %v16372_v17, %v18669_v35  ;;  %v6835_v45 = vrot.slane %v6821_v54, %v18671_v2  ;;  %v6836_v43 = vcombine.high %v6828_v48, %v6828_v48  ;;  %v6844_v0 = vrot.slane %v6828_v48, %v18671_v2 }
 0x347   : > { %v16370_v7 = vcombine.low %v16362_v60, %v16369_v27  ;;  %v6737_v13 = vrot.slane %v6723_v24, %v18671_v2  ;;  %v6738_v38 = vcombine.high %v6730_v53, %v6730_v53  ;;  %v21248_v16 = vrot.slane %v6730_v53, %v18671_v2 }
 0x348   : > { %v16387_v56 = vcombine.low %v16379_v58, %v16386_v41  ;;  %v6837_v32 = vcombine.high %v6835_v45, %v6835_v45  ;;  %v6851_v26 = vrot.slane %v6835_v45, %v18671_v2  ;;  %v6858_v46 = vrot.slane %v6836_v43, %v18671_v2  ;;  %v21311_v45 = vpop.f32.mrf.mxu1  ;;  %v21313_v43 = vpop.f32.mrf.mxu0 }
 0x349   : > { %16866 = vst.msk [vmem:[%s19560_s18 + $0x380] sm:$0xff] %vm651_vm7, %v16370_v7  ;;  %v6866_v28 = vcombine.high %v6844_v0, %v6844_v0  ;;  %v7865_v55 = vrot.slane %v6844_v0, %v18686_v19  ;;  %v6739_v52 = vcombine.high %v6737_v13, %v6737_v13  ;;  %v21262_v8 = vrot.slane %v6737_v13, %v18671_v2 }
 0x34a   : > { %16867 = vst.msk [vmem:[%s19560_s18 + $0x388] sm:$0xff] %vm651_vm7, %v16387_v56  ;;  %v6760_v36 = vrot.slane %v6738_v38, %v18671_v2  ;;  %v6865_v31 = vrot.slane %v6837_v32, %v18671_v2  ;;  %v6867_v12 = vcombine.high %v6851_v26, %v6851_v26  ;;  %v6868_v40 = vcombine.high %v6858_v46, %v6858_v46 }
 0x34b   : > { %v7869_v21 = vrot.slane %v6858_v46, %v18686_v19  ;;  %v7873_v34 = vrot.slane %v6866_v28, %v18686_v19  ;;  %v7881_v15 = vrot.slane %v6851_v26, %v18686_v19  ;;  %v8399_v59 = vsel %vm519_vm4, %v24711_v5, %v7865_v55 }
 0x34c   : > { %v6767_v62 = vrot.slane %v6739_v52, %v18671_v2  ;;  %v6869_v6 = vcombine.high %v6865_v31, %v6865_v31  ;;  %v7877_v25 = vrot.slane %v6868_v40, %v18686_v19  ;;  %v7885_v51 = vrot.slane %v6865_v31, %v18686_v19 }
 0x34d   : > { %v7889_v22 = vrot.slane %v6867_v12, %v18686_v19  ;;  %v8400_v50 = vsel %vm519_vm4, %v24712_v23, %v7869_v21  ;;  %v24713_v44 = vcombine.high %v24711_v5, %v24711_v5  ;;  %v8403_v61 = vsel %vm519_vm4, %v24714_v1, %v7881_v15  ;;  %v21328_v5 = vpop.f32.mrf.mxu1 }
 0x34e   : > { %v13914_v14 = vadd.f32 %v18680_v3, %v8399_v59  ;;  %v7893_v11 = vrot.slane %v6869_v6, %v18686_v19  ;;  %v24715_v30 = vcombine.high %v24712_v23, %v24712_v23  ;;  %v8404_v42 = vsel %vm519_vm4, %v24716_v57, %v7885_v51 }
 0x34f   : > { %v8401_v4 = vsel %vm519_vm4, %v24713_v44, %v7873_v34  ;;  %v24717_v63 = vcombine.high %v24714_v1, %v24714_v1  ;;  %v13915_v60 = vadd.f32 %v18695_v18, %v8400_v50  ;;  %v13918_v48 = vadd.f32 %v18680_v3, %v8403_v61  ;;  %v24720_v50 = vld [vmem:[#allocation96_spill] sm:$0xff] }
 0x350   : > { %v8402_v29 = vsel %vm519_vm4, %v24715_v30, %v7877_v25  ;;  %v13916_v27 = vadd.f32 %v18683_v47, %v8401_v4  ;;  %v24718_v58 = vcombine.high %v24716_v57, %v24716_v57  ;;  %v13919_v24 = vadd.f32 %v18695_v18, %v8404_v42  ;;  %v24724_v30 = vld [vmem:[#allocation97_spill] sm:$0xff] }
 0x351   : > { %v8405_v17 = vsel %vm519_vm4, %v24717_v63, %v7889_v22  ;;  %v13917_v54 = vadd.f32 %v18699_v39, %v8402_v29  ;;  %v6768_v7 = vcombine.high %v21248_v16, %v21248_v16  ;;  %v16524_v56 = vcombine.low %v13914_v14, %v13915_v60  ;;  %v24719_v22 = vld [vmem:[#allocation93_spill] sm:$0xff]  ;;  %v24723_v14 = vld [vmem:[#allocation95_spill] sm:$0xff] }
 0x352   : > { %v8406_v41 = vsel %vm519_vm4, %v24718_v58, %v7893_v11  ;;  %v13920_v53 = vadd.f32 %v18683_v47, %v8405_v17  ;;  %v6769_v38 = vcombine.high %v21262_v8, %v21262_v8  ;;  %v16541_v32 = vcombine.low %v13918_v48, %v13919_v24 }
 0x353   : > { %v13921_v0 = vadd.f32 %v18699_v39, %v8406_v41  ;;  %v16525_v13 = vcombine.low %v13916_v27, %v13917_v54  ;;  %v6770_v26 = vcombine.high %v6760_v36, %v6760_v36  ;;  %v6771_v46 = vcombine.high %v6767_v62, %v6767_v62  ;;  %v21364_v54 = vpop.f32.mrf.mxu1 }
 0x354   : > { %v7801_v28 = vrot.slane %v21248_v16, %v18686_v19  ;;  %v16532_v55 = vrot.slane %v16524_v56, %v18669_v35  ;;  %v7805_v12 = vrot.slane %v6760_v36, %v18686_v19  ;;  %v16549_v40 = vrot.slane %v16541_v32, %v18669_v35  ;;  %v21330_v16 = vpop.f32.mrf.mxu0 }
 0x355   : > { %v16539_v52 = vrot.slane %v16525_v13, %v18669_v35  ;;  %v16542_v31 = vcombine.low %v13920_v53, %v13921_v0  ;;  %v7809_v21 = vrot.slane %v6768_v7, %v18686_v19  ;;  %v7813_v34 = vrot.slane %v6770_v26, %v18686_v19 }
 0x356   : > { %v7817_v15 = vrot.slane %v21262_v8, %v18686_v19  ;;  %v7821_v25 = vrot.slane %v6767_v62, %v18686_v19  ;;  %v7825_v36 = vrot.slane %v6769_v38, %v18686_v19  ;;  %v7829_v51 = vrot.slane %v6771_v46, %v18686_v19  ;;  %v21366_v48 = vpop.f32.mrf.mxu0 }
 0x357   : > { %v16540_v59 = vcombine.low %v16532_v55, %v16539_v52  ;;  %v16556_v6 = vrot.slane %v16542_v31, %v18669_v35  ;;  %v8383_v23 = vsel %vm519_vm4, %v24719_v22, %v7801_v28  ;;  %v8384_v8 = vsel %vm519_vm4, %v24720_v50, %v7805_v12  ;;  %v21386_v12 = vpop.f32.mrf.mxu1 }
 0x358   : > { %v24721_v44 = vcombine.high %v24719_v22, %v24719_v22  ;;  %v24722_v62 = vcombine.high %v24720_v50, %v24720_v50  ;;  %v8387_v11 = vsel %vm519_vm4, %v24723_v14, %v7817_v15  ;;  %v8388_v29 = vsel %vm519_vm4, %v24724_v30, %v7821_v25 }
 0x359   : > { %v16557_v1 = vcombine.low %v16549_v40, %v16556_v6  ;;  %16876 = vst.msk [vmem:[%s19560_s18 + $0x3d0] sm:$0xff] %vm651_vm7, %v16540_v59  ;;  %v24725_v57 = vcombine.high %v24723_v14, %v24723_v14  ;;  %v24726_v63 = vcombine.high %v24724_v30, %v24724_v30  ;;  %v13882_v60 = vadd.f32 %v18680_v3, %v8383_v23  ;;  %v21388_v40 = vpop.f32.mrf.mxu0 }
 0x35a   : > { %v8385_v4 = vsel %vm519_vm4, %v24721_v44, %v7809_v21  ;;  %v8386_v61 = vsel %vm519_vm4, %v24722_v62, %v7813_v34  ;;  %v13883_v27 = vadd.f32 %v18695_v18, %v8384_v8  ;;  %v13886_v24 = vadd.f32 %v18680_v3, %v8387_v11  ;;  %v21406_v44 = vpop.f32.mrf.mxu1 }
 0x35b   : > { %v8389_v42 = vsel %vm519_vm4, %v24725_v57, %v7825_v36  ;;  %v8390_v17 = vsel %vm519_vm4, %v24726_v63, %v7829_v51  ;;  %16877 = vst.msk [vmem:[%s19560_s18 + $0x3d8] sm:$0xff] %vm651_vm7, %v16557_v1  ;;  %v13884_v58 = vadd.f32 %v18683_v47, %v8385_v4  ;;  %v13885_v41 = vadd.f32 %v18699_v39, %v8386_v61  ;;  %v21408_v4 = vpop.f32.mrf.mxu0 }
 0x35c   : > { %v13887_v53 = vadd.f32 %v18695_v18, %v8388_v29  ;;  %v13888_v7 = vadd.f32 %v18683_v47, %v8389_v42  ;;  %v13889_v0 = vadd.f32 %v18699_v39, %v8390_v17  ;;  %v16388_v56 = vcombine.low %v13882_v60, %v13883_v27 }
 0x35d   : > { %v8537_v13 = vcombine.high %v21234_v10, %v21234_v10  ;;  %v16389_v38 = vcombine.low %v13884_v58, %v13885_v41  ;;  %v8544_v26 = vrot.slane %v21234_v10, %v18671_v2  ;;  %v8439_v46 = vcombine.high %v21236_v37, %v21236_v37 }
 0x35e   : > { %v16405_v32 = vcombine.low %v13886_v24, %v13887_v53  ;;  %v16396_v28 = vrot.slane %v16388_v56, %v18669_v35  ;;  %v16406_v55 = vcombine.low %v13888_v7, %v13889_v0  ;;  %v8446_v31 = vrot.slane %v21236_v37, %v18671_v2 }
 0x35f   : > { %v8551_v52 = vrot.slane %v8537_v13, %v18671_v2  ;;  %v16403_v21 = vrot.slane %v16389_v38, %v18669_v35  ;;  %v8552_v34 = vcombine.high %v8544_v26, %v8544_v26  ;;  %v21393_v15 = vrot.slane %v8544_v26, %v18671_v2 }
 0x360   : > { %v16413_v10 = vrot.slane %v16405_v32, %v18669_v35  ;;  %v16420_v59 = vrot.slane %v16406_v55, %v18669_v35  ;;  %v8453_v37 = vrot.slane %v8439_v46, %v18671_v2  ;;  %v8454_v22 = vcombine.high %v8446_v31, %v8446_v31 }
 0x361   : > { %v8553_v6 = vcombine.high %v8551_v52, %v8551_v52  ;;  %v21397_v25 = vrot.slane %v8551_v52, %v18671_v2  ;;  %v16404_v36 = vcombine.low %v16396_v28, %v16403_v21  ;;  %v21401_v51 = vrot.slane %v8552_v34, %v18671_v2 }
 0x362   : > { %v16421_v23 = vcombine.low %v16413_v10, %v16420_v59  ;;  %v8455_v8 = vcombine.high %v8453_v37, %v8453_v37  ;;  %v21415_v62 = vrot.slane %v8446_v31, %v18671_v2  ;;  %v21418_v61 = vrot.slane %v8453_v37, %v18671_v2 }
 0x363   : > { %v21404_v50 = vrot.slane %v8553_v6, %v18671_v2  ;;  %16868 = vst.msk [vmem:[%s19560_s18 + $0x390] sm:$0xff] %vm651_vm7, %v16404_v36  ;;  %v21421_v14 = vrot.slane %v8454_v22, %v18671_v2  ;;  %v2806_v29 = vadd.f32 %v21254_v33, %v21256_v20  ;;  %v2798_v57 = vadd.f32 %v21275_v49, %v21277_v9  ;;  %v21445_v49 = vpop.f32.mrf.mxu1  ;;  %v21447_v9 = vpop.f32.mrf.mxu0 }
 0x364   : > { %16869 = vst.msk [vmem:[%s19560_s18 + $0x398] sm:$0xff] %vm651_vm7, %v16421_v23  ;;  %v21436_v63 = vrot.slane %v8455_v8, %v18671_v2  ;;  %v2819_v60 = vadd.f32 %v21311_v45, %v21313_v43  ;;  %v2811_v6 = vadd.f32 %v21328_v5, %v21330_v16 }
 0x365   : > { %v8586_v58 = vcombine.high %v2806_v29, %v2806_v29  ;;  %v8593_v33 = vrot.slane %v2806_v29, %v18671_v2  ;;  %v8488_v20 = vcombine.high %v2798_v57, %v2798_v57  ;;  %v8495_v24 = vrot.slane %v2798_v57, %v18671_v2  ;;  %v21470_v31 = vpop.f32.mrf.mxu1  ;;  %v21472_v21 = vpop.f32.mrf.mxu0 }
 0x366   : > { %v8733_v53 = vcombine.high %v2819_v60, %v2819_v60  ;;  %v8740_v7 = vrot.slane %v2819_v60, %v18671_v2 }
 0x367   : > { %v8600_v45 = vrot.slane %v8586_v58, %v18671_v2  ;;  %v8601_v43 = vcombine.high %v8593_v33, %v8593_v33  ;;  %v21455_v0 = vrot.slane %v8593_v33, %v18671_v2  ;;  %v8502_v56 = vrot.slane %v8488_v20, %v18671_v2  ;;  %v21510_v20 = vpop.f32.mrf.mxu1 }
 0x368   : > { %v8503_v38 = vcombine.high %v8495_v24, %v8495_v24  ;;  %v21461_v32 = vrot.slane %v8495_v24, %v18671_v2  ;;  %v8747_v26 = vrot.slane %v8733_v53, %v18671_v2  ;;  %v8748_v52 = vcombine.high %v8740_v7, %v8740_v7  ;;  %v21512_v24 = vpop.f32.mrf.mxu0 }
 0x369   : > { %v8602_v46 = vcombine.high %v8600_v45, %v8600_v45  ;;  %v21465_v28 = vrot.slane %v8600_v45, %v18671_v2  ;;  %v21468_v55 = vrot.slane %v8601_v43, %v18671_v2  ;;  %v8504_v10 = vcombine.high %v8502_v56, %v8502_v56 }
 0x36a   : > { %v21475_v34 = vrot.slane %v8502_v56, %v18671_v2  ;;  %v21478_v59 = vrot.slane %v8503_v38, %v18671_v2  ;;  %v8749_v23 = vcombine.high %v8747_v26, %v8747_v26  ;;  %v21497_v5 = vrot.slane %v8740_v7, %v18671_v2  ;;  %v21538_v7 = vpop.f32.mrf.mxu1 }
 0x36b   : > { %v21483_v37 = vrot.slane %v8602_v46, %v18671_v2  ;;  %v21494_v57 = vrot.slane %v8504_v10, %v18671_v2  ;;  %v21502_v60 = vrot.slane %v8747_v26, %v18671_v2  ;;  %v21505_v58 = vrot.slane %v8748_v52, %v18671_v2 }
 0x36c   : > { %v21508_v33 = vrot.slane %v8749_v23, %v18671_v2  ;;  %v8635_v45 = vcombine.high %v2811_v6, %v2811_v6  ;;  %v8642_v43 = vrot.slane %v2811_v6, %v18671_v2  ;;  %v2822_v46 = vadd.f32 %v21364_v54, %v21366_v48  ;;  %v21540_v54 = vpop.f32.mrf.mxu0 }
 0x36d   : > { %v2814_v6 = vadd.f32 %v21386_v12, %v21388_v40  ;;  %v2835_v12 = vadd.f32 %v21406_v44, %v21408_v4 }
 0x36e   : > { %v8649_v52 = vrot.slane %v8635_v45, %v18671_v2  ;;  %v8650_v10 = vcombine.high %v8642_v43, %v8642_v43  ;;  %v21529_v23 = vrot.slane %v8642_v43, %v18671_v2  ;;  %v8782_v16 = vcombine.high %v2822_v46, %v2822_v46  ;;  %v21572_v8 = vpop.f32.mrf.mxu0 }
 0x36f   : > { %v8789_v26 = vrot.slane %v2822_v46, %v18671_v2  ;;  %v8684_v46 = vcombine.high %v2814_v6, %v2814_v6  ;;  %v8691_v53 = vrot.slane %v2814_v6, %v18671_v2  ;;  %v8929_v29 = vcombine.high %v2835_v12, %v2835_v12 }
 0x370   : > { %v8651_v48 = vcombine.high %v8649_v52, %v8649_v52  ;;  %v21543_v45 = vrot.slane %v8649_v52, %v18671_v2  ;;  %v21546_v43 = vrot.slane %v8650_v10, %v18671_v2  ;;  %v8796_v40 = vrot.slane %v8782_v16, %v18671_v2  ;;  %v21601_v41 = vpop.f32.mrf.mxu0 }
 0x371   : > { %v8797_v38 = vcombine.high %v8789_v26, %v8789_v26  ;;  %v21552_v56 = vrot.slane %v8789_v26, %v18671_v2  ;;  %v2827_v10 = vadd.f32 %v21445_v49, %v21447_v9  ;;  %v8698_v52 = vrot.slane %v8684_v46, %v18671_v2 }
 0x372   : > { %v21555_v22 = vrot.slane %v8651_v48, %v18671_v2  ;;  %v8798_v4 = vcombine.high %v8796_v40, %v8796_v40  ;;  %v21565_v16 = vrot.slane %v8796_v40, %v18671_v2  ;;  %v21570_v48 = vpop.f32.mrf.mxu1  ;;  %v8699_v49 = vcombine.high %v8691_v53, %v8691_v53  ;;  %v21635_v30 = vpop.f32.mrf.mxu0 }
 0x373   : > { %v21568_v26 = vrot.slane %v8797_v38, %v18671_v2  ;;  %v21578_v9 = vrot.slane %v8691_v53, %v18671_v2  ;;  %v8700_v6 = vcombine.high %v8698_v52, %v8698_v52  ;;  %v21592_v53 = vrot.slane %v8698_v52, %v18671_v2 }
 0x374   : > { %v21583_v44 = vrot.slane %v8798_v4, %v18671_v2  ;;  %v21595_v13 = vrot.slane %v8699_v49, %v18671_v2  ;;  %v8936_v4 = vrot.slane %v2835_v12, %v18671_v2  ;;  %v8943_v40 = vrot.slane %v8929_v29, %v18671_v2  ;;  %v21599_v38 = vpop.f32.mrf.mxu1 }
 0x375   : > { %24727 = vst [vmem:[#allocation4_spill] sm:$0xff] %v21578_v9  ;;  %24728 = vst [vmem:[#allocation5_spill] sm:$0xff] %v21592_v53  ;;  %v8831_v27 = vcombine.high %v2827_v10, %v2827_v10  ;;  %v21606_v46 = vrot.slane %v8700_v6, %v18671_v2  ;;  %v8838_v49 = vrot.slane %v2827_v10, %v18671_v2 }
 0x376   : > { %24729 = vst [vmem:[#allocation7_spill] sm:$0xff] %v21595_v13  ;;  %v8944_v17 = vcombine.high %v8936_v4, %v8936_v4  ;;  %v8945_v12 = vcombine.high %v8943_v40, %v8943_v40  ;;  %v21612_v29 = vrot.slane %v8936_v4, %v18671_v2  ;;  %v21615_v42 = vrot.slane %v8943_v40, %v18671_v2  ;;  %v21633_v1 = vpop.f32.mrf.mxu1 }
 0x377   : > { %24730 = vst [vmem:[#allocation6_spill] sm:$0xff] %v21606_v46  ;;  %v8845_v36 = vrot.slane %v8831_v27, %v18671_v2  ;;  %v8846_v6 = vcombine.high %v8838_v49, %v8838_v49  ;;  %v21621_v11 = vrot.slane %v8838_v49, %v18671_v2  ;;  %v2838_v52 = vadd.f32 %v21470_v31, %v21472_v21 }
 0x378   : > { %24731 = vst [vmem:[#allocation8_spill] sm:$0xff] %v21612_v29  ;;  %24732 = vst [vmem:[#allocation9_spill] sm:$0xff] %v21615_v42  ;;  %v21628_v4 = vrot.slane %v8944_v17, %v18671_v2  ;;  %v21631_v40 = vrot.slane %v8945_v12, %v18671_v2  ;;  %v2830_v46 = vadd.f32 %v21510_v20, %v21512_v24  ;;  %v17632_v21 = vpop.f32.mrf.mxu1  ;;  %v17598_v20 = vpop.f32.mrf.mxu0 }
 0x379   : > { %24733 = vst [vmem:[#allocation10_spill] sm:$0xff] %v21621_v11  ;;  %v8847_v49 = vcombine.high %v8845_v36, %v8845_v36  ;;  %v21640_v53 = vrot.slane %v8845_v36, %v18671_v2  ;;  %v21643_v10 = vrot.slane %v8846_v6, %v18671_v2  ;;  %v2851_v17 = vadd.f32 %v21538_v7, %v21540_v54 }
 0x37a   : > { %24734 = vst [vmem:[#allocation11_spill] sm:$0xff] %v21628_v4  ;;  %24735 = vst [vmem:[#allocation12_spill] sm:$0xff] %v21631_v40  ;;  %v8978_v42 = vcombine.high %v2838_v52, %v2838_v52  ;;  %v8985_v12 = vrot.slane %v2838_v52, %v18671_v2  ;;  %v8880_v11 = vcombine.high %v2830_v46, %v2830_v46  ;;  %v2694_v29 = vpop.f32.mrf.mxu0 }
 0x37b   : > { %24736 = vst [vmem:[#allocation13_spill] sm:$0xff] %v21640_v53  ;;  %24737 = vst [vmem:[#allocation14_spill] sm:$0xff] %v21643_v10  ;;  %v21658_v6 = vrot.slane %v8847_v49, %v18671_v2  ;;  %v8887_v31 = vrot.slane %v2830_v46, %v18671_v2  ;;  %v9125_v27 = vcombine.high %v2851_v17, %v2851_v17  ;;  %v2858_v10 = vpop.f32.mrf.mxu1 }
 0x37c   : > { %v9132_v49 = vrot.slane %v2851_v17, %v18671_v2  ;;  %v8992_v40 = vrot.slane %v8978_v42, %v18671_v2  ;;  %v8993_v7 = vcombine.high %v8985_v12, %v8985_v12  ;;  %v21671_v54 = vrot.slane %v8985_v12, %v18671_v2 }
 0x37d   : > { %24738 = vst [vmem:[#allocation15_spill] sm:$0xff] %v21658_v6  ;;  %v8894_v52 = vrot.slane %v8880_v11, %v18671_v2  ;;  %v8895_v4 = vcombine.high %v8887_v31, %v8887_v31  ;;  %v21677_v24 = vrot.slane %v8887_v31, %v18671_v2  ;;  %v9139_v36 = vrot.slane %v9125_v27, %v18671_v2 }
 0x37e   : > { %v8994_v53 = vcombine.high %v8992_v40, %v8992_v40  ;;  %v21681_v17 = vrot.slane %v8992_v40, %v18671_v2  ;;  %v21684_v42 = vrot.slane %v8993_v7, %v18671_v2  ;;  %v9140_v12 = vcombine.high %v9132_v49, %v9132_v49  ;;  %v21722_v40 = vpop.f32.mrf.mxu1 }
 0x37f   : > { %24739 = vst [vmem:[#allocation17_spill] sm:$0xff] %v21677_v24  ;;  %v8896_v11 = vcombine.high %v8894_v52, %v8894_v52  ;;  %v21687_v13 = vrot.slane %v8894_v52, %v18671_v2  ;;  %v21690_v46 = vrot.slane %v8895_v4, %v18671_v2  ;;  %v2843_v27 = vadd.f32 %v21570_v48, %v21572_v8  ;;  %v21724_v4 = vpop.f32.mrf.mxu0 }
 0x380   : > { %24740 = vst [vmem:[#allocation16_spill] sm:$0xff] %v21681_v17  ;;  %v21695_v31 = vrot.slane %v8994_v53, %v18671_v2  ;;  %v9141_v6 = vcombine.high %v9139_v36, %v9139_v36  ;;  %v21709_v8 = vrot.slane %v9132_v49, %v18671_v2  ;;  %v21714_v53 = vrot.slane %v9139_v36, %v18671_v2 }
 0x381   : > { %24741 = vst [vmem:[#allocation18_spill] sm:$0xff] %v21687_v13  ;;  %24742 = vst [vmem:[#allocation20_spill] sm:$0xff] %v21690_v46  ;;  %v21706_v9 = vrot.slane %v8896_v11, %v18671_v2  ;;  %v21717_v7 = vrot.slane %v9140_v12, %v18671_v2  ;;  %v9027_v48 = vcombine.high %v2843_v27, %v2843_v27 }
 0x382   : > { %24743 = vst [vmem:[#allocation19_spill] sm:$0xff] %v21695_v31  ;;  %24745 = vst [vmem:[#allocation21_spill] sm:$0xff] %v21709_v8  ;;  %v21720_v52 = vrot.slane %v9141_v6, %v18671_v2  ;;  %v9034_v36 = vrot.slane %v2843_v27, %v18671_v2  ;;  %v2854_v24 = vadd.f32 %v21599_v38, %v21601_v41  ;;  %v2697_v41 = vpop.f32.mrf.mxu0 }
 0x383   : > { %24744 = vst [vmem:[#allocation22_spill] sm:$0xff] %v21706_v9  ;;  %24746 = vst [vmem:[#allocation23_spill] sm:$0xff] %v21714_v53  ;;  %v9041_v49 = vrot.slane %v9027_v48, %v18671_v2  ;;  %v2846_v27 = vadd.f32 %v21633_v1, %v21635_v30  ;;  %v21750_v53 = vpop.f32.mrf.mxu1  ;;  %v2867_v1 = vadd.f32 %v17632_v21, %v17598_v20 }
 0x384   : > { %24747 = vst [vmem:[#allocation24_spill] sm:$0xff] %v21717_v7  ;;  %24748 = vst [vmem:[#allocation25_spill] sm:$0xff] %v21720_v52  ;;  %v9042_v31 = vcombine.high %v9034_v36, %v9034_v36  ;;  %v21741_v11 = vrot.slane %v9034_v36, %v18671_v2  ;;  %v9174_v8 = vcombine.high %v2854_v24, %v2854_v24  ;;  %v17602_v46 = vpop.f32.mrf.mxu0 }
 0x385   : > { %v9181_v13 = vrot.slane %v2854_v24, %v18671_v2  ;;  %v9043_v38 = vcombine.high %v9041_v49, %v9041_v49  ;;  %v21753_v48 = vrot.slane %v9041_v49, %v18671_v2  ;;  %v9076_v6 = vcombine.high %v2846_v27, %v2846_v27 }
 0x386   : > { %24749 = vst [vmem:[#allocation26_spill] sm:$0xff] %v21741_v11  ;;  %v21756_v36 = vrot.slane %v9042_v31, %v18671_v2  ;;  %v9188_v30 = vrot.slane %v9174_v8, %v18671_v2  ;;  %v9083_v49 = vrot.slane %v2846_v27, %v18671_v2  ;;  %v2859_v9 = vadd.f32 %v2858_v10, %v2694_v29  ;;  %v17636_v8 = vpop.f32.mrf.mxu1 }
 0x387   : > { %24750 = vst [vmem:[#allocation28_spill] sm:$0xff] %v21753_v48  ;;  %v9189_v12 = vcombine.high %v9181_v13, %v9181_v13  ;;  %v21760_v7 = vrot.slane %v9181_v13, %v18671_v2  ;;  %v21763_v24 = vrot.slane %v9043_v38, %v18671_v2  ;;  %v9090_v52 = vrot.slane %v9076_v6, %v18671_v2 }
 0x388   : > { %24751 = vst [vmem:[#allocation27_spill] sm:$0xff] %v21756_v36  ;;  %v9190_v21 = vcombine.high %v9188_v30, %v9188_v30  ;;  %v21771_v20 = vrot.slane %v9188_v30, %v18671_v2  ;;  %v9091_v11 = vcombine.high %v9083_v49, %v9083_v49  ;;  %v21780_v29 = vrot.slane %v9083_v49, %v18671_v2 }
 0x389   : > { %24752 = vst [vmem:[#allocation30_spill] sm:$0xff] %v21760_v7  ;;  %24753 = vst [vmem:[#allocation29_spill] sm:$0xff] %v21763_v24  ;;  %v21774_v13 = vrot.slane %v9189_v12, %v18671_v2  ;;  %v9321_v30 = vcombine.high %v2867_v1, %v2867_v1  ;;  %v9092_v38 = vcombine.high %v9090_v52, %v9090_v52  ;;  %v2874_v12 = vpop.f32.mrf.mxu1  ;;  %v2710_v7 = vpop.f32.mrf.mxu0 }
 0x38a   : > { %24754 = vst [vmem:[#allocation33_spill] sm:$0xff] %v21771_v20  ;;  %24756 = vst [vmem:[#allocation34_spill] sm:$0xff] %v21780_v29  ;;  %v21785_v27 = vrot.slane %v9190_v21, %v18671_v2  ;;  %v21794_v49 = vrot.slane %v9090_v52, %v18671_v2  ;;  %v21797_v48 = vrot.slane %v9091_v11, %v18671_v2 }
 0x38b   : > { %24755 = vst [vmem:[#allocation31_spill] sm:$0xff] %v21774_v13  ;;  %v9328_v21 = vrot.slane %v2867_v1, %v18671_v2  ;;  %v9335_v10 = vrot.slane %v9321_v30, %v18671_v2  ;;  %v9223_v24 = vcombine.high %v2859_v9, %v2859_v9  ;;  %v21804_v20 = vrot.slane %v9092_v38, %v18671_v2  ;;  %v21831_v29 = vpop.f32.mrf.mxu1  ;;  %v17603_v36 = vpop.f32.mrf.mxu0 }
 0x38c   : > { %24757 = vst [vmem:[#allocation32_spill] sm:$0xff] %v21785_v27  ;;  %24758 = vst [vmem:[#allocation35_spill] sm:$0xff] %v21794_v49  ;;  %v9230_v6 = vrot.slane %v2859_v9, %v18671_v2  ;;  %v2870_v52 = vadd.f32 %v21722_v40, %v21724_v4 }
 0x38d   : > { %24759 = vst [vmem:[#allocation36_spill] sm:$0xff] %v21797_v48  ;;  %24760 = vst [vmem:[#allocation38_spill] sm:$0xff] %v21804_v20  ;;  %v9336_v11 = vcombine.high %v9328_v21, %v9328_v21  ;;  %v9337_v13 = vcombine.high %v9335_v10, %v9335_v10  ;;  %v21810_v1 = vrot.slane %v9328_v21, %v18671_v2  ;;  %v2713_v40 = vpop.f32.mrf.mxu0 }
 0x38e   : > { %v21813_v30 = vrot.slane %v9335_v10, %v18671_v2  ;;  %v9237_v31 = vrot.slane %v9223_v24, %v18671_v2  ;;  %v9238_v38 = vcombine.high %v9230_v6, %v9230_v6  ;;  %v21819_v27 = vrot.slane %v9230_v6, %v18671_v2 }
 0x38f   : > { %24761 = vst [vmem:[#allocation41_spill] sm:$0xff] %v21810_v1  ;;  %v21826_v21 = vrot.slane %v9336_v11, %v18671_v2  ;;  %v21829_v10 = vrot.slane %v9337_v13, %v18671_v2  ;;  %v2862_v20 = vadd.f32 %v21750_v53, %v2697_v41  ;;  %v2883_v1 = vadd.f32 %v17636_v8, %v17602_v46 }
 0x390   : > { %24762 = vst [vmem:[#allocation37_spill] sm:$0xff] %v21813_v30  ;;  %24763 = vst [vmem:[#allocation40_spill] sm:$0xff] %v21819_v27  ;;  %v9239_v6 = vcombine.high %v9237_v31, %v9237_v31  ;;  %v21836_v49 = vrot.slane %v9237_v31, %v18671_v2  ;;  %v21839_v9 = vrot.slane %v9238_v38, %v18671_v2  ;;  %v2877_v27 = vpop.f32.mrf.mxu1 }
 0x391   : > { %24764 = vst [vmem:[#allocation39_spill] sm:$0xff] %v21826_v21  ;;  %24765 = vst [vmem:[#allocation42_spill] sm:$0xff] %v21829_v10  ;;  %v9370_v48 = vcombine.high %v2870_v52, %v2870_v52  ;;  %v9377_v11 = vrot.slane %v2870_v52, %v18671_v2  ;;  %v9272_v30 = vcombine.high %v2862_v20, %v2862_v20  ;;  %v17606_v10 = vpop.f32.mrf.mxu0 }
 0x392   : > { %24766 = vst [vmem:[#allocation43_spill] sm:$0xff] %v21836_v49  ;;  %24767 = vst [vmem:[#allocation45_spill] sm:$0xff] %v21839_v9  ;;  %v21853_v38 = vrot.slane %v9239_v6, %v18671_v2  ;;  %v9279_v13 = vrot.slane %v2862_v20, %v18671_v2  ;;  %v9517_v41 = vcombine.high %v2883_v1, %v2883_v1  ;;  %v17640_v9 = vpop.f32.mrf.mxu1 }
 0x393   : > { %v9524_v31 = vrot.slane %v2883_v1, %v18671_v2  ;;  %v9384_v6 = vrot.slane %v9370_v48, %v18671_v2  ;;  %v9385_v46 = vcombine.high %v9377_v11, %v9377_v11  ;;  %v21864_v8 = vrot.slane %v9377_v11, %v18671_v2 }
 0x394   : > { %24768 = vst [vmem:[#allocation44_spill] sm:$0xff] %v21853_v38  ;;  %v9286_v52 = vrot.slane %v9272_v30, %v18671_v2  ;;  %v9287_v24 = vcombine.high %v9279_v13, %v9279_v13  ;;  %v21870_v4 = vrot.slane %v9279_v13, %v18671_v2  ;;  %v9531_v53 = vrot.slane %v9517_v41, %v18671_v2 }
 0x395   : > { %v9386_v49 = vcombine.high %v9384_v6, %v9384_v6  ;;  %v21874_v1 = vrot.slane %v9384_v6, %v18671_v2  ;;  %v21877_v48 = vrot.slane %v9385_v46, %v18671_v2  ;;  %v9532_v11 = vcombine.high %v9524_v31, %v9524_v31  ;;  %v2890_v6 = vpop.f32.mrf.mxu1 }
 0x396   : > { %24769 = vst [vmem:[#allocation46_spill] sm:$0xff] %v21870_v4  ;;  %v9288_v30 = vcombine.high %v9286_v52, %v9286_v52  ;;  %v21880_v21 = vrot.slane %v9286_v52, %v18671_v2  ;;  %v21883_v20 = vrot.slane %v9287_v24, %v18671_v2  ;;  %v2875_v13 = vadd.f32 %v2874_v12, %v2710_v7  ;;  %v2726_v52 = vpop.f32.mrf.mxu0 }
 0x397   : > { %24770 = vst [vmem:[#allocation47_spill] sm:$0xff] %v21874_v1  ;;  %24771 = vst [vmem:[#allocation49_spill] sm:$0xff] %v21877_v48  ;;  %v21886_v41 = vrot.slane %v9386_v49, %v18671_v2  ;;  %v9533_v38 = vcombine.high %v9531_v53, %v9531_v53  ;;  %v21900_v7 = vrot.slane %v9524_v31, %v18671_v2 }
 0x398   : > { %24772 = vst [vmem:[#allocation48_spill] sm:$0xff] %v21880_v21  ;;  %24773 = vst [vmem:[#allocation50_spill] sm:$0xff] %v21883_v20  ;;  %v21897_v24 = vrot.slane %v9288_v30, %v18671_v2  ;;  %v21905_v49 = vrot.slane %v9531_v53, %v18671_v2  ;;  %v21908_v46 = vrot.slane %v9532_v11, %v18671_v2 }
 0x399   : > { %24774 = vst [vmem:[#allocation51_spill] sm:$0xff] %v21886_v41  ;;  %24776 = vst [vmem:[#allocation53_spill] sm:$0xff] %v21900_v7  ;;  %v21911_v17 = vrot.slane %v9533_v38, %v18671_v2  ;;  %v9419_v4 = vcombine.high %v2875_v13, %v2875_v13  ;;  %v9426_v12 = vrot.slane %v2875_v13, %v18671_v2  ;;  %v17641_v7 = vpop.f32.mrf.mxu1  ;;  %v17607_v38 = vpop.f32.mrf.mxu0 }
 0x39a   : > { %24775 = vst [vmem:[#allocation52_spill] sm:$0xff] %v21897_v24  ;;  %24777 = vst [vmem:[#allocation55_spill] sm:$0xff] %v21905_v49  ;;  %v2886_v21 = vadd.f32 %v21831_v29, %v17603_v36  ;;  %v2878_v31 = vadd.f32 %v2877_v27, %v2713_v40 }
 0x39b   : > { %24778 = vst [vmem:[#allocation54_spill] sm:$0xff] %v21908_v46  ;;  %24779 = vst [vmem:[#allocation57_spill] sm:$0xff] %v21911_v17  ;;  %v9433_v1 = vrot.slane %v9419_v4, %v18671_v2  ;;  %v9434_v30 = vcombine.high %v9426_v12, %v9426_v12  ;;  %v21927_v41 = vrot.slane %v9426_v12, %v18671_v2  ;;  %v2729_v46 = vpop.f32.mrf.mxu0 }
 0x39c   : > { %v9566_v24 = vcombine.high %v2886_v21, %v2886_v21  ;;  %v9573_v11 = vrot.slane %v2886_v21, %v18671_v2  ;;  %v2899_v4 = vadd.f32 %v17640_v9, %v17606_v10  ;;  %v9468_v53 = vcombine.high %v2878_v31, %v2878_v31 }
 0x39d   : > { %24780 = vst [vmem:[#allocation56_spill] sm:$0xff] %v21927_v41  ;;  %v9435_v49 = vcombine.high %v9433_v1, %v9433_v1  ;;  %v21935_v36 = vrot.slane %v9433_v1, %v18671_v2  ;;  %v21938_v29 = vrot.slane %v9434_v30, %v18671_v2  ;;  %v9475_v1 = vrot.slane %v2878_v31, %v18671_v2 }
 0x39e   : > { %v9580_v27 = vrot.slane %v9566_v24, %v18671_v2  ;;  %v9581_v40 = vcombine.high %v9573_v11, %v9573_v11  ;;  %v21942_v12 = vrot.slane %v9573_v11, %v18671_v2  ;;  %v2891_v17 = vadd.f32 %v2890_v6, %v2726_v52  ;;  %v2893_v11 = vpop.f32.mrf.mxu1 }
 0x39f   : > { %24781 = vst [vmem:[#allocation59_spill] sm:$0xff] %v21935_v36  ;;  %24782 = vst [vmem:[#allocation58_spill] sm:$0xff] %v21938_v29  ;;  %v21945_v13 = vrot.slane %v9435_v49, %v18671_v2  ;;  %v9482_v21 = vrot.slane %v9468_v53, %v18671_v2  ;;  %v9483_v41 = vcombine.high %v9475_v1, %v9475_v1 }
 0x3a0   : > { %24783 = vst [vmem:[#allocation61_spill] sm:$0xff] %v21942_v12  ;;  %v9582_v9 = vcombine.high %v9580_v27, %v9580_v27  ;;  %v21953_v10 = vrot.slane %v9580_v27, %v18671_v2  ;;  %v21956_v24 = vrot.slane %v9581_v40, %v18671_v2  ;;  %v21962_v6 = vrot.slane %v9475_v1, %v18671_v2  ;;  %v17644_v27 = vpop.f32.mrf.mxu1  ;;  %v17610_v12 = vpop.f32.mrf.mxu0 }
 0x3a1   : > { %24784 = vst [vmem:[#allocation60_spill] sm:$0xff] %v21945_v13  ;;  %v9713_v40 = vcombine.high %v2899_v4, %v2899_v4  ;;  %v9484_v49 = vcombine.high %v9482_v21, %v9482_v21  ;;  %v21976_v1 = vrot.slane %v9482_v21, %v18671_v2  ;;  %v21979_v36 = vrot.slane %v9483_v41, %v18671_v2 }
 0x3a2   : > { %24785 = vst [vmem:[#allocation62_spill] sm:$0xff] %v21953_v10  ;;  %24786 = vst [vmem:[#allocation63_spill] sm:$0xff] %v21956_v24  ;;  %v21967_v31 = vrot.slane %v9582_v9, %v18671_v2  ;;  %v9720_v9 = vrot.slane %v2899_v4, %v18671_v2  ;;  %v9615_v13 = vcombine.high %v2891_v17, %v2891_v17  ;;  %v2742_v29 = vpop.f32.mrf.mxu0 }
 0x3a3   : > { %24787 = vst [vmem:[#allocation65_spill] sm:$0xff] %v21962_v6  ;;  %24789 = vst [vmem:[#allocation67_spill] sm:$0xff] %v21976_v1  ;;  %v9727_v52 = vrot.slane %v9713_v40, %v18671_v2  ;;  %v21986_v10 = vrot.slane %v9484_v49, %v18671_v2  ;;  %v9622_v53 = vrot.slane %v2891_v17, %v18671_v2  ;;  %v2906_v6 = vpop.f32.mrf.mxu1 }
 0x3a4   : > { %24788 = vst [vmem:[#allocation64_spill] sm:$0xff] %v21967_v31  ;;  %24790 = vst [vmem:[#allocation66_spill] sm:$0xff] %v21979_v36  ;;  %v9728_v41 = vcombine.high %v9720_v9, %v9720_v9  ;;  %v21992_v4 = vrot.slane %v9720_v9, %v18671_v2  ;;  %v9629_v30 = vrot.slane %v9615_v13, %v18671_v2 }
 0x3a5   : > { %24791 = vst [vmem:[#allocation68_spill] sm:$0xff] %v21986_v10  ;;  %v9729_v24 = vcombine.high %v9727_v52, %v9727_v52  ;;  %v21995_v40 = vrot.slane %v9727_v52, %v18671_v2  ;;  %v9630_v49 = vcombine.high %v9622_v53, %v9622_v53  ;;  %v22001_v31 = vrot.slane %v9622_v53, %v18671_v2 }
 0x3a6   : > { %24792 = vst [vmem:[#allocation69_spill] sm:$0xff] %v21992_v4  ;;  %v22008_v9 = vrot.slane %v9728_v41, %v18671_v2  ;;  %v9631_v1 = vcombine.high %v9629_v30, %v9629_v30  ;;  %v22016_v53 = vrot.slane %v9629_v30, %v18671_v2  ;;  %v2894_v10 = vadd.f32 %v2893_v11, %v2729_v46  ;;  %v17611_v41 = vpop.f32.mrf.mxu0 }
 0x3a7   : > { %24793 = vst [vmem:[#allocation70_spill] sm:$0xff] %v21995_v40  ;;  %24794 = vst [vmem:[#allocation72_spill] sm:$0xff] %v22001_v31  ;;  %v22011_v52 = vrot.slane %v9729_v24, %v18671_v2  ;;  %v22019_v17 = vrot.slane %v9630_v49, %v18671_v2  ;;  %v2902_v24 = vadd.f32 %v17641_v7, %v17607_v38  ;;  %v17645_v40 = vpop.f32.mrf.mxu1 }
 0x3a8   : > { %24796 = vst [vmem:[#allocation73_spill] sm:$0xff] %v22016_v53  ;;  %v22030_v30 = vrot.slane %v9631_v1, %v18671_v2  ;;  %v2915_v4 = vadd.f32 %v17644_v27, %v17610_v12  ;;  %v9664_v48 = vcombine.high %v2894_v10, %v2894_v10  ;;  %v9671_v21 = vrot.slane %v2894_v10, %v18671_v2 }
 0x3a9   : > { %24795 = vst [vmem:[#allocation71_spill] sm:$0xff] %v22011_v52  ;;  %24797 = vst [vmem:[#allocation74_spill] sm:$0xff] %v22019_v17  ;;  %v9762_v49 = vcombine.high %v2902_v24, %v2902_v24  ;;  %v9769_v20 = vrot.slane %v2902_v24, %v18671_v2  ;;  %v2909_v53 = vpop.f32.mrf.mxu1  ;;  %v2745_v17 = vpop.f32.mrf.mxu0 }
 0x3aa   : > { %24798 = vst [vmem:[#allocation77_spill] sm:$0xff] %v22030_v30  ;;  %v9909_v38 = vcombine.high %v2915_v4, %v2915_v4  ;;  %v9916_v11 = vrot.slane %v2915_v4, %v18671_v2  ;;  %v9678_v24 = vrot.slane %v9664_v48, %v18671_v2  ;;  %v9679_v13 = vcombine.high %v9671_v21, %v9671_v21 }
 0x3ab   : > { %v9776_v1 = vrot.slane %v9762_v49, %v18671_v2  ;;  %v9777_v12 = vcombine.high %v9769_v20, %v9769_v20  ;;  %v22041_v27 = vrot.slane %v9769_v20, %v18671_v2  ;;  %v22047_v46 = vrot.slane %v9671_v21, %v18671_v2 }
 0x3ac   : > { %v9923_v7 = vrot.slane %v9909_v38, %v18671_v2  ;;  %v9924_v20 = vcombine.high %v9916_v11, %v9916_v11  ;;  %v9680_v48 = vcombine.high %v9678_v24, %v9678_v24  ;;  %v22057_v31 = vrot.slane %v9678_v24, %v18671_v2  ;;  %v17650_v24 = vpop.f32.mrf.mxu0 }
 0x3ad   : > { %24799 = vst [vmem:[#allocation76_spill] sm:$0xff] %v22047_v46  ;;  %v9778_v36 = vcombine.high %v9776_v1, %v9776_v1  ;;  %v22051_v4 = vrot.slane %v9776_v1, %v18671_v2  ;;  %v22054_v49 = vrot.slane %v9777_v12, %v18671_v2  ;;  %v22060_v10 = vrot.slane %v9679_v13, %v18671_v2  ;;  %v17684_v1 = vpop.f32.mrf.mxu1 }
 0x3ae   : > { %24802 = vst [vmem:[#allocation79_spill] sm:$0xff] %v22057_v31  ;;  %v2907_v21 = vadd.f32 %v2906_v6, %v2742_v29  ;;  %v9925_v30 = vcombine.high %v9923_v7, %v9923_v7  ;;  %v22074_v13 = vrot.slane %v9680_v48, %v18671_v2  ;;  %v22077_v29 = vrot.slane %v9916_v11, %v18671_v2 }
 0x3af   : > { %24800 = vst [vmem:[#allocation80_spill] sm:$0xff] %v22051_v4  ;;  %24801 = vst [vmem:[#allocation75_spill] sm:$0xff] %v22054_v49  ;;  %v22063_v38 = vrot.slane %v9778_v36, %v18671_v2  ;;  %v22082_v6 = vrot.slane %v9923_v7, %v18671_v2  ;;  %v22085_v12 = vrot.slane %v9924_v20, %v18671_v2 }
 0x3b0   : > { %24803 = vst [vmem:[#allocation78_spill] sm:$0xff] %v22060_v10  ;;  %24804 = vst [vmem:[#allocation81_spill] sm:$0xff] %v22074_v13  ;;  %v22088_v52 = vrot.slane %v9925_v30, %v18671_v2  ;;  %v9811_v46 = vcombine.high %v2907_v21, %v2907_v21  ;;  %v9818_v36 = vrot.slane %v2907_v21, %v18671_v2  ;;  %v3123_v10 = vpop.f32.mrf.mxu0 }
 0x3b1   : > { %24805 = vst [vmem:[#allocation82_spill] sm:$0xff] %v22077_v29  ;;  %24806 = vst [vmem:[#allocation83_spill] sm:$0xff] %v22082_v6  ;;  %v2918_v31 = vadd.f32 %v17645_v40, %v17611_v41  ;;  %v2910_v11 = vadd.f32 %v2909_v53, %v2745_v17  ;;  %v3287_v29 = vpop.f32.mrf.mxu1 }
 0x3b2   : > { %24807 = vst [vmem:[#allocation84_spill] sm:$0xff] %v22085_v12  ;;  %24808 = vst [vmem:[#allocation85_spill] sm:$0xff] %v22088_v52  ;;  %v9825_v4 = vrot.slane %v9811_v46, %v18671_v2  ;;  %v9826_v49 = vcombine.high %v9818_v36, %v9818_v36  ;;  %v22103_v48 = vrot.slane %v9818_v36, %v18671_v2 }
 0x3b3   : > { %v9958_v13 = vcombine.high %v2918_v31, %v2918_v31  ;;  %v9965_v20 = vrot.slane %v2918_v31, %v18671_v2  ;;  %v3296_v46 = vadd.f32 %v17684_v1, %v17650_v24  ;;  %v9860_v7 = vcombine.high %v2910_v11, %v2910_v11 }
 0x3b4   : > { %24809 = vst [vmem:[#allocation86_spill] sm:$0xff] %v22103_v48  ;;  %v9827_v30 = vcombine.high %v9825_v4, %v9825_v4  ;;  %v22111_v40 = vrot.slane %v9825_v4, %v18671_v2  ;;  %v22114_v41 = vrot.slane %v9826_v49, %v18671_v2  ;;  %v9867_v4 = vrot.slane %v2910_v11, %v18671_v2 }
 0x3b5   : > { %v9972_v17 = vrot.slane %v9958_v13, %v18671_v2  ;;  %v9973_v53 = vcombine.high %v9965_v20, %v9965_v20  ;;  %v22118_v36 = vrot.slane %v9965_v20, %v18671_v2  ;;  %v3288_v52 = vadd.f32 %v3287_v29, %v3123_v10 }
 0x3b6   : > { %24810 = vst [vmem:[#allocation88_spill] sm:$0xff] %v22111_v40  ;;  %24811 = vst [vmem:[#allocation87_spill] sm:$0xff] %v22114_v41  ;;  %v22121_v21 = vrot.slane %v9827_v30, %v18671_v2  ;;  %v9874_v30 = vrot.slane %v9860_v7, %v18671_v2  ;;  %v9875_v12 = vcombine.high %v9867_v4, %v9867_v4 }
 0x3b7   : > { %24812 = vst [vmem:[#allocation89_spill] sm:$0xff] %v22118_v36  ;;  %v9974_v1 = vcombine.high %v9972_v17, %v9972_v17  ;;  %v22129_v24 = vrot.slane %v9972_v17, %v18671_v2  ;;  %v22132_v13 = vrot.slane %v9973_v53, %v18671_v2  ;;  %v22138_v31 = vrot.slane %v9867_v4, %v18671_v2 }
 0x3b8   : > { %24813 = vst [vmem:[#allocation90_spill] sm:$0xff] %v22121_v21  ;;  %v10393_v17 = vcombine.high %v3296_v46, %v3296_v46  ;;  %v9876_v49 = vcombine.high %v9874_v30, %v9874_v30  ;;  %v22152_v4 = vrot.slane %v9874_v30, %v18671_v2  ;;  %v22155_v20 = vrot.slane %v9875_v12, %v18671_v2 }
 0x3b9   : > { %24814 = vst [vmem:[#allocation92_spill] sm:$0xff] %v22129_v24  ;;  %24815 = vst [vmem:[#allocation91_spill] sm:$0xff] %v22132_v13  ;;  %v22143_v29 = vrot.slane %v9974_v1, %v18671_v2  ;;  %v10400_v1 = vrot.slane %v3296_v46, %v18671_v2  ;;  %v10295_v21 = vcombine.high %v3288_v52, %v3288_v52 }
 0x3ba   : > { %24816 = vst [vmem:[#allocation94_spill] sm:$0xff] %v22138_v31  ;;  %24818 = vst [vmem:[#allocation96_spill] sm:$0xff] %v22152_v4  ;;  %v10407_v10 = vrot.slane %v10393_v17, %v18671_v2  ;;  %v22162_v53 = vrot.slane %v9876_v49, %v18671_v2  ;;  %v10302_v30 = vrot.slane %v3288_v52, %v18671_v2 }
 0x3bb   : > { %24817 = vst [vmem:[#allocation93_spill] sm:$0xff] %v22143_v29  ;;  %24819 = vst [vmem:[#allocation95_spill] sm:$0xff] %v22155_v20  ;;  %v10408_v24 = vcombine.high %v10400_v1, %v10400_v1  ;;  %v10416_v12 = vrot.slane %v10400_v1, %v18671_v2  ;;  %v10309_v36 = vrot.slane %v10295_v21, %v18671_v2 }
 0x3bc   : > { %24820 = vst [vmem:[#allocation97_spill] sm:$0xff] %v22162_v53  ;;  %v10409_v13 = vcombine.high %v10407_v10, %v10407_v10  ;;  %v10423_v46 = vrot.slane %v10407_v10, %v18671_v2  ;;  %v10310_v11 = vcombine.high %v10302_v30, %v10302_v30  ;;  %v22173_v49 = vrot.slane %v10302_v30, %v18671_v2 }
 0x3bd   : > { %v10430_v29 = vrot.slane %v10408_v24, %v18671_v2  ;;  %v10438_v52 = vcombine.high %v10416_v12, %v10416_v12  ;;  %v11930_v53 = vrot.slane %v10416_v12, %v18686_v19  ;;  %v10311_v10 = vcombine.high %v10309_v36, %v10309_v36 }
 0x3be   : > { %v10437_v7 = vrot.slane %v10409_v13, %v18671_v2  ;;  %v10439_v31 = vcombine.high %v10423_v46, %v10423_v46  ;;  %v11946_v1 = vrot.slane %v10423_v46, %v18686_v19  ;;  %v22180_v20 = vrot.slane %v10309_v36, %v18671_v2 }
 0x3bf   : > { %v10440_v17 = vcombine.high %v10430_v29, %v10430_v29  ;;  %v11934_v4 = vrot.slane %v10430_v29, %v18686_v19  ;;  %v11938_v30 = vrot.slane %v10438_v52, %v18686_v19  ;;  %v13159_v40 = vsel %vm519_vm4, %v21393_v15, %v11930_v53  ;;  %v22198_v52 = vpop.f32.mrf.mxu1 }
 0x3c0   : > { %v10441_v21 = vcombine.high %v10437_v7, %v10437_v7  ;;  %v11950_v24 = vrot.slane %v10437_v7, %v18686_v19  ;;  %v11954_v13 = vrot.slane %v10439_v31, %v18686_v19  ;;  %v13163_v12 = vsel %vm519_vm4, %v21397_v25, %v11946_v1  ;;  %v22200_v31 = vpop.f32.mrf.mxu0 }
 0x3c1   : > { %v11942_v46 = vrot.slane %v10440_v17, %v18686_v19  ;;  %v13160_v41 = vsel %vm519_vm4, %v21401_v51, %v11934_v4  ;;  %v24821_v29 = vcombine.high %v21393_v15, %v21393_v15  ;;  %v24822_v17 = vcombine.high %v21397_v25, %v21397_v25 }
 0x3c2   : > { %v11958_v36 = vrot.slane %v10441_v21, %v18686_v19  ;;  %v13164_v53 = vsel %vm519_vm4, %v21404_v50, %v11950_v24  ;;  %v13474_v21 = vadd.f32 %v18680_v3, %v13159_v40  ;;  %v13475_v4 = vadd.f32 %v18695_v18, %v13160_v41 }
 0x3c3   : > { %v13161_v7 = vsel %vm519_vm4, %v24821_v29, %v11938_v30  ;;  %v13165_v1 = vsel %vm519_vm4, %v24822_v17, %v11954_v13  ;;  %v24823_v15 = vcombine.high %v21401_v51, %v21401_v51  ;;  %v24824_v29 = vcombine.high %v21404_v50, %v21404_v50 }
 0x3c4   : > { %v13476_v24 = vadd.f32 %v18683_v47, %v13161_v7  ;;  %v13478_v25 = vadd.f32 %v18680_v3, %v13163_v12  ;;  %v13479_v40 = vadd.f32 %v18695_v18, %v13164_v53  ;;  %v13480_v41 = vadd.f32 %v18683_v47, %v13165_v1  ;;  %v3126_v7 = vpop.f32.mrf.mxu0 }
 0x3c5   : > { %v13162_v30 = vsel %vm519_vm4, %v24823_v15, %v11942_v46  ;;  %v13166_v48 = vsel %vm519_vm4, %v24824_v29, %v11958_v36  ;;  %v14654_v51 = vcombine.low %v13474_v21, %v13475_v4  ;;  %v10332_v46 = vrot.slane %v10310_v11, %v18671_v2  ;;  %v3290_v36 = vpop.f32.mrf.mxu1 }
 0x3c6   : > { %v13477_v13 = vadd.f32 %v18699_v39, %v13162_v30  ;;  %v13481_v17 = vadd.f32 %v18699_v39, %v13166_v48  ;;  %v10339_v15 = vrot.slane %v10311_v10, %v18671_v2  ;;  %v10340_v50 = vcombine.high %v22173_v49, %v22173_v49 }
 0x3c7   : > { %v14671_v12 = vcombine.low %v13478_v25, %v13479_v40  ;;  %v10341_v53 = vcombine.high %v22180_v20, %v22180_v20  ;;  %v14662_v1 = vrot.slane %v14654_v51, %v18669_v35  ;;  %v10342_v30 = vcombine.high %v10332_v46, %v10332_v46 }
 0x3c8   : > { %v14655_v29 = vcombine.low %v13476_v24, %v13477_v13  ;;  %v14672_v6 = vcombine.low %v13480_v41, %v13481_v17  ;;  %v10343_v48 = vcombine.high %v10339_v15, %v10339_v15  ;;  %v11866_v11 = vrot.slane %v22173_v49, %v18686_v19  ;;  %v17688_v49 = vpop.f32.mrf.mxu1  ;;  %v17654_v17 = vpop.f32.mrf.mxu0 }
 0x3c9   : > { %v14679_v21 = vrot.slane %v14671_v12, %v18669_v35  ;;  %v11870_v24 = vrot.slane %v10332_v46, %v18686_v19  ;;  %v11874_v25 = vrot.slane %v10340_v50, %v18686_v19  ;;  %v11878_v13 = vrot.slane %v10342_v30, %v18686_v19 }
 0x3ca   : > { %v14669_v10 = vrot.slane %v14655_v29, %v18669_v35  ;;  %v14686_v4 = vrot.slane %v14672_v6, %v18669_v35  ;;  %v11882_v40 = vrot.slane %v22180_v20, %v18686_v19  ;;  %v11886_v41 = vrot.slane %v10339_v15, %v18686_v19 }
 0x3cb   : > { %v11890_v12 = vrot.slane %v10341_v53, %v18686_v19  ;;  %v11894_v6 = vrot.slane %v10343_v48, %v18686_v19  ;;  %v13143_v46 = vsel %vm519_vm4, %v21415_v62, %v11866_v11  ;;  %v13144_v50 = vsel %vm519_vm4, %v21421_v14, %v11870_v24 }
 0x3cc   : > { %v14670_v51 = vcombine.low %v14662_v1, %v14669_v10  ;;  %v14687_v29 = vcombine.low %v14679_v21, %v14686_v4  ;;  %v24825_v30 = vcombine.high %v21415_v62, %v21415_v62  ;;  %v24826_v15 = vcombine.high %v21421_v14, %v21421_v14 }
 0x3cd   : > { %v13147_v53 = vsel %vm519_vm4, %v21418_v61, %v11882_v40  ;;  %v13148_v48 = vsel %vm519_vm4, %v21436_v63, %v11886_v41  ;;  %v24827_v62 = vcombine.high %v21418_v61, %v21418_v61  ;;  %v24828_v14 = vcombine.high %v21436_v63, %v21436_v63  ;;  %v3139_v40 = vpop.f32.mrf.mxu0 }
 0x3ce   : > { %v13145_v20 = vsel %vm519_vm4, %v24825_v30, %v11874_v25  ;;  %v13146_v1 = vsel %vm519_vm4, %v24826_v15, %v11878_v13  ;;  %16766 = vst.msk [vmem:[%s19560_s18 + $0x60] sm:$0xff] %vm651_vm7, %v14670_v51  ;;  %16767 = vst.msk [vmem:[%s19560_s18 + $0x68] sm:$0xff] %vm651_vm7, %v14687_v29  ;;  %v13442_v21 = vadd.f32 %v18680_v3, %v13143_v46  ;;  %v3303_v13 = vpop.f32.mrf.mxu1 }
 0x3cf   : > { %v13149_v11 = vsel %vm519_vm4, %v24827_v62, %v11890_v12  ;;  %v13150_v10 = vsel %vm519_vm4, %v24828_v14, %v11894_v6  ;;  %v13443_v4 = vadd.f32 %v18695_v18, %v13144_v50  ;;  %v13444_v24 = vadd.f32 %v18683_v47, %v13145_v20 }
 0x3d0   : > { %v13445_v25 = vadd.f32 %v18699_v39, %v13146_v1  ;;  %v13446_v41 = vadd.f32 %v18680_v3, %v13147_v53  ;;  %v13447_v61 = vadd.f32 %v18695_v18, %v13148_v48  ;;  %v13448_v51 = vadd.f32 %v18683_v47, %v13149_v11 }
 0x3d1   : > { %v13449_v63 = vadd.f32 %v18699_v39, %v13150_v10  ;;  %v14518_v29 = vcombine.low %v13442_v21, %v13443_v4  ;;  %v3299_v6 = vadd.f32 %v22198_v52, %v22200_v31  ;;  %v3291_v46 = vadd.f32 %v3290_v36, %v3126_v7 }
 0x3d2   : > { %v14519_v12 = vcombine.low %v13444_v24, %v13445_v25  ;;  %v14535_v50 = vcombine.low %v13446_v41, %v13447_v61  ;;  %v22282_v20 = vadd.f32 %v17688_v49, %v17654_v17  ;;  %v22284_v15 = vadd.f32 %v3303_v13, %v3139_v40 }
 0x3d3   : > { %v14536_v30 = vcombine.low %v13448_v51, %v13449_v63  ;;  %v14526_v1 = vrot.slane %v14518_v29, %v18669_v35  ;;  %v10442_v48 = vcombine.high %v3299_v6, %v3299_v6  ;;  %v10449_v62 = vrot.slane %v3299_v6, %v18671_v2 }
 0x3d4   : > { %v14533_v53 = vrot.slane %v14519_v12, %v18669_v35  ;;  %v14543_v11 = vrot.slane %v14535_v50, %v18669_v35  ;;  %v10344_v52 = vcombine.high %v3291_v46, %v3291_v46  ;;  %v10351_v31 = vrot.slane %v3291_v46, %v18671_v2 }
 0x3d5   : > { %v14550_v14 = vrot.slane %v14536_v30, %v18669_v35  ;;  %v10456_v7 = vrot.slane %v10442_v48, %v18671_v2  ;;  %v10457_v49 = vcombine.high %v10449_v62, %v10449_v62  ;;  %v10465_v17 = vrot.slane %v10449_v62, %v18671_v2 }
 0x3d6   : > { %v14534_v36 = vcombine.low %v14526_v1, %v14533_v53  ;;  %v10358_v21 = vrot.slane %v10344_v52, %v18671_v2  ;;  %v10359_v4 = vcombine.high %v10351_v31, %v10351_v31  ;;  %v10367_v24 = vrot.slane %v10351_v31, %v18671_v2 }
 0x3d7   : > { %v14551_v10 = vcombine.low %v14543_v11, %v14550_v14  ;;  %v10458_v25 = vcombine.high %v10456_v7, %v10456_v7  ;;  %v10472_v13 = vrot.slane %v10456_v7, %v18671_v2  ;;  %v10479_v40 = vrot.slane %v10457_v49, %v18671_v2 }
 0x3d8   : > { %16758 = vst.msk [vmem:[%s19560_s18 + $0x20] sm:$0xff] %vm651_vm7, %v14534_v36  ;;  %v10487_v41 = vcombine.high %v10465_v17, %v10465_v17  ;;  %v11962_v61 = vrot.slane %v10465_v17, %v18686_v19  ;;  %v10360_v51 = vcombine.high %v10358_v21, %v10358_v21  ;;  %v10374_v63 = vrot.slane %v10358_v21, %v18671_v2 }
 0x3d9   : > { %16759 = vst.msk [vmem:[%s19560_s18 + $0x28] sm:$0xff] %vm651_vm7, %v14551_v10  ;;  %v10381_v29 = vrot.slane %v10359_v4, %v18671_v2  ;;  %v10486_v12 = vrot.slane %v10458_v25, %v18671_v2  ;;  %v10488_v6 = vcombine.high %v10472_v13, %v10472_v13  ;;  %v10489_v46 = vcombine.high %v10479_v40, %v10479_v40 }
 0x3da   : > { %v11966_v50 = vrot.slane %v10479_v40, %v18686_v19  ;;  %v11970_v30 = vrot.slane %v10487_v41, %v18686_v19  ;;  %v11978_v1 = vrot.slane %v10472_v13, %v18686_v19  ;;  %v13167_v53 = vsel %vm519_vm4, %v21455_v0, %v11962_v61 }
 0x3db   : > { %v10388_v48 = vrot.slane %v10360_v51, %v18671_v2  ;;  %v10490_v62 = vcombine.high %v10486_v12, %v10486_v12  ;;  %v11974_v11 = vrot.slane %v10489_v46, %v18686_v19  ;;  %v11982_v14 = vrot.slane %v10486_v12, %v18686_v19 }
 0x3dc   : > { %v11986_v52 = vrot.slane %v10488_v6, %v18686_v19  ;;  %v13168_v31 = vsel %vm519_vm4, %v21468_v55, %v11966_v50  ;;  %v24829_v36 = vcombine.high %v21455_v0, %v21455_v0  ;;  %v13171_v49 = vsel %vm519_vm4, %v21465_v28, %v11978_v1 }
 0x3dd   : > { %v13482_v17 = vadd.f32 %v18680_v3, %v13167_v53  ;;  %v11990_v10 = vrot.slane %v10490_v62, %v18686_v19  ;;  %v24830_v21 = vcombine.high %v21468_v55, %v21468_v55  ;;  %v13172_v25 = vsel %vm519_vm4, %v21483_v37, %v11982_v14 }
 0x3de   : > { %v13169_v7 = vsel %vm519_vm4, %v24829_v36, %v11970_v30  ;;  %v24831_v0 = vcombine.high %v21465_v28, %v21465_v28  ;;  %v13483_v40 = vadd.f32 %v18695_v18, %v13168_v31  ;;  %v13486_v51 = vadd.f32 %v18680_v3, %v13171_v49 }
 0x3df   : > { %v13170_v4 = vsel %vm519_vm4, %v24830_v21, %v11974_v11  ;;  %v13484_v41 = vadd.f32 %v18683_v47, %v13169_v7  ;;  %v24832_v55 = vcombine.high %v21483_v37, %v21483_v37  ;;  %v13487_v6 = vadd.f32 %v18695_v18, %v13172_v25 }
 0x3e0   : > { %v13173_v13 = vsel %vm519_vm4, %v24831_v0, %v11986_v52  ;;  %v13485_v61 = vadd.f32 %v18699_v39, %v13170_v4  ;;  %v10389_v28 = vcombine.high %v10367_v24, %v10367_v24  ;;  %v14688_v30 = vcombine.low %v13482_v17, %v13483_v40 }
 0x3e1   : > { %v13174_v12 = vsel %vm519_vm4, %v24832_v55, %v11990_v10  ;;  %v13488_v46 = vadd.f32 %v18683_v47, %v13173_v13  ;;  %v10390_v53 = vcombine.high %v10374_v63, %v10374_v63  ;;  %v14705_v62 = vcombine.low %v13486_v51, %v13487_v6 }
 0x3e2   : > { %v13489_v50 = vadd.f32 %v18699_v39, %v13174_v12  ;;  %v14689_v1 = vcombine.low %v13484_v41, %v13485_v61  ;;  %v10391_v11 = vcombine.high %v10381_v29, %v10381_v29  ;;  %v10392_v14 = vcombine.high %v10388_v48, %v10388_v48 }
 0x3e3   : > { %v11898_v52 = vrot.slane %v10367_v24, %v18686_v19  ;;  %v14696_v31 = vrot.slane %v14688_v30, %v18669_v35  ;;  %v11902_v7 = vrot.slane %v10381_v29, %v18686_v19  ;;  %v14713_v49 = vrot.slane %v14705_v62, %v18669_v35 }
 0x3e4   : > { %v14703_v37 = vrot.slane %v14689_v1, %v18669_v35  ;;  %v14706_v36 = vcombine.low %v13488_v46, %v13489_v50  ;;  %v11906_v10 = vrot.slane %v10389_v28, %v18686_v19  ;;  %v11910_v17 = vrot.slane %v10391_v11, %v18686_v19 }
 0x3e5   : > { %v11914_v21 = vrot.slane %v10374_v63, %v18686_v19  ;;  %v11918_v24 = vrot.slane %v10388_v48, %v18686_v19  ;;  %v11922_v0 = vrot.slane %v10390_v53, %v18686_v19  ;;  %v11926_v13 = vrot.slane %v10392_v14, %v18686_v19 }
 0x3e6   : > { %v14704_v4 = vcombine.low %v14696_v31, %v14703_v37  ;;  %v14720_v25 = vrot.slane %v14706_v36, %v18669_v35  ;;  %v13151_v29 = vsel %vm519_vm4, %v21461_v32, %v11898_v52  ;;  %v13152_v40 = vsel %vm519_vm4, %v21478_v59, %v11902_v7 }
 0x3e7   : > { %v24833_v41 = vcombine.high %v21461_v32, %v21461_v32  ;;  %v24834_v48 = vcombine.high %v21478_v59, %v21478_v59  ;;  %v13155_v55 = vsel %vm519_vm4, %v21475_v34, %v11914_v21  ;;  %v13156_v12 = vsel %vm519_vm4, %v21494_v57, %v11918_v24 }
 0x3e8   : > { %v14721_v61 = vcombine.low %v14713_v49, %v14720_v25  ;;  %16768 = vst.msk [vmem:[%s19560_s18 + $0x70] sm:$0xff] %vm651_vm7, %v14704_v4  ;;  %v24835_v6 = vcombine.high %v21475_v34, %v21475_v34  ;;  %v24836_v46 = vcombine.high %v21494_v57, %v21494_v57  ;;  %v13450_v59 = vadd.f32 %v18680_v3, %v13151_v29 }
 0x3e9   : > { %v13153_v63 = vsel %vm519_vm4, %v24833_v41, %v11906_v10  ;;  %v13154_v51 = vsel %vm519_vm4, %v24834_v48, %v11910_v17  ;;  %v13451_v50 = vadd.f32 %v18695_v18, %v13152_v40  ;;  %v13454_v53 = vadd.f32 %v18680_v3, %v13155_v55 }
 0x3ea   : > { %v13157_v32 = vsel %vm519_vm4, %v24835_v6, %v11922_v0  ;;  %v13158_v28 = vsel %vm519_vm4, %v24836_v46, %v11926_v13  ;;  %16769 = vst.msk [vmem:[%s19560_s18 + $0x78] sm:$0xff] %vm651_vm7, %v14721_v61  ;;  %v13452_v30 = vadd.f32 %v18683_v47, %v13153_v63  ;;  %v13453_v1 = vadd.f32 %v18699_v39, %v13154_v51 }
 0x3eb   : > { %v13455_v34 = vadd.f32 %v18695_v18, %v13156_v12  ;;  %v13456_v62 = vadd.f32 %v18683_v47, %v13157_v32  ;;  %v13457_v57 = vadd.f32 %v18699_v39, %v13158_v28  ;;  %v14552_v11 = vcombine.low %v13450_v59, %v13451_v50 }
 0x3ec   : > { %v10589_v14 = vcombine.high %v22282_v20, %v22282_v20  ;;  %v14553_v52 = vcombine.low %v13452_v30, %v13453_v1  ;;  %v10596_v37 = vrot.slane %v22282_v20, %v18671_v2  ;;  %v10491_v36 = vcombine.high %v22284_v15, %v22284_v15 }
 0x3ed   : > { %v14569_v31 = vcombine.low %v13454_v53, %v13455_v34  ;;  %v14560_v7 = vrot.slane %v14552_v11, %v18669_v35  ;;  %v14570_v49 = vcombine.low %v13456_v62, %v13457_v57  ;;  %v10498_v17 = vrot.slane %v22284_v15, %v18671_v2 }
 0x3ee   : > { %v10603_v10 = vrot.slane %v10589_v14, %v18671_v2  ;;  %v14567_v21 = vrot.slane %v14553_v52, %v18669_v35  ;;  %v10604_v25 = vcombine.high %v10596_v37, %v10596_v37  ;;  %v10612_v24 = vrot.slane %v10596_v37, %v18671_v2 }
 0x3ef   : > { %v14577_v4 = vrot.slane %v14569_v31, %v18669_v35  ;;  %v14584_v20 = vrot.slane %v14570_v49, %v18669_v35  ;;  %v10505_v29 = vrot.slane %v10491_v36, %v18671_v2  ;;  %v24837_v34 = vcombine.high %v21497_v5, %v21497_v5  ;;  %v22442_v36 = vpop.f32.mrf.mxu1 }
 0x3f0   : > { %v10605_v0 = vcombine.high %v10603_v10, %v10603_v10  ;;  %v10619_v13 = vrot.slane %v10603_v10, %v18671_v2  ;;  %v14568_v40 = vcombine.low %v14560_v7, %v14567_v21  ;;  %v10626_v41 = vrot.slane %v10604_v25, %v18671_v2  ;;  %v22444_v7 = vpop.f32.mrf.mxu0 }
 0x3f1   : > { %v10634_v15 = vcombine.high %v10612_v24, %v10612_v24  ;;  %v12058_v63 = vrot.slane %v10612_v24, %v18686_v19  ;;  %v14585_v61 = vcombine.low %v14577_v4, %v14584_v20  ;;  %v24838_v52 = vcombine.high %v21502_v60, %v21502_v60 }
 0x3f2   : > { %v10633_v48 = vrot.slane %v10605_v0, %v18671_v2  ;;  %v10635_v51 = vcombine.high %v10619_v13, %v10619_v13  ;;  %v12074_v55 = vrot.slane %v10619_v13, %v18686_v19  ;;  %16760 = vst.msk [vmem:[%s19560_s18 + $0x30] sm:$0xff] %vm651_vm7, %v14568_v40  ;;  %v10636_v12 = vcombine.high %v10626_v41, %v10626_v41 }
 0x3f3   : > { %v12062_v6 = vrot.slane %v10626_v41, %v18686_v19  ;;  %v12066_v32 = vrot.slane %v10634_v15, %v18686_v19  ;;  %v13191_v46 = vsel %vm519_vm4, %v21497_v5, %v12058_v63  ;;  %16761 = vst.msk [vmem:[%s19560_s18 + $0x38] sm:$0xff] %vm651_vm7, %v14585_v61  ;;  %v24839_v5 = vcombine.high %v21505_v58, %v21505_v58 }
 0x3f4   : > { %v10637_v28 = vcombine.high %v10633_v48, %v10633_v48  ;;  %v12078_v59 = vrot.slane %v10633_v48, %v18686_v19  ;;  %v12082_v50 = vrot.slane %v10635_v51, %v18686_v19  ;;  %v13195_v30 = vsel %vm519_vm4, %v21502_v60, %v12074_v55  ;;  %v3142_v51 = vpop.f32.mrf.mxu0 }
 0x3f5   : > { %v12070_v1 = vrot.slane %v10636_v12, %v18686_v19  ;;  %v13192_v53 = vsel %vm519_vm4, %v21505_v58, %v12062_v6  ;;  %v13193_v62 = vsel %vm519_vm4, %v24837_v34, %v12066_v32  ;;  %v13538_v57 = vadd.f32 %v18680_v3, %v13191_v46 }
 0x3f6   : > { %v12086_v11 = vrot.slane %v10637_v28, %v18686_v19  ;;  %v13196_v14 = vsel %vm519_vm4, %v21508_v33, %v12078_v59  ;;  %v13197_v31 = vsel %vm519_vm4, %v24838_v52, %v12082_v50  ;;  %v13539_v37 = vadd.f32 %v18695_v18, %v13192_v53 }
 0x3f7   : > { %v13194_v49 = vsel %vm519_vm4, %v24839_v5, %v12070_v1  ;;  %v13540_v10 = vadd.f32 %v18683_v47, %v13193_v62  ;;  %v13542_v21 = vadd.f32 %v18680_v3, %v13195_v30  ;;  %v13543_v4 = vadd.f32 %v18695_v18, %v13196_v14  ;;  %v17658_v14 = vpop.f32.mrf.mxu0 }
 0x3f8   : > { %v24840_v60 = vcombine.high %v21508_v33, %v21508_v33  ;;  %v13541_v24 = vadd.f32 %v18699_v39, %v13194_v49  ;;  %v13544_v20 = vadd.f32 %v18683_v47, %v13197_v31  ;;  %v14926_v0 = vcombine.low %v13538_v57, %v13539_v37  ;;  %v3306_v33 = vpop.f32.mrf.mxu1 }
 0x3f9   : > { %v14943_v13 = vcombine.low %v13542_v21, %v13543_v4  ;;  %v10506_v40 = vcombine.high %v10498_v17, %v10498_v17  ;;  %v10507_v41 = vcombine.high %v10505_v29, %v10505_v29  ;;  %v10514_v61 = vrot.slane %v10498_v17, %v18671_v2 }
 0x3fa   : > { %v13198_v25 = vsel %vm519_vm4, %v24840_v60, %v12086_v11  ;;  %v14927_v15 = vcombine.low %v13540_v10, %v13541_v24  ;;  %v14934_v63 = vrot.slane %v14926_v0, %v18669_v35  ;;  %v10521_v48 = vrot.slane %v10505_v29, %v18671_v2  ;;  %v17692_v11 = vpop.f32.mrf.mxu1 }
 0x3fb   : > { %v13545_v58 = vadd.f32 %v18699_v39, %v13198_v25  ;;  %v14951_v12 = vrot.slane %v14943_v13, %v18669_v35  ;;  %v10528_v6 = vrot.slane %v10506_v40, %v18671_v2  ;;  %v10535_v32 = vrot.slane %v10507_v41, %v18671_v2 }
 0x3fc   : > { %v14941_v46 = vrot.slane %v14927_v15, %v18669_v35  ;;  %v10536_v28 = vcombine.high %v10514_v61, %v10514_v61  ;;  %v10537_v59 = vcombine.high %v10521_v48, %v10521_v48  ;;  %v11994_v50 = vrot.slane %v10514_v61, %v18686_v19  ;;  %v3155_v61 = vpop.f32.mrf.mxu0 }
 0x3fd   : > { %v14944_v55 = vcombine.low %v13544_v20, %v13545_v58  ;;  %v10538_v30 = vcombine.high %v10528_v6, %v10528_v6  ;;  %v10539_v29 = vcombine.high %v10535_v32, %v10535_v32  ;;  %v11998_v1 = vrot.slane %v10528_v6, %v18686_v19 }
 0x3fe   : > { %v14942_v53 = vcombine.low %v14934_v63, %v14941_v46  ;;  %v12002_v34 = vrot.slane %v10536_v28, %v18686_v19  ;;  %v12010_v62 = vrot.slane %v10521_v48, %v18686_v19  ;;  %v12014_v57 = vrot.slane %v10535_v32, %v18686_v19  ;;  %v3319_v63 = vpop.f32.mrf.mxu1 }
 0x3ff   : > { %v14958_v17 = vrot.slane %v14944_v55, %v18669_v35  ;;  %v12006_v31 = vrot.slane %v10538_v30, %v18686_v19  ;;  %v12018_v37 = vrot.slane %v10537_v59, %v18686_v19  ;;  %v12022_v5 = vrot.slane %v10539_v29, %v18686_v19 }
 0x400   : > { %16782 = vst.msk [vmem:[%s19560_s18 + $0xe0] sm:$0xff] %vm651_vm7, %v14942_v53  ;;  %v13175_v49 = vsel %vm519_vm4, %v21529_v23, %v11994_v50  ;;  %v13176_v10 = vsel %vm519_vm4, %v21546_v43, %v11998_v1  ;;  %v24841_v21 = vcombine.high %v21529_v23, %v21529_v23  ;;  %v13179_v60 = vsel %vm519_vm4, %v21543_v45, %v12010_v62 }
 0x401   : > { %v14959_v52 = vcombine.low %v14951_v12, %v14958_v17  ;;  %v24842_v25 = vcombine.high %v21546_v43, %v21546_v43  ;;  %v13180_v20 = vsel %vm519_vm4, %v21555_v22, %v12014_v57  ;;  %v24843_v0 = vcombine.high %v21543_v45, %v21543_v45 }
 0x402   : > { %v13177_v4 = vsel %vm519_vm4, %v24841_v21, %v12002_v34  ;;  %v24844_v58 = vcombine.high %v21555_v22, %v21555_v22  ;;  %v13506_v40 = vadd.f32 %v18680_v3, %v13175_v49  ;;  %v13507_v41 = vadd.f32 %v18695_v18, %v13176_v10 }
 0x403   : > { %16783 = vst.msk [vmem:[%s19560_s18 + $0xe8] sm:$0xff] %vm651_vm7, %v14959_v52  ;;  %v13178_v24 = vsel %vm519_vm4, %v24842_v25, %v12006_v31  ;;  %v13181_v23 = vsel %vm519_vm4, %v24843_v0, %v12018_v37  ;;  %v13508_v43 = vadd.f32 %v18683_v47, %v13177_v4  ;;  %v13510_v48 = vadd.f32 %v18680_v3, %v13179_v60 }
 0x404   : > { %v13182_v13 = vsel %vm519_vm4, %v24844_v58, %v12022_v5  ;;  %v13509_v15 = vadd.f32 %v18699_v39, %v13178_v24  ;;  %v13511_v45 = vadd.f32 %v18695_v18, %v13180_v20  ;;  %v13512_v55 = vadd.f32 %v18683_v47, %v13181_v23 }
 0x405   : > { %v13513_v22 = vadd.f32 %v18699_v39, %v13182_v13  ;;  %v14790_v12 = vcombine.low %v13506_v40, %v13507_v41  ;;  %v3315_v32 = vadd.f32 %v22442_v36, %v22444_v7  ;;  %v3307_v46 = vadd.f32 %v3306_v33, %v3142_v51 }
 0x406   : > { %v14791_v6 = vcombine.low %v13508_v43, %v13509_v15  ;;  %v14807_v28 = vcombine.low %v13510_v48, %v13511_v45  ;;  %v22514_v50 = vadd.f32 %v17692_v11, %v17658_v14  ;;  %v22516_v17 = vadd.f32 %v3319_v63, %v3155_v61 }
 0x407   : > { %v14808_v59 = vcombine.low %v13512_v55, %v13513_v22  ;;  %v14798_v30 = vrot.slane %v14790_v12, %v18669_v35  ;;  %v10638_v1 = vcombine.high %v3315_v32, %v3315_v32  ;;  %v10645_v53 = vrot.slane %v3315_v32, %v18671_v2 }
 0x408   : > { %v14805_v29 = vrot.slane %v14791_v6, %v18669_v35  ;;  %v14815_v34 = vrot.slane %v14807_v28, %v18669_v35  ;;  %v10540_v36 = vcombine.high %v3307_v46, %v3307_v46  ;;  %v10547_v7 = vrot.slane %v3307_v46, %v18671_v2 }
 0x409   : > { %v14822_v62 = vrot.slane %v14808_v59, %v18669_v35  ;;  %v10652_v51 = vrot.slane %v10638_v1, %v18671_v2  ;;  %v10653_v57 = vcombine.high %v10645_v53, %v10645_v53  ;;  %v10661_v11 = vrot.slane %v10645_v53, %v18671_v2 }
 0x40a   : > { %v14806_v33 = vcombine.low %v14798_v30, %v14805_v29  ;;  %v10554_v52 = vrot.slane %v10540_v36, %v18671_v2  ;;  %v10555_v31 = vcombine.high %v10547_v7, %v10547_v7  ;;  %v10563_v37 = vrot.slane %v10547_v7, %v18671_v2 }
 0x40b   : > { %v14823_v14 = vcombine.low %v14815_v34, %v14822_v62  ;;  %v10654_v5 = vcombine.high %v10652_v51, %v10652_v51  ;;  %v10668_v49 = vrot.slane %v10652_v51, %v18671_v2  ;;  %v10675_v10 = vrot.slane %v10653_v57, %v18671_v2 }
 0x40c   : > { %16774 = vst.msk [vmem:[%s19560_s18 + $0xa0] sm:$0xff] %vm651_vm7, %v14806_v33  ;;  %v10683_v21 = vcombine.high %v10661_v11, %v10661_v11  ;;  %v12090_v4 = vrot.slane %v10661_v11, %v18686_v19  ;;  %v10556_v60 = vcombine.high %v10554_v52, %v10554_v52  ;;  %v10570_v25 = vrot.slane %v10554_v52, %v18671_v2 }
 0x40d   : > { %16775 = vst.msk [vmem:[%s19560_s18 + $0xa8] sm:$0xff] %vm651_vm7, %v14823_v14  ;;  %v10577_v24 = vrot.slane %v10555_v31, %v18671_v2  ;;  %v10682_v20 = vrot.slane %v10654_v5, %v18671_v2  ;;  %v10684_v0 = vcombine.high %v10668_v49, %v10668_v49  ;;  %v10685_v23 = vcombine.high %v10675_v10, %v10675_v10 }
 0x40e   : > { %v12094_v58 = vrot.slane %v10675_v10, %v18686_v19  ;;  %v12098_v13 = vrot.slane %v10683_v21, %v18686_v19  ;;  %v12106_v40 = vrot.slane %v10668_v49, %v18686_v19  ;;  %v13199_v41 = vsel %vm519_vm4, %v21552_v56, %v12090_v4 }
 0x40f   : > { %v10584_v43 = vrot.slane %v10556_v60, %v18671_v2  ;;  %v10686_v15 = vcombine.high %v10682_v20, %v10682_v20  ;;  %v12102_v63 = vrot.slane %v10685_v23, %v18686_v19  ;;  %v12110_v61 = vrot.slane %v10682_v20, %v18686_v19 }
 0x410   : > { %v12114_v48 = vrot.slane %v10684_v0, %v18686_v19  ;;  %v13200_v45 = vsel %vm519_vm4, %v21568_v26, %v12094_v58  ;;  %v24845_v55 = vcombine.high %v21552_v56, %v21552_v56  ;;  %v13203_v12 = vsel %vm519_vm4, %v21565_v16, %v12106_v40 }
 0x411   : > { %v13546_v6 = vadd.f32 %v18680_v3, %v13199_v41  ;;  %v12118_v32 = vrot.slane %v10686_v15, %v18686_v19  ;;  %v24846_v46 = vcombine.high %v21568_v26, %v21568_v26  ;;  %v13204_v59 = vsel %vm519_vm4, %v21583_v44, %v12110_v61  ;;  %v24849_v41 = vld [vmem:[#allocation4_spill] sm:$0xff]  ;;  %v24850_v15 = vld [vmem:[#allocation7_spill] sm:$0xff] }
 0x412   : > { %v13201_v22 = vsel %vm519_vm4, %v24845_v55, %v12098_v13  ;;  %v24847_v56 = vcombine.high %v21565_v16, %v21565_v16  ;;  %v13547_v29 = vadd.f32 %v18695_v18, %v13200_v45  ;;  %v13550_v34 = vadd.f32 %v18680_v3, %v13203_v12  ;;  %v24853_v55 = vld [vmem:[#allocation5_spill] sm:$0xff]  ;;  %v24854_v12 = vld [vmem:[#allocation6_spill] sm:$0xff] }
 0x413   : > { %v13202_v28 = vsel %vm519_vm4, %v24846_v46, %v12102_v63  ;;  %v13548_v1 = vadd.f32 %v18683_v47, %v13201_v22  ;;  %v24848_v26 = vcombine.high %v21583_v44, %v21583_v44  ;;  %v13551_v36 = vadd.f32 %v18695_v18, %v13204_v59 }
 0x414   : > { %v13205_v30 = vsel %vm519_vm4, %v24847_v56, %v12114_v48  ;;  %v13549_v53 = vadd.f32 %v18699_v39, %v13202_v28  ;;  %v10585_v16 = vcombine.high %v10563_v37, %v10563_v37  ;;  %v14960_v51 = vcombine.low %v13546_v6, %v13547_v29 }
 0x415   : > { %v13206_v62 = vsel %vm519_vm4, %v24848_v26, %v12118_v32  ;;  %v13552_v7 = vadd.f32 %v18683_v47, %v13205_v30  ;;  %v10586_v11 = vcombine.high %v10570_v25, %v10570_v25  ;;  %v14977_v14 = vcombine.low %v13550_v34, %v13551_v36 }
 0x416   : > { %v13553_v33 = vadd.f32 %v18699_v39, %v13206_v62  ;;  %v14961_v57 = vcombine.low %v13548_v1, %v13549_v53  ;;  %v10587_v52 = vcombine.high %v10577_v24, %v10577_v24  ;;  %v10588_v31 = vcombine.high %v10584_v43, %v10584_v43 }
 0x417   : > { %v12026_v5 = vrot.slane %v10563_v37, %v18686_v19  ;;  %v14968_v49 = vrot.slane %v14960_v51, %v18669_v35  ;;  %v12030_v21 = vrot.slane %v10577_v24, %v18686_v19  ;;  %v14985_v4 = vrot.slane %v14977_v14, %v18669_v35 }
 0x418   : > { %v14975_v44 = vrot.slane %v14961_v57, %v18669_v35  ;;  %v14978_v10 = vcombine.low %v13552_v7, %v13553_v33  ;;  %v12034_v60 = vrot.slane %v10585_v16, %v18686_v19  ;;  %v12038_v20 = vrot.slane %v10587_v52, %v18686_v19 }
 0x419   : > { %v12042_v0 = vrot.slane %v10570_v25, %v18686_v19  ;;  %v12046_v37 = vrot.slane %v10584_v43, %v18686_v19  ;;  %v12050_v13 = vrot.slane %v10586_v11, %v18686_v19  ;;  %v12054_v40 = vrot.slane %v10588_v31, %v18686_v19 }
 0x41a   : > { %v14976_v23 = vcombine.low %v14968_v49, %v14975_v44  ;;  %v14992_v58 = vrot.slane %v14978_v10, %v18669_v35  ;;  %v13183_v24 = vsel %vm519_vm4, %v24849_v41, %v12026_v5  ;;  %v13184_v63 = vsel %vm519_vm4, %v24850_v15, %v12030_v21 }
 0x41b   : > { %v24851_v61 = vcombine.high %v24849_v41, %v24849_v41  ;;  %v24852_v43 = vcombine.high %v24850_v15, %v24850_v15  ;;  %v13187_v22 = vsel %vm519_vm4, %v24853_v55, %v12042_v0  ;;  %v13188_v6 = vsel %vm519_vm4, %v24854_v12, %v12046_v37 }
 0x41c   : > { %v14993_v48 = vcombine.low %v14985_v4, %v14992_v58  ;;  %16784 = vst.msk [vmem:[%s19560_s18 + $0xf0] sm:$0xff] %vm651_vm7, %v14976_v23  ;;  %v24855_v32 = vcombine.high %v24853_v55, %v24853_v55  ;;  %v24856_v28 = vcombine.high %v24854_v12, %v24854_v12  ;;  %v13514_v56 = vadd.f32 %v18680_v3, %v13183_v24  ;;  %v24859_v12 = vld [vmem:[#allocation11_spill] sm:$0xff] }
 0x41d   : > { %v13185_v25 = vsel %vm519_vm4, %v24851_v61, %v12034_v60  ;;  %v13186_v45 = vsel %vm519_vm4, %v24852_v43, %v12038_v20  ;;  %v13515_v30 = vadd.f32 %v18695_v18, %v13184_v63  ;;  %v13518_v53 = vadd.f32 %v18680_v3, %v13187_v22  ;;  %v24857_v63 = vld [vmem:[#allocation8_spill] sm:$0xff] }
 0x41e   : > { %v13189_v46 = vsel %vm519_vm4, %v24855_v32, %v12050_v13  ;;  %v13190_v59 = vsel %vm519_vm4, %v24856_v28, %v12054_v40  ;;  %16785 = vst.msk [vmem:[%s19560_s18 + $0xf8] sm:$0xff] %vm651_vm7, %v14993_v48  ;;  %v13516_v29 = vadd.f32 %v18683_v47, %v13185_v25  ;;  %v13517_v1 = vadd.f32 %v18699_v39, %v13186_v45  ;;  %v24858_v45 = vld [vmem:[#allocation9_spill] sm:$0xff] }
 0x41f   : > { %v13519_v34 = vadd.f32 %v18695_v18, %v13188_v6  ;;  %v13520_v26 = vadd.f32 %v18683_v47, %v13189_v46  ;;  %v13521_v62 = vadd.f32 %v18699_v39, %v13190_v59  ;;  %v14824_v36 = vcombine.low %v13514_v56, %v13515_v30  ;;  %v24861_v56 = vld [vmem:[#allocation12_spill] sm:$0xff] }
 0x420   : > { %v10785_v7 = vcombine.high %v22514_v50, %v22514_v50  ;;  %v14825_v16 = vcombine.low %v13516_v29, %v13517_v1  ;;  %v10792_v51 = vrot.slane %v22514_v50, %v18671_v2  ;;  %v10687_v57 = vcombine.high %v22516_v17, %v22516_v17 }
 0x421   : > { %v14841_v33 = vcombine.low %v13518_v53, %v13519_v34  ;;  %v14832_v11 = vrot.slane %v14824_v36, %v18669_v35  ;;  %v14842_v14 = vcombine.low %v13520_v26, %v13521_v62  ;;  %v10694_v31 = vrot.slane %v22516_v17, %v18671_v2  ;;  %v22674_v34 = vpop.f32.mrf.mxu1  ;;  %v22676_v26 = vpop.f32.mrf.mxu0 }
 0x422   : > { %v10799_v52 = vrot.slane %v10785_v7, %v18671_v2  ;;  %v14839_v5 = vrot.slane %v14825_v16, %v18669_v35  ;;  %v10800_v44 = vcombine.high %v10792_v51, %v10792_v51  ;;  %v10808_v10 = vrot.slane %v10792_v51, %v18671_v2 }
 0x423   : > { %v14849_v49 = vrot.slane %v14841_v33, %v18669_v35  ;;  %v14856_v50 = vrot.slane %v14842_v14, %v18669_v35  ;;  %v10701_v60 = vrot.slane %v10687_v57, %v18671_v2  ;;  %v24860_v32 = vcombine.high %v24857_v63, %v24857_v63 }
 0x424   : > { %v10801_v21 = vcombine.high %v10799_v52, %v10799_v52  ;;  %v10815_v4 = vrot.slane %v10799_v52, %v18671_v2  ;;  %v14840_v20 = vcombine.low %v14832_v11, %v14839_v5  ;;  %v10822_v0 = vrot.slane %v10800_v44, %v18671_v2 }
 0x425   : > { %v10830_v17 = vcombine.high %v10808_v10, %v10808_v10  ;;  %v12186_v23 = vrot.slane %v10808_v10, %v18686_v19  ;;  %v14857_v58 = vcombine.low %v14849_v49, %v14856_v50  ;;  %v24862_v29 = vcombine.high %v24858_v45, %v24858_v45 }
 0x426   : > { %v10829_v37 = vrot.slane %v10801_v21, %v18671_v2  ;;  %v10831_v13 = vcombine.high %v10815_v4, %v10815_v4  ;;  %v12202_v40 = vrot.slane %v10815_v4, %v18686_v19  ;;  %16776 = vst.msk [vmem:[%s19560_s18 + $0xb0] sm:$0xff] %vm651_vm7, %v14840_v20  ;;  %v10832_v41 = vcombine.high %v10822_v0, %v10822_v0 }
 0x427   : > { %v12190_v24 = vrot.slane %v10822_v0, %v18686_v19  ;;  %v12194_v15 = vrot.slane %v10830_v17, %v18686_v19  ;;  %v13223_v61 = vsel %vm519_vm4, %v24857_v63, %v12186_v23  ;;  %16777 = vst.msk [vmem:[%s19560_s18 + $0xb8] sm:$0xff] %vm651_vm7, %v14857_v58  ;;  %v24863_v62 = vcombine.high %v24859_v12, %v24859_v12  ;;  %v3322_v0 = vpop.f32.mrf.mxu1  ;;  %v3158_v17 = vpop.f32.mrf.mxu0 }
 0x428   : > { %v10833_v25 = vcombine.high %v10829_v37, %v10829_v37  ;;  %v12206_v48 = vrot.slane %v10829_v37, %v18686_v19  ;;  %v12210_v43 = vrot.slane %v10831_v13, %v18686_v19  ;;  %v13227_v55 = vsel %vm519_vm4, %v24858_v45, %v12202_v40 }
 0x429   : > { %v12198_v22 = vrot.slane %v10832_v41, %v18686_v19  ;;  %v13224_v6 = vsel %vm519_vm4, %v24859_v12, %v12190_v24  ;;  %v13225_v46 = vsel %vm519_vm4, %v24860_v32, %v12194_v15  ;;  %v13602_v28 = vadd.f32 %v18680_v3, %v13223_v61 }
 0x42a   : > { %v12214_v59 = vrot.slane %v10833_v25, %v18686_v19  ;;  %v13228_v30 = vsel %vm519_vm4, %v24861_v56, %v12206_v48  ;;  %v13229_v1 = vsel %vm519_vm4, %v24862_v29, %v12210_v43  ;;  %v13603_v53 = vadd.f32 %v18695_v18, %v13224_v6 }
 0x42b   : > { %v13226_v36 = vsel %vm519_vm4, %v24863_v62, %v12198_v22  ;;  %v13604_v7 = vadd.f32 %v18683_v47, %v13225_v46  ;;  %v13606_v16 = vadd.f32 %v18680_v3, %v13227_v55  ;;  %v13607_v33 = vadd.f32 %v18695_v18, %v13228_v30  ;;  %v17696_v55 = vpop.f32.mrf.mxu1  ;;  %v17662_v22 = vpop.f32.mrf.mxu0 }
 0x42c   : > { %v24864_v51 = vcombine.high %v24861_v56, %v24861_v56  ;;  %v13605_v11 = vadd.f32 %v18699_v39, %v13226_v36  ;;  %v13608_v14 = vadd.f32 %v18683_v47, %v13229_v1  ;;  %v15198_v52 = vcombine.low %v13602_v28, %v13603_v53  ;;  %v24865_v28 = vld [vmem:[#allocation10_spill] sm:$0xff]  ;;  %v24868_v53 = vld [vmem:[#allocation13_spill] sm:$0xff] }
 0x42d   : > { %v15215_v49 = vcombine.low %v13606_v16, %v13607_v33  ;;  %v10702_v44 = vcombine.high %v10694_v31, %v10694_v31  ;;  %v10703_v10 = vcombine.high %v10701_v60, %v10701_v60  ;;  %v10710_v4 = vrot.slane %v10694_v31, %v18671_v2  ;;  %v24866_v56 = vld [vmem:[#allocation14_spill] sm:$0xff]  ;;  %v24870_v16 = vld [vmem:[#allocation15_spill] sm:$0xff] }
 0x42e   : > { %v13230_v57 = vsel %vm519_vm4, %v24864_v51, %v12214_v59  ;;  %v15199_v50 = vcombine.low %v13604_v7, %v13605_v11  ;;  %v15206_v21 = vrot.slane %v15198_v52, %v18669_v35  ;;  %v10717_v20 = vrot.slane %v10701_v60, %v18671_v2 }
 0x42f   : > { %v13609_v5 = vadd.f32 %v18699_v39, %v13230_v57  ;;  %v15223_v58 = vrot.slane %v15215_v49, %v18669_v35  ;;  %v10724_v37 = vrot.slane %v10702_v44, %v18671_v2  ;;  %v10731_v13 = vrot.slane %v10703_v10, %v18671_v2  ;;  %v3335_v10 = vpop.f32.mrf.mxu1 }
 0x430   : > { %v15213_v40 = vrot.slane %v15199_v50, %v18669_v35  ;;  %v10732_v41 = vcombine.high %v10710_v4, %v10710_v4  ;;  %v10733_v24 = vcombine.high %v10717_v20, %v10717_v20  ;;  %v12122_v15 = vrot.slane %v10710_v4, %v18686_v19  ;;  %v3171_v50 = vpop.f32.mrf.mxu0 }
 0x431   : > { %v15216_v23 = vcombine.low %v13608_v14, %v13609_v5  ;;  %v10734_v63 = vcombine.high %v10724_v37, %v10724_v37  ;;  %v10735_v60 = vcombine.high %v10731_v13, %v10731_v13  ;;  %v12126_v61 = vrot.slane %v10724_v37, %v18686_v19 }
 0x432   : > { %v15214_v25 = vcombine.low %v15206_v21, %v15213_v40  ;;  %v12130_v48 = vrot.slane %v10732_v41, %v18686_v19  ;;  %v12138_v43 = vrot.slane %v10717_v20, %v18686_v19  ;;  %v12142_v45 = vrot.slane %v10731_v13, %v18686_v19 }
 0x433   : > { %v15230_v31 = vrot.slane %v15216_v23, %v18669_v35  ;;  %v12134_v6 = vrot.slane %v10734_v63, %v18686_v19  ;;  %v12146_v32 = vrot.slane %v10733_v24, %v18686_v19  ;;  %v12150_v46 = vrot.slane %v10735_v60, %v18686_v19 }
 0x434   : > { %16798 = vst.msk [vmem:[%s19560_s18 + $0x160] sm:$0xff] %vm651_vm7, %v15214_v25  ;;  %v13207_v59 = vsel %vm519_vm4, %v24865_v28, %v12122_v15  ;;  %v13208_v30 = vsel %vm519_vm4, %v24866_v56, %v12126_v61  ;;  %v24867_v29 = vcombine.high %v24865_v28, %v24865_v28  ;;  %v13211_v62 = vsel %vm519_vm4, %v24868_v53, %v12138_v43 }
 0x435   : > { %v15231_v12 = vcombine.low %v15223_v58, %v15230_v31  ;;  %v24869_v36 = vcombine.high %v24866_v56, %v24866_v56  ;;  %v13212_v33 = vsel %vm519_vm4, %v24870_v16, %v12142_v45  ;;  %v24871_v51 = vcombine.high %v24868_v53, %v24868_v53 }
 0x436   : > { %v13209_v1 = vsel %vm519_vm4, %v24867_v29, %v12130_v48  ;;  %v24872_v11 = vcombine.high %v24870_v16, %v24870_v16  ;;  %v13570_v52 = vadd.f32 %v18680_v3, %v13207_v59  ;;  %v13571_v5 = vadd.f32 %v18695_v18, %v13208_v30 }
 0x437   : > { %16799 = vst.msk [vmem:[%s19560_s18 + $0x168] sm:$0xff] %vm651_vm7, %v15231_v12  ;;  %v13210_v7 = vsel %vm519_vm4, %v24869_v36, %v12134_v6  ;;  %v13213_v57 = vsel %vm519_vm4, %v24871_v51, %v12146_v32  ;;  %v13572_v49 = vadd.f32 %v18683_v47, %v13209_v1  ;;  %v13574_v21 = vadd.f32 %v18680_v3, %v13211_v62 }
 0x438   : > { %v13214_v14 = vsel %vm519_vm4, %v24872_v11, %v12150_v46  ;;  %v13573_v44 = vadd.f32 %v18699_v39, %v13210_v7  ;;  %v13575_v4 = vadd.f32 %v18695_v18, %v13212_v33  ;;  %v13576_v20 = vadd.f32 %v18683_v47, %v13213_v57 }
 0x439   : > { %v13577_v23 = vadd.f32 %v18699_v39, %v13214_v14  ;;  %v15062_v58 = vcombine.low %v13570_v52, %v13571_v5  ;;  %v3331_v13 = vadd.f32 %v22674_v34, %v22676_v26  ;;  %v3323_v40 = vadd.f32 %v3322_v0, %v3158_v17 }
 0x43a   : > { %v15063_v37 = vcombine.low %v13572_v49, %v13573_v44  ;;  %v15079_v41 = vcombine.low %v13574_v21, %v13575_v4  ;;  %v22746_v15 = vadd.f32 %v17696_v55, %v17662_v22  ;;  %v22748_v31 = vadd.f32 %v3335_v10, %v3171_v50  ;;  %v24874_v21 = vld [vmem:[#allocation16_spill] sm:$0xff] }
 0x43b   : > { %v15080_v24 = vcombine.low %v13576_v20, %v13577_v23  ;;  %v15070_v63 = vrot.slane %v15062_v58, %v18669_v35  ;;  %v10834_v61 = vcombine.high %v3331_v13, %v3331_v13  ;;  %v10841_v25 = vrot.slane %v3331_v13, %v18671_v2  ;;  %v24876_v13 = vld [vmem:[#allocation19_spill] sm:$0xff] }
 0x43c   : > { %v15077_v60 = vrot.slane %v15063_v37, %v18669_v35  ;;  %v15087_v48 = vrot.slane %v15079_v41, %v18669_v35  ;;  %v10736_v34 = vcombine.high %v3323_v40, %v3323_v40  ;;  %v10743_v26 = vrot.slane %v3323_v40, %v18671_v2 }
 0x43d   : > { %v15094_v43 = vrot.slane %v15080_v24, %v18669_v35  ;;  %v10848_v17 = vrot.slane %v10834_v61, %v18671_v2  ;;  %v10849_v45 = vcombine.high %v10841_v25, %v10841_v25  ;;  %v10857_v55 = vrot.slane %v10841_v25, %v18671_v2 }
 0x43e   : > { %v15078_v0 = vcombine.low %v15070_v63, %v15077_v60  ;;  %v10750_v12 = vrot.slane %v10736_v34, %v18671_v2  ;;  %v10751_v6 = vcombine.high %v10743_v26, %v10743_v26  ;;  %v10759_v32 = vrot.slane %v10743_v26, %v18671_v2 }
 0x43f   : > { %v15095_v22 = vcombine.low %v15087_v48, %v15094_v43  ;;  %v10850_v46 = vcombine.high %v10848_v17, %v10848_v17  ;;  %v10864_v28 = vrot.slane %v10848_v17, %v18671_v2  ;;  %v10871_v59 = vrot.slane %v10849_v45, %v18671_v2 }
 0x440   : > { %16790 = vst.msk [vmem:[%s19560_s18 + $0x120] sm:$0xff] %vm651_vm7, %v15078_v0  ;;  %v10879_v56 = vcombine.high %v10857_v55, %v10857_v55  ;;  %v12218_v30 = vrot.slane %v10857_v55, %v18686_v19  ;;  %v10752_v29 = vcombine.high %v10750_v12, %v10750_v12  ;;  %v10766_v1 = vrot.slane %v10750_v12, %v18671_v2 }
 0x441   : > { %16791 = vst.msk [vmem:[%s19560_s18 + $0x128] sm:$0xff] %vm651_vm7, %v15095_v22  ;;  %v10773_v53 = vrot.slane %v10751_v6, %v18671_v2  ;;  %v10878_v62 = vrot.slane %v10850_v46, %v18671_v2  ;;  %v10880_v36 = vcombine.high %v10864_v28, %v10864_v28  ;;  %v10881_v7 = vcombine.high %v10871_v59, %v10871_v59 }
 0x442   : > { %v12222_v16 = vrot.slane %v10871_v59, %v18686_v19  ;;  %v12226_v33 = vrot.slane %v10879_v56, %v18686_v19  ;;  %v12234_v51 = vrot.slane %v10864_v28, %v18686_v19  ;;  %v13231_v57 = vsel %vm519_vm4, %v21671_v54, %v12218_v30 }
 0x443   : > { %v10780_v11 = vrot.slane %v10752_v29, %v18671_v2  ;;  %v10882_v14 = vcombine.high %v10878_v62, %v10878_v62  ;;  %v12230_v52 = vrot.slane %v10881_v7, %v18686_v19  ;;  %v12238_v5 = vrot.slane %v10878_v62, %v18686_v19 }
 0x444   : > { %v12242_v49 = vrot.slane %v10880_v36, %v18686_v19  ;;  %v13232_v44 = vsel %vm519_vm4, %v21684_v42, %v12222_v16  ;;  %v24873_v10 = vcombine.high %v21671_v54, %v21671_v54  ;;  %v13235_v4 = vsel %vm519_vm4, %v24874_v21, %v12234_v51 }
 0x445   : > { %v13610_v20 = vadd.f32 %v18680_v3, %v13231_v57  ;;  %v12246_v23 = vrot.slane %v10882_v14, %v18686_v19  ;;  %v24875_v58 = vcombine.high %v21684_v42, %v21684_v42  ;;  %v13236_v40 = vsel %vm519_vm4, %v24876_v13, %v12238_v5  ;;  %v24879_v57 = vld [vmem:[#allocation17_spill] sm:$0xff]  ;;  %v24880_v14 = vld [vmem:[#allocation20_spill] sm:$0xff] }
 0x446   : > { %v13233_v50 = vsel %vm519_vm4, %v24873_v10, %v12226_v33  ;;  %v24877_v54 = vcombine.high %v24874_v21, %v24874_v21  ;;  %v13611_v24 = vadd.f32 %v18695_v18, %v13232_v44  ;;  %v13614_v61 = vadd.f32 %v18680_v3, %v13235_v4  ;;  %v24883_v10 = vld [vmem:[#allocation18_spill] sm:$0xff] }
 0x447   : > { %v13234_v37 = vsel %vm519_vm4, %v24875_v58, %v12230_v52  ;;  %v13612_v63 = vadd.f32 %v18683_v47, %v13233_v50  ;;  %v24878_v42 = vcombine.high %v24876_v13, %v24876_v13  ;;  %v13615_v48 = vadd.f32 %v18695_v18, %v13236_v40  ;;  %v24884_v21 = vld [vmem:[#allocation22_spill] sm:$0xff] }
 0x448   : > { %v13237_v41 = vsel %vm519_vm4, %v24877_v54, %v12242_v49  ;;  %v13613_v60 = vadd.f32 %v18699_v39, %v13234_v37  ;;  %v10781_v34 = vcombine.high %v10759_v32, %v10759_v32  ;;  %v15232_v0 = vcombine.low %v13610_v20, %v13611_v24 }
 0x449   : > { %v13238_v25 = vsel %vm519_vm4, %v24878_v42, %v12246_v23  ;;  %v13616_v43 = vadd.f32 %v18683_v47, %v13237_v41  ;;  %v10782_v45 = vcombine.high %v10766_v1, %v10766_v1  ;;  %v15249_v55 = vcombine.low %v13614_v61, %v13615_v48 }
 0x44a   : > { %v13617_v26 = vadd.f32 %v18699_v39, %v13238_v25  ;;  %v15233_v17 = vcombine.low %v13612_v63, %v13613_v60  ;;  %v10783_v22 = vcombine.high %v10773_v53, %v10773_v53  ;;  %v10784_v12 = vcombine.high %v10780_v11, %v10780_v11 }
 0x44b   : > { %v12154_v6 = vrot.slane %v10759_v32, %v18686_v19  ;;  %v15240_v46 = vrot.slane %v15232_v0, %v18669_v35  ;;  %v12158_v56 = vrot.slane %v10773_v53, %v18686_v19  ;;  %v15257_v30 = vrot.slane %v15249_v55, %v18669_v35 }
 0x44c   : > { %v15247_v28 = vrot.slane %v15233_v17, %v18669_v35  ;;  %v15250_v59 = vcombine.low %v13616_v43, %v13617_v26  ;;  %v12162_v29 = vrot.slane %v10781_v34, %v18686_v19  ;;  %v12166_v62 = vrot.slane %v10783_v22, %v18686_v19 }
 0x44d   : > { %v12170_v36 = vrot.slane %v10766_v1, %v18686_v19  ;;  %v12174_v32 = vrot.slane %v10780_v11, %v18686_v19  ;;  %v12178_v33 = vrot.slane %v10782_v45, %v18686_v19  ;;  %v12182_v51 = vrot.slane %v10784_v12, %v18686_v19 }
 0x44e   : > { %v15248_v7 = vcombine.low %v15240_v46, %v15247_v28  ;;  %v15264_v16 = vrot.slane %v15250_v59, %v18669_v35  ;;  %v13215_v53 = vsel %vm519_vm4, %v24879_v57, %v12154_v6  ;;  %v13216_v52 = vsel %vm519_vm4, %v24880_v14, %v12158_v56 }
 0x44f   : > { %v24881_v5 = vcombine.high %v24879_v57, %v24879_v57  ;;  %v24882_v11 = vcombine.high %v24880_v14, %v24880_v14  ;;  %v13219_v50 = vsel %vm519_vm4, %v24883_v10, %v12170_v36  ;;  %v13220_v4 = vsel %vm519_vm4, %v24884_v21, %v12174_v32 }
 0x450   : > { %v15265_v49 = vcombine.low %v15257_v30, %v15264_v16  ;;  %16800 = vst.msk [vmem:[%s19560_s18 + $0x170] sm:$0xff] %vm651_vm7, %v15248_v7  ;;  %v24885_v20 = vcombine.high %v24883_v10, %v24883_v10  ;;  %v24886_v58 = vcombine.high %v24884_v21, %v24884_v21  ;;  %v13578_v13 = vadd.f32 %v18680_v3, %v13215_v53  ;;  %v24887_v53 = vld [vmem:[#allocation21_spill] sm:$0xff]  ;;  %v24889_v10 = vld [vmem:[#allocation24_spill] sm:$0xff] }
 0x451   : > { %v13217_v1 = vsel %vm519_vm4, %v24881_v5, %v12162_v29  ;;  %v13218_v44 = vsel %vm519_vm4, %v24882_v11, %v12166_v62  ;;  %v13579_v40 = vadd.f32 %v18695_v18, %v13216_v52  ;;  %v13582_v24 = vadd.f32 %v18680_v3, %v13219_v50 }
 0x452   : > { %v13221_v23 = vsel %vm519_vm4, %v24885_v20, %v12178_v33  ;;  %v13222_v37 = vsel %vm519_vm4, %v24886_v58, %v12182_v51  ;;  %16801 = vst.msk [vmem:[%s19560_s18 + $0x178] sm:$0xff] %vm651_vm7, %v15265_v49  ;;  %v13580_v54 = vadd.f32 %v18683_v47, %v13217_v1  ;;  %v13581_v41 = vadd.f32 %v18699_v39, %v13218_v44  ;;  %v24888_v49 = vld [vmem:[#allocation23_spill] sm:$0xff]  ;;  %v24891_v58 = vld [vmem:[#allocation25_spill] sm:$0xff] }
 0x453   : > { %v13583_v63 = vadd.f32 %v18695_v18, %v13220_v4  ;;  %v13584_v60 = vadd.f32 %v18683_v47, %v13221_v23  ;;  %v13585_v61 = vadd.f32 %v18699_v39, %v13222_v37  ;;  %v15096_v42 = vcombine.low %v13578_v13, %v13579_v40 }
 0x454   : > { %v10981_v25 = vcombine.high %v22746_v15, %v22746_v15  ;;  %v15097_v48 = vcombine.low %v13580_v54, %v13581_v41  ;;  %v10988_v34 = vrot.slane %v22746_v15, %v18671_v2  ;;  %v10883_v26 = vcombine.high %v22748_v31, %v22748_v31  ;;  %v22906_v41 = vpop.f32.mrf.mxu1 }
 0x455   : > { %v15113_v43 = vcombine.low %v13582_v24, %v13583_v63  ;;  %v15104_v0 = vrot.slane %v15096_v42, %v18669_v35  ;;  %v15114_v17 = vcombine.low %v13584_v60, %v13585_v61  ;;  %v10890_v55 = vrot.slane %v22748_v31, %v18671_v2  ;;  %v22908_v24 = vpop.f32.mrf.mxu0 }
 0x456   : > { %v10995_v45 = vrot.slane %v10981_v25, %v18671_v2  ;;  %v15111_v22 = vrot.slane %v15097_v48, %v18669_v35  ;;  %v10996_v6 = vcombine.high %v10988_v34, %v10988_v34  ;;  %v11004_v46 = vrot.slane %v10988_v34, %v18671_v2 }
 0x457   : > { %v15121_v12 = vrot.slane %v15113_v43, %v18669_v35  ;;  %v15128_v15 = vrot.slane %v15114_v17, %v18669_v35  ;;  %v10897_v56 = vrot.slane %v10883_v26, %v18671_v2  ;;  %v24890_v21 = vcombine.high %v24887_v53, %v24887_v53 }
 0x458   : > { %v10997_v28 = vcombine.high %v10995_v45, %v10995_v45  ;;  %v11011_v59 = vrot.slane %v10995_v45, %v18671_v2  ;;  %v15112_v30 = vcombine.low %v15104_v0, %v15111_v22  ;;  %v11018_v29 = vrot.slane %v10996_v6, %v18671_v2 }
 0x459   : > { %v11026_v31 = vcombine.high %v11004_v46, %v11004_v46  ;;  %v12314_v62 = vrot.slane %v11004_v46, %v18686_v19  ;;  %v15129_v36 = vcombine.low %v15121_v12, %v15128_v15  ;;  %v24892_v13 = vcombine.high %v24888_v49, %v24888_v49 }
 0x45a   : > { %v11025_v7 = vrot.slane %v10997_v28, %v18671_v2  ;;  %v11027_v16 = vcombine.high %v11011_v59, %v11011_v59  ;;  %v12330_v32 = vrot.slane %v11011_v59, %v18686_v19  ;;  %16792 = vst.msk [vmem:[%s19560_s18 + $0x130] sm:$0xff] %vm651_vm7, %v15112_v30  ;;  %v11028_v33 = vcombine.high %v11018_v29, %v11018_v29  ;;  %v3338_v59 = vpop.f32.mrf.mxu1  ;;  %v3174_v30 = vpop.f32.mrf.mxu0 }
 0x45b   : > { %v12318_v51 = vrot.slane %v11018_v29, %v18686_v19  ;;  %v12322_v57 = vrot.slane %v11026_v31, %v18686_v19  ;;  %v13255_v14 = vsel %vm519_vm4, %v24887_v53, %v12314_v62  ;;  %16793 = vst.msk [vmem:[%s19560_s18 + $0x138] sm:$0xff] %vm651_vm7, %v15129_v36  ;;  %v24893_v63 = vcombine.high %v24889_v10, %v24889_v10 }
 0x45c   : > { %v11029_v52 = vcombine.high %v11025_v7, %v11025_v7  ;;  %v12334_v5 = vrot.slane %v11025_v7, %v18686_v19  ;;  %v12338_v1 = vrot.slane %v11027_v16, %v18686_v19  ;;  %v13259_v11 = vsel %vm519_vm4, %v24888_v49, %v12330_v32  ;;  %v17666_v49 = vpop.f32.mrf.mxu0 }
 0x45d   : > { %v12326_v44 = vrot.slane %v11028_v33, %v18686_v19  ;;  %v13256_v50 = vsel %vm519_vm4, %v24889_v10, %v12318_v51  ;;  %v13257_v4 = vsel %vm519_vm4, %v24890_v21, %v12322_v57  ;;  %v13666_v20 = vadd.f32 %v18680_v3, %v13255_v14  ;;  %v24895_v21 = vld [vmem:[#allocation26_spill] sm:$0xff] }
 0x45e   : > { %v12342_v23 = vrot.slane %v11029_v52, %v18686_v19  ;;  %v13260_v37 = vsel %vm519_vm4, %v24891_v58, %v12334_v5  ;;  %v13261_v40 = vsel %vm519_vm4, %v24892_v13, %v12338_v1  ;;  %v13667_v54 = vadd.f32 %v18695_v18, %v13256_v50  ;;  %v17700_v1 = vpop.f32.mrf.mxu1  ;;  %v24898_v13 = vld [vmem:[#allocation28_spill] sm:$0xff] }
 0x45f   : > { %v13258_v60 = vsel %vm519_vm4, %v24893_v63, %v12326_v44  ;;  %v13668_v61 = vadd.f32 %v18683_v47, %v13257_v4  ;;  %v13670_v42 = vadd.f32 %v18680_v3, %v13259_v11  ;;  %v13671_v25 = vadd.f32 %v18695_v18, %v13260_v37 }
 0x460   : > { %v24894_v48 = vcombine.high %v24891_v58, %v24891_v58  ;;  %v13669_v34 = vadd.f32 %v18699_v39, %v13258_v60  ;;  %v13672_v26 = vadd.f32 %v18683_v47, %v13261_v40  ;;  %v15470_v0 = vcombine.low %v13666_v20, %v13667_v54  ;;  %v24896_v20 = vld [vmem:[#allocation27_spill] sm:$0xff]  ;;  %v24900_v60 = vld [vmem:[#allocation29_spill] sm:$0xff] }
 0x461   : > { %v15487_v45 = vcombine.low %v13670_v42, %v13671_v25  ;;  %v10898_v22 = vcombine.high %v10890_v55, %v10890_v55  ;;  %v10899_v12 = vcombine.high %v10897_v56, %v10897_v56  ;;  %v10906_v15 = vrot.slane %v10890_v55, %v18671_v2 }
 0x462   : > { %v13262_v43 = vsel %vm519_vm4, %v24894_v48, %v12342_v23  ;;  %v15471_v6 = vcombine.low %v13668_v61, %v13669_v34  ;;  %v15478_v46 = vrot.slane %v15470_v0, %v18669_v35  ;;  %v10913_v28 = vrot.slane %v10897_v56, %v18671_v2 }
 0x463   : > { %v13673_v17 = vadd.f32 %v18699_v39, %v13262_v43  ;;  %v15495_v31 = vrot.slane %v15487_v45, %v18669_v35  ;;  %v10920_v62 = vrot.slane %v10898_v22, %v18671_v2  ;;  %v10927_v36 = vrot.slane %v10899_v12, %v18671_v2  ;;  %v3351_v45 = vpop.f32.mrf.mxu1  ;;  %v3187_v22 = vpop.f32.mrf.mxu0 }
 0x464   : > { %v15485_v7 = vrot.slane %v15471_v6, %v18669_v35  ;;  %v10928_v16 = vcombine.high %v10906_v15, %v10906_v15  ;;  %v10929_v32 = vcombine.high %v10913_v28, %v10913_v28  ;;  %v12250_v33 = vrot.slane %v10906_v15, %v18686_v19 }
 0x465   : > { %v15488_v29 = vcombine.low %v13672_v26, %v13673_v17  ;;  %v10930_v51 = vcombine.high %v10920_v62, %v10920_v62  ;;  %v10931_v56 = vcombine.high %v10927_v36, %v10927_v36  ;;  %v12254_v57 = vrot.slane %v10920_v62, %v18686_v19 }
 0x466   : > { %v15486_v53 = vcombine.low %v15478_v46, %v15485_v7  ;;  %v12258_v14 = vrot.slane %v10928_v16, %v18686_v19  ;;  %v12266_v52 = vrot.slane %v10913_v28, %v18686_v19  ;;  %v12270_v5 = vrot.slane %v10927_v36, %v18686_v19 }
 0x467   : > { %v15502_v55 = vrot.slane %v15488_v29, %v18669_v35  ;;  %v12262_v44 = vrot.slane %v10930_v51, %v18686_v19  ;;  %v12274_v10 = vrot.slane %v10929_v32, %v18686_v19  ;;  %v12278_v50 = vrot.slane %v10931_v56, %v18686_v19 }
 0x468   : > { %16814 = vst.msk [vmem:[%s19560_s18 + $0x1e0] sm:$0xff] %vm651_vm7, %v15486_v53  ;;  %v13239_v4 = vsel %vm519_vm4, %v24895_v21, %v12250_v33  ;;  %v13240_v23 = vsel %vm519_vm4, %v24896_v20, %v12254_v57  ;;  %v24897_v58 = vcombine.high %v24895_v21, %v24895_v21  ;;  %v13243_v40 = vsel %vm519_vm4, %v24898_v13, %v12266_v52 }
 0x469   : > { %v15503_v11 = vcombine.low %v15495_v31, %v15502_v55  ;;  %v24899_v54 = vcombine.high %v24896_v20, %v24896_v20  ;;  %v13244_v61 = vsel %vm519_vm4, %v24900_v60, %v12270_v5  ;;  %v24901_v42 = vcombine.high %v24898_v13, %v24898_v13 }
 0x46a   : > { %v13241_v37 = vsel %vm519_vm4, %v24897_v58, %v12258_v14  ;;  %v24902_v48 = vcombine.high %v24900_v60, %v24900_v60  ;;  %v13634_v34 = vadd.f32 %v18680_v3, %v13239_v4  ;;  %v13635_v26 = vadd.f32 %v18695_v18, %v13240_v23 }
 0x46b   : > { %16815 = vst.msk [vmem:[%s19560_s18 + $0x1e8] sm:$0xff] %vm651_vm7, %v15503_v11  ;;  %v13242_v63 = vsel %vm519_vm4, %v24899_v54, %v12262_v44  ;;  %v13245_v25 = vsel %vm519_vm4, %v24901_v42, %v12274_v10  ;;  %v13636_v0 = vadd.f32 %v18683_v47, %v13241_v37  ;;  %v13638_v12 = vadd.f32 %v18680_v3, %v13243_v40 }
 0x46c   : > { %v13246_v43 = vsel %vm519_vm4, %v24902_v48, %v12278_v50  ;;  %v13637_v17 = vadd.f32 %v18699_v39, %v13242_v63  ;;  %v13639_v6 = vadd.f32 %v18695_v18, %v13244_v61  ;;  %v13640_v46 = vadd.f32 %v18683_v47, %v13245_v25  ;;  %v24903_v61 = vld [vmem:[#allocation30_spill] sm:$0xff] }
 0x46d   : > { %v13641_v15 = vadd.f32 %v18699_v39, %v13246_v43  ;;  %v15334_v28 = vcombine.low %v13634_v34, %v13635_v26  ;;  %v3347_v31 = vadd.f32 %v22906_v41, %v22908_v24  ;;  %v3339_v62 = vadd.f32 %v3338_v59, %v3174_v30 }
 0x46e   : > { %v15335_v29 = vcombine.low %v13636_v0, %v13637_v17  ;;  %v15351_v36 = vcombine.low %v13638_v12, %v13639_v6  ;;  %v22978_v16 = vadd.f32 %v17700_v1, %v17666_v49  ;;  %v22980_v32 = vadd.f32 %v3351_v45, %v3187_v22  ;;  %v24904_v0 = vld [vmem:[#allocation31_spill] sm:$0xff]  ;;  %v24906_v12 = vld [vmem:[#allocation33_spill] sm:$0xff] }
 0x46f   : > { %v15352_v7 = vcombine.low %v13640_v46, %v13641_v15  ;;  %v15342_v33 = vrot.slane %v15334_v28, %v18669_v35  ;;  %v11030_v51 = vcombine.high %v3347_v31, %v3347_v31  ;;  %v11037_v56 = vrot.slane %v3347_v31, %v18671_v2  ;;  %v24908_v31 = vld [vmem:[#allocation32_spill] sm:$0xff] }
 0x470   : > { %v15349_v55 = vrot.slane %v15335_v29, %v18669_v35  ;;  %v15359_v57 = vrot.slane %v15351_v36, %v18669_v35  ;;  %v10932_v41 = vcombine.high %v3339_v62, %v3339_v62  ;;  %v10939_v24 = vrot.slane %v3339_v62, %v18671_v2 }
 0x471   : > { %v15366_v53 = vrot.slane %v15352_v7, %v18669_v35  ;;  %v11044_v30 = vrot.slane %v11030_v51, %v18671_v2  ;;  %v11045_v14 = vcombine.high %v11037_v56, %v11037_v56  ;;  %v11053_v52 = vrot.slane %v11037_v56, %v18671_v2 }
 0x472   : > { %v15350_v59 = vcombine.low %v15342_v33, %v15349_v55  ;;  %v10946_v1 = vrot.slane %v10932_v41, %v18671_v2  ;;  %v10947_v49 = vcombine.high %v10939_v24, %v10939_v24  ;;  %v10955_v11 = vrot.slane %v10939_v24, %v18671_v2 }
 0x473   : > { %v15367_v5 = vcombine.low %v15359_v57, %v15366_v53  ;;  %v11046_v44 = vcombine.high %v11044_v30, %v11044_v30  ;;  %v11060_v10 = vrot.slane %v11044_v30, %v18671_v2  ;;  %v11067_v50 = vrot.slane %v11045_v14, %v18671_v2 }
 0x474   : > { %16806 = vst.msk [vmem:[%s19560_s18 + $0x1a0] sm:$0xff] %vm651_vm7, %v15350_v59  ;;  %v11075_v21 = vcombine.high %v11053_v52, %v11053_v52  ;;  %v12346_v4 = vrot.slane %v11053_v52, %v18686_v19  ;;  %v10948_v20 = vcombine.high %v10946_v1, %v10946_v1  ;;  %v10962_v23 = vrot.slane %v10946_v1, %v18671_v2 }
 0x475   : > { %16807 = vst.msk [vmem:[%s19560_s18 + $0x1a8] sm:$0xff] %vm651_vm7, %v15367_v5  ;;  %v10969_v58 = vrot.slane %v10947_v49, %v18671_v2  ;;  %v11074_v37 = vrot.slane %v11046_v44, %v18671_v2  ;;  %v11076_v13 = vcombine.high %v11060_v10, %v11060_v10  ;;  %v11077_v40 = vcombine.high %v11067_v50, %v11067_v50 }
 0x476   : > { %v12350_v54 = vrot.slane %v11067_v50, %v18686_v19  ;;  %v12354_v63 = vrot.slane %v11075_v21, %v18686_v19  ;;  %v12362_v60 = vrot.slane %v11060_v10, %v18686_v19  ;;  %v13263_v42 = vsel %vm519_vm4, %v24903_v61, %v12346_v4 }
 0x477   : > { %v10976_v25 = vrot.slane %v10948_v20, %v18671_v2  ;;  %v11078_v48 = vcombine.high %v11074_v37, %v11074_v37  ;;  %v12358_v43 = vrot.slane %v11077_v40, %v18686_v19  ;;  %v12366_v34 = vrot.slane %v11074_v37, %v18686_v19 }
 0x478   : > { %v12370_v26 = vrot.slane %v11076_v13, %v18686_v19  ;;  %v13264_v17 = vsel %vm519_vm4, %v24904_v0, %v12350_v54  ;;  %v24905_v45 = vcombine.high %v24903_v61, %v24903_v61  ;;  %v13267_v6 = vsel %vm519_vm4, %v24906_v12, %v12362_v60 }
 0x479   : > { %v13674_v46 = vadd.f32 %v18680_v3, %v13263_v42  ;;  %v12374_v15 = vrot.slane %v11078_v48, %v18686_v19  ;;  %v24907_v28 = vcombine.high %v24904_v0, %v24904_v0  ;;  %v13268_v62 = vsel %vm519_vm4, %v24908_v31, %v12366_v34  ;;  %v24911_v48 = vld [vmem:[#allocation34_spill] sm:$0xff] }
 0x47a   : > { %v13265_v22 = vsel %vm519_vm4, %v24905_v45, %v12354_v63  ;;  %v24909_v36 = vcombine.high %v24906_v12, %v24906_v12  ;;  %v13675_v33 = vadd.f32 %v18695_v18, %v13264_v17  ;;  %v13678_v56 = vadd.f32 %v18680_v3, %v13267_v6  ;;  %v24915_v45 = vld [vmem:[#allocation35_spill] sm:$0xff]  ;;  %v24916_v12 = vld [vmem:[#allocation38_spill] sm:$0xff] }
 0x47b   : > { %v13266_v29 = vsel %vm519_vm4, %v24907_v28, %v12358_v43  ;;  %v13676_v55 = vadd.f32 %v18683_v47, %v13265_v22  ;;  %v24910_v57 = vcombine.high %v24908_v31, %v24908_v31  ;;  %v13679_v41 = vadd.f32 %v18695_v18, %v13268_v62  ;;  %v24912_v43 = vld [vmem:[#allocation36_spill] sm:$0xff] }
 0x47c   : > { %v13269_v7 = vsel %vm519_vm4, %v24909_v36, %v12370_v26  ;;  %v13677_v51 = vadd.f32 %v18699_v39, %v13266_v29  ;;  %v10977_v59 = vcombine.high %v10955_v11, %v10955_v11  ;;  %v15504_v14 = vcombine.low %v13674_v46, %v13675_v33 }
 0x47d   : > { %v13270_v53 = vsel %vm519_vm4, %v24910_v57, %v12374_v15  ;;  %v13680_v24 = vadd.f32 %v18683_v47, %v13269_v7  ;;  %v10978_v5 = vcombine.high %v10962_v23, %v10962_v23  ;;  %v15521_v1 = vcombine.low %v13678_v56, %v13679_v41 }
 0x47e   : > { %v13681_v30 = vadd.f32 %v18699_v39, %v13270_v53  ;;  %v15505_v52 = vcombine.low %v13676_v55, %v13677_v51  ;;  %v10979_v49 = vcombine.high %v10969_v58, %v10969_v58  ;;  %v10980_v44 = vcombine.high %v10976_v25, %v10976_v25 }
 0x47f   : > { %v12282_v10 = vrot.slane %v10955_v11, %v18686_v19  ;;  %v15512_v50 = vrot.slane %v15504_v14, %v18669_v35  ;;  %v12286_v20 = vrot.slane %v10969_v58, %v18686_v19  ;;  %v15529_v37 = vrot.slane %v15521_v1, %v18669_v35 }
 0x480   : > { %v15519_v21 = vrot.slane %v15505_v52, %v18669_v35  ;;  %v15522_v4 = vcombine.low %v13680_v24, %v13681_v30  ;;  %v12290_v13 = vrot.slane %v10977_v59, %v18686_v19  ;;  %v12294_v40 = vrot.slane %v10979_v49, %v18686_v19 }
 0x481   : > { %v12298_v54 = vrot.slane %v10962_v23, %v18686_v19  ;;  %v12302_v11 = vrot.slane %v10976_v25, %v18686_v19  ;;  %v12306_v61 = vrot.slane %v10978_v5, %v18686_v19  ;;  %v12310_v42 = vrot.slane %v10980_v44, %v18686_v19 }
 0x482   : > { %v15520_v63 = vcombine.low %v15512_v50, %v15519_v21  ;;  %v15536_v60 = vrot.slane %v15522_v4, %v18669_v35  ;;  %v13247_v58 = vsel %vm519_vm4, %v24911_v48, %v12282_v10  ;;  %v13248_v34 = vsel %vm519_vm4, %v24912_v43, %v12286_v20 }
 0x483   : > { %v24913_v26 = vcombine.high %v24911_v48, %v24911_v48  ;;  %v24914_v25 = vcombine.high %v24912_v43, %v24912_v43  ;;  %v13251_v22 = vsel %vm519_vm4, %v24915_v45, %v12298_v54  ;;  %v13252_v6 = vsel %vm519_vm4, %v24916_v12, %v12302_v11 }
 0x484   : > { %v15537_v0 = vcombine.low %v15529_v37, %v15536_v60  ;;  %16816 = vst.msk [vmem:[%s19560_s18 + $0x1f0] sm:$0xff] %vm651_vm7, %v15520_v63  ;;  %v24917_v46 = vcombine.high %v24915_v45, %v24915_v45  ;;  %v24918_v28 = vcombine.high %v24916_v12, %v24916_v12  ;;  %v13642_v31 = vadd.f32 %v18680_v3, %v13247_v58  ;;  %v24919_v58 = vld [vmem:[#allocation41_spill] sm:$0xff]  ;;  %v24921_v45 = vld [vmem:[#allocation39_spill] sm:$0xff] }
 0x485   : > { %v13249_v23 = vsel %vm519_vm4, %v24913_v26, %v12290_v13  ;;  %v13250_v17 = vsel %vm519_vm4, %v24914_v25, %v12294_v40  ;;  %v13643_v62 = vadd.f32 %v18695_v18, %v13248_v34  ;;  %v13646_v33 = vadd.f32 %v18680_v3, %v13251_v22 }
 0x486   : > { %v13253_v15 = vsel %vm519_vm4, %v24917_v46, %v12306_v61  ;;  %v13254_v29 = vsel %vm519_vm4, %v24918_v28, %v12310_v42  ;;  %16817 = vst.msk [vmem:[%s19560_s18 + $0x1f8] sm:$0xff] %vm651_vm7, %v15537_v0  ;;  %v13644_v36 = vadd.f32 %v18683_v47, %v13249_v23  ;;  %v13645_v7 = vadd.f32 %v18699_v39, %v13250_v17  ;;  %v24920_v0 = vld [vmem:[#allocation37_spill] sm:$0xff]  ;;  %v24923_v28 = vld [vmem:[#allocation42_spill] sm:$0xff] }
 0x487   : > { %v13647_v55 = vadd.f32 %v18695_v18, %v13252_v6  ;;  %v13648_v51 = vadd.f32 %v18683_v47, %v13253_v15  ;;  %v13649_v56 = vadd.f32 %v18699_v39, %v13254_v29  ;;  %v15368_v57 = vcombine.low %v13642_v31, %v13643_v62 }
 0x488   : > { %v11177_v53 = vcombine.high %v22978_v16, %v22978_v16  ;;  %v15369_v41 = vcombine.low %v13644_v36, %v13645_v7  ;;  %v11184_v59 = vrot.slane %v22978_v16, %v18671_v2  ;;  %v11079_v30 = vcombine.high %v22980_v32, %v22980_v32  ;;  %v23138_v7 = vpop.f32.mrf.mxu1 }
 0x489   : > { %v15385_v24 = vcombine.low %v13646_v33, %v13647_v55  ;;  %v15376_v14 = vrot.slane %v15368_v57, %v18669_v35  ;;  %v15386_v52 = vcombine.low %v13648_v51, %v13649_v56  ;;  %v11086_v1 = vrot.slane %v22980_v32, %v18671_v2  ;;  %v23140_v33 = vpop.f32.mrf.mxu0 }
 0x48a   : > { %v11191_v5 = vrot.slane %v11177_v53, %v18671_v2  ;;  %v15383_v49 = vrot.slane %v15369_v41, %v18669_v35  ;;  %v11192_v10 = vcombine.high %v11184_v59, %v11184_v59  ;;  %v11200_v50 = vrot.slane %v11184_v59, %v18671_v2 }
 0x48b   : > { %v15393_v44 = vrot.slane %v15385_v24, %v18669_v35  ;;  %v15400_v16 = vrot.slane %v15386_v52, %v18669_v35  ;;  %v11093_v20 = vrot.slane %v11079_v30, %v18671_v2  ;;  %v24922_v12 = vcombine.high %v24919_v58, %v24919_v58 }
 0x48c   : > { %v11193_v21 = vcombine.high %v11191_v5, %v11191_v5  ;;  %v11207_v4 = vrot.slane %v11191_v5, %v18671_v2  ;;  %v15384_v37 = vcombine.low %v15376_v14, %v15383_v49  ;;  %v11214_v13 = vrot.slane %v11192_v10, %v18671_v2 }
 0x48d   : > { %v11222_v32 = vcombine.high %v11200_v50, %v11200_v50  ;;  %v12442_v40 = vrot.slane %v11200_v50, %v18686_v19  ;;  %v15401_v54 = vcombine.low %v15393_v44, %v15400_v16  ;;  %v24924_v31 = vcombine.high %v24920_v0, %v24920_v0 }
 0x48e   : > { %v11221_v63 = vrot.slane %v11193_v21, %v18671_v2  ;;  %v11223_v60 = vcombine.high %v11207_v4, %v11207_v4  ;;  %v12458_v11 = vrot.slane %v11207_v4, %v18686_v19  ;;  %16808 = vst.msk [vmem:[%s19560_s18 + $0x1b0] sm:$0xff] %vm651_vm7, %v15384_v37  ;;  %v11224_v61 = vcombine.high %v11214_v13, %v11214_v13  ;;  %v3354_v4 = vpop.f32.mrf.mxu1  ;;  %v3190_v37 = vpop.f32.mrf.mxu0 }
 0x48f   : > { %v12446_v42 = vrot.slane %v11214_v13, %v18686_v19  ;;  %v12450_v48 = vrot.slane %v11222_v32, %v18686_v19  ;;  %v13287_v43 = vsel %vm519_vm4, %v24919_v58, %v12442_v40  ;;  %16809 = vst.msk [vmem:[%s19560_s18 + $0x1b8] sm:$0xff] %vm651_vm7, %v15401_v54  ;;  %v24925_v55 = vcombine.high %v24921_v45, %v24921_v45 }
 0x490   : > { %v11225_v34 = vcombine.high %v11221_v63, %v11221_v63  ;;  %v12462_v26 = vrot.slane %v11221_v63, %v18686_v19  ;;  %v12466_v23 = vrot.slane %v11223_v60, %v18686_v19  ;;  %v13291_v25 = vsel %vm519_vm4, %v24920_v0, %v12458_v11  ;;  %v17670_v0 = vpop.f32.mrf.mxu0 }
 0x491   : > { %v12454_v17 = vrot.slane %v11224_v61, %v18686_v19  ;;  %v13288_v22 = vsel %vm519_vm4, %v24921_v45, %v12446_v42  ;;  %v13289_v6 = vsel %vm519_vm4, %v24922_v12, %v12450_v48  ;;  %v13730_v46 = vadd.f32 %v18680_v3, %v13287_v43  ;;  %v24927_v12 = vld [vmem:[#allocation40_spill] sm:$0xff] }
 0x492   : > { %v12470_v15 = vrot.slane %v11225_v34, %v18686_v19  ;;  %v13292_v29 = vsel %vm519_vm4, %v24923_v28, %v12462_v26  ;;  %v13293_v62 = vsel %vm519_vm4, %v24924_v31, %v12466_v23  ;;  %v13731_v36 = vadd.f32 %v18695_v18, %v13288_v22  ;;  %v17704_v23 = vpop.f32.mrf.mxu1  ;;  %v24930_v31 = vld [vmem:[#allocation43_spill] sm:$0xff] }
 0x493   : > { %v13290_v51 = vsel %vm519_vm4, %v24925_v55, %v12454_v17  ;;  %v13732_v56 = vadd.f32 %v18683_v47, %v13289_v6  ;;  %v13734_v57 = vadd.f32 %v18680_v3, %v13291_v25  ;;  %v13735_v53 = vadd.f32 %v18695_v18, %v13292_v29 }
 0x494   : > { %v24926_v41 = vcombine.high %v24923_v28, %v24923_v28  ;;  %v13733_v59 = vadd.f32 %v18699_v39, %v13290_v51  ;;  %v13736_v30 = vadd.f32 %v18683_v47, %v13293_v62  ;;  %v15742_v14 = vcombine.low %v13730_v46, %v13731_v36  ;;  %v24928_v46 = vld [vmem:[#allocation45_spill] sm:$0xff]  ;;  %v24932_v51 = vld [vmem:[#allocation44_spill] sm:$0xff] }
 0x495   : > { %v15759_v5 = vcombine.low %v13734_v57, %v13735_v53  ;;  %v11094_v49 = vcombine.high %v11086_v1, %v11086_v1  ;;  %v11095_v44 = vcombine.high %v11093_v20, %v11093_v20  ;;  %v11102_v16 = vrot.slane %v11086_v1, %v18671_v2 }
 0x496   : > { %v13294_v24 = vsel %vm519_vm4, %v24926_v41, %v12470_v15  ;;  %v15743_v10 = vcombine.low %v13732_v56, %v13733_v59  ;;  %v15750_v50 = vrot.slane %v15742_v14, %v18669_v35  ;;  %v11109_v21 = vrot.slane %v11093_v20, %v18671_v2 }
 0x497   : > { %v13737_v52 = vadd.f32 %v18699_v39, %v13294_v24  ;;  %v15767_v32 = vrot.slane %v15759_v5, %v18669_v35  ;;  %v11116_v40 = vrot.slane %v11094_v49, %v18671_v2  ;;  %v11123_v54 = vrot.slane %v11095_v44, %v18671_v2  ;;  %v3367_v5 = vpop.f32.mrf.mxu1  ;;  %v3203_v49 = vpop.f32.mrf.mxu0 }
 0x498   : > { %v15757_v63 = vrot.slane %v15743_v10, %v18669_v35  ;;  %v11124_v60 = vcombine.high %v11102_v16, %v11102_v16  ;;  %v11125_v11 = vcombine.high %v11109_v21, %v11109_v21  ;;  %v12378_v61 = vrot.slane %v11102_v16, %v18686_v19 }
 0x499   : > { %v15760_v13 = vcombine.low %v13736_v30, %v13737_v52  ;;  %v11126_v42 = vcombine.high %v11116_v40, %v11116_v40  ;;  %v11127_v20 = vcombine.high %v11123_v54, %v11123_v54  ;;  %v12382_v48 = vrot.slane %v11116_v40, %v18686_v19 }
 0x49a   : > { %v15758_v58 = vcombine.low %v15750_v50, %v15757_v63  ;;  %v12386_v43 = vrot.slane %v11124_v60, %v18686_v19  ;;  %v12394_v34 = vrot.slane %v11109_v21, %v18686_v19  ;;  %v12398_v26 = vrot.slane %v11123_v54, %v18686_v19 }
 0x49b   : > { %v15774_v1 = vrot.slane %v15760_v13, %v18669_v35  ;;  %v12390_v17 = vrot.slane %v11126_v42, %v18686_v19  ;;  %v12402_v45 = vrot.slane %v11125_v11, %v18686_v19  ;;  %v12406_v22 = vrot.slane %v11127_v20, %v18686_v19 }
 0x49c   : > { %16830 = vst.msk [vmem:[%s19560_s18 + $0x260] sm:$0xff] %vm651_vm7, %v15758_v58  ;;  %v13271_v6 = vsel %vm519_vm4, %v24927_v12, %v12378_v61  ;;  %v13272_v15 = vsel %vm519_vm4, %v24928_v46, %v12382_v48  ;;  %v24929_v28 = vcombine.high %v24927_v12, %v24927_v12  ;;  %v13275_v62 = vsel %vm519_vm4, %v24930_v31, %v12394_v34 }
 0x49d   : > { %v15775_v25 = vcombine.low %v15767_v32, %v15774_v1  ;;  %v24931_v36 = vcombine.high %v24928_v46, %v24928_v46  ;;  %v13276_v56 = vsel %vm519_vm4, %v24932_v51, %v12398_v26  ;;  %v24933_v57 = vcombine.high %v24930_v31, %v24930_v31 }
 0x49e   : > { %v13273_v29 = vsel %vm519_vm4, %v24929_v28, %v12386_v43  ;;  %v24934_v41 = vcombine.high %v24932_v51, %v24932_v51  ;;  %v13698_v59 = vadd.f32 %v18680_v3, %v13271_v6  ;;  %v13699_v30 = vadd.f32 %v18695_v18, %v13272_v15 }
 0x49f   : > { %16831 = vst.msk [vmem:[%s19560_s18 + $0x268] sm:$0xff] %vm651_vm7, %v15775_v25  ;;  %v13274_v55 = vsel %vm519_vm4, %v24931_v36, %v12390_v17  ;;  %v13277_v53 = vsel %vm519_vm4, %v24933_v57, %v12402_v45  ;;  %v13700_v14 = vadd.f32 %v18683_v47, %v13273_v29  ;;  %v13702_v44 = vadd.f32 %v18680_v3, %v13275_v62 }
 0x4a0   : > { %v13278_v24 = vsel %vm519_vm4, %v24934_v41, %v12406_v22  ;;  %v13701_v52 = vadd.f32 %v18699_v39, %v13274_v55  ;;  %v13703_v10 = vadd.f32 %v18695_v18, %v13276_v56  ;;  %v13704_v50 = vadd.f32 %v18683_v47, %v13277_v53 }
 0x4a1   : > { %v13705_v16 = vadd.f32 %v18699_v39, %v13278_v24  ;;  %v15606_v21 = vcombine.low %v13698_v59, %v13699_v30  ;;  %v3363_v32 = vadd.f32 %v23138_v7, %v23140_v33  ;;  %v3355_v40 = vadd.f32 %v3354_v4, %v3190_v37  ;;  %v24935_v30 = vld [vmem:[#allocation49_spill] sm:$0xff] }
 0x4a2   : > { %v15607_v13 = vcombine.low %v13700_v14, %v13701_v52  ;;  %v15623_v54 = vcombine.low %v13702_v44, %v13703_v10  ;;  %v23210_v60 = vadd.f32 %v17704_v23, %v17670_v0  ;;  %v23212_v11 = vadd.f32 %v3367_v5, %v3203_v49  ;;  %v24937_v49 = vld [vmem:[#allocation47_spill] sm:$0xff] }
 0x4a3   : > { %v15624_v63 = vcombine.low %v13704_v50, %v13705_v16  ;;  %v15614_v61 = vrot.slane %v15606_v21, %v18669_v35  ;;  %v11226_v42 = vcombine.high %v3363_v32, %v3363_v32  ;;  %v11233_v20 = vrot.slane %v3363_v32, %v18671_v2 }
 0x4a4   : > { %v15621_v1 = vrot.slane %v15607_v13, %v18669_v35  ;;  %v15631_v48 = vrot.slane %v15623_v54, %v18669_v35  ;;  %v11128_v7 = vcombine.high %v3355_v40, %v3355_v40  ;;  %v11135_v33 = vrot.slane %v3355_v40, %v18671_v2  ;;  %v24939_v13 = vld [vmem:[#allocation51_spill] sm:$0xff] }
 0x4a5   : > { %v15638_v58 = vrot.slane %v15624_v63, %v18669_v35  ;;  %v11240_v37 = vrot.slane %v11226_v42, %v18671_v2  ;;  %v11241_v43 = vcombine.high %v11233_v20, %v11233_v20  ;;  %v11249_v34 = vrot.slane %v11233_v20, %v18671_v2 }
 0x4a6   : > { %v15622_v4 = vcombine.low %v15614_v61, %v15621_v1  ;;  %v11142_v23 = vrot.slane %v11128_v7, %v18671_v2  ;;  %v11143_v0 = vcombine.high %v11135_v33, %v11135_v33  ;;  %v11151_v25 = vrot.slane %v11135_v33, %v18671_v2 }
 0x4a7   : > { %v15639_v26 = vcombine.low %v15631_v48, %v15638_v58  ;;  %v11242_v17 = vcombine.high %v11240_v37, %v11240_v37  ;;  %v11256_v45 = vrot.slane %v11240_v37, %v18671_v2  ;;  %v11263_v22 = vrot.slane %v11241_v43, %v18671_v2 }
 0x4a8   : > { %16822 = vst.msk [vmem:[%s19560_s18 + $0x220] sm:$0xff] %vm651_vm7, %v15622_v4  ;;  %v11271_v12 = vcombine.high %v11249_v34, %v11249_v34  ;;  %v12474_v6 = vrot.slane %v11249_v34, %v18686_v19  ;;  %v11144_v46 = vcombine.high %v11142_v23, %v11142_v23  ;;  %v11158_v15 = vrot.slane %v11142_v23, %v18671_v2 }
 0x4a9   : > { %16823 = vst.msk [vmem:[%s19560_s18 + $0x228] sm:$0xff] %vm651_vm7, %v15639_v26  ;;  %v11165_v28 = vrot.slane %v11143_v0, %v18671_v2  ;;  %v11270_v29 = vrot.slane %v11242_v17, %v18671_v2  ;;  %v11272_v31 = vcombine.high %v11256_v45, %v11256_v45  ;;  %v11273_v62 = vcombine.high %v11263_v22, %v11263_v22 }
 0x4aa   : > { %v12478_v36 = vrot.slane %v11263_v22, %v18686_v19  ;;  %v12482_v55 = vrot.slane %v11271_v12, %v18686_v19  ;;  %v12490_v51 = vrot.slane %v11256_v45, %v18686_v19  ;;  %v13295_v56 = vsel %vm519_vm4, %v21864_v8, %v12474_v6 }
 0x4ab   : > { %v11172_v57 = vrot.slane %v11144_v46, %v18671_v2  ;;  %v11274_v53 = vcombine.high %v11270_v29, %v11270_v29  ;;  %v12486_v41 = vrot.slane %v11273_v62, %v18686_v19  ;;  %v12494_v24 = vrot.slane %v11270_v29, %v18686_v19 }
 0x4ac   : > { %v12498_v59 = vrot.slane %v11272_v31, %v18686_v19  ;;  %v13296_v14 = vsel %vm519_vm4, %v24935_v30, %v12478_v36  ;;  %v24936_v52 = vcombine.high %v21864_v8, %v21864_v8  ;;  %v13299_v44 = vsel %vm519_vm4, %v24937_v49, %v12490_v51 }
 0x4ad   : > { %v13738_v10 = vadd.f32 %v18680_v3, %v13295_v56  ;;  %v12502_v50 = vrot.slane %v11274_v53, %v18686_v19  ;;  %v24938_v16 = vcombine.high %v24935_v30, %v24935_v30  ;;  %v13300_v32 = vsel %vm519_vm4, %v24939_v13, %v12494_v24  ;;  %v24942_v56 = vld [vmem:[#allocation46_spill] sm:$0xff] }
 0x4ae   : > { %v13297_v5 = vsel %vm519_vm4, %v24936_v52, %v12482_v55  ;;  %v24940_v8 = vcombine.high %v24937_v49, %v24937_v49  ;;  %v13739_v54 = vadd.f32 %v18695_v18, %v13296_v14  ;;  %v13742_v1 = vadd.f32 %v18680_v3, %v13299_v44  ;;  %v24943_v53 = vld [vmem:[#allocation50_spill] sm:$0xff]  ;;  %v24946_v14 = vld [vmem:[#allocation48_spill] sm:$0xff] }
 0x4af   : > { %v13298_v21 = vsel %vm519_vm4, %v24938_v16, %v12486_v41  ;;  %v13740_v63 = vadd.f32 %v18683_v47, %v13297_v5  ;;  %v24941_v42 = vcombine.high %v24939_v13, %v24939_v13  ;;  %v13743_v48 = vadd.f32 %v18695_v18, %v13300_v32  ;;  %v24947_v5 = vld [vmem:[#allocation52_spill] sm:$0xff] }
 0x4b0   : > { %v13301_v40 = vsel %vm519_vm4, %v24940_v8, %v12498_v59  ;;  %v13741_v61 = vadd.f32 %v18699_v39, %v13298_v21  ;;  %v11173_v7 = vcombine.high %v11151_v25, %v11151_v25  ;;  %v15776_v4 = vcombine.low %v13738_v10, %v13739_v54 }
 0x4b1   : > { %v13302_v20 = vsel %vm519_vm4, %v24941_v42, %v12502_v50  ;;  %v13744_v58 = vadd.f32 %v18683_v47, %v13301_v40  ;;  %v11174_v43 = vcombine.high %v11158_v15, %v11158_v15  ;;  %v15793_v34 = vcombine.low %v13742_v1, %v13743_v48 }
 0x4b2   : > { %v13745_v33 = vadd.f32 %v18699_v39, %v13302_v20  ;;  %v15777_v37 = vcombine.low %v13740_v63, %v13741_v61  ;;  %v11175_v26 = vcombine.high %v11165_v28, %v11165_v28  ;;  %v11176_v23 = vcombine.high %v11172_v57, %v11172_v57 }
 0x4b3   : > { %v12410_v0 = vrot.slane %v11151_v25, %v18686_v19  ;;  %v15784_v17 = vrot.slane %v15776_v4, %v18669_v35  ;;  %v12414_v12 = vrot.slane %v11165_v28, %v18686_v19  ;;  %v15801_v6 = vrot.slane %v15793_v34, %v18669_v35 }
 0x4b4   : > { %v15791_v45 = vrot.slane %v15777_v37, %v18669_v35  ;;  %v15794_v22 = vcombine.low %v13744_v58, %v13745_v33  ;;  %v12418_v46 = vrot.slane %v11173_v7, %v18686_v19  ;;  %v12422_v29 = vrot.slane %v11175_v26, %v18686_v19 }
 0x4b5   : > { %v12426_v31 = vrot.slane %v11158_v15, %v18686_v19  ;;  %v12430_v25 = vrot.slane %v11172_v57, %v18686_v19  ;;  %v12434_v55 = vrot.slane %v11174_v43, %v18686_v19  ;;  %v12438_v51 = vrot.slane %v11176_v23, %v18686_v19 }
 0x4b6   : > { %v15792_v62 = vcombine.low %v15784_v17, %v15791_v45  ;;  %v15808_v36 = vrot.slane %v15794_v22, %v18669_v35  ;;  %v13279_v28 = vsel %vm519_vm4, %v24942_v56, %v12410_v0  ;;  %v13280_v41 = vsel %vm519_vm4, %v24943_v53, %v12414_v12 }
 0x4b7   : > { %v24944_v24 = vcombine.high %v24942_v56, %v24942_v56  ;;  %v24945_v57 = vcombine.high %v24943_v53, %v24943_v53  ;;  %v13283_v52 = vsel %vm519_vm4, %v24946_v14, %v12426_v31  ;;  %v13284_v49 = vsel %vm519_vm4, %v24947_v5, %v12430_v25  ;;  %v24950_v56 = vld [vmem:[#allocation53_spill] sm:$0xff] }
 0x4b8   : > { %v15809_v59 = vcombine.low %v15801_v6, %v15808_v36  ;;  %16832 = vst.msk [vmem:[%s19560_s18 + $0x270] sm:$0xff] %vm651_vm7, %v15792_v62  ;;  %v24948_v44 = vcombine.high %v24946_v14, %v24946_v14  ;;  %v24949_v50 = vcombine.high %v24947_v5, %v24947_v5  ;;  %v13706_v21 = vadd.f32 %v18680_v3, %v13279_v28 }
 0x4b9   : > { %v13281_v15 = vsel %vm519_vm4, %v24944_v24, %v12418_v46  ;;  %v13282_v30 = vsel %vm519_vm4, %v24945_v57, %v12422_v29  ;;  %v13707_v13 = vadd.f32 %v18695_v18, %v13280_v41  ;;  %v13710_v40 = vadd.f32 %v18680_v3, %v13283_v52 }
 0x4ba   : > { %v13285_v10 = vsel %vm519_vm4, %v24948_v44, %v12434_v55  ;;  %v13286_v16 = vsel %vm519_vm4, %v24949_v50, %v12438_v51  ;;  %16833 = vst.msk [vmem:[%s19560_s18 + $0x278] sm:$0xff] %vm651_vm7, %v15809_v59  ;;  %v13708_v32 = vadd.f32 %v18683_v47, %v13281_v15  ;;  %v13709_v8 = vadd.f32 %v18699_v39, %v13282_v30  ;;  %v24951_v15 = vld [vmem:[#allocation55_spill] sm:$0xff]  ;;  %v24952_v30 = vld [vmem:[#allocation54_spill] sm:$0xff] }
 0x4bb   : > { %v13711_v54 = vadd.f32 %v18695_v18, %v13284_v49  ;;  %v13712_v63 = vadd.f32 %v18683_v47, %v13285_v10  ;;  %v13713_v61 = vadd.f32 %v18699_v39, %v13286_v16  ;;  %v15640_v1 = vcombine.low %v13706_v21, %v13707_v13  ;;  %v24954_v10 = vld [vmem:[#allocation57_spill] sm:$0xff] }
 0x4bc   : > { %v11373_v42 = vcombine.high %v23210_v60, %v23210_v60  ;;  %v15641_v20 = vcombine.low %v13708_v32, %v13709_v8  ;;  %v11380_v58 = vrot.slane %v23210_v60, %v18671_v2  ;;  %v11275_v7 = vcombine.high %v23212_v11, %v23212_v11  ;;  %v23370_v32 = vpop.f32.mrf.mxu1  ;;  %v23372_v8 = vpop.f32.mrf.mxu0 }
 0x4bd   : > { %v15657_v48 = vcombine.low %v13710_v40, %v13711_v54  ;;  %v15648_v33 = vrot.slane %v15640_v1, %v18669_v35  ;;  %v15658_v4 = vcombine.low %v13712_v63, %v13713_v61  ;;  %v11282_v43 = vrot.slane %v23212_v11, %v18671_v2 }
 0x4be   : > { %v11387_v37 = vrot.slane %v11373_v42, %v18671_v2  ;;  %v15655_v34 = vrot.slane %v15641_v20, %v18669_v35  ;;  %v11388_v23 = vcombine.high %v11380_v58, %v11380_v58  ;;  %v11396_v0 = vrot.slane %v11380_v58, %v18671_v2 }
 0x4bf   : > { %v15665_v26 = vrot.slane %v15657_v48, %v18669_v35  ;;  %v15672_v60 = vrot.slane %v15658_v4, %v18669_v35  ;;  %v11289_v22 = vrot.slane %v11275_v7, %v18671_v2  ;;  %v24953_v52 = vcombine.high %v24950_v56, %v24950_v56 }
 0x4c0   : > { %v11389_v17 = vcombine.high %v11387_v37, %v11387_v37  ;;  %v11403_v45 = vrot.slane %v11387_v37, %v18671_v2  ;;  %v15656_v12 = vcombine.low %v15648_v33, %v15655_v34  ;;  %v11410_v6 = vrot.slane %v11388_v23, %v18671_v2 }
 0x4c1   : > { %v11418_v11 = vcombine.high %v11396_v0, %v11396_v0  ;;  %v12570_v46 = vrot.slane %v11396_v0, %v18686_v19  ;;  %v15673_v29 = vcombine.low %v15665_v26, %v15672_v60  ;;  %v24955_v16 = vcombine.high %v24951_v15, %v24951_v15 }
 0x4c2   : > { %v11417_v31 = vrot.slane %v11389_v17, %v18671_v2  ;;  %v11419_v62 = vcombine.high %v11403_v45, %v11403_v45  ;;  %v12586_v36 = vrot.slane %v11403_v45, %v18686_v19  ;;  %16824 = vst.msk [vmem:[%s19560_s18 + $0x230] sm:$0xff] %vm651_vm7, %v15656_v12  ;;  %v11420_v25 = vcombine.high %v11410_v6, %v11410_v6  ;;  %v3370_v17 = vpop.f32.mrf.mxu1  ;;  %v3206_v45 = vpop.f32.mrf.mxu0 }
 0x4c3   : > { %v12574_v55 = vrot.slane %v11410_v6, %v18686_v19  ;;  %v12578_v51 = vrot.slane %v11418_v11, %v18686_v19  ;;  %v13319_v28 = vsel %vm519_vm4, %v24950_v56, %v12570_v46  ;;  %16825 = vst.msk [vmem:[%s19560_s18 + $0x238] sm:$0xff] %vm651_vm7, %v15673_v29  ;;  %v24956_v40 = vcombine.high %v24952_v30, %v24952_v30 }
 0x4c4   : > { %v11421_v53 = vcombine.high %v11417_v31, %v11417_v31  ;;  %v12590_v41 = vrot.slane %v11417_v31, %v18686_v19  ;;  %v12594_v24 = vrot.slane %v11419_v62, %v18686_v19  ;;  %v13323_v59 = vsel %vm519_vm4, %v24951_v15, %v12586_v36 }
 0x4c5   : > { %v12582_v57 = vrot.slane %v11420_v25, %v18686_v19  ;;  %v13320_v14 = vsel %vm519_vm4, %v24952_v30, %v12574_v55  ;;  %v13321_v5 = vsel %vm519_vm4, %v24953_v52, %v12578_v51  ;;  %v13794_v49 = vadd.f32 %v18680_v3, %v13319_v28 }
 0x4c6   : > { %v12598_v44 = vrot.slane %v11421_v53, %v18686_v19  ;;  %v13324_v50 = vsel %vm519_vm4, %v24954_v10, %v12590_v41  ;;  %v13325_v21 = vsel %vm519_vm4, %v24955_v16, %v12594_v24  ;;  %v13795_v13 = vadd.f32 %v18695_v18, %v13320_v14  ;;  %v17708_v41 = vpop.f32.mrf.mxu1  ;;  %v17674_v24 = vpop.f32.mrf.mxu0  ;;  %v24958_v14 = vld [vmem:[#allocation56_spill] sm:$0xff] }
 0x4c7   : > { %v13322_v54 = vsel %vm519_vm4, %v24956_v40, %v12582_v57  ;;  %v13796_v63 = vadd.f32 %v18683_v47, %v13321_v5  ;;  %v13798_v61 = vadd.f32 %v18680_v3, %v13323_v59  ;;  %v13799_v1 = vadd.f32 %v18695_v18, %v13324_v50  ;;  %v24959_v5 = vld [vmem:[#allocation58_spill] sm:$0xff]  ;;  %v24961_v50 = vld [vmem:[#allocation59_spill] sm:$0xff]  ;;  %v24963_v40 = vld [vmem:[#allocation60_spill] sm:$0xff] }
 0x4c8   : > { %v24957_v42 = vcombine.high %v24954_v10, %v24954_v10  ;;  %v13797_v48 = vadd.f32 %v18699_v39, %v13322_v54  ;;  %v13800_v58 = vadd.f32 %v18683_v47, %v13325_v21  ;;  %v16014_v7 = vcombine.low %v13794_v49, %v13795_v13 }
 0x4c9   : > { %v16031_v4 = vcombine.low %v13798_v61, %v13799_v1  ;;  %v11290_v37 = vcombine.high %v11282_v43, %v11282_v43  ;;  %v11291_v34 = vcombine.high %v11289_v22, %v11289_v22  ;;  %v11298_v0 = vrot.slane %v11282_v43, %v18671_v2 }
 0x4ca   : > { %v13326_v20 = vsel %vm519_vm4, %v24957_v42, %v12598_v44  ;;  %v16015_v26 = vcombine.low %v13796_v63, %v13797_v48  ;;  %v16022_v23 = vrot.slane %v16014_v7, %v18669_v35  ;;  %v11305_v60 = vrot.slane %v11289_v22, %v18671_v2 }
 0x4cb   : > { %v13801_v33 = vadd.f32 %v18699_v39, %v13326_v20  ;;  %v16039_v6 = vrot.slane %v16031_v4, %v18669_v35  ;;  %v11312_v11 = vrot.slane %v11290_v37, %v18671_v2  ;;  %v11319_v46 = vrot.slane %v11291_v34, %v18671_v2  ;;  %v3219_v4 = vpop.f32.mrf.mxu0 }
 0x4cc   : > { %v16029_v29 = vrot.slane %v16015_v26, %v18669_v35  ;;  %v11320_v31 = vcombine.high %v11298_v0, %v11298_v0  ;;  %v11321_v62 = vcombine.high %v11305_v60, %v11305_v60  ;;  %v12506_v36 = vrot.slane %v11298_v0, %v18686_v19 }
 0x4cd   : > { %v16032_v12 = vcombine.low %v13800_v58, %v13801_v33  ;;  %v11322_v25 = vcombine.high %v11312_v11, %v11312_v11  ;;  %v11323_v22 = vcombine.high %v11319_v46, %v11319_v46  ;;  %v12510_v55 = vrot.slane %v11312_v11, %v18686_v19  ;;  %v3383_v33 = vpop.f32.mrf.mxu1 }
 0x4ce   : > { %v16030_v51 = vcombine.low %v16022_v23, %v16029_v29  ;;  %v12514_v56 = vrot.slane %v11320_v31, %v18686_v19  ;;  %v12522_v28 = vrot.slane %v11305_v60, %v18686_v19  ;;  %v12526_v53 = vrot.slane %v11319_v46, %v18686_v19 }
 0x4cf   : > { %v16046_v43 = vrot.slane %v16032_v12, %v18669_v35  ;;  %v12518_v59 = vrot.slane %v11322_v25, %v18686_v19  ;;  %v12530_v57 = vrot.slane %v11321_v62, %v18686_v19  ;;  %v12534_v30 = vrot.slane %v11323_v22, %v18686_v19 }
 0x4d0   : > { %16846 = vst.msk [vmem:[%s19560_s18 + $0x2e0] sm:$0xff] %vm651_vm7, %v16030_v51  ;;  %v13303_v52 = vsel %vm519_vm4, %v24958_v14, %v12506_v36  ;;  %v13304_v49 = vsel %vm519_vm4, %v24959_v5, %v12510_v55  ;;  %v24960_v44 = vcombine.high %v24958_v14, %v24958_v14  ;;  %v13307_v16 = vsel %vm519_vm4, %v24961_v50, %v12522_v28 }
 0x4d1   : > { %v16047_v15 = vcombine.low %v16039_v6, %v16046_v43  ;;  %v24962_v21 = vcombine.high %v24959_v5, %v24959_v5  ;;  %v13308_v54 = vsel %vm519_vm4, %v24963_v40, %v12526_v53  ;;  %v24964_v63 = vcombine.high %v24961_v50, %v24961_v50 }
 0x4d2   : > { %v13305_v10 = vsel %vm519_vm4, %v24960_v44, %v12514_v56  ;;  %v24965_v1 = vcombine.high %v24963_v40, %v24963_v40  ;;  %v13762_v20 = vadd.f32 %v18680_v3, %v13303_v52  ;;  %v13763_v48 = vadd.f32 %v18695_v18, %v13304_v49  ;;  %v24966_v40 = vld [vmem:[#allocation61_spill] sm:$0xff] }
 0x4d3   : > { %16847 = vst.msk [vmem:[%s19560_s18 + $0x2e8] sm:$0xff] %vm651_vm7, %v16047_v15  ;;  %v13306_v13 = vsel %vm519_vm4, %v24962_v21, %v12518_v59  ;;  %v13309_v61 = vsel %vm519_vm4, %v24964_v63, %v12530_v57  ;;  %v13764_v58 = vadd.f32 %v18683_v47, %v13305_v10  ;;  %v13766_v37 = vadd.f32 %v18680_v3, %v13307_v16 }
 0x4d4   : > { %v13310_v42 = vsel %vm519_vm4, %v24965_v1, %v12534_v30  ;;  %v13765_v7 = vadd.f32 %v18699_v39, %v13306_v13  ;;  %v13767_v34 = vadd.f32 %v18695_v18, %v13308_v54  ;;  %v13768_v26 = vadd.f32 %v18683_v47, %v13309_v61 }
 0x4d5   : > { %v13769_v23 = vadd.f32 %v18699_v39, %v13310_v42  ;;  %v15878_v0 = vcombine.low %v13762_v20, %v13763_v48  ;;  %v3379_v12 = vadd.f32 %v23370_v32, %v23372_v8  ;;  %v3371_v6 = vadd.f32 %v3370_v17, %v3206_v45  ;;  %v24967_v48 = vld [vmem:[#allocation63_spill] sm:$0xff] }
 0x4d6   : > { %v15879_v60 = vcombine.low %v13764_v58, %v13765_v7  ;;  %v15895_v11 = vcombine.low %v13766_v37, %v13767_v34  ;;  %v23442_v29 = vadd.f32 %v17708_v41, %v17674_v24  ;;  %v23444_v31 = vadd.f32 %v3383_v33, %v3219_v4  ;;  %v24969_v4 = vld [vmem:[#allocation62_spill] sm:$0xff] }
 0x4d7   : > { %v15896_v46 = vcombine.low %v13768_v26, %v13769_v23  ;;  %v15886_v62 = vrot.slane %v15878_v0, %v18669_v35  ;;  %v11422_v43 = vcombine.high %v3379_v12, %v3379_v12  ;;  %v11429_v25 = vrot.slane %v3379_v12, %v18671_v2 }
 0x4d8   : > { %v15893_v36 = vrot.slane %v15879_v60, %v18669_v35  ;;  %v15903_v22 = vrot.slane %v15895_v11, %v18669_v35  ;;  %v11324_v32 = vcombine.high %v3371_v6, %v3371_v6  ;;  %v11331_v8 = vrot.slane %v3371_v6, %v18671_v2  ;;  %v24971_v60 = vld [vmem:[#allocation64_spill] sm:$0xff] }
 0x4d9   : > { %v15910_v55 = vrot.slane %v15896_v46, %v18669_v35  ;;  %v11436_v45 = vrot.slane %v11422_v43, %v18671_v2  ;;  %v11437_v51 = vcombine.high %v11429_v25, %v11429_v25  ;;  %v11445_v56 = vrot.slane %v11429_v25, %v18671_v2 }
 0x4da   : > { %v15894_v17 = vcombine.low %v15886_v62, %v15893_v36  ;;  %v11338_v53 = vrot.slane %v11324_v32, %v18671_v2  ;;  %v11339_v41 = vcombine.high %v11331_v8, %v11331_v8  ;;  %v11347_v24 = vrot.slane %v11331_v8, %v18671_v2 }
 0x4db   : > { %v15911_v28 = vcombine.low %v15903_v22, %v15910_v55  ;;  %v11438_v15 = vcombine.high %v11436_v45, %v11436_v45  ;;  %v11452_v59 = vrot.slane %v11436_v45, %v18671_v2  ;;  %v11459_v57 = vrot.slane %v11437_v51, %v18671_v2 }
 0x4dc   : > { %16838 = vst.msk [vmem:[%s19560_s18 + $0x2a0] sm:$0xff] %vm651_vm7, %v15894_v17  ;;  %v11467_v30 = vcombine.high %v11445_v56, %v11445_v56  ;;  %v12602_v14 = vrot.slane %v11445_v56, %v18686_v19  ;;  %v11340_v52 = vcombine.high %v11338_v53, %v11338_v53  ;;  %v11354_v5 = vrot.slane %v11338_v53, %v18671_v2 }
 0x4dd   : > { %16839 = vst.msk [vmem:[%s19560_s18 + $0x2a8] sm:$0xff] %vm651_vm7, %v15911_v28  ;;  %v11361_v49 = vrot.slane %v11339_v41, %v18671_v2  ;;  %v11466_v44 = vrot.slane %v11438_v15, %v18671_v2  ;;  %v11468_v10 = vcombine.high %v11452_v59, %v11452_v59  ;;  %v11469_v50 = vcombine.high %v11459_v57, %v11459_v57 }
 0x4de   : > { %v12606_v16 = vrot.slane %v11459_v57, %v18686_v19  ;;  %v12610_v21 = vrot.slane %v11467_v30, %v18686_v19  ;;  %v12618_v13 = vrot.slane %v11452_v59, %v18686_v19  ;;  %v13327_v54 = vsel %vm519_vm4, %v24966_v40, %v12602_v14 }
 0x4df   : > { %v11368_v63 = vrot.slane %v11340_v52, %v18671_v2  ;;  %v11470_v61 = vcombine.high %v11466_v44, %v11466_v44  ;;  %v12614_v1 = vrot.slane %v11469_v50, %v18686_v19  ;;  %v12622_v42 = vrot.slane %v11466_v44, %v18686_v19 }
 0x4e0   : > { %v12626_v20 = vrot.slane %v11468_v10, %v18686_v19  ;;  %v13328_v58 = vsel %vm519_vm4, %v24967_v48, %v12606_v16  ;;  %v24968_v7 = vcombine.high %v24966_v40, %v24966_v40  ;;  %v13331_v37 = vsel %vm519_vm4, %v24969_v4, %v12618_v13 }
 0x4e1   : > { %v13802_v34 = vadd.f32 %v18680_v3, %v13327_v54  ;;  %v12630_v26 = vrot.slane %v11470_v61, %v18686_v19  ;;  %v24970_v23 = vcombine.high %v24967_v48, %v24967_v48  ;;  %v13332_v12 = vsel %vm519_vm4, %v24971_v60, %v12622_v42  ;;  %v24974_v54 = vld [vmem:[#allocation65_spill] sm:$0xff]  ;;  %v24975_v61 = vld [vmem:[#allocation66_spill] sm:$0xff] }
 0x4e2   : > { %v13329_v33 = vsel %vm519_vm4, %v24968_v7, %v12610_v21  ;;  %v24972_v6 = vcombine.high %v24969_v4, %v24969_v4  ;;  %v13803_v46 = vadd.f32 %v18695_v18, %v13328_v58  ;;  %v13806_v43 = vadd.f32 %v18680_v3, %v13331_v37  ;;  %v24978_v58 = vld [vmem:[#allocation67_spill] sm:$0xff] }
 0x4e3   : > { %v13330_v0 = vsel %vm519_vm4, %v24970_v23, %v12614_v1  ;;  %v13804_v62 = vadd.f32 %v18683_v47, %v13329_v33  ;;  %v24973_v25 = vcombine.high %v24971_v60, %v24971_v60  ;;  %v13807_v55 = vadd.f32 %v18695_v18, %v13332_v12  ;;  %v24979_v33 = vld [vmem:[#allocation68_spill] sm:$0xff] }
 0x4e4   : > { %v13333_v11 = vsel %vm519_vm4, %v24972_v6, %v12626_v20  ;;  %v13805_v36 = vadd.f32 %v18699_v39, %v13330_v0  ;;  %v11369_v8 = vcombine.high %v11347_v24, %v11347_v24  ;;  %v16048_v45 = vcombine.low %v13802_v34, %v13803_v46 }
 0x4e5   : > { %v13334_v22 = vsel %vm519_vm4, %v24973_v25, %v12630_v26  ;;  %v13808_v32 = vadd.f32 %v18683_v47, %v13333_v11  ;;  %v11370_v56 = vcombine.high %v11354_v5, %v11354_v5  ;;  %v16065_v28 = vcombine.low %v13806_v43, %v13807_v55 }
 0x4e6   : > { %v13809_v17 = vadd.f32 %v18699_v39, %v13334_v22  ;;  %v16049_v51 = vcombine.low %v13804_v62, %v13805_v36  ;;  %v11371_v53 = vcombine.high %v11361_v49, %v11361_v49  ;;  %v11372_v41 = vcombine.high %v11368_v63, %v11368_v63 }
 0x4e7   : > { %v12538_v15 = vrot.slane %v11347_v24, %v18686_v19  ;;  %v16056_v59 = vrot.slane %v16048_v45, %v18669_v35  ;;  %v12542_v14 = vrot.slane %v11361_v49, %v18686_v19  ;;  %v16073_v52 = vrot.slane %v16065_v28, %v18669_v35 }
 0x4e8   : > { %v16063_v57 = vrot.slane %v16049_v51, %v18669_v35  ;;  %v16066_v30 = vcombine.low %v13808_v32, %v13809_v17  ;;  %v12546_v44 = vrot.slane %v11369_v8, %v18686_v19  ;;  %v12550_v10 = vrot.slane %v11371_v53, %v18686_v19 }
 0x4e9   : > { %v12554_v50 = vrot.slane %v11354_v5, %v18686_v19  ;;  %v12558_v24 = vrot.slane %v11368_v63, %v18686_v19  ;;  %v12562_v13 = vrot.slane %v11370_v56, %v18686_v19  ;;  %v12566_v40 = vrot.slane %v11372_v41, %v18686_v19 }
 0x4ea   : > { %v16064_v16 = vcombine.low %v16056_v59, %v16063_v57  ;;  %v16080_v21 = vrot.slane %v16066_v30, %v18669_v35  ;;  %v13311_v49 = vsel %vm519_vm4, %v24974_v54, %v12538_v15  ;;  %v13312_v1 = vsel %vm519_vm4, %v24975_v61, %v12542_v14 }
 0x4eb   : > { %v24976_v42 = vcombine.high %v24974_v54, %v24974_v54  ;;  %v24977_v63 = vcombine.high %v24975_v61, %v24975_v61  ;;  %v13315_v7 = vsel %vm519_vm4, %v24978_v58, %v12554_v50  ;;  %v13316_v4 = vsel %vm519_vm4, %v24979_v33, %v12558_v24  ;;  %v24982_v54 = vld [vmem:[#allocation69_spill] sm:$0xff] }
 0x4ec   : > { %v16081_v20 = vcombine.low %v16073_v52, %v16080_v21  ;;  %16848 = vst.msk [vmem:[%s19560_s18 + $0x2f0] sm:$0xff] %vm651_vm7, %v16064_v16  ;;  %v24980_v37 = vcombine.high %v24978_v58, %v24978_v58  ;;  %v24981_v26 = vcombine.high %v24979_v33, %v24979_v33  ;;  %v13770_v0 = vadd.f32 %v18680_v3, %v13311_v49 }
 0x4ed   : > { %v13313_v5 = vsel %vm519_vm4, %v24976_v42, %v12546_v44  ;;  %v13314_v48 = vsel %vm519_vm4, %v24977_v63, %v12550_v10  ;;  %v13771_v60 = vadd.f32 %v18695_v18, %v13312_v1  ;;  %v13774_v11 = vadd.f32 %v18680_v3, %v13315_v7 }
 0x4ee   : > { %v13317_v34 = vsel %vm519_vm4, %v24980_v37, %v12562_v13  ;;  %v13318_v23 = vsel %vm519_vm4, %v24981_v26, %v12566_v40  ;;  %16849 = vst.msk [vmem:[%s19560_s18 + $0x2f8] sm:$0xff] %vm651_vm7, %v16081_v20  ;;  %v13772_v12 = vadd.f32 %v18683_v47, %v13313_v5  ;;  %v13773_v6 = vadd.f32 %v18699_v39, %v13314_v48  ;;  %v24983_v5 = vld [vmem:[#allocation70_spill] sm:$0xff]  ;;  %v24985_v37 = vld [vmem:[#allocation71_spill] sm:$0xff] }
 0x4ef   : > { %v13775_v46 = vadd.f32 %v18695_v18, %v13316_v4  ;;  %v13776_v62 = vadd.f32 %v18683_v47, %v13317_v34  ;;  %v13777_v36 = vadd.f32 %v18699_v39, %v13318_v23  ;;  %v15912_v43 = vcombine.low %v13770_v0, %v13771_v60  ;;  %v23602_v60 = vpop.f32.mrf.mxu1 }
 0x4f0   : > { %v11569_v25 = vcombine.high %v23442_v29, %v23442_v29  ;;  %v15913_v22 = vcombine.low %v13772_v12, %v13773_v6  ;;  %v11576_v32 = vrot.slane %v23442_v29, %v18671_v2  ;;  %v11471_v8 = vcombine.high %v23444_v31, %v23444_v31  ;;  %v23604_v12 = vpop.f32.mrf.mxu0 }
 0x4f1   : > { %v15929_v55 = vcombine.low %v13774_v11, %v13775_v46  ;;  %v15920_v17 = vrot.slane %v15912_v43, %v18669_v35  ;;  %v15930_v45 = vcombine.low %v13776_v62, %v13777_v36  ;;  %v11478_v56 = vrot.slane %v23444_v31, %v18671_v2 }
 0x4f2   : > { %v11583_v51 = vrot.slane %v11569_v25, %v18671_v2  ;;  %v15927_v28 = vrot.slane %v15913_v22, %v18669_v35  ;;  %v11584_v41 = vcombine.high %v11576_v32, %v11576_v32  ;;  %v11592_v15 = vrot.slane %v11576_v32, %v18671_v2 }
 0x4f3   : > { %v15937_v53 = vrot.slane %v15929_v55, %v18669_v35  ;;  %v15944_v29 = vrot.slane %v15930_v45, %v18669_v35  ;;  %v11485_v30 = vrot.slane %v11471_v8, %v18671_v2  ;;  %v24984_v58 = vcombine.high %v24982_v54, %v24982_v54 }
 0x4f4   : > { %v11585_v59 = vcombine.high %v11583_v51, %v11583_v51  ;;  %v11599_v57 = vrot.slane %v11583_v51, %v18671_v2  ;;  %v15928_v14 = vcombine.low %v15920_v17, %v15927_v28  ;;  %v11606_v52 = vrot.slane %v11584_v41, %v18671_v2 }
 0x4f5   : > { %v11614_v31 = vcombine.high %v11592_v15, %v11592_v15  ;;  %v12698_v44 = vrot.slane %v11592_v15, %v18686_v19  ;;  %v15945_v10 = vcombine.low %v15937_v53, %v15944_v29  ;;  %v24986_v26 = vcombine.high %v24983_v5, %v24983_v5  ;;  %v3386_v15 = vpop.f32.mrf.mxu1  ;;  %v3222_v29 = vpop.f32.mrf.mxu0 }
 0x4f6   : > { %v11613_v50 = vrot.slane %v11585_v59, %v18671_v2  ;;  %v11615_v16 = vcombine.high %v11599_v57, %v11599_v57  ;;  %v12714_v21 = vrot.slane %v11599_v57, %v18686_v19  ;;  %16840 = vst.msk [vmem:[%s19560_s18 + $0x2b0] sm:$0xff] %vm651_vm7, %v15928_v14  ;;  %v11616_v24 = vcombine.high %v11606_v52, %v11606_v52 }
 0x4f7   : > { %v12702_v13 = vrot.slane %v11606_v52, %v18686_v19  ;;  %v12706_v40 = vrot.slane %v11614_v31, %v18686_v19  ;;  %v13351_v49 = vsel %vm519_vm4, %v24982_v54, %v12698_v44  ;;  %16841 = vst.msk [vmem:[%s19560_s18 + $0x2b8] sm:$0xff] %vm651_vm7, %v15945_v10  ;;  %v24987_v6 = vcombine.high %v22008_v9, %v22008_v9 }
 0x4f8   : > { %v11617_v61 = vcombine.high %v11613_v50, %v11613_v50  ;;  %v12718_v1 = vrot.slane %v11613_v50, %v18686_v19  ;;  %v12722_v42 = vrot.slane %v11615_v16, %v18686_v19  ;;  %v13355_v20 = vsel %vm519_vm4, %v24983_v5, %v12714_v21 }
 0x4f9   : > { %v12710_v63 = vrot.slane %v11616_v24, %v18686_v19  ;;  %v13352_v48 = vsel %vm519_vm4, %v22008_v9, %v12702_v13  ;;  %v13353_v7 = vsel %vm519_vm4, %v24984_v58, %v12706_v40  ;;  %v13858_v33 = vadd.f32 %v18680_v3, %v13351_v49  ;;  %v17712_v49 = vpop.f32.mrf.mxu1  ;;  %v24990_v58 = vld [vmem:[#allocation74_spill] sm:$0xff] }
 0x4fa   : > { %v12726_v4 = vrot.slane %v11617_v61, %v18686_v19  ;;  %v13356_v34 = vsel %vm519_vm4, %v24985_v37, %v12718_v1  ;;  %v13357_v23 = vsel %vm519_vm4, %v24986_v26, %v12722_v42  ;;  %v13859_v0 = vadd.f32 %v18695_v18, %v13352_v48  ;;  %v17678_v61 = vpop.f32.mrf.mxu0 }
 0x4fb   : > { %v13354_v11 = vsel %vm519_vm4, %v24987_v6, %v12710_v63  ;;  %v13860_v46 = vadd.f32 %v18683_v47, %v13353_v7  ;;  %v13862_v62 = vadd.f32 %v18680_v3, %v13355_v20  ;;  %v13863_v36 = vadd.f32 %v18695_v18, %v13356_v34  ;;  %v24989_v63 = vld [vmem:[#allocation72_spill] sm:$0xff] }
 0x4fc   : > { %v24988_v43 = vcombine.high %v24985_v37, %v24985_v37  ;;  %v13861_v22 = vadd.f32 %v18699_v39, %v13354_v11  ;;  %v13864_v55 = vadd.f32 %v18683_v47, %v13357_v23  ;;  %v16286_v32 = vcombine.low %v13858_v33, %v13859_v0  ;;  %v24992_v37 = vld [vmem:[#allocation73_spill] sm:$0xff] }
 0x4fd   : > { %v16303_v8 = vcombine.low %v13862_v62, %v13863_v36  ;;  %v11486_v17 = vcombine.high %v11478_v56, %v11478_v56  ;;  %v11487_v45 = vcombine.high %v11485_v30, %v11485_v30  ;;  %v11494_v53 = vrot.slane %v11478_v56, %v18671_v2  ;;  %v24994_v0 = vld [vmem:[#allocation77_spill] sm:$0xff] }
 0x4fe   : > { %v13358_v25 = vsel %vm519_vm4, %v24988_v43, %v12726_v4  ;;  %v16287_v51 = vcombine.low %v13860_v46, %v13861_v22  ;;  %v16294_v28 = vrot.slane %v16286_v32, %v18669_v35  ;;  %v11501_v41 = vrot.slane %v11485_v30, %v18671_v2  ;;  %v3399_v32 = vpop.f32.mrf.mxu1 }
 0x4ff   : > { %v13865_v9 = vadd.f32 %v18699_v39, %v13358_v25  ;;  %v16311_v57 = vrot.slane %v16303_v8, %v18669_v35  ;;  %v11508_v14 = vrot.slane %v11486_v17, %v18671_v2  ;;  %v11515_v52 = vrot.slane %v11487_v45, %v18671_v2 }
 0x500   : > { %v16301_v31 = vrot.slane %v16287_v51, %v18669_v35  ;;  %v11516_v44 = vcombine.high %v11494_v53, %v11494_v53  ;;  %v11517_v10 = vcombine.high %v11501_v41, %v11501_v41  ;;  %v12634_v50 = vrot.slane %v11494_v53, %v18686_v19 }
 0x501   : > { %v16304_v59 = vcombine.low %v13864_v55, %v13865_v9  ;;  %v11518_v16 = vcombine.high %v11508_v14, %v11508_v14  ;;  %v11519_v30 = vcombine.high %v11515_v52, %v11515_v52  ;;  %v12638_v21 = vrot.slane %v11508_v14, %v18686_v19  ;;  %v3235_v9 = vpop.f32.mrf.mxu0 }
 0x502   : > { %v16302_v24 = vcombine.low %v16294_v28, %v16301_v31  ;;  %v12642_v13 = vrot.slane %v11516_v44, %v18686_v19  ;;  %v12650_v40 = vrot.slane %v11501_v41, %v18686_v19  ;;  %v12654_v54 = vrot.slane %v11515_v52, %v18686_v19 }
 0x503   : > { %v16318_v56 = vrot.slane %v16304_v59, %v18669_v35  ;;  %v12646_v42 = vrot.slane %v11518_v16, %v18686_v19  ;;  %v12658_v5 = vrot.slane %v11517_v10, %v18686_v19  ;;  %v12662_v20 = vrot.slane %v11519_v30, %v18686_v19 }
 0x504   : > { %16862 = vst.msk [vmem:[%s19560_s18 + $0x360] sm:$0xff] %vm651_vm7, %v16302_v24  ;;  %v13335_v48 = vsel %vm519_vm4, %v24989_v63, %v12634_v50  ;;  %v13336_v7 = vsel %vm519_vm4, %v24990_v58, %v12638_v21  ;;  %v24991_v33 = vcombine.high %v24989_v63, %v24989_v63  ;;  %v13339_v34 = vsel %vm519_vm4, %v24992_v37, %v12650_v40 }
 0x505   : > { %v16319_v1 = vcombine.low %v16311_v57, %v16318_v56  ;;  %v24993_v26 = vcombine.high %v24990_v58, %v24990_v58  ;;  %v13340_v6 = vsel %vm519_vm4, %v24994_v0, %v12654_v54  ;;  %v24995_v11 = vcombine.high %v24992_v37, %v24992_v37 }
 0x506   : > { %v13337_v4 = vsel %vm519_vm4, %v24991_v33, %v12642_v13  ;;  %v24996_v62 = vcombine.high %v24994_v0, %v24994_v0  ;;  %v13826_v43 = vadd.f32 %v18680_v3, %v13335_v48  ;;  %v13827_v25 = vadd.f32 %v18695_v18, %v13336_v7 }
 0x507   : > { %16863 = vst.msk [vmem:[%s19560_s18 + $0x368] sm:$0xff] %vm651_vm7, %v16319_v1  ;;  %v13338_v23 = vsel %vm519_vm4, %v24993_v26, %v12646_v42  ;;  %v13341_v46 = vsel %vm519_vm4, %v24995_v11, %v12658_v5  ;;  %v13828_v22 = vadd.f32 %v18683_v47, %v13337_v4  ;;  %v13830_v8 = vadd.f32 %v18680_v3, %v13339_v34 }
 0x508   : > { %v13342_v36 = vsel %vm519_vm4, %v24996_v62, %v12662_v20  ;;  %v13829_v55 = vadd.f32 %v18699_v39, %v13338_v23  ;;  %v13831_v17 = vadd.f32 %v18695_v18, %v13340_v6  ;;  %v13832_v45 = vadd.f32 %v18683_v47, %v13341_v46 }
 0x509   : > { %v13833_v51 = vadd.f32 %v18699_v39, %v13342_v36  ;;  %v16150_v28 = vcombine.low %v13826_v43, %v13827_v25  ;;  %v3395_v41 = vadd.f32 %v23602_v60, %v23604_v12  ;;  %v3387_v59 = vadd.f32 %v3386_v15, %v3222_v29  ;;  %v24997_v36 = vld [vmem:[#allocation75_spill] sm:$0xff] }
 0x50a   : > { %v16151_v53 = vcombine.low %v13828_v22, %v13829_v55  ;;  %v16167_v57 = vcombine.low %v13830_v8, %v13831_v17  ;;  %v23674_v52 = vadd.f32 %v17712_v49, %v17678_v61  ;;  %v23676_v31 = vadd.f32 %v3399_v32, %v3235_v9  ;;  %v24999_v55 = vld [vmem:[#allocation80_spill] sm:$0xff] }
 0x50b   : > { %v16168_v14 = vcombine.low %v13832_v45, %v13833_v51  ;;  %v16158_v44 = vrot.slane %v16150_v28, %v18669_v35  ;;  %v11618_v50 = vcombine.high %v3395_v41, %v3395_v41  ;;  %v11625_v56 = vrot.slane %v3395_v41, %v18671_v2 }
 0x50c   : > { %v16165_v10 = vrot.slane %v16151_v53, %v18669_v35  ;;  %v16175_v16 = vrot.slane %v16167_v57, %v18669_v35  ;;  %v11520_v60 = vcombine.high %v3387_v59, %v3387_v59  ;;  %v11527_v12 = vrot.slane %v3387_v59, %v18671_v2 }
 0x50d   : > { %v16182_v30 = vrot.slane %v16168_v14, %v18669_v35  ;;  %v11632_v29 = vrot.slane %v11618_v50, %v18671_v2  ;;  %v11633_v21 = vcombine.high %v11625_v56, %v11625_v56  ;;  %v11641_v24 = vrot.slane %v11625_v56, %v18671_v2 }
 0x50e   : > { %v16166_v15 = vcombine.low %v16158_v44, %v16165_v10  ;;  %v11534_v40 = vrot.slane %v11520_v60, %v18671_v2  ;;  %v11535_v54 = vcombine.high %v11527_v12, %v11527_v12  ;;  %v11543_v49 = vrot.slane %v11527_v12, %v18671_v2 }
 0x50f   : > { %v16183_v13 = vcombine.low %v16175_v16, %v16182_v30  ;;  %v11634_v61 = vcombine.high %v11632_v29, %v11632_v29  ;;  %v11648_v1 = vrot.slane %v11632_v29, %v18671_v2  ;;  %v11655_v42 = vrot.slane %v11633_v21, %v18671_v2 }
 0x510   : > { %16854 = vst.msk [vmem:[%s19560_s18 + $0x320] sm:$0xff] %vm651_vm7, %v16166_v15  ;;  %v11663_v5 = vcombine.high %v11641_v24, %v11641_v24  ;;  %v12730_v20 = vrot.slane %v11641_v24, %v18686_v19  ;;  %v11536_v63 = vcombine.high %v11534_v40, %v11534_v40  ;;  %v11550_v48 = vrot.slane %v11534_v40, %v18671_v2 }
 0x511   : > { %16855 = vst.msk [vmem:[%s19560_s18 + $0x328] sm:$0xff] %vm651_vm7, %v16183_v13  ;;  %v11557_v58 = vrot.slane %v11535_v54, %v18671_v2  ;;  %v11662_v7 = vrot.slane %v11634_v61, %v18671_v2  ;;  %v11664_v33 = vcombine.high %v11648_v1, %v11648_v1  ;;  %v11665_v4 = vcombine.high %v11655_v42, %v11655_v42 }
 0x512   : > { %v12734_v37 = vrot.slane %v11655_v42, %v18686_v19  ;;  %v12738_v34 = vrot.slane %v11663_v5, %v18686_v19  ;;  %v12746_v26 = vrot.slane %v11648_v1, %v18686_v19  ;;  %v13359_v23 = vsel %vm519_vm4, %v22041_v27, %v12730_v20 }
 0x513   : > { %v11564_v0 = vrot.slane %v11536_v63, %v18671_v2  ;;  %v11666_v6 = vcombine.high %v11662_v7, %v11662_v7  ;;  %v12742_v11 = vrot.slane %v11665_v4, %v18686_v19  ;;  %v12750_v46 = vrot.slane %v11662_v7, %v18686_v19  ;;  %v25003_v4 = vld [vmem:[#allocation76_spill] sm:$0xff] }
 0x514   : > { %v12754_v62 = vrot.slane %v11664_v33, %v18686_v19  ;;  %v13360_v43 = vsel %vm519_vm4, %v24997_v36, %v12734_v37  ;;  %v24998_v25 = vcombine.high %v22041_v27, %v22041_v27  ;;  %v13363_v32 = vsel %vm519_vm4, %v24999_v55, %v12746_v26  ;;  %v25004_v37 = vld [vmem:[#allocation78_spill] sm:$0xff] }
 0x515   : > { %v13866_v9 = vadd.f32 %v18680_v3, %v13359_v23  ;;  %v12758_v8 = vrot.slane %v11666_v6, %v18686_v19  ;;  %v25000_v17 = vcombine.high %v24997_v36, %v24997_v36  ;;  %v13364_v51 = vsel %vm519_vm4, %v22063_v38, %v12750_v46 }
 0x516   : > { %v13361_v22 = vsel %vm519_vm4, %v24998_v25, %v12738_v34  ;;  %v25001_v27 = vcombine.high %v24999_v55, %v24999_v55  ;;  %v13867_v53 = vadd.f32 %v18695_v18, %v13360_v43  ;;  %v13870_v57 = vadd.f32 %v18680_v3, %v13363_v32 }
 0x517   : > { %v13362_v45 = vsel %vm519_vm4, %v25000_v17, %v12742_v11  ;;  %v13868_v41 = vadd.f32 %v18683_v47, %v13361_v22  ;;  %v25002_v14 = vcombine.high %v22063_v38, %v22063_v38  ;;  %v13871_v10 = vadd.f32 %v18695_v18, %v13364_v51  ;;  %v25007_v11 = vld [vmem:[#allocation79_spill] sm:$0xff] }
 0x518   : > { %v13365_v28 = vsel %vm519_vm4, %v25001_v27, %v12754_v62  ;;  %v13869_v59 = vadd.f32 %v18699_v39, %v13362_v45  ;;  %v11565_v56 = vcombine.high %v11543_v49, %v11543_v49  ;;  %v16320_v30 = vcombine.low %v13866_v9, %v13867_v53  ;;  %v25008_v62 = vld [vmem:[#allocation81_spill] sm:$0xff] }
 0x519   : > { %v13366_v44 = vsel %vm519_vm4, %v25002_v14, %v12758_v8  ;;  %v13872_v50 = vadd.f32 %v18683_v47, %v13365_v28  ;;  %v11566_v12 = vcombine.high %v11550_v48, %v11550_v48  ;;  %v16337_v15 = vcombine.low %v13870_v57, %v13871_v10 }
 0x51a   : > { %v13873_v16 = vadd.f32 %v18699_v39, %v13366_v44  ;;  %v16321_v60 = vcombine.low %v13868_v41, %v13869_v59  ;;  %v11567_v29 = vcombine.high %v11557_v58, %v11557_v58  ;;  %v11568_v21 = vcombine.high %v11564_v0, %v11564_v0 }
 0x51b   : > { %v12666_v24 = vrot.slane %v11543_v49, %v18686_v19  ;;  %v16328_v13 = vrot.slane %v16320_v30, %v18669_v35  ;;  %v12670_v54 = vrot.slane %v11557_v58, %v18686_v19  ;;  %v16345_v61 = vrot.slane %v16337_v15, %v18669_v35 }
 0x51c   : > { %v16335_v38 = vrot.slane %v16321_v60, %v18669_v35  ;;  %v16338_v40 = vcombine.low %v13872_v50, %v13873_v16  ;;  %v12674_v1 = vrot.slane %v11565_v56, %v18686_v19  ;;  %v12678_v42 = vrot.slane %v11567_v29, %v18686_v19 }
 0x51d   : > { %v12682_v5 = vrot.slane %v11550_v48, %v18686_v19  ;;  %v12686_v49 = vrot.slane %v11564_v0, %v18686_v19  ;;  %v12690_v7 = vrot.slane %v11566_v12, %v18686_v19  ;;  %v12694_v33 = vrot.slane %v11568_v21, %v18686_v19 }
 0x51e   : > { %v16336_v20 = vcombine.low %v16328_v13, %v16335_v38  ;;  %v16352_v63 = vrot.slane %v16338_v40, %v18669_v35  ;;  %v13343_v58 = vsel %vm519_vm4, %v25003_v4, %v12666_v24  ;;  %v13344_v34 = vsel %vm519_vm4, %v25004_v37, %v12670_v54 }
 0x51f   : > { %v25005_v26 = vcombine.high %v25003_v4, %v25003_v4  ;;  %v25006_v0 = vcombine.high %v25004_v37, %v25004_v37  ;;  %v13347_v46 = vsel %vm519_vm4, %v25007_v11, %v12682_v5  ;;  %v13348_v36 = vsel %vm519_vm4, %v25008_v62, %v12686_v49  ;;  %v25011_v49 = vld [vmem:[#allocation82_spill] sm:$0xff]  ;;  %v25012_v37 = vld [vmem:[#allocation83_spill] sm:$0xff] }
 0x520   : > { %v16353_v23 = vcombine.low %v16345_v61, %v16352_v63  ;;  %16864 = vst.msk [vmem:[%s19560_s18 + $0x370] sm:$0xff] %vm651_vm7, %v16336_v20  ;;  %v25009_v43 = vcombine.high %v25007_v11, %v25007_v11  ;;  %v25010_v22 = vcombine.high %v25008_v62, %v25008_v62  ;;  %v13834_v32 = vadd.f32 %v18680_v3, %v13343_v58  ;;  %v25015_v62 = vld [vmem:[#allocation85_spill] sm:$0xff] }
 0x521   : > { %v13345_v48 = vsel %vm519_vm4, %v25005_v26, %v12674_v1  ;;  %v13346_v6 = vsel %vm519_vm4, %v25006_v0, %v12678_v42  ;;  %v13835_v9 = vadd.f32 %v18695_v18, %v13344_v34  ;;  %v13838_v45 = vadd.f32 %v18680_v3, %v13347_v46 }
 0x522   : > { %v13349_v25 = vsel %vm519_vm4, %v25009_v43, %v12690_v7  ;;  %v13350_v55 = vsel %vm519_vm4, %v25010_v22, %v12694_v33  ;;  %16865 = vst.msk [vmem:[%s19560_s18 + $0x378] sm:$0xff] %vm651_vm7, %v16353_v23  ;;  %v13836_v8 = vadd.f32 %v18683_v47, %v13345_v48  ;;  %v13837_v17 = vadd.f32 %v18699_v39, %v13346_v6  ;;  %v25013_v48 = vld [vmem:[#allocation84_spill] sm:$0xff] }
 0x523   : > { %v13839_v51 = vadd.f32 %v18695_v18, %v13348_v36  ;;  %v13840_v27 = vadd.f32 %v18683_v47, %v13349_v25  ;;  %v13841_v28 = vadd.f32 %v18699_v39, %v13350_v55  ;;  %v16184_v53 = vcombine.low %v13834_v32, %v13835_v9 }
 0x524   : > { %v11765_v41 = vcombine.high %v23674_v52, %v23674_v52  ;;  %v16185_v59 = vcombine.low %v13836_v8, %v13837_v17  ;;  %v11772_v14 = vrot.slane %v23674_v52, %v18671_v2  ;;  %v11667_v44 = vcombine.high %v23676_v31, %v23676_v31 }
 0x525   : > { %v16201_v57 = vcombine.low %v13838_v45, %v13839_v51  ;;  %v16192_v10 = vrot.slane %v16184_v53, %v18669_v35  ;;  %v16202_v50 = vcombine.low %v13840_v27, %v13841_v28  ;;  %v11674_v16 = vrot.slane %v23676_v31, %v18671_v2 }
 0x526   : > { %v11779_v56 = vrot.slane %v11765_v41, %v18671_v2  ;;  %v16199_v30 = vrot.slane %v16185_v59, %v18669_v35  ;;  %v11780_v12 = vcombine.high %v11772_v14, %v11772_v14  ;;  %v11788_v15 = vrot.slane %v11772_v14, %v18671_v2 }
 0x527   : > { %v16209_v60 = vrot.slane %v16201_v57, %v18669_v35  ;;  %v16216_v52 = vrot.slane %v16202_v50, %v18669_v35  ;;  %v11681_v24 = vrot.slane %v11667_v44, %v18671_v2  ;;  %v25014_v0 = vcombine.high %v25011_v49, %v25011_v49 }
 0x528   : > { %v11781_v29 = vcombine.high %v11779_v56, %v11779_v56  ;;  %v11795_v21 = vrot.slane %v11779_v56, %v18671_v2  ;;  %v16200_v13 = vcombine.low %v16192_v10, %v16199_v30  ;;  %v11802_v38 = vrot.slane %v11780_v12, %v18671_v2 }
 0x529   : > { %v11810_v31 = vcombine.high %v11788_v15, %v11788_v15  ;;  %v12826_v40 = vrot.slane %v11788_v15, %v18686_v19  ;;  %v16217_v54 = vcombine.low %v16209_v60, %v16216_v52  ;;  %v25016_v43 = vcombine.high %v25012_v37, %v25012_v37 }
 0x52a   : > { %v11809_v61 = vrot.slane %v11781_v29, %v18671_v2  ;;  %v11811_v1 = vcombine.high %v11795_v21, %v11795_v21  ;;  %v12842_v42 = vrot.slane %v11795_v21, %v18686_v19  ;;  %16856 = vst.msk [vmem:[%s19560_s18 + $0x330] sm:$0xff] %vm651_vm7, %v16200_v13  ;;  %v11812_v5 = vcombine.high %v11802_v38, %v11802_v38 }
 0x52b   : > { %v12830_v20 = vrot.slane %v11802_v38, %v18686_v19  ;;  %v12834_v63 = vrot.slane %v11810_v31, %v18686_v19  ;;  %v13383_v7 = vsel %vm519_vm4, %v25011_v49, %v12826_v40  ;;  %16857 = vst.msk [vmem:[%s19560_s18 + $0x338] sm:$0xff] %vm651_vm7, %v16217_v54  ;;  %v25017_v55 = vcombine.high %v25013_v48, %v25013_v48  ;;  %v17713_v40 = vpop.f32.mrf.mxu1  ;;  %v17679_v54 = vpop.f32.mrf.mxu0 }
 0x52c   : > { %v11813_v33 = vcombine.high %v11809_v61, %v11809_v61  ;;  %v12846_v4 = vrot.slane %v11809_v61, %v18686_v19  ;;  %v12850_v58 = vrot.slane %v11811_v1, %v18686_v19  ;;  %v13387_v34 = vsel %vm519_vm4, %v25012_v37, %v12842_v42 }
 0x52d   : > { %v12838_v26 = vrot.slane %v11812_v5, %v18686_v19  ;;  %v13384_v23 = vsel %vm519_vm4, %v25013_v48, %v12830_v20  ;;  %v13385_v6 = vsel %vm519_vm4, %v25014_v0, %v12834_v63  ;;  %v13922_v11 = vadd.f32 %v18680_v3, %v13383_v7  ;;  %v25022_v48 = vld [vmem:[#allocation88_spill] sm:$0xff] }
 0x52e   : > { %v12854_v46 = vrot.slane %v11813_v33, %v18686_v19  ;;  %v13388_v36 = vsel %vm519_vm4, %v25015_v62, %v12846_v4  ;;  %v13389_v25 = vsel %vm519_vm4, %v25016_v43, %v12850_v58  ;;  %v13923_v22 = vadd.f32 %v18695_v18, %v13384_v23  ;;  %v25019_v33 = vld [vmem:[#allocation86_spill] sm:$0xff]  ;;  %v25020_v58 = vld [vmem:[#allocation87_spill] sm:$0xff] }
 0x52f   : > { %v13386_v32 = vsel %vm519_vm4, %v25017_v55, %v12838_v26  ;;  %v13924_v9 = vadd.f32 %v18683_v47, %v13385_v6  ;;  %v13926_v8 = vadd.f32 %v18680_v3, %v13387_v34  ;;  %v13927_v17 = vadd.f32 %v18695_v18, %v13388_v36  ;;  %v3238_v55 = vpop.f32.mrf.mxu0 }
 0x530   : > { %v25018_v45 = vcombine.high %v25015_v62, %v25015_v62  ;;  %v13925_v27 = vadd.f32 %v18699_v39, %v13386_v32  ;;  %v13928_v28 = vadd.f32 %v18683_v47, %v13389_v25  ;;  %v16558_v53 = vcombine.low %v13922_v11, %v13923_v22  ;;  %v25024_v11 = vld [vmem:[#allocation90_spill] sm:$0xff]  ;;  %v3402_v22 = vpop.f32.mrf.mxu1 }
 0x531   : > { %v16575_v59 = vcombine.low %v13926_v8, %v13927_v17  ;;  %v11682_v57 = vcombine.high %v11674_v16, %v11674_v16  ;;  %v11683_v14 = vcombine.high %v11681_v24, %v11681_v24  ;;  %v11690_v50 = vrot.slane %v11674_v16, %v18671_v2 }
 0x532   : > { %v13390_v51 = vsel %vm519_vm4, %v25018_v45, %v12854_v46  ;;  %v16559_v44 = vcombine.low %v13924_v9, %v13925_v27  ;;  %v16566_v10 = vrot.slane %v16558_v53, %v18669_v35  ;;  %v11697_v56 = vrot.slane %v11681_v24, %v18671_v2 }
 0x533   : > { %v13929_v41 = vadd.f32 %v18699_v39, %v13390_v51  ;;  %v16583_v60 = vrot.slane %v16575_v59, %v18669_v35  ;;  %v11704_v12 = vrot.slane %v11682_v57, %v18671_v2  ;;  %v11711_v15 = vrot.slane %v11683_v14, %v18671_v2  ;;  %v25027_v14 = vld [vmem:[#allocation95_spill] sm:$0xff] }
 0x534   : > { %v16573_v52 = vrot.slane %v16559_v44, %v18669_v35  ;;  %v11712_v29 = vcombine.high %v11690_v50, %v11690_v50  ;;  %v11713_v21 = vcombine.high %v11697_v56, %v11697_v56  ;;  %v12762_v13 = vrot.slane %v11690_v50, %v18686_v19 }
 0x535   : > { %v16576_v30 = vcombine.low %v13928_v28, %v13929_v41  ;;  %v11714_v31 = vcombine.high %v11704_v12, %v11704_v12  ;;  %v11715_v16 = vcombine.high %v11711_v15, %v11711_v15  ;;  %v12766_v24 = vrot.slane %v11704_v12, %v18686_v19 }
 0x536   : > { %v16574_v61 = vcombine.low %v16566_v10, %v16573_v52  ;;  %v12770_v1 = vrot.slane %v11712_v29, %v18686_v19  ;;  %v12778_v42 = vrot.slane %v11697_v56, %v18686_v19  ;;  %v12782_v5 = vrot.slane %v11711_v15, %v18686_v19  ;;  %v25028_v10 = vld [vmem:[#allocation97_spill] sm:$0xff] }
 0x537   : > { %v16590_v38 = vrot.slane %v16576_v30, %v18669_v35  ;;  %v12774_v63 = vrot.slane %v11714_v31, %v18686_v19  ;;  %v12786_v49 = vrot.slane %v11713_v21, %v18686_v19  ;;  %v12790_v7 = vrot.slane %v11715_v16, %v18686_v19 }
 0x538   : > { %16878 = vst.msk [vmem:[%s19560_s18 + $0x3e0] sm:$0xff] %vm651_vm7, %v16574_v61  ;;  %v13367_v4 = vsel %vm519_vm4, %v25019_v33, %v12762_v13  ;;  %v13368_v37 = vsel %vm519_vm4, %v25020_v58, %v12766_v24  ;;  %v25021_v34 = vcombine.high %v25019_v33, %v25019_v33  ;;  %v13371_v23 = vsel %vm519_vm4, %v25022_v48, %v12778_v42 }
 0x539   : > { %v16591_v20 = vcombine.low %v16583_v60, %v16590_v38  ;;  %v25023_v0 = vcombine.high %v25020_v58, %v25020_v58  ;;  %v13372_v46 = vsel %vm519_vm4, %v25024_v11, %v12782_v5  ;;  %v25025_v62 = vcombine.high %v25022_v48, %v25022_v48 }
 0x53a   : > { %v13369_v26 = vsel %vm519_vm4, %v25021_v34, %v12770_v1  ;;  %v25026_v43 = vcombine.high %v25024_v11, %v25024_v11  ;;  %v13890_v32 = vadd.f32 %v18680_v3, %v13367_v4  ;;  %v13891_v9 = vadd.f32 %v18695_v18, %v13368_v37 }
 0x53b   : > { %16879 = vst.msk [vmem:[%s19560_s18 + $0x3e8] sm:$0xff] %vm651_vm7, %v16591_v20  ;;  %v13370_v6 = vsel %vm519_vm4, %v25023_v0, %v12774_v63  ;;  %v13373_v36 = vsel %vm519_vm4, %v25025_v62, %v12786_v49  ;;  %v13892_v8 = vadd.f32 %v18683_v47, %v13369_v26  ;;  %v13894_v45 = vadd.f32 %v18680_v3, %v13371_v23 }
 0x53c   : > { %v13374_v25 = vsel %vm519_vm4, %v25026_v43, %v12790_v7  ;;  %v13893_v17 = vadd.f32 %v18699_v39, %v13370_v6  ;;  %v13895_v51 = vadd.f32 %v18695_v18, %v13372_v46  ;;  %v13896_v27 = vadd.f32 %v18683_v47, %v13373_v36  ;;  %v25029_v6 = vld [vmem:[#allocation89_spill] sm:$0xff] }
 0x53d   : > { %v13897_v28 = vadd.f32 %v18699_v39, %v13374_v25  ;;  %v16422_v53 = vcombine.low %v13890_v32, %v13891_v9  ;;  %v3411_v59 = vadd.f32 %v17713_v40, %v17679_v54  ;;  %v3403_v57 = vadd.f32 %v3402_v22, %v3238_v55  ;;  %v25030_v22 = vld [vmem:[#allocation91_spill] sm:$0xff] }
 0x53e   : > { %v16423_v41 = vcombine.low %v13892_v8, %v13893_v17  ;;  %v9907_v44 = vcombine.high %v25027_v14, %v25027_v14  ;;  %v9908_v50 = vcombine.high %v25028_v10, %v25028_v10  ;;  %v16439_v56 = vcombine.low %v13894_v45, %v13895_v51  ;;  %v25032_v8 = vld [vmem:[#allocation92_spill] sm:$0xff] }
 0x53f   : > { %v16440_v30 = vcombine.low %v13896_v27, %v13897_v28  ;;  %v16430_v60 = vrot.slane %v16422_v53, %v18669_v35  ;;  %v11814_v15 = vcombine.high %v3411_v59, %v3411_v59  ;;  %v11821_v52 = vrot.slane %v3411_v59, %v18671_v2  ;;  %v25034_v28 = vld [vmem:[#allocation93_spill] sm:$0xff] }
 0x540   : > { %v16437_v12 = vrot.slane %v16423_v41, %v18669_v35  ;;  %v16447_v29 = vrot.slane %v16439_v56, %v18669_v35  ;;  %v11716_v13 = vcombine.high %v3403_v57, %v3403_v57  ;;  %v11723_v38 = vrot.slane %v3403_v57, %v18671_v2 }
 0x541   : > { %v16454_v21 = vrot.slane %v16440_v30, %v18669_v35  ;;  %v11828_v16 = vrot.slane %v11814_v15, %v18671_v2  ;;  %v11829_v24 = vcombine.high %v11821_v52, %v11821_v52  ;;  %v11837_v40 = vrot.slane %v11821_v52, %v18671_v2 }
 0x542   : > { %v16438_v31 = vcombine.low %v16430_v60, %v16437_v12  ;;  %v11730_v61 = vrot.slane %v11716_v13, %v18671_v2  ;;  %v11731_v1 = vcombine.high %v11723_v38, %v11723_v38  ;;  %v11739_v42 = vrot.slane %v11723_v38, %v18671_v2 }
 0x543   : > { %v16455_v54 = vcombine.low %v16447_v29, %v16454_v21  ;;  %v11830_v5 = vcombine.high %v11828_v16, %v11828_v16  ;;  %v11844_v20 = vrot.slane %v11828_v16, %v18671_v2  ;;  %v11851_v63 = vrot.slane %v11829_v24, %v18671_v2 }
 0x544   : > { %16870 = vst.msk [vmem:[%s19560_s18 + $0x3a0] sm:$0xff] %vm651_vm7, %v16438_v31  ;;  %v11859_v49 = vcombine.high %v11837_v40, %v11837_v40  ;;  %v12858_v7 = vrot.slane %v11837_v40, %v18686_v19  ;;  %v11732_v33 = vcombine.high %v11730_v61, %v11730_v61  ;;  %v11746_v4 = vrot.slane %v11730_v61, %v18671_v2 }
 0x545   : > { %16871 = vst.msk [vmem:[%s19560_s18 + $0x3a8] sm:$0xff] %vm651_vm7, %v16455_v54  ;;  %v11753_v58 = vrot.slane %v11731_v1, %v18671_v2  ;;  %v11858_v37 = vrot.slane %v11830_v5, %v18671_v2  ;;  %v11860_v34 = vcombine.high %v11844_v20, %v11844_v20  ;;  %v11861_v26 = vcombine.high %v11851_v63, %v11851_v63 }
 0x546   : > { %v12862_v48 = vrot.slane %v11851_v63, %v18686_v19  ;;  %v12866_v23 = vrot.slane %v11859_v49, %v18686_v19  ;;  %v12874_v0 = vrot.slane %v11844_v20, %v18686_v19  ;;  %v13391_v11 = vsel %vm519_vm4, %v25029_v6, %v12858_v7 }
 0x547   : > { %v11760_v46 = vrot.slane %v11732_v33, %v18671_v2  ;;  %v11862_v62 = vcombine.high %v11858_v37, %v11858_v37  ;;  %v12870_v36 = vrot.slane %v11861_v26, %v18686_v19  ;;  %v12878_v43 = vrot.slane %v11858_v37, %v18686_v19 }
 0x548   : > { %v12882_v25 = vrot.slane %v11860_v34, %v18686_v19  ;;  %v13392_v55 = vsel %vm519_vm4, %v25030_v22, %v12862_v48  ;;  %v25031_v32 = vcombine.high %v25029_v6, %v25029_v6  ;;  %v13395_v17 = vsel %vm519_vm4, %v25032_v8, %v12874_v0  ;;  %v25037_v0 = vld [vmem:[#allocation94_spill] sm:$0xff] }
 0x549   : > { %v13930_v2 = vadd.f32 %v18680_v3, %v13391_v11  ;;  %v12886_v45 = vrot.slane %v11862_v62, %v18686_v19  ;;  %v25033_v51 = vcombine.high %v25030_v22, %v25030_v22  ;;  %v13396_v53 = vsel %vm519_vm4, %v25034_v28, %v12878_v43 }
 0x54a   : > { %v13393_v9 = vsel %vm519_vm4, %v25031_v32, %v12866_v23  ;;  %v25035_v41 = vcombine.high %v25032_v8, %v25032_v8  ;;  %v13931_v57 = vadd.f32 %v18695_v18, %v13392_v55  ;;  %v13934_v60 = vadd.f32 %v18680_v3, %v13395_v17 }
 0x54b   : > { %v13394_v27 = vsel %vm519_vm4, %v25033_v51, %v12870_v36  ;;  %v13932_v56 = vadd.f32 %v18683_v47, %v13393_v9  ;;  %v25036_v12 = vcombine.high %v25034_v28, %v25034_v28  ;;  %v13935_v52 = vadd.f32 %v18695_v18, %v13396_v53 }
 0x54c   : > { %v13397_v59 = vsel %vm519_vm4, %v25035_v41, %v12882_v25  ;;  %v13933_v30 = vadd.f32 %v18699_v39, %v13394_v27  ;;  %v11761_v21 = vcombine.high %v11739_v42, %v11739_v42  ;;  %v16592_v38 = vcombine.low %v13930_v2, %v13931_v57 }
 0x54d   : > { %v13398_v15 = vsel %vm519_vm4, %v25036_v12, %v12886_v45  ;;  %v13936_v29 = vadd.f32 %v18683_v47, %v13397_v59  ;;  %v11762_v16 = vcombine.high %v11746_v4, %v11746_v4  ;;  %v16609_v24 = vcombine.low %v13934_v60, %v13935_v52 }
 0x54e   : > { %v13937_v13 = vadd.f32 %v18699_v39, %v13398_v15  ;;  %v16593_v31 = vcombine.low %v13932_v56, %v13933_v30  ;;  %v11763_v40 = vcombine.high %v11753_v58, %v11753_v58  ;;  %v11764_v54 = vcombine.high %v11760_v46, %v11760_v46 }
 0x54f   : > { %v12794_v61 = vrot.slane %v11739_v42, %v18686_v19  ;;  %v16600_v1 = vrot.slane %v16592_v38, %v18669_v35  ;;  %v12798_v63 = vrot.slane %v11753_v58, %v18686_v19  ;;  %v16617_v49 = vrot.slane %v16609_v24, %v18669_v35 }
 0x550   : > { %v16607_v5 = vrot.slane %v16593_v31, %v18669_v35  ;;  %v16610_v20 = vcombine.low %v13936_v29, %v13937_v13  ;;  %v12802_v7 = vrot.slane %v11761_v21, %v18686_v19  ;;  %v12806_v33 = vrot.slane %v11763_v40, %v18686_v19 }
 0x551   : > { %v12810_v37 = vrot.slane %v11746_v4, %v18686_v19  ;;  %v12814_v42 = vrot.slane %v11760_v46, %v18686_v19  ;;  %v12818_v48 = vrot.slane %v11762_v16, %v18686_v19  ;;  %v12822_v23 = vrot.slane %v11764_v54, %v18686_v19  ;;  %v25039_v19 = vld [vmem:[#allocation96_spill] sm:$0xff] }
 0x552   : > { %v16608_v34 = vcombine.low %v16600_v1, %v16607_v5  ;;  %v16624_v26 = vrot.slane %v16610_v20, %v18669_v35  ;;  %v13375_v58 = vsel %vm519_vm4, %v25037_v0, %v12794_v61  ;;  %v13376_v6 = vsel %vm519_vm4, %v25027_v14, %v12798_v63 }
 0x553   : > { %v25038_v11 = vcombine.high %v25037_v0, %v25037_v0  ;;  %v13378_v46 = vsel %vm519_vm4, %v9907_v44, %v12806_v33  ;;  %v13379_v36 = vsel %vm519_vm4, %v25039_v19, %v12810_v37  ;;  %v13380_v43 = vsel %vm519_vm4, %v25028_v10, %v12814_v42 }
 0x554   : > { %v16625_v62 = vcombine.low %v16617_v49, %v16624_v26  ;;  %16880 = vst.msk [vmem:[%s19560_s18 + $0x3f0] sm:$0xff] %vm651_vm7, %v16608_v34  ;;  %v25040_v25 = vcombine.high %v25039_v19, %v25039_v19  ;;  %v13382_v55 = vsel %vm519_vm4, %v9908_v50, %v12822_v23  ;;  %v13898_v14 = vadd.f32 %v18680_v3, %v13375_v58 }
 0x555   : > { %v13377_v4 = vsel %vm519_vm4, %v25038_v11, %v12802_v7  ;;  %v13899_v44 = vadd.f32 %v18695_v18, %v13376_v6  ;;  %v13901_v9 = vadd.f32 %v18699_v39, %v13378_v46  ;;  %v13902_v8 = vadd.f32 %v18680_v3, %v13379_v36 }
 0x556   : > { %v13381_v22 = vsel %vm519_vm4, %v25040_v25, %v12818_v48  ;;  %16881 = vst.msk [vmem:[%s19560_s18 + $0x3f8] sm:$0xff] %vm651_vm7, %v16625_v62  ;;  %v13900_v32 = vadd.f32 %v18683_v47, %v13377_v4  ;;  %v13903_v17 = vadd.f32 %v18695_v18, %v13380_v43  ;;  %v13905_v50 = vadd.f32 %v18699_v39, %v13382_v55 }
 0x557   : > { %v13904_v10 = vadd.f32 %v18683_v47, %v13381_v22  ;;  %v16456_v2 = vcombine.low %v13898_v14, %v13899_v44 }
 0x558   : > { %v16457_v45 = vcombine.low %v13900_v32, %v13901_v9  ;;  %v16473_v51 = vcombine.low %v13902_v8, %v13903_v17 }
 0x559   : > { %v16474_v27 = vcombine.low %v13904_v10, %v13905_v50  ;;  %v16464_v28 = vrot.slane %v16456_v2, %v18669_v35 }
 0x55a   : > { %v16471_v53 = vrot.slane %v16457_v45, %v18669_v35  ;;  %v16481_v41 = vrot.slane %v16473_v51, %v18669_v35 }
 0x55b   : > { %v16488_v59 = vrot.slane %v16474_v27, %v18669_v35 }
 0x55c   : > { %v16472_v57 = vcombine.low %v16464_v28, %v16471_v53 }
 0x55d   : > { %v16489_v3 = vcombine.low %v16481_v41, %v16488_v59 }
 0x55e   : > { %16872 = vst.msk [vmem:[%s19560_s18 + $0x3b0] sm:$0xff] %vm651_vm7, %v16472_v57 }
 0x55f   : > { %16873 = vst.msk [vmem:[%s19560_s18 + $0x3b8] sm:$0xff] %vm651_vm7, %v16489_v3 }
 0x560 PF: > { %s13_s14 = sadd.s32 1, %s17888_s14   ;;  %s25041_s12 = smov %s17884_s13 }
 0x561   : > { %p10_p5 = scmp.ge.s32.totalorder %s13_s14, 4   ;;  %s25042_s13 = smov %s25044_s15 }
 0x563   :  { %12 = sbr.rel (!%p10_p5) target bundleno = 2 (0x2), region = 76 }

</bundles_post_ra>
